<compile_context>
chip_gen: v5e
topology: v5e:2x2
jax: 0.10.0
libtpu: 0.0.40
codegen_flags: <defaults>
</compile_context>

<pallas_src>
import functools

import jax
import jax.numpy as jnp
from jax.experimental import pallas as pl
from jax.experimental.pallas import tpu as pltpu

CONV_KERNEL_SIZE = 3  # stands in for config.CONV_KERNEL_SIZE


def _round_up(x, m):
    return ((x + m - 1) // m) * m


# ----------------------------------------------------------------------------
# Kernel 1: ConvTranspose2d(kernel=2, stride=2) as one lane-dense matmul.
#   out[(dy*2+dx)*Cout + co, p] = sum_ci W[ci, co, dy, dx] * x[ci, p] + b[co]
# ----------------------------------------------------------------------------
def _upconv_kernel(x_ref, w_ref, b_ref, o_ref):
    acc = jnp.dot(w_ref[...], x_ref[...], preferred_element_type=jnp.float32)
    o_ref[...] = (acc + b_ref[...]).astype(o_ref.dtype)


def upconv2x2(x_nchw, w2d, b2d):
    """ConvTranspose2d(cin, cout, 2, 2) on NCHW input; weights pre-flattened."""
    n, cin, h, w = x_nchw.shape
    cout4 = w2d.shape[0]
    cout = cout4 // 4
    dtype = w2d.dtype
    hw = h * w
    p = _round_up(hw, 128)
    x_flat = x_nchw.reshape(n, cin, hw).astype(dtype)
    x_flat = jnp.pad(x_flat, ((0, 0), (0, 0), (0, p - hw)))
    y = pl.pallas_call(
        _upconv_kernel,
        out_shape=jax.ShapeDtypeStruct((n, cout4, p), dtype),
        grid=(n,),
        in_specs=[
            pl.BlockSpec((None, cin, p), lambda i: (i, 0, 0)),
            pl.BlockSpec((cout4, cin), lambda i: (0, 0)),
            pl.BlockSpec((cout4, 1), lambda i: (0, 0)),
        ],
        out_specs=pl.BlockSpec((None, cout4, p), lambda i: (i, 0, 0)),
        compiler_params=pltpu.CompilerParams(
            dimension_semantics=("parallel",)),
    )(x_flat, w2d, b2d)
    # TODO(synk): the 2x2 pixel-shuffle interleave of the 4 taps is left to
    # XLA glue; a strided out_spec could emit it directly from the kernel.
    y = y[:, :, :hw].reshape(n, 2, 2, cout, h, w)
    y = jnp.transpose(y, (0, 3, 4, 1, 5, 2)).reshape(n, cout, 2 * h, 2 * w)
    return y


# ----------------------------------------------------------------------------
# Kernel 2: one fused decoder block:
#   cat([up, enc], C) -> Conv3x3 -> ReLU -> Conv3x3
# Activations are (C, P) with P = flattened H*W on the block's *input* grid
# (zero padded).  A valid 3x3 conv is 9 accumulated matmuls on slices of the
# flat axis shifted by dy*W + dx.  Outputs are indexed on the same grid, so
# conv2 reuses the identical shift scheme on conv1's VMEM-resident result;
# columns whose (y, x) exceed the valid extent are junk and cropped outside.
# ----------------------------------------------------------------------------
def _block_kernel(up_ref, enc_ref, w1u_ref, w1e_ref, b1_ref, w2_ref, b2_ref,
                  o_ref, h1_ref, *, win, k):
    c_mid, p1 = h1_ref.shape
    p2 = o_ref.shape[-1]

    # conv1 (implicit channel concat) + bias + ReLU, kept in VMEM scratch.
    acc = jnp.zeros((c_mid, p1), jnp.float32)
    for t in range(k * k):
        off = (t // k) * win + (t % k)
        acc = acc + jnp.dot(w1u_ref[t], up_ref[:, off:off + p1],
                            preferred_element_type=jnp.float32)
        acc = acc + jnp.dot(w1e_ref[t], enc_ref[:, off:off + p1],
                            preferred_element_type=jnp.float32)
    h1_ref[...] = jnp.maximum(acc + b1_ref[...], 0.0).astype(h1_ref.dtype)

    # conv2 + bias.
    acc2 = jnp.zeros((c_mid, p2), jnp.float32)
    for t in range(k * k):
        off = (t // k) * win + (t % k)
        acc2 = acc2 + jnp.dot(w2_ref[t], h1_ref[:, off:off + p2],
                              preferred_element_type=jnp.float32)
    o_ref[...] = (acc2 + b2_ref[...]).astype(o_ref.dtype)


def dec_block(up_nchw, enc_nchw, w1u, w1e, b1, w2, b2, out_dtype,
              k=CONV_KERNEL_SIZE):
    n, c_up, hin, win = up_nchw.shape
    c_enc = enc_nchw.shape[1]
    c_mid = w2.shape[1]
    dtype = w1u.dtype
    hw = hin * win
    pad = _round_up((k - 1) * (win + 1), 128)  # >= max tap offset, lane aligned
    p2 = _round_up(hw, 128)                    # columns written by conv2
    p1 = p2 + pad                              # conv1 columns (conv2 halo)
    p0 = p1 + pad                              # input columns (conv1 halo)

    def flat(a):
        a = a.reshape(n, a.shape[1], hw).astype(dtype)
        return jnp.pad(a, ((0, 0), (0, 0), (0, p0 - hw)))

    up_f, enc_f = flat(up_nchw), flat(enc_nchw)
    kernel = functools.partial(_block_kernel, win=win, k=k)
    y = pl.pallas_call(
        kernel,
        out_shape=jax.ShapeDtypeStruct((n, c_mid, p2), out_dtype),
        grid=(n,),
        in_specs=[
            pl.BlockSpec((None, c_up, p0), lambda i: (i, 0, 0)),
            pl.BlockSpec((None, c_enc, p0), lambda i: (i, 0, 0)),
            pl.BlockSpec((k * k, c_mid, c_up), lambda i: (0, 0, 0)),
            pl.BlockSpec((k * k, c_mid, c_enc), lambda i: (0, 0, 0)),
            pl.BlockSpec((c_mid, 1), lambda i: (0, 0)),
            pl.BlockSpec((k * k, c_mid, c_mid), lambda i: (0, 0, 0)),
            pl.BlockSpec((c_mid, 1), lambda i: (0, 0)),
        ],
        out_specs=pl.BlockSpec((None, c_mid, p2), lambda i: (i, 0, 0)),
        scratch_shapes=[pltpu.VMEM((c_mid, p1), dtype)],
        compiler_params=pltpu.CompilerParams(
            dimension_semantics=("parallel",)),
    )(up_f, enc_f, w1u, w1e, b1, w2, b2)
    ho, wo = hin - 2 * (k - 1), win - 2 * (k - 1)
    return y[:, :, :hw].reshape(n, c_mid, hin, win)[:, :, :ho, :wo]


# ----------------------------------------------------------------------------
# Glue (NCHW interface, mirrors the PyTorch module).
# ----------------------------------------------------------------------------
def center_crop(enc, h, w):
    he, we = enc.shape[2], enc.shape[3]
    top = int(round((he - h) / 2.0))
    left = int(round((we - w) / 2.0))
    return enc[:, :, top:top + h, left:left + w]


def prepare_params(params, k=CONV_KERNEL_SIZE, dtype=jnp.bfloat16):
    """One-time weight layout transforms into kernel-ready arrays."""
    prepared = []
    for p in params:
        cin, cout = p["up_w"].shape[0], p["up_w"].shape[1]
        up_w2d = jnp.transpose(p["up_w"], (2, 3, 1, 0)).reshape(
            4 * cout, cin).astype(dtype)
        up_b2d = jnp.tile(p["up_b"], 4).reshape(4 * cout, 1).astype(jnp.float32)
        c_mid, c_cat = p["c1_w"].shape[0], p["c1_w"].shape[1]
        c_up = cout
        w1 = jnp.transpose(p["c1_w"], (2, 3, 0, 1)).reshape(k * k, c_mid, c_cat)
        prepared.append(dict(
            up_w2d=up_w2d, up_b2d=up_b2d,
            w1u=w1[:, :, :c_up].astype(dtype),
            w1e=w1[:, :, c_up:].astype(dtype),
            b1=p["c1_b"].reshape(c_mid, 1).astype(jnp.float32),
            w2=jnp.transpose(p["c2_w"], (2, 3, 0, 1)).reshape(
                k * k, c_mid, c_mid).astype(dtype),
            b2=p["c2_b"].reshape(c_mid, 1).astype(jnp.float32),
        ))
    return prepared


def decoder_forward(prepared, x_nchw, enc_features_nchw):
    x = x_nchw
    last = len(prepared) - 1
    for i, p in enumerate(prepared):
        up = upconv2x2(x, p["up_w2d"], p["up_b2d"])
        enc = center_crop(enc_features_nchw[i], up.shape[2], up.shape[3])
        out_dtype = jnp.float32 if i == last else p["w1u"].dtype
        x = dec_block(up, enc, p["w1u"], p["w1e"], p["b1"], p["w2"], p["b2"],
                      out_dtype)
    return x


def init_params(key, channels=(64, 32, 16), k=CONV_KERNEL_SIZE):
    """Deterministic PyTorch-shaped parameters (uniform, fan-in scaled)."""
    def u(k_, shape, fan_in):
        bound = 1.0 / (fan_in ** 0.5)
        return jax.random.uniform(k_, shape, jnp.float32, -bound, bound)

    params = []
    for i in range(len(channels) - 1):
        cin, cout = channels[i], channels[i + 1]
        key, k0, k1, k2, k3, k4, k5 = jax.random.split(key, 7)
        params.append(dict(
            up_w=u(k0, (cin, cout, 2, 2), cin * 4),
            up_b=u(k1, (cout,), cin * 4),
            c1_w=u(k2, (cout, cin, k, k), cin * k * k),
            c1_b=u(k3, (cout,), cin * k * k),
            c2_w=u(k4, (cout, cout, k, k), cout * k * k),
            c2_b=u(k5, (cout,), cout * k * k),
        ))
    return params


# ----------------------------------------------------------------------------
# Pure-JAX reference (NCHW, PyTorch semantics) for correctness checking.
# ----------------------------------------------------------------------------
def _ref_conv2d(x, w, b):
    n, cin, hh, ww = x.shape
    cout, _, kh, kw = w.shape
    ho, wo = hh - kh + 1, ww - kw + 1
    out = jnp.zeros((n, cout, ho, wo), jnp.float32)
    for dy in range(kh):
        for dx in range(kw):
            out = out + jnp.einsum(
                "nchw,oc->nohw", x[:, :, dy:dy + ho, dx:dx + wo],
                w[:, :, dy, dx], precision=jax.lax.Precision.HIGHEST)
    return out + b.reshape(1, cout, 1, 1)


def _ref_upconv2x2(x, w, b):
    n, _, h, wd = x.shape
    cout = w.shape[1]
    out = jnp.einsum("nchw,coyx->nohywx", x, w,
                     precision=jax.lax.Precision.HIGHEST)
    return out.reshape(n, cout, 2 * h, 2 * wd) + b.reshape(1, cout, 1, 1)


def _ref_decoder(params, x, encs):
    for i, p in enumerate(params):
        x = _ref_upconv2x2(x, p["up_w"], p["up_b"])
        enc = center_crop(encs[i], x.shape[2], x.shape[3])
        x = jnp.concatenate([x, enc], axis=1)
        x = jnp.maximum(_ref_conv2d(x, p["c1_w"], p["c1_b"]), 0.0)
        x = _ref_conv2d(x, p["c2_w"], p["c2_b"])
    return x


if __name__ == "__main__":
    key = jax.random.PRNGKey(0)
    kp, kx, k0, k1 = jax.random.split(key, 4)
    params = init_params(kp)

    # NCHW inputs consistent with the PyTorch module (channels=(64, 32, 16)).
    x = jax.random.normal(kx, (2, 64, 8, 8), jnp.float32)
    enc_features = [
        jax.random.normal(k0, (2, 32, 20, 20), jnp.float32),  # cropped to 16x16
        jax.random.normal(k1, (2, 16, 28, 28), jnp.float32),  # cropped to 24x24
    ]

    fwd = jax.jit(decoder_forward)

    # Fast path: bf16 MXU operands, f32 accumulation, f32 final output.
    prepared_bf16 = prepare_params(params, dtype=jnp.bfloat16)
    out = jax.block_until_ready(fwd(prepared_bf16, x, enc_features))
    assert out.shape == (2, 16, 20, 20), out.shape
    assert out.dtype == jnp.float32
    assert bool(jnp.all(jnp.isfinite(out)))

    # Correctness: f32-operand Pallas path vs the pure-JAX reference.
    prepared_f32 = prepare_params(params, dtype=jnp.float32)
    out_f32 = jax.block_until_ready(fwd(prepared_f32, x, enc_features))
    ref = jax.block_until_ready(_ref_decoder(params, x, enc_features))
    assert bool(jnp.allclose(out_f32, ref, atol=2e-2, rtol=2e-2)), \
        float(jnp.max(jnp.abs(out_f32 - ref)))

    print("KERNEL_OK")
</pallas_src>

<mosaic_0001>
module attributes {stable_mosaic.version = 11 : i64} {
  func.func @_upconv_kernel(%arg0: i32, %arg1: memref<1x64x128xbf16, #tpu.memory_space<vmem>>, %arg2: memref<128x64xbf16, #tpu.memory_space<vmem>>, %arg3: memref<128x1xf32, #tpu.memory_space<vmem>>, %arg4: memref<1x128x128xbf16, #tpu.memory_space<vmem>>) attributes {dimension_semantics = [#tpu.dimension_semantics<parallel>], iteration_bounds = array<i64: 2>, scalar_prefetch = 0 : i64, scratch_operands = 0 : i64, tpu.core_type = #tpu.core_type<tc>, window_params = [{transform_indices = @transform_0, window_bounds = array<i64: 1, 64, 128>}, {pipeline_mode = #tpu.pipeline_mode<synchronous>, transform_indices = @transform_1, window_bounds = array<i64: 128, 64>}, {pipeline_mode = #tpu.pipeline_mode<synchronous>, transform_indices = @transform_2, window_bounds = array<i64: 128, 1>}, {transform_indices = @transform_3, window_bounds = array<i64: 1, 128, 128>}]} {
    %c0 = arith.constant 0 : index
    %c0_0 = arith.constant 0 : index
    %0 = vector.load %arg2[%c0, %c0_0] : memref<128x64xbf16, #tpu.memory_space<vmem>>, vector<128x64xbf16>
    %c0_1 = arith.constant 0 : index
    %c0_2 = arith.constant 0 : index
    %c0_3 = arith.constant 0 : index
    %1 = vector.load %arg1[%c0_1, %c0_2, %c0_3] : memref<1x64x128xbf16, #tpu.memory_space<vmem>>, vector<1x64x128xbf16>
    %2 = vector.shape_cast %1 : vector<1x64x128xbf16> to vector<64x128xbf16>
    %cst = arith.constant dense<0.000000e+00> : vector<128x128xf32>
    %3 = tpu.matmul %0, %2, %cst {dimension_numbers = #tpu.dot_dimension_numbers<[1], [0], [0], [1], [0, 0, 1, 1], [], []>} : vector<128x64xbf16>, vector<64x128xbf16>, vector<128x128xf32> -> vector<128x128xf32>
    %c0_4 = arith.constant 0 : index
    %c0_5 = arith.constant 0 : index
    %4 = vector.load %arg3[%c0_4, %c0_5] : memref<128x1xf32, #tpu.memory_space<vmem>>, vector<128x1xf32>
    %5 = vector.broadcast %4 : vector<128x1xf32> to vector<128x128xf32>
    %6 = arith.addf %3, %5 : vector<128x128xf32>
    %7 = arith.truncf %6 : vector<128x128xf32> to vector<128x128xbf16>
    %c0_6 = arith.constant 0 : index
    %c0_7 = arith.constant 0 : index
    %c0_8 = arith.constant 0 : index
    %8 = vector.load %arg4[%c0_6, %c0_7, %c0_8] : memref<1x128x128xbf16, #tpu.memory_space<vmem>>, vector<1x128x128xbf16>
    %9 = vector.shape_cast %8 : vector<1x128x128xbf16> to vector<128x128xbf16>
    %10 = vector.shape_cast %7 : vector<128x128xbf16> to vector<1x128x128xbf16>
    tpu.vector_store %arg4[%c0_6, %c0_7, %c0_8], %10 {strides = array<i32>} : memref<1x128x128xbf16, #tpu.memory_space<vmem>>, vector<1x128x128xbf16>,
    return
  }
  func.func @transform_0(%arg0: i32) -> (i32, i32, i32) {
    %c0_i32 = arith.constant 0 : i32
    %c0_i32_0 = arith.constant 0 : i32
    %c0_i32_1 = arith.constant 0 : i32
    return %arg0, %c0_i32, %c0_i32_0 : i32, i32, i32
  }
  func.func @transform_1(%arg0: i32) -> (i32, i32) {
    %c0_i32 = arith.constant 0 : i32
    %c0_i32_0 = arith.constant 0 : i32
    %c0_i32_1 = arith.constant 0 : i32
    return %c0_i32, %c0_i32_0 : i32, i32
  }
  func.func @transform_2(%arg0: i32) -> (i32, i32) {
    %c0_i32 = arith.constant 0 : i32
    %c0_i32_0 = arith.constant 0 : i32
    %c0_i32_1 = arith.constant 0 : i32
    return %c0_i32, %c0_i32_0 : i32, i32
  }
  func.func @transform_3(%arg0: i32) -> (i32, i32, i32) {
    %c0_i32 = arith.constant 0 : i32
    %c0_i32_0 = arith.constant 0 : i32
    %c0_i32_1 = arith.constant 0 : i32
    return %arg0, %c0_i32, %c0_i32_0 : i32, i32, i32
  }
}

module attributes {stable_mosaic.version = 11 : i64} {
  func.func @_block_kernel(%arg0: i32, %arg1: memref<1x32x512xbf16, #tpu.memory_space<vmem>>, %arg2: memref<1x32x512xbf16, #tpu.memory_space<vmem>>, %arg3: memref<9x32x32xbf16, #tpu.memory_space<vmem>>, %arg4: memref<9x32x32xbf16, #tpu.memory_space<vmem>>, %arg5: memref<32x1xf32, #tpu.memory_space<vmem>>, %arg6: memref<9x32x32xbf16, #tpu.memory_space<vmem>>, %arg7: memref<32x1xf32, #tpu.memory_space<vmem>>, %arg8: memref<1x32x256xbf16, #tpu.memory_space<vmem>>, %arg9: memref<32x384xbf16, #tpu.memory_space<vmem>>) attributes {dimension_semantics = [#tpu.dimension_semantics<parallel>], iteration_bounds = array<i64: 2>, scalar_prefetch = 0 : i64, scratch_operands = 1 : i64, tpu.core_type = #tpu.core_type<tc>, window_params = [{transform_indices = @transform_0, window_bounds = array<i64: 1, 32, 512>}, {transform_indices = @transform_1, window_bounds = array<i64: 1, 32, 512>}, {pipeline_mode = #tpu.pipeline_mode<synchronous>, transform_indices = @transform_2, window_bounds = array<i64: 9, 32, 32>}, {pipeline_mode = #tpu.pipeline_mode<synchronous>, transform_indices = @transform_3, window_bounds = array<i64: 9, 32, 32>}, {pipeline_mode = #tpu.pipeline_mode<synchronous>, transform_indices = @transform_4, window_bounds = array<i64: 32, 1>}, {pipeline_mode = #tpu.pipeline_mode<synchronous>, transform_indices = @transform_5, window_bounds = array<i64: 9, 32, 32>}, {pipeline_mode = #tpu.pipeline_mode<synchronous>, transform_indices = @transform_6, window_bounds = array<i64: 32, 1>}, {transform_indices = @transform_7, window_bounds = array<i64: 1, 32, 256>}]} {
    %cst = arith.constant 0.000000e+00 : f32
    %0 = vector.broadcast %cst : f32 to vector<32x384xf32>
    %c0 = arith.constant 0 : index
    %c0_0 = arith.constant 0 : index
    %c0_1 = arith.constant 0 : index
    %1 = vector.load %arg3[%c0, %c0_0, %c0_1] : memref<9x32x32xbf16, #tpu.memory_space<vmem>>, vector<1x32x32xbf16>
    %2 = vector.shape_cast %1 : vector<1x32x32xbf16> to vector<32x32xbf16>
    %c0_2 = arith.constant 0 : index
    %c0_3 = arith.constant 0 : index
    %c0_4 = arith.constant 0 : index
    %3 = vector.load %arg1[%c0_2, %c0_3, %c0_4] : memref<1x32x512xbf16, #tpu.memory_space<vmem>>, vector<1x32x384xbf16>
    %4 = vector.shape_cast %3 : vector<1x32x384xbf16> to vector<32x384xbf16>
    %cst_5 = arith.constant dense<0.000000e+00> : vector<32x384xf32>
    %5 = tpu.matmul %2, %4, %cst_5 {dimension_numbers = #tpu.dot_dimension_numbers<[1], [0], [0], [1], [0, 0, 1, 1], [], []>} : vector<32x32xbf16>, vector<32x384xbf16>, vector<32x384xf32> -> vector<32x384xf32>
    %6 = arith.addf %0, %5 : vector<32x384xf32>
    %c0_6 = arith.constant 0 : index
    %c0_7 = arith.constant 0 : index
    %c0_8 = arith.constant 0 : index
    %7 = vector.load %arg4[%c0_6, %c0_7, %c0_8] : memref<9x32x32xbf16, #tpu.memory_space<vmem>>, vector<1x32x32xbf16>
    %8 = vector.shape_cast %7 : vector<1x32x32xbf16> to vector<32x32xbf16>
    %c0_9 = arith.constant 0 : index
    %c0_10 = arith.constant 0 : index
    %c0_11 = arith.constant 0 : index
    %9 = vector.load %arg2[%c0_9, %c0_10, %c0_11] : memref<1x32x512xbf16, #tpu.memory_space<vmem>>, vector<1x32x384xbf16>
    %10 = vector.shape_cast %9 : vector<1x32x384xbf16> to vector<32x384xbf16>
    %cst_12 = arith.constant dense<0.000000e+00> : vector<32x384xf32>
    %11 = tpu.matmul %8, %10, %cst_12 {dimension_numbers = #tpu.dot_dimension_numbers<[1], [0], [0], [1], [0, 0, 1, 1], [], []>} : vector<32x32xbf16>, vector<32x384xbf16>, vector<32x384xf32> -> vector<32x384xf32>
    %12 = arith.addf %6, %11 : vector<32x384xf32>
    %c1 = arith.constant 1 : index
    %c0_13 = arith.constant 0 : index
    %c0_14 = arith.constant 0 : index
    %13 = vector.load %arg3[%c1, %c0_13, %c0_14] : memref<9x32x32xbf16, #tpu.memory_space<vmem>>, vector<1x32x32xbf16>
    %14 = vector.shape_cast %13 : vector<1x32x32xbf16> to vector<32x32xbf16>
    %c0_15 = arith.constant 0 : index
    %c0_16 = arith.constant 0 : index
    %c1_17 = arith.constant 1 : index
    %15 = vector.load %arg1[%c0_15, %c0_16, %c1_17] : memref<1x32x512xbf16, #tpu.memory_space<vmem>>, vector<1x32x384xbf16>
    %16 = vector.shape_cast %15 : vector<1x32x384xbf16> to vector<32x384xbf16>
    %cst_18 = arith.constant dense<0.000000e+00> : vector<32x384xf32>
    %17 = tpu.matmul %14, %16, %cst_18 {dimension_numbers = #tpu.dot_dimension_numbers<[1], [0], [0], [1], [0, 0, 1, 1], [], []>} : vector<32x32xbf16>, vector<32x384xbf16>, vector<32x384xf32> -> vector<32x384xf32>
    %18 = arith.addf %12, %17 : vector<32x384xf32>
    %c1_19 = arith.constant 1 : index
    %c0_20 = arith.constant 0 : index
    %c0_21 = arith.constant 0 : index
    %19 = vector.load %arg4[%c1_19, %c0_20, %c0_21] : memref<9x32x32xbf16, #tpu.memory_space<vmem>>, vector<1x32x32xbf16>
    %20 = vector.shape_cast %19 : vector<1x32x32xbf16> to vector<32x32xbf16>
    %c0_22 = arith.constant 0 : index
    %c0_23 = arith.constant 0 : index
    %c1_24 = arith.constant 1 : index
    %21 = vector.load %arg2[%c0_22, %c0_23, %c1_24] : memref<1x32x512xbf16, #tpu.memory_space<vmem>>, vector<1x32x384xbf16>
    %22 = vector.shape_cast %21 : vector<1x32x384xbf16> to vector<32x384xbf16>
    %cst_25 = arith.constant dense<0.000000e+00> : vector<32x384xf32>
    %23 = tpu.matmul %20, %22, %cst_25 {dimension_numbers = #tpu.dot_dimension_numbers<[1], [0], [0], [1], [0, 0, 1, 1], [], []>} : vector<32x32xbf16>, vector<32x384xbf16>, vector<32x384xf32> -> vector<32x384xf32>
    %24 = arith.addf %18, %23 : vector<32x384xf32>
    %c2 = arith.constant 2 : index
    %c0_26 = arith.constant 0 : index
    %c0_27 = arith.constant 0 : index
    %25 = vector.load %arg3[%c2, %c0_26, %c0_27] : memref<9x32x32xbf16, #tpu.memory_space<vmem>>, vector<1x32x32xbf16>
    %26 = vector.shape_cast %25 : vector<1x32x32xbf16> to vector<32x32xbf16>
    %c0_28 = arith.constant 0 : index
    %c0_29 = arith.constant 0 : index
    %c2_30 = arith.constant 2 : index
    %27 = vector.load %arg1[%c0_28, %c0_29, %c2_30] : memref<1x32x512xbf16, #tpu.memory_space<vmem>>, vector<1x32x384xbf16>
    %28 = vector.shape_cast %27 : vector<1x32x384xbf16> to vector<32x384xbf16>
    %cst_31 = arith.constant dense<0.000000e+00> : vector<32x384xf32>
    %29 = tpu.matmul %26, %28, %cst_31 {dimension_numbers = #tpu.dot_dimension_numbers<[1], [0], [0], [1], [0, 0, 1, 1], [], []>} : vector<32x32xbf16>, vector<32x384xbf16>, vector<32x384xf32> -> vector<32x384xf32>
    %30 = arith.addf %24, %29 : vector<32x384xf32>
    %c2_32 = arith.constant 2 : index
    %c0_33 = arith.constant 0 : index
    %c0_34 = arith.constant 0 : index
    %31 = vector.load %arg4[%c2_32, %c0_33, %c0_34] : memref<9x32x32xbf16, #tpu.memory_space<vmem>>, vector<1x32x32xbf16>
    %32 = vector.shape_cast %31 : vector<1x32x32xbf16> to vector<32x32xbf16>
    %c0_35 = arith.constant 0 : index
    %c0_36 = arith.constant 0 : index
    %c2_37 = arith.constant 2 : index
    %33 = vector.load %arg2[%c0_35, %c0_36, %c2_37] : memref<1x32x512xbf16, #tpu.memory_space<vmem>>, vector<1x32x384xbf16>
    %34 = vector.shape_cast %33 : vector<1x32x384xbf16> to vector<32x384xbf16>
    %cst_38 = arith.constant dense<0.000000e+00> : vector<32x384xf32>
    %35 = tpu.matmul %32, %34, %cst_38 {dimension_numbers = #tpu.dot_dimension_numbers<[1], [0], [0], [1], [0, 0, 1, 1], [], []>} : vector<32x32xbf16>, vector<32x384xbf16>, vector<32x384xf32> -> vector<32x384xf32>
    %36 = arith.addf %30, %35 : vector<32x384xf32>
    %c3 = arith.constant 3 : index
    %c0_39 = arith.constant 0 : index
    %c0_40 = arith.constant 0 : index
    %37 = vector.load %arg3[%c3, %c0_39, %c0_40] : memref<9x32x32xbf16, #tpu.memory_space<vmem>>, vector<1x32x32xbf16>
    %38 = vector.shape_cast %37 : vector<1x32x32xbf16> to vector<32x32xbf16>
    %c0_41 = arith.constant 0 : index
    %c0_42 = arith.constant 0 : index
    %c16 = arith.constant 16 : index
    %39 = vector.load %arg1[%c0_41, %c0_42, %c16] : memref<1x32x512xbf16, #tpu.memory_space<vmem>>, vector<1x32x384xbf16>
    %40 = vector.shape_cast %39 : vector<1x32x384xbf16> to vector<32x384xbf16>
    %cst_43 = arith.constant dense<0.000000e+00> : vector<32x384xf32>
    %41 = tpu.matmul %38, %40, %cst_43 {dimension_numbers = #tpu.dot_dimension_numbers<[1], [0], [0], [1], [0, 0, 1, 1], [], []>} : vector<32x32xbf16>, vector<32x384xbf16>, vector<32x384xf32> -> vector<32x384xf32>
    %42 = arith.addf %36, %41 : vector<32x384xf32>
    %c3_44 = arith.constant 3 : index
    %c0_45 = arith.constant 0 : index
    %c0_46 = arith.constant 0 : index
    %43 = vector.load %arg4[%c3_44, %c0_45, %c0_46] : memref<9x32x32xbf16, #tpu.memory_space<vmem>>, vector<1x32x32xbf16>
    %44 = vector.shape_cast %43 : vector<1x32x32xbf16> to vector<32x32xbf16>
    %c0_47 = arith.constant 0 : index
    %c0_48 = arith.constant 0 : index
    %c16_49 = arith.constant 16 : index
    %45 = vector.load %arg2[%c0_47, %c0_48, %c16_49] : memref<1x32x512xbf16, #tpu.memory_space<vmem>>, vector<1x32x384xbf16>
    %46 = vector.shape_cast %45 : vector<1x32x384xbf16> to vector<32x384xbf16>
    %cst_50 = arith.constant dense<0.000000e+00> : vector<32x384xf32>
    %47 = tpu.matmul %44, %46, %cst_50 {dimension_numbers = #tpu.dot_dimension_numbers<[1], [0], [0], [1], [0, 0, 1, 1], [], []>} : vector<32x32xbf16>, vector<32x384xbf16>, vector<32x384xf32> -> vector<32x384xf32>
    %48 = arith.addf %42, %47 : vector<32x384xf32>
    %c4 = arith.constant 4 : index
    %c0_51 = arith.constant 0 : index
    %c0_52 = arith.constant 0 : index
    %49 = vector.load %arg3[%c4, %c0_51, %c0_52] : memref<9x32x32xbf16, #tpu.memory_space<vmem>>, vector<1x32x32xbf16>
    %50 = vector.shape_cast %49 : vector<1x32x32xbf16> to vector<32x32xbf16>
    %c0_53 = arith.constant 0 : index
    %c0_54 = arith.constant 0 : index
    %c17 = arith.constant 17 : index
    %51 = vector.load %arg1[%c0_53, %c0_54, %c17] : memref<1x32x512xbf16, #tpu.memory_space<vmem>>, vector<1x32x384xbf16>
    %52 = vector.shape_cast %51 : vector<1x32x384xbf16> to vector<32x384xbf16>
    %cst_55 = arith.constant dense<0.000000e+00> : vector<32x384xf32>
    %53 = tpu.matmul %50, %52, %cst_55 {dimension_numbers = #tpu.dot_dimension_numbers<[1], [0], [0], [1], [0, 0, 1, 1], [], []>} : vector<32x32xbf16>, vector<32x384xbf16>, vector<32x384xf32> -> vector<32x384xf32>
    %54 = arith.addf %48, %53 : vector<32x384xf32>
    %c4_56 = arith.constant 4 : index
    %c0_57 = arith.constant 0 : index
    %c0_58 = arith.constant 0 : index
    %55 = vector.load %arg4[%c4_56, %c0_57, %c0_58] : memref<9x32x32xbf16, #tpu.memory_space<vmem>>, vector<1x32x32xbf16>
    %56 = vector.shape_cast %55 : vector<1x32x32xbf16> to vector<32x32xbf16>
    %c0_59 = arith.constant 0 : index
    %c0_60 = arith.constant 0 : index
    %c17_61 = arith.constant 17 : index
    %57 = vector.load %arg2[%c0_59, %c0_60, %c17_61] : memref<1x32x512xbf16, #tpu.memory_space<vmem>>, vector<1x32x384xbf16>
    %58 = vector.shape_cast %57 : vector<1x32x384xbf16> to vector<32x384xbf16>
    %cst_62 = arith.constant dense<0.000000e+00> : vector<32x384xf32>
    %59 = tpu.matmul %56, %58, %cst_62 {dimension_numbers = #tpu.dot_dimension_numbers<[1], [0], [0], [1], [0, 0, 1, 1], [], []>} : vector<32x32xbf16>, vector<32x384xbf16>, vector<32x384xf32> -> vector<32x384xf32>
    %60 = arith.addf %54, %59 : vector<32x384xf32>
    %c5 = arith.constant 5 : index
    %c0_63 = arith.constant 0 : index
    %c0_64 = arith.constant 0 : index
    %61 = vector.load %arg3[%c5, %c0_63, %c0_64] : memref<9x32x32xbf16, #tpu.memory_space<vmem>>, vector<1x32x32xbf16>
    %62 = vector.shape_cast %61 : vector<1x32x32xbf16> to vector<32x32xbf16>
    %c0_65 = arith.constant 0 : index
    %c0_66 = arith.constant 0 : index
    %c18 = arith.constant 18 : index
    %63 = vector.load %arg1[%c0_65, %c0_66, %c18] : memref<1x32x512xbf16, #tpu.memory_space<vmem>>, vector<1x32x384xbf16>
    %64 = vector.shape_cast %63 : vector<1x32x384xbf16> to vector<32x384xbf16>
    %cst_67 = arith.constant dense<0.000000e+00> : vector<32x384xf32>
    %65 = tpu.matmul %62, %64, %cst_67 {dimension_numbers = #tpu.dot_dimension_numbers<[1], [0], [0], [1], [0, 0, 1, 1], [], []>} : vector<32x32xbf16>, vector<32x384xbf16>, vector<32x384xf32> -> vector<32x384xf32>
    %66 = arith.addf %60, %65 : vector<32x384xf32>
    %c5_68 = arith.constant 5 : index
    %c0_69 = arith.constant 0 : index
    %c0_70 = arith.constant 0 : index
    %67 = vector.load %arg4[%c5_68, %c0_69, %c0_70] : memref<9x32x32xbf16, #tpu.memory_space<vmem>>, vector<1x32x32xbf16>
    %68 = vector.shape_cast %67 : vector<1x32x32xbf16> to vector<32x32xbf16>
    %c0_71 = arith.constant 0 : index
    %c0_72 = arith.constant 0 : index
    %c18_73 = arith.constant 18 : index
    %69 = vector.load %arg2[%c0_71, %c0_72, %c18_73] : memref<1x32x512xbf16, #tpu.memory_space<vmem>>, vector<1x32x384xbf16>
    %70 = vector.shape_cast %69 : vector<1x32x384xbf16> to vector<32x384xbf16>
    %cst_74 = arith.constant dense<0.000000e+00> : vector<32x384xf32>
    %71 = tpu.matmul %68, %70, %cst_74 {dimension_numbers = #tpu.dot_dimension_numbers<[1], [0], [0], [1], [0, 0, 1, 1], [], []>} : vector<32x32xbf16>, vector<32x384xbf16>, vector<32x384xf32> -> vector<32x384xf32>
    %72 = arith.addf %66, %71 : vector<32x384xf32>
    %c6 = arith.constant 6 : index
    %c0_75 = arith.constant 0 : index
    %c0_76 = arith.constant 0 : index
    %73 = vector.load %arg3[%c6, %c0_75, %c0_76] : memref<9x32x32xbf16, #tpu.memory_space<vmem>>, vector<1x32x32xbf16>
    %74 = vector.shape_cast %73 : vector<1x32x32xbf16> to vector<32x32xbf16>
    %c0_77 = arith.constant 0 : index
    %c0_78 = arith.constant 0 : index
    %c32 = arith.constant 32 : index
    %75 = vector.load %arg1[%c0_77, %c0_78, %c32] : memref<1x32x512xbf16, #tpu.memory_space<vmem>>, vector<1x32x384xbf16>
    %76 = vector.shape_cast %75 : vector<1x32x384xbf16> to vector<32x384xbf16>
    %cst_79 = arith.constant dense<0.000000e+00> : vector<32x384xf32>
    %77 = tpu.matmul %74, %76, %cst_79 {dimension_numbers = #tpu.dot_dimension_numbers<[1], [0], [0], [1], [0, 0, 1, 1], [], []>} : vector<32x32xbf16>, vector<32x384xbf16>, vector<32x384xf32> -> vector<32x384xf32>
    %78 = arith.addf %72, %77 : vector<32x384xf32>
    %c6_80 = arith.constant 6 : index
    %c0_81 = arith.constant 0 : index
    %c0_82 = arith.constant 0 : index
    %79 = vector.load %arg4[%c6_80, %c0_81, %c0_82] : memref<9x32x32xbf16, #tpu.memory_space<vmem>>, vector<1x32x32xbf16>
    %80 = vector.shape_cast %79 : vector<1x32x32xbf16> to vector<32x32xbf16>
    %c0_83 = arith.constant 0 : index
    %c0_84 = arith.constant 0 : index
    %c32_85 = arith.constant 32 : index
    %81 = vector.load %arg2[%c0_83, %c0_84, %c32_85] : memref<1x32x512xbf16, #tpu.memory_space<vmem>>, vector<1x32x384xbf16>
    %82 = vector.shape_cast %81 : vector<1x32x384xbf16> to vector<32x384xbf16>
    %cst_86 = arith.constant dense<0.000000e+00> : vector<32x384xf32>
    %83 = tpu.matmul %80, %82, %cst_86 {dimension_numbers = #tpu.dot_dimension_numbers<[1], [0], [0], [1], [0, 0, 1, 1], [], []>} : vector<32x32xbf16>, vector<32x384xbf16>, vector<32x384xf32> -> vector<32x384xf32>
    %84 = arith.addf %78, %83 : vector<32x384xf32>
    %c7 = arith.constant 7 : index
    %c0_87 = arith.constant 0 : index
    %c0_88 = arith.constant 0 : index
    %85 = vector.load %arg3[%c7, %c0_87, %c0_88] : memref<9x32x32xbf16, #tpu.memory_space<vmem>>, vector<1x32x32xbf16>
    %86 = vector.shape_cast %85 : vector<1x32x32xbf16> to vector<32x32xbf16>
    %c0_89 = arith.constant 0 : index
    %c0_90 = arith.constant 0 : index
    %c33 = arith.constant 33 : index
    %87 = vector.load %arg1[%c0_89, %c0_90, %c33] : memref<1x32x512xbf16, #tpu.memory_space<vmem>>, vector<1x32x384xbf16>
    %88 = vector.shape_cast %87 : vector<1x32x384xbf16> to vector<32x384xbf16>
    %cst_91 = arith.constant dense<0.000000e+00> : vector<32x384xf32>
    %89 = tpu.matmul %86, %88, %cst_91 {dimension_numbers = #tpu.dot_dimension_numbers<[1], [0], [0], [1], [0, 0, 1, 1], [], []>} : vector<32x32xbf16>, vector<32x384xbf16>, vector<32x384xf32> -> vector<32x384xf32>
    %90 = arith.addf %84, %89 : vector<32x384xf32>
    %c7_92 = arith.constant 7 : index
    %c0_93 = arith.constant 0 : index
    %c0_94 = arith.constant 0 : index
    %91 = vector.load %arg4[%c7_92, %c0_93, %c0_94] : memref<9x32x32xbf16, #tpu.memory_space<vmem>>, vector<1x32x32xbf16>
    %92 = vector.shape_cast %91 : vector<1x32x32xbf16> to vector<32x32xbf16>
    %c0_95 = arith.constant 0 : index
    %c0_96 = arith.constant 0 : index
    %c33_97 = arith.constant 33 : index
    %93 = vector.load %arg2[%c0_95, %c0_96, %c33_97] : memref<1x32x512xbf16, #tpu.memory_space<vmem>>, vector<1x32x384xbf16>
    %94 = vector.shape_cast %93 : vector<1x32x384xbf16> to vector<32x384xbf16>
    %cst_98 = arith.constant dense<0.000000e+00> : vector<32x384xf32>
    %95 = tpu.matmul %92, %94, %cst_98 {dimension_numbers = #tpu.dot_dimension_numbers<[1], [0], [0], [1], [0, 0, 1, 1], [], []>} : vector<32x32xbf16>, vector<32x384xbf16>, vector<32x384xf32> -> vector<32x384xf32>
    %96 = arith.addf %90, %95 : vector<32x384xf32>
    %c8 = arith.constant 8 : index
    %c0_99 = arith.constant 0 : index
    %c0_100 = arith.constant 0 : index
    %97 = vector.load %arg3[%c8, %c0_99, %c0_100] : memref<9x32x32xbf16, #tpu.memory_space<vmem>>, vector<1x32x32xbf16>
    %98 = vector.shape_cast %97 : vector<1x32x32xbf16> to vector<32x32xbf16>
    %c0_101 = arith.constant 0 : index
    %c0_102 = arith.constant 0 : index
    %c34 = arith.constant 34 : index
    %99 = vector.load %arg1[%c0_101, %c0_102, %c34] : memref<1x32x512xbf16, #tpu.memory_space<vmem>>, vector<1x32x384xbf16>
    %100 = vector.shape_cast %99 : vector<1x32x384xbf16> to vector<32x384xbf16>
    %cst_103 = arith.constant dense<0.000000e+00> : vector<32x384xf32>
    %101 = tpu.matmul %98, %100, %cst_103 {dimension_numbers = #tpu.dot_dimension_numbers<[1], [0], [0], [1], [0, 0, 1, 1], [], []>} : vector<32x32xbf16>, vector<32x384xbf16>, vector<32x384xf32> -> vector<32x384xf32>
    %102 = arith.addf %96, %101 : vector<32x384xf32>
    %c8_104 = arith.constant 8 : index
    %c0_105 = arith.constant 0 : index
    %c0_106 = arith.constant 0 : index
    %103 = vector.load %arg4[%c8_104, %c0_105, %c0_106] : memref<9x32x32xbf16, #tpu.memory_space<vmem>>, vector<1x32x32xbf16>
    %104 = vector.shape_cast %103 : vector<1x32x32xbf16> to vector<32x32xbf16>
    %c0_107 = arith.constant 0 : index
    %c0_108 = arith.constant 0 : index
    %c34_109 = arith.constant 34 : index
    %105 = vector.load %arg2[%c0_107, %c0_108, %c34_109] : memref<1x32x512xbf16, #tpu.memory_space<vmem>>, vector<1x32x384xbf16>
    %106 = vector.shape_cast %105 : vector<1x32x384xbf16> to vector<32x384xbf16>
    %cst_110 = arith.constant dense<0.000000e+00> : vector<32x384xf32>
    %107 = tpu.matmul %104, %106, %cst_110 {dimension_numbers = #tpu.dot_dimension_numbers<[1], [0], [0], [1], [0, 0, 1, 1], [], []>} : vector<32x32xbf16>, vector<32x384xbf16>, vector<32x384xf32> -> vector<32x384xf32>
    %108 = arith.addf %102, %107 : vector<32x384xf32>
    %c0_111 = arith.constant 0 : index
    %c0_112 = arith.constant 0 : index
    %109 = vector.load %arg5[%c0_111, %c0_112] : memref<32x1xf32, #tpu.memory_space<vmem>>, vector<32x1xf32>
    %110 = vector.broadcast %109 : vector<32x1xf32> to vector<32x384xf32>
    %111 = arith.addf %108, %110 : vector<32x384xf32>
    %cst_113 = arith.constant 0.000000e+00 : f32
    %112 = vector.broadcast %cst_113 : f32 to vector<32x384xf32>
    %113 = arith.maximumf %111, %112 : vector<32x384xf32>
    %114 = arith.truncf %113 : vector<32x384xf32> to vector<32x384xbf16>
    %c0_114 = arith.constant 0 : index
    %c0_115 = arith.constant 0 : index
    %115 = vector.load %arg9[%c0_114, %c0_115] : memref<32x384xbf16, #tpu.memory_space<vmem>>, vector<32x384xbf16>
    tpu.vector_store %arg9[%c0_114, %c0_115], %114 {strides = array<i32>} : memref<32x384xbf16, #tpu.memory_space<vmem>>, vector<32x384xbf16>,
    %cst_116 = arith.constant 0.000000e+00 : f32
    %116 = vector.broadcast %cst_116 : f32 to vector<32x256xf32>
    %c0_117 = arith.constant 0 : index
    %c0_118 = arith.constant 0 : index
    %c0_119 = arith.constant 0 : index
    %117 = vector.load %arg6[%c0_117, %c0_118, %c0_119] : memref<9x32x32xbf16, #tpu.memory_space<vmem>>, vector<1x32x32xbf16>
    %118 = vector.shape_cast %117 : vector<1x32x32xbf16> to vector<32x32xbf16>
    %c0_120 = arith.constant 0 : index
    %c0_121 = arith.constant 0 : index
    %119 = vector.load %arg9[%c0_120, %c0_121] : memref<32x384xbf16, #tpu.memory_space<vmem>>, vector<32x256xbf16>
    %cst_122 = arith.constant dense<0.000000e+00> : vector<32x256xf32>
    %120 = tpu.matmul %118, %119, %cst_122 {dimension_numbers = #tpu.dot_dimension_numbers<[1], [0], [0], [1], [0, 0, 1, 1], [], []>} : vector<32x32xbf16>, vector<32x256xbf16>, vector<32x256xf32> -> vector<32x256xf32>
    %121 = arith.addf %116, %120 : vector<32x256xf32>
    %c1_123 = arith.constant 1 : index
    %c0_124 = arith.constant 0 : index
    %c0_125 = arith.constant 0 : index
    %122 = vector.load %arg6[%c1_123, %c0_124, %c0_125] : memref<9x32x32xbf16, #tpu.memory_space<vmem>>, vector<1x32x32xbf16>
    %123 = vector.shape_cast %122 : vector<1x32x32xbf16> to vector<32x32xbf16>
    %c0_126 = arith.constant 0 : index
    %c1_127 = arith.constant 1 : index
    %124 = vector.load %arg9[%c0_126, %c1_127] : memref<32x384xbf16, #tpu.memory_space<vmem>>, vector<32x256xbf16>
    %cst_128 = arith.constant dense<0.000000e+00> : vector<32x256xf32>
    %125 = tpu.matmul %123, %124, %cst_128 {dimension_numbers = #tpu.dot_dimension_numbers<[1], [0], [0], [1], [0, 0, 1, 1], [], []>} : vector<32x32xbf16>, vector<32x256xbf16>, vector<32x256xf32> -> vector<32x256xf32>
    %126 = arith.addf %121, %125 : vector<32x256xf32>
    %c2_129 = arith.constant 2 : index
    %c0_130 = arith.constant 0 : index
    %c0_131 = arith.constant 0 : index
    %127 = vector.load %arg6[%c2_129, %c0_130, %c0_131] : memref<9x32x32xbf16, #tpu.memory_space<vmem>>, vector<1x32x32xbf16>
    %128 = vector.shape_cast %127 : vector<1x32x32xbf16> to vector<32x32xbf16>
    %c0_132 = arith.constant 0 : index
    %c2_133 = arith.constant 2 : index
    %129 = vector.load %arg9[%c0_132, %c2_133] : memref<32x384xbf16, #tpu.memory_space<vmem>>, vector<32x256xbf16>
    %cst_134 = arith.constant dense<0.000000e+00> : vector<32x256xf32>
    %130 = tpu.matmul %128, %129, %cst_134 {dimension_numbers = #tpu.dot_dimension_numbers<[1], [0], [0], [1], [0, 0, 1, 1], [], []>} : vector<32x32xbf16>, vector<32x256xbf16>, vector<32x256xf32> -> vector<32x256xf32>
    %131 = arith.addf %126, %130 : vector<32x256xf32>
    %c3_135 = arith.constant 3 : index
    %c0_136 = arith.constant 0 : index
    %c0_137 = arith.constant 0 : index
    %132 = vector.load %arg6[%c3_135, %c0_136, %c0_137] : memref<9x32x32xbf16, #tpu.memory_space<vmem>>, vector<1x32x32xbf16>
    %133 = vector.shape_cast %132 : vector<1x32x32xbf16> to vector<32x32xbf16>
    %c0_138 = arith.constant 0 : index
    %c16_139 = arith.constant 16 : index
    %134 = vector.load %arg9[%c0_138, %c16_139] : memref<32x384xbf16, #tpu.memory_space<vmem>>, vector<32x256xbf16>
    %cst_140 = arith.constant dense<0.000000e+00> : vector<32x256xf32>
    %135 = tpu.matmul %133, %134, %cst_140 {dimension_numbers = #tpu.dot_dimension_numbers<[1], [0], [0], [1], [0, 0, 1, 1], [], []>} : vector<32x32xbf16>, vector<32x256xbf16>, vector<32x256xf32> -> vector<32x256xf32>
    %136 = arith.addf %131, %135 : vector<32x256xf32>
    %c4_141 = arith.constant 4 : index
    %c0_142 = arith.constant 0 : index
    %c0_143 = arith.constant 0 : index
    %137 = vector.load %arg6[%c4_141, %c0_142, %c0_143] : memref<9x32x32xbf16, #tpu.memory_space<vmem>>, vector<1x32x32xbf16>
    %138 = vector.shape_cast %137 : vector<1x32x32xbf16> to vector<32x32xbf16>
    %c0_144 = arith.constant 0 : index
    %c17_145 = arith.constant 17 : index
    %139 = vector.load %arg9[%c0_144, %c17_145] : memref<32x384xbf16, #tpu.memory_space<vmem>>, vector<32x256xbf16>
    %cst_146 = arith.constant dense<0.000000e+00> : vector<32x256xf32>
    %140 = tpu.matmul %138, %139, %cst_146 {dimension_numbers = #tpu.dot_dimension_numbers<[1], [0], [0], [1], [0, 0, 1, 1], [], []>} : vector<32x32xbf16>, vector<32x256xbf16>, vector<32x256xf32> -> vector<32x256xf32>
    %141 = arith.addf %136, %140 : vector<32x256xf32>
    %c5_147 = arith.constant 5 : index
    %c0_148 = arith.constant 0 : index
    %c0_149 = arith.constant 0 : index
    %142 = vector.load %arg6[%c5_147, %c0_148, %c0_149] : memref<9x32x32xbf16, #tpu.memory_space<vmem>>, vector<1x32x32xbf16>
    %143 = vector.shape_cast %142 : vector<1x32x32xbf16> to vector<32x32xbf16>
    %c0_150 = arith.constant 0 : index
    %c18_151 = arith.constant 18 : index
    %144 = vector.load %arg9[%c0_150, %c18_151] : memref<32x384xbf16, #tpu.memory_space<vmem>>, vector<32x256xbf16>
    %cst_152 = arith.constant dense<0.000000e+00> : vector<32x256xf32>
    %145 = tpu.matmul %143, %144, %cst_152 {dimension_numbers = #tpu.dot_dimension_numbers<[1], [0], [0], [1], [0, 0, 1, 1], [], []>} : vector<32x32xbf16>, vector<32x256xbf16>, vector<32x256xf32> -> vector<32x256xf32>
    %146 = arith.addf %141, %145 : vector<32x256xf32>
    %c6_153 = arith.constant 6 : index
    %c0_154 = arith.constant 0 : index
    %c0_155 = arith.constant 0 : index
    %147 = vector.load %arg6[%c6_153, %c0_154, %c0_155] : memref<9x32x32xbf16, #tpu.memory_space<vmem>>, vector<1x32x32xbf16>
    %148 = vector.shape_cast %147 : vector<1x32x32xbf16> to vector<32x32xbf16>
    %c0_156 = arith.constant 0 : index
    %c32_157 = arith.constant 32 : index
    %149 = vector.load %arg9[%c0_156, %c32_157] : memref<32x384xbf16, #tpu.memory_space<vmem>>, vector<32x256xbf16>
    %cst_158 = arith.constant dense<0.000000e+00> : vector<32x256xf32>
    %150 = tpu.matmul %148, %149, %cst_158 {dimension_numbers = #tpu.dot_dimension_numbers<[1], [0], [0], [1], [0, 0, 1, 1], [], []>} : vector<32x32xbf16>, vector<32x256xbf16>, vector<32x256xf32> -> vector<32x256xf32>
    %151 = arith.addf %146, %150 : vector<32x256xf32>
    %c7_159 = arith.constant 7 : index
    %c0_160 = arith.constant 0 : index
    %c0_161 = arith.constant 0 : index
    %152 = vector.load %arg6[%c7_159, %c0_160, %c0_161] : memref<9x32x32xbf16, #tpu.memory_space<vmem>>, vector<1x32x32xbf16>
    %153 = vector.shape_cast %152 : vector<1x32x32xbf16> to vector<32x32xbf16>
    %c0_162 = arith.constant 0 : index
    %c33_163 = arith.constant 33 : index
    %154 = vector.load %arg9[%c0_162, %c33_163] : memref<32x384xbf16, #tpu.memory_space<vmem>>, vector<32x256xbf16>
    %cst_164 = arith.constant dense<0.000000e+00> : vector<32x256xf32>
    %155 = tpu.matmul %153, %154, %cst_164 {dimension_numbers = #tpu.dot_dimension_numbers<[1], [0], [0], [1], [0, 0, 1, 1], [], []>} : vector<32x32xbf16>, vector<32x256xbf16>, vector<32x256xf32> -> vector<32x256xf32>
    %156 = arith.addf %151, %155 : vector<32x256xf32>
    %c8_165 = arith.constant 8 : index
    %c0_166 = arith.constant 0 : index
    %c0_167 = arith.constant 0 : index
    %157 = vector.load %arg6[%c8_165, %c0_166, %c0_167] : memref<9x32x32xbf16, #tpu.memory_space<vmem>>, vector<1x32x32xbf16>
    %158 = vector.shape_cast %157 : vector<1x32x32xbf16> to vector<32x32xbf16>
    %c0_168 = arith.constant 0 : index
    %c34_169 = arith.constant 34 : index
    %159 = vector.load %arg9[%c0_168, %c34_169] : memref<32x384xbf16, #tpu.memory_space<vmem>>, vector<32x256xbf16>
    %cst_170 = arith.constant dense<0.000000e+00> : vector<32x256xf32>
    %160 = tpu.matmul %158, %159, %cst_170 {dimension_numbers = #tpu.dot_dimension_numbers<[1], [0], [0], [1], [0, 0, 1, 1], [], []>} : vector<32x32xbf16>, vector<32x256xbf16>, vector<32x256xf32> -> vector<32x256xf32>
    %161 = arith.addf %156, %160 : vector<32x256xf32>
    %c0_171 = arith.constant 0 : index
    %c0_172 = arith.constant 0 : index
    %162 = vector.load %arg7[%c0_171, %c0_172] : memref<32x1xf32, #tpu.memory_space<vmem>>, vector<32x1xf32>
    %163 = vector.broadcast %162 : vector<32x1xf32> to vector<32x256xf32>
    %164 = arith.addf %161, %163 : vector<32x256xf32>
    %165 = arith.truncf %164 : vector<32x256xf32> to vector<32x256xbf16>
    %c0_173 = arith.constant 0 : index
    %c0_174 = arith.constant 0 : index
    %c0_175 = arith.constant 0 : index
    %166 = vector.load %arg8[%c0_173, %c0_174, %c0_175] : memref<1x32x256xbf16, #tpu.memory_space<vmem>>, vector<1x32x256xbf16>
    %167 = vector.shape_cast %166 : vector<1x32x256xbf16> to vector<32x256xbf16>
    %168 = vector.shape_cast %165 : vector<32x256xbf16> to vector<1x32x256xbf16>
    tpu.vector_store %arg8[%c0_173, %c0_174, %c0_175], %168 {strides = array<i32>} : memref<1x32x256xbf16, #tpu.memory_space<vmem>>, vector<1x32x256xbf16>,
    return
  }
  func.func @transform_0(%arg0: i32) -> (i32, i32, i32) {
    %c0_i32 = arith.constant 0 : i32
    %c0_i32_0 = arith.constant 0 : i32
    %c0_i32_1 = arith.constant 0 : i32
    return %arg0, %c0_i32, %c0_i32_0 : i32, i32, i32
  }
  func.func @transform_1(%arg0: i32) -> (i32, i32, i32) {
    %c0_i32 = arith.constant 0 : i32
    %c0_i32_0 = arith.constant 0 : i32
    %c0_i32_1 = arith.constant 0 : i32
    return %arg0, %c0_i32, %c0_i32_0 : i32, i32, i32
  }
  func.func @transform_2(%arg0: i32) -> (i32, i32, i32) {
    %c0_i32 = arith.constant 0 : i32
    %c0_i32_0 = arith.constant 0 : i32
    %c0_i32_1 = arith.constant 0 : i32
    %c0_i32_2 = arith.constant 0 : i32
    return %c0_i32, %c0_i32_0, %c0_i32_1 : i32, i32, i32
  }
  func.func @transform_3(%arg0: i32) -> (i32, i32, i32) {
    %c0_i32 = arith.constant 0 : i32
    %c0_i32_0 = arith.constant 0 : i32
    %c0_i32_1 = arith.constant 0 : i32
    %c0_i32_2 = arith.constant 0 : i32
    return %c0_i32, %c0_i32_0, %c0_i32_1 : i32, i32, i32
  }
  func.func @transform_4(%arg0: i32) -> (i32, i32) {
    %c0_i32 = arith.constant 0 : i32
    %c0_i32_0 = arith.constant 0 : i32
    %c0_i32_1 = arith.constant 0 : i32
    return %c0_i32, %c0_i32_0 : i32, i32
  }
  func.func @transform_5(%arg0: i32) -> (i32, i32, i32) {
    %c0_i32 = arith.constant 0 : i32
    %c0_i32_0 = arith.constant 0 : i32
    %c0_i32_1 = arith.constant 0 : i32
    %c0_i32_2 = arith.constant 0 : i32
    return %c0_i32, %c0_i32_0, %c0_i32_1 : i32, i32, i32
  }
  func.func @transform_6(%arg0: i32) -> (i32, i32) {
    %c0_i32 = arith.constant 0 : i32
    %c0_i32_0 = arith.constant 0 : i32
    %c0_i32_1 = arith.constant 0 : i32
    return %c0_i32, %c0_i32_0 : i32, i32
  }
  func.func @transform_7(%arg0: i32) -> (i32, i32, i32) {
    %c0_i32 = arith.constant 0 : i32
    %c0_i32_0 = arith.constant 0 : i32
    %c0_i32_1 = arith.constant 0 : i32
    return %arg0, %c0_i32, %c0_i32_0 : i32, i32, i32
  }
}

module attributes {stable_mosaic.version = 11 : i64} {
  func.func @_upconv_kernel(%arg0: i32, %arg1: memref<1x32x256xbf16, #tpu.memory_space<vmem>>, %arg2: memref<64x32xbf16, #tpu.memory_space<vmem>>, %arg3: memref<64x1xf32, #tpu.memory_space<vmem>>, %arg4: memref<1x64x256xbf16, #tpu.memory_space<vmem>>) attributes {dimension_semantics = [#tpu.dimension_semantics<parallel>], iteration_bounds = array<i64: 2>, scalar_prefetch = 0 : i64, scratch_operands = 0 : i64, tpu.core_type = #tpu.core_type<tc>, window_params = [{transform_indices = @transform_0, window_bounds = array<i64: 1, 32, 256>}, {pipeline_mode = #tpu.pipeline_mode<synchronous>, transform_indices = @transform_1, window_bounds = array<i64: 64, 32>}, {pipeline_mode = #tpu.pipeline_mode<synchronous>, transform_indices = @transform_2, window_bounds = array<i64: 64, 1>}, {transform_indices = @transform_3, window_bounds = array<i64: 1, 64, 256>}]} {
    %c0 = arith.constant 0 : index
    %c0_0 = arith.constant 0 : index
    %0 = vector.load %arg2[%c0, %c0_0] : memref<64x32xbf16, #tpu.memory_space<vmem>>, vector<64x32xbf16>
    %c0_1 = arith.constant 0 : index
    %c0_2 = arith.constant 0 : index
    %c0_3 = arith.constant 0 : index
    %1 = vector.load %arg1[%c0_1, %c0_2, %c0_3] : memref<1x32x256xbf16, #tpu.memory_space<vmem>>, vector<1x32x256xbf16>
    %2 = vector.shape_cast %1 : vector<1x32x256xbf16> to vector<32x256xbf16>
    %cst = arith.constant dense<0.000000e+00> : vector<64x256xf32>
    %3 = tpu.matmul %0, %2, %cst {dimension_numbers = #tpu.dot_dimension_numbers<[1], [0], [0], [1], [0, 0, 1, 1], [], []>} : vector<64x32xbf16>, vector<32x256xbf16>, vector<64x256xf32> -> vector<64x256xf32>
    %c0_4 = arith.constant 0 : index
    %c0_5 = arith.constant 0 : index
    %4 = vector.load %arg3[%c0_4, %c0_5] : memref<64x1xf32, #tpu.memory_space<vmem>>, vector<64x1xf32>
    %5 = vector.broadcast %4 : vector<64x1xf32> to vector<64x256xf32>
    %6 = arith.addf %3, %5 : vector<64x256xf32>
    %7 = arith.truncf %6 : vector<64x256xf32> to vector<64x256xbf16>
    %c0_6 = arith.constant 0 : index
    %c0_7 = arith.constant 0 : index
    %c0_8 = arith.constant 0 : index
    %8 = vector.load %arg4[%c0_6, %c0_7, %c0_8] : memref<1x64x256xbf16, #tpu.memory_space<vmem>>, vector<1x64x256xbf16>
    %9 = vector.shape_cast %8 : vector<1x64x256xbf16> to vector<64x256xbf16>
    %10 = vector.shape_cast %7 : vector<64x256xbf16> to vector<1x64x256xbf16>
    tpu.vector_store %arg4[%c0_6, %c0_7, %c0_8], %10 {strides = array<i32>} : memref<1x64x256xbf16, #tpu.memory_space<vmem>>, vector<1x64x256xbf16>,
    return
  }
  func.func @transform_0(%arg0: i32) -> (i32, i32, i32) {
    %c0_i32 = arith.constant 0 : i32
    %c0_i32_0 = arith.constant 0 : i32
    %c0_i32_1 = arith.constant 0 : i32
    return %arg0, %c0_i32, %c0_i32_0 : i32, i32, i32
  }
  func.func @transform_1(%arg0: i32) -> (i32, i32) {
    %c0_i32 = arith.constant 0 : i32
    %c0_i32_0 = arith.constant 0 : i32
    %c0_i32_1 = arith.constant 0 : i32
    return %c0_i32, %c0_i32_0 : i32, i32
  }
  func.func @transform_2(%arg0: i32) -> (i32, i32) {
    %c0_i32 = arith.constant 0 : i32
    %c0_i32_0 = arith.constant 0 : i32
    %c0_i32_1 = arith.constant 0 : i32
    return %c0_i32, %c0_i32_0 : i32, i32
  }
  func.func @transform_3(%arg0: i32) -> (i32, i32, i32) {
    %c0_i32 = arith.constant 0 : i32
    %c0_i32_0 = arith.constant 0 : i32
    %c0_i32_1 = arith.constant 0 : i32
    return %arg0, %c0_i32, %c0_i32_0 : i32, i32, i32
  }
}

module attributes {stable_mosaic.version = 11 : i64} {
  func.func @_block_kernel(%arg0: i32, %arg1: memref<1x16x896xbf16, #tpu.memory_space<vmem>>, %arg2: memref<1x16x896xbf16, #tpu.memory_space<vmem>>, %arg3: memref<9x16x16xbf16, #tpu.memory_space<vmem>>, %arg4: memref<9x16x16xbf16, #tpu.memory_space<vmem>>, %arg5: memref<16x1xf32, #tpu.memory_space<vmem>>, %arg6: memref<9x16x16xbf16, #tpu.memory_space<vmem>>, %arg7: memref<16x1xf32, #tpu.memory_space<vmem>>, %arg8: memref<1x16x640xf32, #tpu.memory_space<vmem>>, %arg9: memref<16x768xbf16, #tpu.memory_space<vmem>>) attributes {dimension_semantics = [#tpu.dimension_semantics<parallel>], iteration_bounds = array<i64: 2>, scalar_prefetch = 0 : i64, scratch_operands = 1 : i64, tpu.core_type = #tpu.core_type<tc>, window_params = [{transform_indices = @transform_0, window_bounds = array<i64: 1, 16, 896>}, {transform_indices = @transform_1, window_bounds = array<i64: 1, 16, 896>}, {pipeline_mode = #tpu.pipeline_mode<synchronous>, transform_indices = @transform_2, window_bounds = array<i64: 9, 16, 16>}, {pipeline_mode = #tpu.pipeline_mode<synchronous>, transform_indices = @transform_3, window_bounds = array<i64: 9, 16, 16>}, {pipeline_mode = #tpu.pipeline_mode<synchronous>, transform_indices = @transform_4, window_bounds = array<i64: 16, 1>}, {pipeline_mode = #tpu.pipeline_mode<synchronous>, transform_indices = @transform_5, window_bounds = array<i64: 9, 16, 16>}, {pipeline_mode = #tpu.pipeline_mode<synchronous>, transform_indices = @transform_6, window_bounds = array<i64: 16, 1>}, {transform_indices = @transform_7, window_bounds = array<i64: 1, 16, 640>}]} {
    %cst = arith.constant 0.000000e+00 : f32
    %0 = vector.broadcast %cst : f32 to vector<16x768xf32>
    %c0 = arith.constant 0 : index
    %c0_0 = arith.constant 0 : index
    %c0_1 = arith.constant 0 : index
    %1 = vector.load %arg3[%c0, %c0_0, %c0_1] : memref<9x16x16xbf16, #tpu.memory_space<vmem>>, vector<1x16x16xbf16>
    %2 = vector.shape_cast %1 : vector<1x16x16xbf16> to vector<16x16xbf16>
    %c0_2 = arith.constant 0 : index
    %c0_3 = arith.constant 0 : index
    %c0_4 = arith.constant 0 : index
    %3 = vector.load %arg1[%c0_2, %c0_3, %c0_4] : memref<1x16x896xbf16, #tpu.memory_space<vmem>>, vector<1x16x768xbf16>
    %4 = vector.shape_cast %3 : vector<1x16x768xbf16> to vector<16x768xbf16>
    %cst_5 = arith.constant dense<0.000000e+00> : vector<16x768xf32>
    %5 = tpu.matmul %2, %4, %cst_5 {dimension_numbers = #tpu.dot_dimension_numbers<[1], [0], [0], [1], [0, 0, 1, 1], [], []>} : vector<16x16xbf16>, vector<16x768xbf16>, vector<16x768xf32> -> vector<16x768xf32>
    %6 = arith.addf %0, %5 : vector<16x768xf32>
    %c0_6 = arith.constant 0 : index
    %c0_7 = arith.constant 0 : index
    %c0_8 = arith.constant 0 : index
    %7 = vector.load %arg4[%c0_6, %c0_7, %c0_8] : memref<9x16x16xbf16, #tpu.memory_space<vmem>>, vector<1x16x16xbf16>
    %8 = vector.shape_cast %7 : vector<1x16x16xbf16> to vector<16x16xbf16>
    %c0_9 = arith.constant 0 : index
    %c0_10 = arith.constant 0 : index
    %c0_11 = arith.constant 0 : index
    %9 = vector.load %arg2[%c0_9, %c0_10, %c0_11] : memref<1x16x896xbf16, #tpu.memory_space<vmem>>, vector<1x16x768xbf16>
    %10 = vector.shape_cast %9 : vector<1x16x768xbf16> to vector<16x768xbf16>
    %cst_12 = arith.constant dense<0.000000e+00> : vector<16x768xf32>
    %11 = tpu.matmul %8, %10, %cst_12 {dimension_numbers = #tpu.dot_dimension_numbers<[1], [0], [0], [1], [0, 0, 1, 1], [], []>} : vector<16x16xbf16>, vector<16x768xbf16>, vector<16x768xf32> -> vector<16x768xf32>
    %12 = arith.addf %6, %11 : vector<16x768xf32>
    %c1 = arith.constant 1 : index
    %c0_13 = arith.constant 0 : index
    %c0_14 = arith.constant 0 : index
    %13 = vector.load %arg3[%c1, %c0_13, %c0_14] : memref<9x16x16xbf16, #tpu.memory_space<vmem>>, vector<1x16x16xbf16>
    %14 = vector.shape_cast %13 : vector<1x16x16xbf16> to vector<16x16xbf16>
    %c0_15 = arith.constant 0 : index
    %c0_16 = arith.constant 0 : index
    %c1_17 = arith.constant 1 : index
    %15 = vector.load %arg1[%c0_15, %c0_16, %c1_17] : memref<1x16x896xbf16, #tpu.memory_space<vmem>>, vector<1x16x768xbf16>
    %16 = vector.shape_cast %15 : vector<1x16x768xbf16> to vector<16x768xbf16>
    %cst_18 = arith.constant dense<0.000000e+00> : vector<16x768xf32>
    %17 = tpu.matmul %14, %16, %cst_18 {dimension_numbers = #tpu.dot_dimension_numbers<[1], [0], [0], [1], [0, 0, 1, 1], [], []>} : vector<16x16xbf16>, vector<16x768xbf16>, vector<16x768xf32> -> vector<16x768xf32>
    %18 = arith.addf %12, %17 : vector<16x768xf32>
    %c1_19 = arith.constant 1 : index
    %c0_20 = arith.constant 0 : index
    %c0_21 = arith.constant 0 : index
    %19 = vector.load %arg4[%c1_19, %c0_20, %c0_21] : memref<9x16x16xbf16, #tpu.memory_space<vmem>>, vector<1x16x16xbf16>
    %20 = vector.shape_cast %19 : vector<1x16x16xbf16> to vector<16x16xbf16>
    %c0_22 = arith.constant 0 : index
    %c0_23 = arith.constant 0 : index
    %c1_24 = arith.constant 1 : index
    %21 = vector.load %arg2[%c0_22, %c0_23, %c1_24] : memref<1x16x896xbf16, #tpu.memory_space<vmem>>, vector<1x16x768xbf16>
    %22 = vector.shape_cast %21 : vector<1x16x768xbf16> to vector<16x768xbf16>
    %cst_25 = arith.constant dense<0.000000e+00> : vector<16x768xf32>
    %23 = tpu.matmul %20, %22, %cst_25 {dimension_numbers = #tpu.dot_dimension_numbers<[1], [0], [0], [1], [0, 0, 1, 1], [], []>} : vector<16x16xbf16>, vector<16x768xbf16>, vector<16x768xf32> -> vector<16x768xf32>
    %24 = arith.addf %18, %23 : vector<16x768xf32>
    %c2 = arith.constant 2 : index
    %c0_26 = arith.constant 0 : index
    %c0_27 = arith.constant 0 : index
    %25 = vector.load %arg3[%c2, %c0_26, %c0_27] : memref<9x16x16xbf16, #tpu.memory_space<vmem>>, vector<1x16x16xbf16>
    %26 = vector.shape_cast %25 : vector<1x16x16xbf16> to vector<16x16xbf16>
    %c0_28 = arith.constant 0 : index
    %c0_29 = arith.constant 0 : index
    %c2_30 = arith.constant 2 : index
    %27 = vector.load %arg1[%c0_28, %c0_29, %c2_30] : memref<1x16x896xbf16, #tpu.memory_space<vmem>>, vector<1x16x768xbf16>
    %28 = vector.shape_cast %27 : vector<1x16x768xbf16> to vector<16x768xbf16>
    %cst_31 = arith.constant dense<0.000000e+00> : vector<16x768xf32>
    %29 = tpu.matmul %26, %28, %cst_31 {dimension_numbers = #tpu.dot_dimension_numbers<[1], [0], [0], [1], [0, 0, 1, 1], [], []>} : vector<16x16xbf16>, vector<16x768xbf16>, vector<16x768xf32> -> vector<16x768xf32>
    %30 = arith.addf %24, %29 : vector<16x768xf32>
    %c2_32 = arith.constant 2 : index
    %c0_33 = arith.constant 0 : index
    %c0_34 = arith.constant 0 : index
    %31 = vector.load %arg4[%c2_32, %c0_33, %c0_34] : memref<9x16x16xbf16, #tpu.memory_space<vmem>>, vector<1x16x16xbf16>
    %32 = vector.shape_cast %31 : vector<1x16x16xbf16> to vector<16x16xbf16>
    %c0_35 = arith.constant 0 : index
    %c0_36 = arith.constant 0 : index
    %c2_37 = arith.constant 2 : index
    %33 = vector.load %arg2[%c0_35, %c0_36, %c2_37] : memref<1x16x896xbf16, #tpu.memory_space<vmem>>, vector<1x16x768xbf16>
    %34 = vector.shape_cast %33 : vector<1x16x768xbf16> to vector<16x768xbf16>
    %cst_38 = arith.constant dense<0.000000e+00> : vector<16x768xf32>
    %35 = tpu.matmul %32, %34, %cst_38 {dimension_numbers = #tpu.dot_dimension_numbers<[1], [0], [0], [1], [0, 0, 1, 1], [], []>} : vector<16x16xbf16>, vector<16x768xbf16>, vector<16x768xf32> -> vector<16x768xf32>
    %36 = arith.addf %30, %35 : vector<16x768xf32>
    %c3 = arith.constant 3 : index
    %c0_39 = arith.constant 0 : index
    %c0_40 = arith.constant 0 : index
    %37 = vector.load %arg3[%c3, %c0_39, %c0_40] : memref<9x16x16xbf16, #tpu.memory_space<vmem>>, vector<1x16x16xbf16>
    %38 = vector.shape_cast %37 : vector<1x16x16xbf16> to vector<16x16xbf16>
    %c0_41 = arith.constant 0 : index
    %c0_42 = arith.constant 0 : index
    %c24 = arith.constant 24 : index
    %39 = vector.load %arg1[%c0_41, %c0_42, %c24] : memref<1x16x896xbf16, #tpu.memory_space<vmem>>, vector<1x16x768xbf16>
    %40 = vector.shape_cast %39 : vector<1x16x768xbf16> to vector<16x768xbf16>
    %cst_43 = arith.constant dense<0.000000e+00> : vector<16x768xf32>
    %41 = tpu.matmul %38, %40, %cst_43 {dimension_numbers = #tpu.dot_dimension_numbers<[1], [0], [0], [1], [0, 0, 1, 1], [], []>} : vector<16x16xbf16>, vector<16x768xbf16>, vector<16x768xf32> -> vector<16x768xf32>
    %42 = arith.addf %36, %41 : vector<16x768xf32>
    %c3_44 = arith.constant 3 : index
    %c0_45 = arith.constant 0 : index
    %c0_46 = arith.constant 0 : index
    %43 = vector.load %arg4[%c3_44, %c0_45, %c0_46] : memref<9x16x16xbf16, #tpu.memory_space<vmem>>, vector<1x16x16xbf16>
    %44 = vector.shape_cast %43 : vector<1x16x16xbf16> to vector<16x16xbf16>
    %c0_47 = arith.constant 0 : index
    %c0_48 = arith.constant 0 : index
    %c24_49 = arith.constant 24 : index
    %45 = vector.load %arg2[%c0_47, %c0_48, %c24_49] : memref<1x16x896xbf16, #tpu.memory_space<vmem>>, vector<1x16x768xbf16>
    %46 = vector.shape_cast %45 : vector<1x16x768xbf16> to vector<16x768xbf16>
    %cst_50 = arith.constant dense<0.000000e+00> : vector<16x768xf32>
    %47 = tpu.matmul %44, %46, %cst_50 {dimension_numbers = #tpu.dot_dimension_numbers<[1], [0], [0], [1], [0, 0, 1, 1], [], []>} : vector<16x16xbf16>, vector<16x768xbf16>, vector<16x768xf32> -> vector<16x768xf32>
    %48 = arith.addf %42, %47 : vector<16x768xf32>
    %c4 = arith.constant 4 : index
    %c0_51 = arith.constant 0 : index
    %c0_52 = arith.constant 0 : index
    %49 = vector.load %arg3[%c4, %c0_51, %c0_52] : memref<9x16x16xbf16, #tpu.memory_space<vmem>>, vector<1x16x16xbf16>
    %50 = vector.shape_cast %49 : vector<1x16x16xbf16> to vector<16x16xbf16>
    %c0_53 = arith.constant 0 : index
    %c0_54 = arith.constant 0 : index
    %c25 = arith.constant 25 : index
    %51 = vector.load %arg1[%c0_53, %c0_54, %c25] : memref<1x16x896xbf16, #tpu.memory_space<vmem>>, vector<1x16x768xbf16>
    %52 = vector.shape_cast %51 : vector<1x16x768xbf16> to vector<16x768xbf16>
    %cst_55 = arith.constant dense<0.000000e+00> : vector<16x768xf32>
    %53 = tpu.matmul %50, %52, %cst_55 {dimension_numbers = #tpu.dot_dimension_numbers<[1], [0], [0], [1], [0, 0, 1, 1], [], []>} : vector<16x16xbf16>, vector<16x768xbf16>, vector<16x768xf32> -> vector<16x768xf32>
    %54 = arith.addf %48, %53 : vector<16x768xf32>
    %c4_56 = arith.constant 4 : index
    %c0_57 = arith.constant 0 : index
    %c0_58 = arith.constant 0 : index
    %55 = vector.load %arg4[%c4_56, %c0_57, %c0_58] : memref<9x16x16xbf16, #tpu.memory_space<vmem>>, vector<1x16x16xbf16>
    %56 = vector.shape_cast %55 : vector<1x16x16xbf16> to vector<16x16xbf16>
    %c0_59 = arith.constant 0 : index
    %c0_60 = arith.constant 0 : index
    %c25_61 = arith.constant 25 : index
    %57 = vector.load %arg2[%c0_59, %c0_60, %c25_61] : memref<1x16x896xbf16, #tpu.memory_space<vmem>>, vector<1x16x768xbf16>
    %58 = vector.shape_cast %57 : vector<1x16x768xbf16> to vector<16x768xbf16>
    %cst_62 = arith.constant dense<0.000000e+00> : vector<16x768xf32>
    %59 = tpu.matmul %56, %58, %cst_62 {dimension_numbers = #tpu.dot_dimension_numbers<[1], [0], [0], [1], [0, 0, 1, 1], [], []>} : vector<16x16xbf16>, vector<16x768xbf16>, vector<16x768xf32> -> vector<16x768xf32>
    %60 = arith.addf %54, %59 : vector<16x768xf32>
    %c5 = arith.constant 5 : index
    %c0_63 = arith.constant 0 : index
    %c0_64 = arith.constant 0 : index
    %61 = vector.load %arg3[%c5, %c0_63, %c0_64] : memref<9x16x16xbf16, #tpu.memory_space<vmem>>, vector<1x16x16xbf16>
    %62 = vector.shape_cast %61 : vector<1x16x16xbf16> to vector<16x16xbf16>
    %c0_65 = arith.constant 0 : index
    %c0_66 = arith.constant 0 : index
    %c26 = arith.constant 26 : index
    %63 = vector.load %arg1[%c0_65, %c0_66, %c26] : memref<1x16x896xbf16, #tpu.memory_space<vmem>>, vector<1x16x768xbf16>
    %64 = vector.shape_cast %63 : vector<1x16x768xbf16> to vector<16x768xbf16>
    %cst_67 = arith.constant dense<0.000000e+00> : vector<16x768xf32>
    %65 = tpu.matmul %62, %64, %cst_67 {dimension_numbers = #tpu.dot_dimension_numbers<[1], [0], [0], [1], [0, 0, 1, 1], [], []>} : vector<16x16xbf16>, vector<16x768xbf16>, vector<16x768xf32> -> vector<16x768xf32>
    %66 = arith.addf %60, %65 : vector<16x768xf32>
    %c5_68 = arith.constant 5 : index
    %c0_69 = arith.constant 0 : index
    %c0_70 = arith.constant 0 : index
    %67 = vector.load %arg4[%c5_68, %c0_69, %c0_70] : memref<9x16x16xbf16, #tpu.memory_space<vmem>>, vector<1x16x16xbf16>
    %68 = vector.shape_cast %67 : vector<1x16x16xbf16> to vector<16x16xbf16>
    %c0_71 = arith.constant 0 : index
    %c0_72 = arith.constant 0 : index
    %c26_73 = arith.constant 26 : index
    %69 = vector.load %arg2[%c0_71, %c0_72, %c26_73] : memref<1x16x896xbf16, #tpu.memory_space<vmem>>, vector<1x16x768xbf16>
    %70 = vector.shape_cast %69 : vector<1x16x768xbf16> to vector<16x768xbf16>
    %cst_74 = arith.constant dense<0.000000e+00> : vector<16x768xf32>
    %71 = tpu.matmul %68, %70, %cst_74 {dimension_numbers = #tpu.dot_dimension_numbers<[1], [0], [0], [1], [0, 0, 1, 1], [], []>} : vector<16x16xbf16>, vector<16x768xbf16>, vector<16x768xf32> -> vector<16x768xf32>
    %72 = arith.addf %66, %71 : vector<16x768xf32>
    %c6 = arith.constant 6 : index
    %c0_75 = arith.constant 0 : index
    %c0_76 = arith.constant 0 : index
    %73 = vector.load %arg3[%c6, %c0_75, %c0_76] : memref<9x16x16xbf16, #tpu.memory_space<vmem>>, vector<1x16x16xbf16>
    %74 = vector.shape_cast %73 : vector<1x16x16xbf16> to vector<16x16xbf16>
    %c0_77 = arith.constant 0 : index
    %c0_78 = arith.constant 0 : index
    %c48 = arith.constant 48 : index
    %75 = vector.load %arg1[%c0_77, %c0_78, %c48] : memref<1x16x896xbf16, #tpu.memory_space<vmem>>, vector<1x16x768xbf16>
    %76 = vector.shape_cast %75 : vector<1x16x768xbf16> to vector<16x768xbf16>
    %cst_79 = arith.constant dense<0.000000e+00> : vector<16x768xf32>
    %77 = tpu.matmul %74, %76, %cst_79 {dimension_numbers = #tpu.dot_dimension_numbers<[1], [0], [0], [1], [0, 0, 1, 1], [], []>} : vector<16x16xbf16>, vector<16x768xbf16>, vector<16x768xf32> -> vector<16x768xf32>
    %78 = arith.addf %72, %77 : vector<16x768xf32>
    %c6_80 = arith.constant 6 : index
    %c0_81 = arith.constant 0 : index
    %c0_82 = arith.constant 0 : index
    %79 = vector.load %arg4[%c6_80, %c0_81, %c0_82] : memref<9x16x16xbf16, #tpu.memory_space<vmem>>, vector<1x16x16xbf16>
    %80 = vector.shape_cast %79 : vector<1x16x16xbf16> to vector<16x16xbf16>
    %c0_83 = arith.constant 0 : index
    %c0_84 = arith.constant 0 : index
    %c48_85 = arith.constant 48 : index
    %81 = vector.load %arg2[%c0_83, %c0_84, %c48_85] : memref<1x16x896xbf16, #tpu.memory_space<vmem>>, vector<1x16x768xbf16>
    %82 = vector.shape_cast %81 : vector<1x16x768xbf16> to vector<16x768xbf16>
    %cst_86 = arith.constant dense<0.000000e+00> : vector<16x768xf32>
    %83 = tpu.matmul %80, %82, %cst_86 {dimension_numbers = #tpu.dot_dimension_numbers<[1], [0], [0], [1], [0, 0, 1, 1], [], []>} : vector<16x16xbf16>, vector<16x768xbf16>, vector<16x768xf32> -> vector<16x768xf32>
    %84 = arith.addf %78, %83 : vector<16x768xf32>
    %c7 = arith.constant 7 : index
    %c0_87 = arith.constant 0 : index
    %c0_88 = arith.constant 0 : index
    %85 = vector.load %arg3[%c7, %c0_87, %c0_88] : memref<9x16x16xbf16, #tpu.memory_space<vmem>>, vector<1x16x16xbf16>
    %86 = vector.shape_cast %85 : vector<1x16x16xbf16> to vector<16x16xbf16>
    %c0_89 = arith.constant 0 : index
    %c0_90 = arith.constant 0 : index
    %c49 = arith.constant 49 : index
    %87 = vector.load %arg1[%c0_89, %c0_90, %c49] : memref<1x16x896xbf16, #tpu.memory_space<vmem>>, vector<1x16x768xbf16>
    %88 = vector.shape_cast %87 : vector<1x16x768xbf16> to vector<16x768xbf16>
    %cst_91 = arith.constant dense<0.000000e+00> : vector<16x768xf32>
    %89 = tpu.matmul %86, %88, %cst_91 {dimension_numbers = #tpu.dot_dimension_numbers<[1], [0], [0], [1], [0, 0, 1, 1], [], []>} : vector<16x16xbf16>, vector<16x768xbf16>, vector<16x768xf32> -> vector<16x768xf32>
    %90 = arith.addf %84, %89 : vector<16x768xf32>
    %c7_92 = arith.constant 7 : index
    %c0_93 = arith.constant 0 : index
    %c0_94 = arith.constant 0 : index
    %91 = vector.load %arg4[%c7_92, %c0_93, %c0_94] : memref<9x16x16xbf16, #tpu.memory_space<vmem>>, vector<1x16x16xbf16>
    %92 = vector.shape_cast %91 : vector<1x16x16xbf16> to vector<16x16xbf16>
    %c0_95 = arith.constant 0 : index
    %c0_96 = arith.constant 0 : index
    %c49_97 = arith.constant 49 : index
    %93 = vector.load %arg2[%c0_95, %c0_96, %c49_97] : memref<1x16x896xbf16, #tpu.memory_space<vmem>>, vector<1x16x768xbf16>
    %94 = vector.shape_cast %93 : vector<1x16x768xbf16> to vector<16x768xbf16>
    %cst_98 = arith.constant dense<0.000000e+00> : vector<16x768xf32>
    %95 = tpu.matmul %92, %94, %cst_98 {dimension_numbers = #tpu.dot_dimension_numbers<[1], [0], [0], [1], [0, 0, 1, 1], [], []>} : vector<16x16xbf16>, vector<16x768xbf16>, vector<16x768xf32> -> vector<16x768xf32>
    %96 = arith.addf %90, %95 : vector<16x768xf32>
    %c8 = arith.constant 8 : index
    %c0_99 = arith.constant 0 : index
    %c0_100 = arith.constant 0 : index
    %97 = vector.load %arg3[%c8, %c0_99, %c0_100] : memref<9x16x16xbf16, #tpu.memory_space<vmem>>, vector<1x16x16xbf16>
    %98 = vector.shape_cast %97 : vector<1x16x16xbf16> to vector<16x16xbf16>
    %c0_101 = arith.constant 0 : index
    %c0_102 = arith.constant 0 : index
    %c50 = arith.constant 50 : index
    %99 = vector.load %arg1[%c0_101, %c0_102, %c50] : memref<1x16x896xbf16, #tpu.memory_space<vmem>>, vector<1x16x768xbf16>
    %100 = vector.shape_cast %99 : vector<1x16x768xbf16> to vector<16x768xbf16>
    %cst_103 = arith.constant dense<0.000000e+00> : vector<16x768xf32>
    %101 = tpu.matmul %98, %100, %cst_103 {dimension_numbers = #tpu.dot_dimension_numbers<[1], [0], [0], [1], [0, 0, 1, 1], [], []>} : vector<16x16xbf16>, vector<16x768xbf16>, vector<16x768xf32> -> vector<16x768xf32>
    %102 = arith.addf %96, %101 : vector<16x768xf32>
    %c8_104 = arith.constant 8 : index
    %c0_105 = arith.constant 0 : index
    %c0_106 = arith.constant 0 : index
    %103 = vector.load %arg4[%c8_104, %c0_105, %c0_106] : memref<9x16x16xbf16, #tpu.memory_space<vmem>>, vector<1x16x16xbf16>
    %104 = vector.shape_cast %103 : vector<1x16x16xbf16> to vector<16x16xbf16>
    %c0_107 = arith.constant 0 : index
    %c0_108 = arith.constant 0 : index
    %c50_109 = arith.constant 50 : index
    %105 = vector.load %arg2[%c0_107, %c0_108, %c50_109] : memref<1x16x896xbf16, #tpu.memory_space<vmem>>, vector<1x16x768xbf16>
    %106 = vector.shape_cast %105 : vector<1x16x768xbf16> to vector<16x768xbf16>
    %cst_110 = arith.constant dense<0.000000e+00> : vector<16x768xf32>
    %107 = tpu.matmul %104, %106, %cst_110 {dimension_numbers = #tpu.dot_dimension_numbers<[1], [0], [0], [1], [0, 0, 1, 1], [], []>} : vector<16x16xbf16>, vector<16x768xbf16>, vector<16x768xf32> -> vector<16x768xf32>
    %108 = arith.addf %102, %107 : vector<16x768xf32>
    %c0_111 = arith.constant 0 : index
    %c0_112 = arith.constant 0 : index
    %109 = vector.load %arg5[%c0_111, %c0_112] : memref<16x1xf32, #tpu.memory_space<vmem>>, vector<16x1xf32>
    %110 = vector.broadcast %109 : vector<16x1xf32> to vector<16x768xf32>
    %111 = arith.addf %108, %110 : vector<16x768xf32>
    %cst_113 = arith.constant 0.000000e+00 : f32
    %112 = vector.broadcast %cst_113 : f32 to vector<16x768xf32>
    %113 = arith.maximumf %111, %112 : vector<16x768xf32>
    %114 = arith.truncf %113 : vector<16x768xf32> to vector<16x768xbf16>
    %c0_114 = arith.constant 0 : index
    %c0_115 = arith.constant 0 : index
    %115 = vector.load %arg9[%c0_114, %c0_115] : memref<16x768xbf16, #tpu.memory_space<vmem>>, vector<16x768xbf16>
    tpu.vector_store %arg9[%c0_114, %c0_115], %114 {strides = array<i32>} : memref<16x768xbf16, #tpu.memory_space<vmem>>, vector<16x768xbf16>,
    %cst_116 = arith.constant 0.000000e+00 : f32
    %116 = vector.broadcast %cst_116 : f32 to vector<16x640xf32>
    %c0_117 = arith.constant 0 : index
    %c0_118 = arith.constant 0 : index
    %c0_119 = arith.constant 0 : index
    %117 = vector.load %arg6[%c0_117, %c0_118, %c0_119] : memref<9x16x16xbf16, #tpu.memory_space<vmem>>, vector<1x16x16xbf16>
    %118 = vector.shape_cast %117 : vector<1x16x16xbf16> to vector<16x16xbf16>
    %c0_120 = arith.constant 0 : index
    %c0_121 = arith.constant 0 : index
    %119 = vector.load %arg9[%c0_120, %c0_121] : memref<16x768xbf16, #tpu.memory_space<vmem>>, vector<16x640xbf16>
    %cst_122 = arith.constant dense<0.000000e+00> : vector<16x640xf32>
    %120 = tpu.matmul %118, %119, %cst_122 {dimension_numbers = #tpu.dot_dimension_numbers<[1], [0], [0], [1], [0, 0, 1, 1], [], []>} : vector<16x16xbf16>, vector<16x640xbf16>, vector<16x640xf32> -> vector<16x640xf32>
    %121 = arith.addf %116, %120 : vector<16x640xf32>
    %c1_123 = arith.constant 1 : index
    %c0_124 = arith.constant 0 : index
    %c0_125 = arith.constant 0 : index
    %122 = vector.load %arg6[%c1_123, %c0_124, %c0_125] : memref<9x16x16xbf16, #tpu.memory_space<vmem>>, vector<1x16x16xbf16>
    %123 = vector.shape_cast %122 : vector<1x16x16xbf16> to vector<16x16xbf16>
    %c0_126 = arith.constant 0 : index
    %c1_127 = arith.constant 1 : index
    %124 = vector.load %arg9[%c0_126, %c1_127] : memref<16x768xbf16, #tpu.memory_space<vmem>>, vector<16x640xbf16>
    %cst_128 = arith.constant dense<0.000000e+00> : vector<16x640xf32>
    %125 = tpu.matmul %123, %124, %cst_128 {dimension_numbers = #tpu.dot_dimension_numbers<[1], [0], [0], [1], [0, 0, 1, 1], [], []>} : vector<16x16xbf16>, vector<16x640xbf16>, vector<16x640xf32> -> vector<16x640xf32>
    %126 = arith.addf %121, %125 : vector<16x640xf32>
    %c2_129 = arith.constant 2 : index
    %c0_130 = arith.constant 0 : index
    %c0_131 = arith.constant 0 : index
    %127 = vector.load %arg6[%c2_129, %c0_130, %c0_131] : memref<9x16x16xbf16, #tpu.memory_space<vmem>>, vector<1x16x16xbf16>
    %128 = vector.shape_cast %127 : vector<1x16x16xbf16> to vector<16x16xbf16>
    %c0_132 = arith.constant 0 : index
    %c2_133 = arith.constant 2 : index
    %129 = vector.load %arg9[%c0_132, %c2_133] : memref<16x768xbf16, #tpu.memory_space<vmem>>, vector<16x640xbf16>
    %cst_134 = arith.constant dense<0.000000e+00> : vector<16x640xf32>
    %130 = tpu.matmul %128, %129, %cst_134 {dimension_numbers = #tpu.dot_dimension_numbers<[1], [0], [0], [1], [0, 0, 1, 1], [], []>} : vector<16x16xbf16>, vector<16x640xbf16>, vector<16x640xf32> -> vector<16x640xf32>
    %131 = arith.addf %126, %130 : vector<16x640xf32>
    %c3_135 = arith.constant 3 : index
    %c0_136 = arith.constant 0 : index
    %c0_137 = arith.constant 0 : index
    %132 = vector.load %arg6[%c3_135, %c0_136, %c0_137] : memref<9x16x16xbf16, #tpu.memory_space<vmem>>, vector<1x16x16xbf16>
    %133 = vector.shape_cast %132 : vector<1x16x16xbf16> to vector<16x16xbf16>
    %c0_138 = arith.constant 0 : index
    %c24_139 = arith.constant 24 : index
    %134 = vector.load %arg9[%c0_138, %c24_139] : memref<16x768xbf16, #tpu.memory_space<vmem>>, vector<16x640xbf16>
    %cst_140 = arith.constant dense<0.000000e+00> : vector<16x640xf32>
    %135 = tpu.matmul %133, %134, %cst_140 {dimension_numbers = #tpu.dot_dimension_numbers<[1], [0], [0], [1], [0, 0, 1, 1], [], []>} : vector<16x16xbf16>, vector<16x640xbf16>, vector<16x640xf32> -> vector<16x640xf32>
    %136 = arith.addf %131, %135 : vector<16x640xf32>
    %c4_141 = arith.constant 4 : index
    %c0_142 = arith.constant 0 : index
    %c0_143 = arith.constant 0 : index
    %137 = vector.load %arg6[%c4_141, %c0_142, %c0_143] : memref<9x16x16xbf16, #tpu.memory_space<vmem>>, vector<1x16x16xbf16>
    %138 = vector.shape_cast %137 : vector<1x16x16xbf16> to vector<16x16xbf16>
    %c0_144 = arith.constant 0 : index
    %c25_145 = arith.constant 25 : index
    %139 = vector.load %arg9[%c0_144, %c25_145] : memref<16x768xbf16, #tpu.memory_space<vmem>>, vector<16x640xbf16>
    %cst_146 = arith.constant dense<0.000000e+00> : vector<16x640xf32>
    %140 = tpu.matmul %138, %139, %cst_146 {dimension_numbers = #tpu.dot_dimension_numbers<[1], [0], [0], [1], [0, 0, 1, 1], [], []>} : vector<16x16xbf16>, vector<16x640xbf16>, vector<16x640xf32> -> vector<16x640xf32>
    %141 = arith.addf %136, %140 : vector<16x640xf32>
    %c5_147 = arith.constant 5 : index
    %c0_148 = arith.constant 0 : index
    %c0_149 = arith.constant 0 : index
    %142 = vector.load %arg6[%c5_147, %c0_148, %c0_149] : memref<9x16x16xbf16, #tpu.memory_space<vmem>>, vector<1x16x16xbf16>
    %143 = vector.shape_cast %142 : vector<1x16x16xbf16> to vector<16x16xbf16>
    %c0_150 = arith.constant 0 : index
    %c26_151 = arith.constant 26 : index
    %144 = vector.load %arg9[%c0_150, %c26_151] : memref<16x768xbf16, #tpu.memory_space<vmem>>, vector<16x640xbf16>
    %cst_152 = arith.constant dense<0.000000e+00> : vector<16x640xf32>
    %145 = tpu.matmul %143, %144, %cst_152 {dimension_numbers = #tpu.dot_dimension_numbers<[1], [0], [0], [1], [0, 0, 1, 1], [], []>} : vector<16x16xbf16>, vector<16x640xbf16>, vector<16x640xf32> -> vector<16x640xf32>
    %146 = arith.addf %141, %145 : vector<16x640xf32>
    %c6_153 = arith.constant 6 : index
    %c0_154 = arith.constant 0 : index
    %c0_155 = arith.constant 0 : index
    %147 = vector.load %arg6[%c6_153, %c0_154, %c0_155] : memref<9x16x16xbf16, #tpu.memory_space<vmem>>, vector<1x16x16xbf16>
    %148 = vector.shape_cast %147 : vector<1x16x16xbf16> to vector<16x16xbf16>
    %c0_156 = arith.constant 0 : index
    %c48_157 = arith.constant 48 : index
    %149 = vector.load %arg9[%c0_156, %c48_157] : memref<16x768xbf16, #tpu.memory_space<vmem>>, vector<16x640xbf16>
    %cst_158 = arith.constant dense<0.000000e+00> : vector<16x640xf32>
    %150 = tpu.matmul %148, %149, %cst_158 {dimension_numbers = #tpu.dot_dimension_numbers<[1], [0], [0], [1], [0, 0, 1, 1], [], []>} : vector<16x16xbf16>, vector<16x640xbf16>, vector<16x640xf32> -> vector<16x640xf32>
    %151 = arith.addf %146, %150 : vector<16x640xf32>
    %c7_159 = arith.constant 7 : index
    %c0_160 = arith.constant 0 : index
    %c0_161 = arith.constant 0 : index
    %152 = vector.load %arg6[%c7_159, %c0_160, %c0_161] : memref<9x16x16xbf16, #tpu.memory_space<vmem>>, vector<1x16x16xbf16>
    %153 = vector.shape_cast %152 : vector<1x16x16xbf16> to vector<16x16xbf16>
    %c0_162 = arith.constant 0 : index
    %c49_163 = arith.constant 49 : index
    %154 = vector.load %arg9[%c0_162, %c49_163] : memref<16x768xbf16, #tpu.memory_space<vmem>>, vector<16x640xbf16>
    %cst_164 = arith.constant dense<0.000000e+00> : vector<16x640xf32>
    %155 = tpu.matmul %153, %154, %cst_164 {dimension_numbers = #tpu.dot_dimension_numbers<[1], [0], [0], [1], [0, 0, 1, 1], [], []>} : vector<16x16xbf16>, vector<16x640xbf16>, vector<16x640xf32> -> vector<16x640xf32>
    %156 = arith.addf %151, %155 : vector<16x640xf32>
    %c8_165 = arith.constant 8 : index
    %c0_166 = arith.constant 0 : index
    %c0_167 = arith.constant 0 : index
    %157 = vector.load %arg6[%c8_165, %c0_166, %c0_167] : memref<9x16x16xbf16, #tpu.memory_space<vmem>>, vector<1x16x16xbf16>
    %158 = vector.shape_cast %157 : vector<1x16x16xbf16> to vector<16x16xbf16>
    %c0_168 = arith.constant 0 : index
    %c50_169 = arith.constant 50 : index
    %159 = vector.load %arg9[%c0_168, %c50_169] : memref<16x768xbf16, #tpu.memory_space<vmem>>, vector<16x640xbf16>
    %cst_170 = arith.constant dense<0.000000e+00> : vector<16x640xf32>
    %160 = tpu.matmul %158, %159, %cst_170 {dimension_numbers = #tpu.dot_dimension_numbers<[1], [0], [0], [1], [0, 0, 1, 1], [], []>} : vector<16x16xbf16>, vector<16x640xbf16>, vector<16x640xf32> -> vector<16x640xf32>
    %161 = arith.addf %156, %160 : vector<16x640xf32>
    %c0_171 = arith.constant 0 : index
    %c0_172 = arith.constant 0 : index
    %162 = vector.load %arg7[%c0_171, %c0_172] : memref<16x1xf32, #tpu.memory_space<vmem>>, vector<16x1xf32>
    %163 = vector.broadcast %162 : vector<16x1xf32> to vector<16x640xf32>
    %164 = arith.addf %161, %163 : vector<16x640xf32>
    %c0_173 = arith.constant 0 : index
    %c0_174 = arith.constant 0 : index
    %c0_175 = arith.constant 0 : index
    %165 = vector.load %arg8[%c0_173, %c0_174, %c0_175] : memref<1x16x640xf32, #tpu.memory_space<vmem>>, vector<1x16x640xf32>
    %166 = vector.shape_cast %165 : vector<1x16x640xf32> to vector<16x640xf32>
    %167 = vector.shape_cast %164 : vector<16x640xf32> to vector<1x16x640xf32>
    tpu.vector_store %arg8[%c0_173, %c0_174, %c0_175], %167 {strides = array<i32>} : memref<1x16x640xf32, #tpu.memory_space<vmem>>, vector<1x16x640xf32>,
    return
  }
  func.func @transform_0(%arg0: i32) -> (i32, i32, i32) {
    %c0_i32 = arith.constant 0 : i32
    %c0_i32_0 = arith.constant 0 : i32
    %c0_i32_1 = arith.constant 0 : i32
    return %arg0, %c0_i32, %c0_i32_0 : i32, i32, i32
  }
  func.func @transform_1(%arg0: i32) -> (i32, i32, i32) {
    %c0_i32 = arith.constant 0 : i32
    %c0_i32_0 = arith.constant 0 : i32
    %c0_i32_1 = arith.constant 0 : i32
    return %arg0, %c0_i32, %c0_i32_0 : i32, i32, i32
  }
  func.func @transform_2(%arg0: i32) -> (i32, i32, i32) {
    %c0_i32 = arith.constant 0 : i32
    %c0_i32_0 = arith.constant 0 : i32
    %c0_i32_1 = arith.constant 0 : i32
    %c0_i32_2 = arith.constant 0 : i32
    return %c0_i32, %c0_i32_0, %c0_i32_1 : i32, i32, i32
  }
  func.func @transform_3(%arg0: i32) -> (i32, i32, i32) {
    %c0_i32 = arith.constant 0 : i32
    %c0_i32_0 = arith.constant 0 : i32
    %c0_i32_1 = arith.constant 0 : i32
    %c0_i32_2 = arith.constant 0 : i32
    return %c0_i32, %c0_i32_0, %c0_i32_1 : i32, i32, i32
  }
  func.func @transform_4(%arg0: i32) -> (i32, i32) {
    %c0_i32 = arith.constant 0 : i32
    %c0_i32_0 = arith.constant 0 : i32
    %c0_i32_1 = arith.constant 0 : i32
    return %c0_i32, %c0_i32_0 : i32, i32
  }
  func.func @transform_5(%arg0: i32) -> (i32, i32, i32) {
    %c0_i32 = arith.constant 0 : i32
    %c0_i32_0 = arith.constant 0 : i32
    %c0_i32_1 = arith.constant 0 : i32
    %c0_i32_2 = arith.constant 0 : i32
    return %c0_i32, %c0_i32_0, %c0_i32_1 : i32, i32, i32
  }
  func.func @transform_6(%arg0: i32) -> (i32, i32) {
    %c0_i32 = arith.constant 0 : i32
    %c0_i32_0 = arith.constant 0 : i32
    %c0_i32_1 = arith.constant 0 : i32
    return %c0_i32, %c0_i32_0 : i32, i32
  }
  func.func @transform_7(%arg0: i32) -> (i32, i32, i32) {
    %c0_i32 = arith.constant 0 : i32
    %c0_i32_0 = arith.constant 0 : i32
    %c0_i32_1 = arith.constant 0 : i32
    return %arg0, %c0_i32, %c0_i32_0 : i32, i32, i32
  }
}

</mosaic_0001>

<bundles_post_ra>
// kernel: decoder_forward.4
= control target key start
LH: loop header
LB: loop body
LE: loop exit
PB: predicated region body
PF: predicated region fallthrough
CT: control target
= control target key end

     0   :  { %s698_s12 = smov 0   ;;  %s809_s0 = inlined_call_operand.vmem [shape: bf16[2,64,128], index: 0, kind: input, shape index: {}]   ;;  %s810_s1 = inlined_call_operand.vmem [shape: bf16[128,64], index: 1, kind: input, shape index: {}]   ;;  %s811_s2 = inlined_call_operand.vmem [shape: f32[128,1], index: 2, kind: input, shape index: {}]   ;;  %s812_s3 = inlined_call_operand.vmem [shape: bf16[2,128,128], index: 3, kind: output, shape index: {}]  }
   0x1 LB: > { %s517_s13 = sadd.s32 4294967295, %s675_s12   ;;  %p521_p0 = scmp.ge.s32.totalorder %s675_s12, 1  ;;  %s675_s12 = sphi %s698_s12, %s13_s12  }
   0x2   : > { %p137_p1 = scmp.lt.s32.totalorder %s675_s12, 3 }
   0x4   : > { %p138_p2 = pnand %p521_p0, %p137_p1 }
   0x5   : > { %p161_p3 = scmp.lt.s32.totalorder (!%p138_p2), %s517_s13, 1 }
   0x6   : > { %141 = sbr.rel (%p138_p2) target bundleno = 194 (0xc2), region = 32 }
   0xb   : > { %v198_v0 = vld [vmem:[%s811_s2 + $0x10] sm:$0xff]  ;;  %v196_v1 = vld [vmem:[%s811_s2] sm:$0xff]  ;;  %v677_v2 = vmov 0   ;;  %s814_s13 = smov (!%p161_p3, %s517_s13), 1  ;;  %v199_v5 = vld [vmem:[%s811_s2 + $0x18] sm:$0xff]  ;;  %vm356_vm0 = vcmask 523264  }
   0xc   : > { %667 = vset.pattern.permute.xlu1 %v677_v2  ;;  %666 = vset.pattern.permute.xlu0 %v677_v2  ;;  %v200_v3 = vld [vmem:[%s811_s2 + $0x20] sm:$0xff]  ;;  %s584_s20 = sshll.u32 %s814_s13, 5  ;;  %v197_v6 = vld [vmem:[%s811_s2 + $0x8] sm:$0xff]  ;;  %v203_v10 = vld [vmem:[%s811_s2 + $0x38] sm:$0xff]  ;;  %s585_s16 = sshll.u32 %s814_s13, 6 }
   0xd   : > { %224 = vperm.xlu1 %667, %v198_v0   ;;  %214 = vperm.xlu0 %666, %v196_v1   ;;  %s165_s23 = scalar_lea.vmem %s809_s0, %s584_s20  ;;  %v201_v8 = vld [vmem:[%s811_s2 + $0x28] sm:$0xff]  ;;  %v202_v11 = vld [vmem:[%s811_s2 + $0x30] sm:$0xff]  ;;  %v586_v13 = vld [vmem:[%s810_s1] sm:$0xff]  ;;  %s796_s19 = scalar_lea.vmem %s812_s3, %s585_s16 }
   0xe   : > { %668 = vset.pattern.permute.xlu2 %v677_v2  ;;  %v597_v4 = vld [vmem:[%s165_s23 + $0x18] sm:$0xff]  ;;  %v596_v7 = vld [vmem:[%s165_s23 + $0x10] sm:$0xff]  ;;  %v595_v9 = vld [vmem:[%s165_s23 + $0x8] sm:$0xff] }
   0xf   : > { %234 = vperm.xlu2 %668, %v200_v3   ;;  %385 = vmatpush.bf16.msra.mxu0 %v597_v4  ;;  %v594_v12 = vld [vmem:[%s165_s23] sm:$0xff]  ;;  %v588_v14 = vld [vmem:[%s810_s1 + $0x10] sm:$0xff]  ;;  %v205_v19 = vld [vmem:[%s811_s2 + $0x48] sm:$0xff] }
  0x10   : > { %645 = vmatpush.bf16.msra.mxu1 %v597_v4  ;;  %646 = vmatpush.bf16.msra.mxu2 %v597_v4  ;;  %v204_v15 = vld [vmem:[%s811_s2 + $0x40] sm:$0xff]  ;;  %v592_v17 = vld [vmem:[%s810_s1 + $0x30] sm:$0xff]  ;;  %v207_v20 = vld [vmem:[%s811_s2 + $0x58] sm:$0xff] }
  0x11   : > { %647 = vmatpush.bf16.msra.mxu3 %v597_v4  ;;  %v590_v16 = vld [vmem:[%s810_s1 + $0x20] sm:$0xff]  ;;  %v206_v18 = vld [vmem:[%s811_s2 + $0x50] sm:$0xff]  ;;  %v209_v21 = vld [vmem:[%s811_s2 + $0x68] sm:$0xff] }
  0x12   : > { %v208_v22 = vld [vmem:[%s811_s2 + $0x60] sm:$0xff]  ;;  %v587_v23 = vld [vmem:[%s810_s1 + $0x8] sm:$0xff]  ;;  %v589_v24 = vld [vmem:[%s810_s1 + $0x18] sm:$0xff] }
  0x13   : > { %386 = vmatpush.bf16.msra.mxu0 %v596_v7  ;;  %v210_v25 = vld [vmem:[%s811_s2 + $0x70] sm:$0xff]  ;;  %v591_v26 = vld [vmem:[%s810_s1 + $0x28] sm:$0xff]  ;;  %v593_v27 = vld [vmem:[%s810_s1 + $0x38] sm:$0xff] }
  0x14   : > { %648 = vmatpush.bf16.msra.mxu1 %v596_v7  ;;  %649 = vmatpush.bf16.msra.mxu2 %v596_v7  ;;  %v211_v28 = vld [vmem:[%s811_s2 + $0x78] sm:$0xff] }
  0x15   : > { %229 = vperm.xlu1 %667, %v199_v5   ;;  %219 = vperm.xlu0 %666, %v197_v6  }
  0x16   : > { %650 = vmatpush.bf16.msra.mxu3 %v596_v7 }
  0x17   : > { %239 = vperm.xlu2 %668, %v201_v8   ;;  %387 = vmatpush.bf16.msra.mxu0 %v595_v9 }
  0x18   : > { %651 = vmatpush.bf16.msra.mxu1 %v595_v9  ;;  %652 = vmatpush.bf16.msra.mxu2 %v595_v9 }
  0x1a   : > { %653 = vmatpush.bf16.msra.mxu3 %v595_v9 }
  0x1b   : > { %388 = vmatpush.bf16.msra.mxu0 %v594_v12 }
  0x1c   : > { %654 = vmatpush.bf16.msra.mxu1 %v594_v12  ;;  %655 = vmatpush.bf16.msra.mxu2 %v594_v12 }
  0x1d   : > { %249 = vperm.xlu1 %667, %v203_v10   ;;  %244 = vperm.xlu0 %666, %v202_v11  }
  0x1e   : > { %656 = vmatpush.bf16.msra.mxu3 %v594_v12  ;;  %574 = vmatmul.msk.bf16.vlgmr.msra.gmra.mxu0 %vm356_vm0, %v586_v13 }
  0x1f   : > { %254 = vperm.xlu2 %668, %v204_v15   ;;  %576 = vmatmul.msk.bf16.vlgmr.msra.gmra.mxu1 %vm356_vm0, %v588_v14 }
  0x20   : > { %578 = vmatmul.msk.bf16.vlgmr.msra.gmra.mxu2 %vm356_vm0, %v590_v16 }
  0x21   : > { %580 = vmatmul.msk.bf16.vlgmr.msra.gmra.mxu3 %vm356_vm0, %v592_v17 }
  0x25   : > { %264 = vperm.xlu1 %667, %v206_v18   ;;  %259 = vperm.xlu0 %666, %v205_v19  }
  0x27   : > { %269 = vperm.xlu2 %668, %v207_v20  }
  0x2d   : > { %279 = vperm.xlu1 %667, %v209_v21   ;;  %274 = vperm.xlu0 %666, %v208_v22  }
  0x2e   : > { %575 = vmatmul.msk.bf16.gmra.mxu0 %vm356_vm0, %v587_v23 }
  0x2f   : > { %284 = vperm.xlu2 %668, %v210_v25   ;;  %577 = vmatmul.msk.bf16.gmra.mxu1 %vm356_vm0, %v589_v24 }
  0x30   : > { %579 = vmatmul.msk.bf16.gmra.mxu2 %vm356_vm0, %v591_v26 }
  0x31   : > { %581 = vmatmul.msk.bf16.gmra.mxu3 %vm356_vm0, %v593_v27 }
  0x35   : > { %289 = vperm.xlu0 %666, %v211_v28  }
  0x69   : > { %v235_v33 = vpop.permute.xlu2 %234 }
  0x71   : > { %v240_v36 = vpop.permute.xlu2 %239 }
  0x79   : > { %v255_v45 = vpop.permute.xlu2 %254 }
  0x7f   : > { %v225_v29 = vpop.permute.xlu1 %224  ;;  %v215_v30 = vpop.permute.xlu0 %214 }
  0x81   : > { %v270_v0 = vpop.permute.xlu2 %269 }
  0x87   : > { %v230_v31 = vpop.permute.xlu1 %229  ;;  %v220_v32 = vpop.permute.xlu0 %219 }
  0x89   : > { %v285_v11 = vpop.permute.xlu2 %284 }
  0x8f   : > { %v250_v34 = vpop.permute.xlu1 %249  ;;  %v245_v35 = vpop.permute.xlu0 %244 }
  0x97   : > { %v265_v39 = vpop.permute.xlu1 %264  ;;  %v260_v40 = vpop.permute.xlu0 %259 }
  0x9b   : > { %v390_v37 = vpop.f32.mrf.mxu0 }
  0x9c   : > { %v400_v38 = vpop.f32.mrf.mxu1  ;;  %v391_v46 = vadd.f32 %v390_v37, %v215_v30 }
  0x9d   : > { %v401_v47 = vadd.f32 %v400_v38, %v235_v33 }
  0x9f   : > { %v280_v52 = vpop.permute.xlu1 %279  ;;  %v275_v53 = vpop.permute.xlu0 %274 }
  0xa3   : > { %v410_v41 = vpop.f32.mrf.mxu2  ;;  %v392_v43 = vpop.f32.mrf.mxu0 }
  0xa4   : > { %v420_v42 = vpop.f32.mrf.mxu3  ;;  %v402_v44 = vpop.f32.mrf.mxu1  ;;  %v393_v48 = vadd.f32 %v392_v43, %v220_v32  ;;  %v411_v56 = vadd.f32 %v410_v41, %v255_v45 }
  0xa5   : > { %v403_v49 = vadd.f32 %v402_v44, %v240_v36  ;;  %v421_v57 = vadd.f32 %v420_v42, %v275_v53 }
  0xa6   : > { %v601_v50 = vpack.c.bf16 %v393_v48, %v391_v46 }
  0xa7   : > { %v611_v51 = vpack.c.bf16 %v403_v49, %v401_v47  ;;  %v290_v12 = vpop.permute.xlu0 %289 }
  0xa8   : > { %602 = vst [vmem:[%s796_s19] sm:$0xff] %v601_v50  }
  0xa9   : > { %639 = vst [vmem:[%s796_s19 + $0x10] sm:$0xff] %v611_v51  }
  0xab   : > { %v412_v54 = vpop.f32.mrf.mxu2  ;;  %v395_v60 = vpop.f32.mrf.mxu0 }
  0xac   : > { %v422_v55 = vpop.f32.mrf.mxu3  ;;  %v413_v58 = vadd.f32 %v412_v54, %v260_v40  ;;  %v405_v61 = vpop.f32.mrf.mxu1  ;;  %v396_v5 = vadd.f32 %v395_v60, %v225_v29 }
  0xad   : > { %v423_v59 = vadd.f32 %v422_v55, %v280_v52  ;;  %v406_v6 = vadd.f32 %v405_v61, %v245_v35 }
  0xae   : > { %v621_v62 = vpack.c.bf16 %v413_v58, %v411_v56 }
  0xaf   : > { %v631_v63 = vpack.c.bf16 %v423_v59, %v421_v57 }
  0xb0   : > { %641 = vst [vmem:[%s796_s19 + $0x20] sm:$0xff] %v621_v62  }
  0xb1   : > { %643 = vst [vmem:[%s796_s19 + $0x30] sm:$0xff] %v631_v63  }
  0xb3   : > { %v415_v1 = vpop.f32.mrf.mxu2  ;;  %v397_v3 = vpop.f32.mrf.mxu0 }
  0xb4   : > { %v425_v2 = vpop.f32.mrf.mxu3  ;;  %v407_v4 = vpop.f32.mrf.mxu1  ;;  %v398_v7 = vadd.f32 %v397_v3, %v230_v31  ;;  %v416_v15 = vadd.f32 %v415_v1, %v265_v39 }
  0xb5   : > { %v408_v8 = vadd.f32 %v407_v4, %v250_v34  ;;  %v426_v16 = vadd.f32 %v425_v2, %v285_v11 }
  0xb6   : > { %v606_v9 = vpack.c.bf16 %v398_v7, %v396_v5 }
  0xb7   : > { %v616_v10 = vpack.c.bf16 %v408_v8, %v406_v6 }
  0xb8   : > { %638 = vst [vmem:[%s796_s19 + $0x8] sm:$0xff] %v606_v9  }
  0xb9   : > { %640 = vst [vmem:[%s796_s19 + $0x18] sm:$0xff] %v616_v10  }
  0xbb   : > { %v417_v13 = vpop.f32.mrf.mxu2 }
  0xbc   : > { %v427_v14 = vpop.f32.mrf.mxu3  ;;  %v418_v17 = vadd.f32 %v417_v13, %v270_v0 }
  0xbd   : > { %v428_v18 = vadd.f32 %v427_v14, %v290_v12 }
  0xbe   : > { %v626_v19 = vpack.c.bf16 %v418_v17, %v416_v15 }
  0xbf   : > { %v636_v20 = vpack.c.bf16 %v428_v18, %v426_v16 }
  0xc0   : > { %642 = vst [vmem:[%s796_s19 + $0x28] sm:$0xff] %v626_v19  }
  0xc1   : > { %644 = vst [vmem:[%s796_s19 + $0x38] sm:$0xff] %v636_v20  }
  0xc2 PF: > { %s13_s12 = sadd.s32 1, %s675_s12  }
  0xc3   : > { %p10_p4 = scmp.ge.s32.totalorder %s13_s12, 4  }
  0xc5   :  { %12 = sbr.rel (!%p10_p4) target bundleno = 1 (0x1), region = 62 }

// kernel: decoder_forward.6
= control target key start
LH: loop header
LB: loop body
LE: loop exit
PB: predicated region body
PF: predicated region fallthrough
CT: control target
= control target key end

     0   :  { %s520_s12 = smov 0   ;;  %s595_s0 = inlined_call_operand.vmem [shape: bf16[2,32,256], index: 0, kind: input, shape index: {}]   ;;  %s596_s1 = inlined_call_operand.vmem [shape: bf16[64,32], index: 1, kind: input, shape index: {}]   ;;  %s597_s2 = inlined_call_operand.vmem [shape: f32[64,1], index: 2, kind: input, shape index: {}]   ;;  %s598_s3 = inlined_call_operand.vmem [shape: bf16[2,64,256], index: 3, kind: output, shape index: {}]  }
   0x1 LB: > { %s414_s13 = sadd.s32 4294967295, %s497_s12   ;;  %p418_p0 = scmp.ge.s32.totalorder %s497_s12, 1  ;;  %s497_s12 = sphi %s520_s12, %s13_s12  }
   0x2   : > { %p137_p1 = scmp.lt.s32.totalorder %s497_s12, 3 }
   0x4   : > { %p138_p2 = pnand %p418_p0, %p137_p1 }
   0x5   : > { %p161_p3 = scmp.lt.s32.totalorder (!%p138_p2), %s414_s13, 1 }
   0x6   : > { %141 = sbr.rel (%p138_p2) target bundleno = 188 (0xbc), region = 32 }
   0xb   : > { %v186_v0 = vld [vmem:[%s597_s2 + $0x10] sm:$0xff]  ;;  %v499_v1 = vmov 0   ;;  %v184_v2 = vld [vmem:[%s597_s2] sm:$0xff]  ;;  %s600_s13 = smov (!%p161_p3, %s414_s13), 1  ;;  %v187_v7 = vld [vmem:[%s597_s2 + $0x18] sm:$0xff]  ;;  %vm272_vm0 = vcmask 261120  }
   0xc   : > { %489 = vset.pattern.permute.xlu1 %v499_v1  ;;  %488 = vset.pattern.permute.xlu0 %v499_v1  ;;  %v188_v3 = vld [vmem:[%s597_s2 + $0x20] sm:$0xff]  ;;  %s465_s20 = sshll.u32 %s600_s13, 5  ;;  %v185_v15 = vld [vmem:[%s597_s2 + $0x8] sm:$0xff]  ;;  %v469_v20 = vld [vmem:[%s596_s1 + $0x10] sm:$0xff]  ;;  %s466_s17 = sshll.u32 %s600_s13, 6 }
   0xd   : > { %204 = vperm.xlu1 %489, %v186_v0   ;;  %194 = vperm.xlu0 %488, %v184_v2   ;;  %s165_s23 = scalar_lea.vmem %s595_s0, %s465_s20  ;;  %v189_v17 = vld [vmem:[%s597_s2 + $0x28] sm:$0xff]  ;;  %v467_v19 = vld [vmem:[%s596_s1] sm:$0xff]  ;;  %v191_v21 = vld [vmem:[%s597_s2 + $0x38] sm:$0xff]  ;;  %s582_s20 = scalar_lea.vmem %s598_s3, %s466_s17 }
   0xe   : > { %490 = vset.pattern.permute.xlu2 %v499_v1  ;;  %v449_v4 = vld [vmem:[%s165_s23 + $0x10] sm:$0xf]  ;;  %v474_v5 = vld [vmem:[%s165_s23 + $0x14] sm:$0xf0]  ;;  %v473_v6 = vld [vmem:[%s165_s23 + $0x14] sm:$0xf] }
   0xf   : > { %214 = vperm.xlu2 %490, %v188_v3   ;;  %v450_v8 = vor.u32 %v474_v5, %v449_v4  ;;  %v451_v9 = vld [vmem:[%s165_s23 + $0x18] sm:$0xf0]  ;;  %v441_v10 = vld [vmem:[%s165_s23] sm:$0xf]  ;;  %v472_v11 = vld [vmem:[%s165_s23 + $0x4] sm:$0xf0] }
  0x10   : > { %v454_v12 = vor.u32 %v473_v6, %v451_v9  ;;  %v471_v13 = vld [vmem:[%s165_s23 + $0x4] sm:$0xf]  ;;  %v443_v14 = vld [vmem:[%s165_s23 + $0x8] sm:$0xf0]  ;;  %v442_v16 = vor.u32 %v472_v11, %v441_v10  ;;  %v190_v22 = vld [vmem:[%s597_s2 + $0x30] sm:$0xff] }
  0x11   : > { %291 = vmatpush.bf16.msra.mxu0 %v450_v8  ;;  %475 = vmatpush.bf16.msra.mxu2 %v450_v8  ;;  %v446_v18 = vor.u32 %v471_v13, %v443_v14  ;;  %v468_v23 = vld [vmem:[%s596_s1 + $0x8] sm:$0xff]  ;;  %v470_v24 = vld [vmem:[%s596_s1 + $0x18] sm:$0xff] }
  0x12   : > { %320 = vmatpush.bf16.msra.mxu1 %v454_v12  ;;  %477 = vmatpush.bf16.msra.mxu3 %v454_v12 }
  0x15   : > { %209 = vperm.xlu1 %489, %v187_v7   ;;  %199 = vperm.xlu0 %488, %v185_v15  }
  0x16   : > { %292 = vmatpush.bf16.msra.mxu0 %v442_v16  ;;  %476 = vmatpush.bf16.msra.mxu2 %v442_v16 }
  0x17   : > { %219 = vperm.xlu2 %490, %v189_v17   ;;  %321 = vmatpush.bf16.msra.mxu1 %v446_v18 }
  0x18   : > { %478 = vmatpush.bf16.msra.mxu3 %v446_v18 }
  0x19   : > { %455 = vmatmul.msk.bf16.vlgmr.msra.gmra.mxu0 %vm272_vm0, %v467_v19  ;;  %457 = vmatmul.msk.bf16.vlgmr.msra.gmra.mxu2 %vm272_vm0, %v469_v20 }
  0x1a   : > { %459 = vmatmul.msk.bf16.vlgmr.msra.gmra.mxu1 %vm272_vm0, %v467_v19 }
  0x1b   : > { %461 = vmatmul.msk.bf16.vlgmr.msra.gmra.mxu3 %vm272_vm0, %v469_v20 }
  0x1d   : > { %229 = vperm.xlu1 %489, %v191_v21   ;;  %224 = vperm.xlu0 %488, %v190_v22  }
  0x29   : > { %456 = vmatmul.msk.bf16.gmra.mxu0 %vm272_vm0, %v468_v23  ;;  %458 = vmatmul.msk.bf16.gmra.mxu2 %vm272_vm0, %v470_v24 }
  0x2a   : > { %460 = vmatmul.msk.bf16.gmra.mxu1 %vm272_vm0, %v468_v23 }
  0x2b   : > { %462 = vmatmul.msk.bf16.gmra.mxu3 %vm272_vm0, %v470_v24 }
  0x69   : > { %v215_v30 = vpop.permute.xlu2 %214 }
  0x71   : > { %v220_v44 = vpop.permute.xlu2 %219 }
  0x7f   : > { %v195_v25 = vpop.permute.xlu0 %194  ;;  %v205_v40 = vpop.permute.xlu1 %204 }
  0x87   : > { %v200_v35 = vpop.permute.xlu0 %199  ;;  %v210_v54 = vpop.permute.xlu1 %209 }
  0x8f   : > { %v225_v56 = vpop.permute.xlu0 %224  ;;  %v230_v3 = vpop.permute.xlu1 %229 }
  0x96   : > { %v294_v26 = vpop.f32.mrf.mxu0 }
  0x97   : > { %v295_v27 = vadd.f32 %v294_v26, %v195_v25  ;;  %v323_v28 = vpop.f32.mrf.mxu1 }
  0x98   : > { %v324_v29 = vadd.f32 %v323_v28, %v195_v25 }
  0x9a   : > { %v343_v31 = vpack.c.bf16 %v324_v29, %v295_v27 }
  0x9c   : > { %351 = vst [vmem:[%s582_s20] sm:$0xff] %v343_v31  ;;  %v304_v32 = vpop.f32.mrf.mxu2 }
  0x9d   : > { %v305_v33 = vadd.f32 %v304_v32, %v215_v30 }
  0x9e   : > { %v333_v34 = vpop.f32.mrf.mxu3  ;;  %v296_v37 = vpop.f32.mrf.mxu0 }
  0x9f   : > { %v334_v36 = vadd.f32 %v333_v34, %v215_v30  ;;  %v297_v38 = vadd.f32 %v296_v37, %v200_v35  ;;  %v325_v39 = vpop.f32.mrf.mxu1 }
  0xa0   : > { %v326_v42 = vadd.f32 %v325_v39, %v200_v35 }
  0xa1   : > { %v347_v41 = vpack.c.bf16 %v334_v36, %v305_v33 }
  0xa2   : > { %v344_v43 = vpack.c.bf16 %v326_v42, %v297_v38 }
  0xa3   : > { %355 = vst [vmem:[%s582_s20 + $0x20] sm:$0xff] %v347_v41 }
  0xa4   : > { %352 = vst [vmem:[%s582_s20 + $0x8] sm:$0xff] %v344_v43  ;;  %v306_v45 = vpop.f32.mrf.mxu2 }
  0xa5   : > { %v307_v46 = vadd.f32 %v306_v45, %v220_v44 }
  0xa6   : > { %v335_v47 = vpop.f32.mrf.mxu3  ;;  %v299_v49 = vpop.f32.mrf.mxu0 }
  0xa7   : > { %v336_v48 = vadd.f32 %v335_v47, %v220_v44  ;;  %v300_v50 = vadd.f32 %v299_v49, %v205_v40  ;;  %v328_v51 = vpop.f32.mrf.mxu1 }
  0xa8   : > { %v329_v53 = vadd.f32 %v328_v51, %v205_v40 }
  0xa9   : > { %v348_v52 = vpack.c.bf16 %v336_v48, %v307_v46 }
  0xaa   : > { %v345_v55 = vpack.c.bf16 %v329_v53, %v300_v50 }
  0xab   : > { %356 = vst [vmem:[%s582_s20 + $0x28] sm:$0xff] %v348_v52 }
  0xac   : > { %353 = vst [vmem:[%s582_s20 + $0x10] sm:$0xff] %v345_v55  ;;  %v309_v57 = vpop.f32.mrf.mxu2 }
  0xad   : > { %v310_v58 = vadd.f32 %v309_v57, %v225_v56 }
  0xae   : > { %v338_v59 = vpop.f32.mrf.mxu3  ;;  %v301_v61 = vpop.f32.mrf.mxu0 }
  0xaf   : > { %v339_v60 = vadd.f32 %v338_v59, %v225_v56  ;;  %v302_v62 = vadd.f32 %v301_v61, %v210_v54  ;;  %v330_v63 = vpop.f32.mrf.mxu1 }
  0xb0   : > { %v331_v1 = vadd.f32 %v330_v63, %v210_v54 }
  0xb1   : > { %v349_v0 = vpack.c.bf16 %v339_v60, %v310_v58 }
  0xb2   : > { %v346_v2 = vpack.c.bf16 %v331_v1, %v302_v62 }
  0xb3   : > { %357 = vst [vmem:[%s582_s20 + $0x30] sm:$0xff] %v349_v0 }
  0xb4   : > { %354 = vst [vmem:[%s582_s20 + $0x18] sm:$0xff] %v346_v2  ;;  %v311_v4 = vpop.f32.mrf.mxu2 }
  0xb5   : > { %v312_v5 = vadd.f32 %v311_v4, %v230_v3 }
  0xb6   : > { %v340_v6 = vpop.f32.mrf.mxu3 }
  0xb7   : > { %v341_v7 = vadd.f32 %v340_v6, %v230_v3 }
  0xb9   : > { %v350_v8 = vpack.c.bf16 %v341_v7, %v312_v5 }
  0xbb   : > { %358 = vst [vmem:[%s582_s20 + $0x38] sm:$0xff] %v350_v8 }
  0xbc PF: > { %s13_s12 = sadd.s32 1, %s497_s12  }
  0xbd   : > { %p10_p4 = scmp.ge.s32.totalorder %s13_s12, 4  }
  0xbf   :  { %12 = sbr.rel (!%p10_p4) target bundleno = 1 (0x1), region = 62 }

// kernel: decoder_forward.5
= control target key start
LH: loop header
LB: loop body
LE: loop exit
PB: predicated region body
PF: predicated region fallthrough
CT: control target
= control target key end

     0   :  { %s4279_s24 = smov 0   ;;  %s5645_s0 = inlined_call_operand.vmem [shape: bf16[2,32,512], index: 0, kind: input, shape index: {}]   ;;  %s5646_s1 = inlined_call_operand.vmem [shape: bf16[2,32,512], index: 1, kind: input, shape index: {}]   ;;  %s5647_s2 = inlined_call_operand.vmem [shape: bf16[9,32,32], index: 2, kind: input, shape index: {}]   ;;  %s5648_s3 = inlined_call_operand.vmem [shape: bf16[9,32,32], index: 3, kind: input, shape index: {}]   ;;  %s5649_s4 = inlined_call_operand.vmem [shape: f32[32,1], index: 4, kind: input, shape index: {}]   ;;  %s5650_s5 = inlined_call_operand.vmem [shape: bf16[9,32,32], index: 5, kind: input, shape index: {}]   ;;  %s5651_s6 = inlined_call_operand.vmem [shape: f32[32,1], index: 6, kind: input, shape index: {}]   ;;  %s5652_s7 = inlined_call_operand.vmem [shape: bf16[2,32,256], index: 7, kind: output, shape index: {}]  }
   0x1 LB: > { %s3486_s25 = sadd.s32 4294967295, %s4228_s24   ;;  %p3490_p0 = scmp.ge.s32.totalorder %s4228_s24, 1  ;;  %s4228_s24 = sphi %s4279_s24, %s17_s24  }
   0x2   : > { %p247_p1 = scmp.lt.s32.totalorder %s4228_s24, 3 }
   0x4   : > { %p248_p2 = pnand %p3490_p0, %p247_p1 }
   0x6   : > { %251 = sbr.rel (%p248_p2) target bundleno = 1102 (0x44e), region = 48 }
   0xb   : > { %p284_p3 = scmp.lt.s32.totalorder %s3486_s25, 1  ;;  %s4230_s30 = smov 127   ;;  %v4345_v28 = vld [vmem:[%s5648_s3] sm:$0xff]  ;;  %vm366_vm0 = vcmask 261120   ;;  %v4393_v53 = vld [vmem:[%s5648_s3 + $0x8] sm:$0xff]  ;;  %vm606_vm1 = vcmask 1039360  }
   0xc   : > { %s4231_s17 = smov 126   ;;  %s4232_s20 = smov 112   ;;  %vm883_vm2 = vcmask 1031168   ;;  %vm1120_vm3 = vcmask 916480   ;;  %vm1357_vm4 = vcmask 908288   ;;  %vm1594_vm5 = vcmask 900096  }
   0xd   : > { %s5684_s25 = smov (!%p284_p3, %s3486_s25), 1  ;;  %s4233_s23 = smov 111   ;;  %vm1831_vm6 = vcmask 785408   ;;  %vm2068_vm7 = vcmask 777216   ;;  %vm2305_vm8 = vcmask 769024  }
   0xe   : > { %s4107_s26 = sshll.u32 %s5684_s25, 6  ;;  %s4235_s21 = smov 96  }
   0xf   : > { %s4293_s29 = scalar_lea.vmem %s5645_s0, %s4107_s26  ;;  %s4316_s10 = scalar_lea.vmem %s5646_s1, %s4107_s26 }
  0x10   : > { %v3611_v0 = vld [vmem:[%s4293_s29 + $0x28] sm:$0xf]  ;;  %v4135_v1 = vld [vmem:[%s4293_s29 + $0x34] sm:$0xf0]  ;;  %v3603_v2 = vld [vmem:[%s4293_s29 + $0x20] sm:$0xf] }
  0x11   : > { %v4298_v3 = vor.u32 %v4135_v1, %v3611_v0  ;;  %v4134_v4 = vld [vmem:[%s4293_s29 + $0x2c] sm:$0xf0]  ;;  %v3587_v6 = vld [vmem:[%s4293_s29] sm:$0xf]  ;;  %v4128_v8 = vld [vmem:[%s4293_s29 + $0x4] sm:$0xf] }
  0x12   : > { %v4301_v5 = vor.u32 %v4134_v4, %v3603_v2  ;;  %v4130_v7 = vld [vmem:[%s4293_s29 + $0xc] sm:$0xf0]  ;;  %v3589_v9 = vld [vmem:[%s4293_s29 + $0x10] sm:$0xf0]  ;;  %v4132_v10 = vld [vmem:[%s4293_s29 + $0x24] sm:$0xf] }
  0x13   : > { %602 = vrot.lane.b32.xlu1 %v4298_v3, %s4230_s30  ;;  %v3605_v11 = vld [vmem:[%s4293_s29 + $0x30] sm:$0xf0]  ;;  %v4318_v12 = vor.u32 %v4128_v8, %v3589_v9  ;;  %v3519_v13 = vld [vmem:[%s4316_s10 + $0x20] sm:$0xf]  ;;  %v4321_v14 = vor.u32 %v4130_v7, %v3587_v6  ;;  %v4124_v15 = vld [vmem:[%s4316_s10 + $0x2c] sm:$0xf0] }
  0x14   : > { %598 = vrot.lane.b32.xlu0 %v4301_v5, %s4230_s30  ;;  %v4326_v16 = vor.u32 %v4132_v10, %v3605_v11  ;;  %v3595_v17 = vld [vmem:[%s4293_s29 + $0x8] sm:$0xf]  ;;  %v4131_v18 = vld [vmem:[%s4293_s29 + $0x14] sm:$0xf0]  ;;  %v3520_v19 = vor.u32 %v4124_v15, %v3519_v13  ;;  %v3507_v20 = vld [vmem:[%s4316_s10] sm:$0xf] }
  0x15   : > { %592 = vrot.lane.b32.xlu2 %v4318_v12, %s4230_s30  ;;  %v4121_v21 = vld [vmem:[%s4316_s10 + $0xc] sm:$0xf0]  ;;  %v4334_v23 = vor.u32 %v4131_v18, %v3595_v17  ;;  %v3653_v24 = vld [vmem:[%s4316_s10 + $0x20] sm:$0xf]  ;;  %v4133_v26 = vld [vmem:[%s4293_s29 + $0x2c] sm:$0xf] }
  0x16   : > { %379 = vmatpush.bf16.msra.mxu0 %v3520_v19  ;;  %v3508_v22 = vor.u32 %v4121_v21, %v3507_v20  ;;  %v4144_v25 = vld [vmem:[%s4316_s10 + $0x2c] sm:$0xf0]  ;;  %v3613_v27 = vld [vmem:[%s4293_s29 + $0x38] sm:$0xf0]  ;;  %v4142_v31 = vld [vmem:[%s4316_s10 + $0x24] sm:$0xf] }
  0x17   : > { %v4347_v29 = vor.u32 %v4144_v25, %v3653_v24  ;;  %v4351_v30 = vor.u32 %v4133_v26, %v3613_v27  ;;  %v3655_v32 = vld [vmem:[%s4316_s10 + $0x30] sm:$0xf0]  ;;  %v3637_v34 = vld [vmem:[%s4316_s10] sm:$0xf]  ;;  %v4140_v35 = vld [vmem:[%s4316_s10 + $0xc] sm:$0xf0] }
  0x18   : > { %v4359_v33 = vor.u32 %v4142_v31, %v3655_v32  ;;  %v4129_v36 = vld [vmem:[%s4293_s29 + $0xc] sm:$0xf]  ;;  %v3597_v37 = vld [vmem:[%s4293_s29 + $0x18] sm:$0xf0]  ;;  %v4367_v38 = vor.u32 %v4140_v35, %v3637_v34  ;;  %v4138_v40 = vld [vmem:[%s4316_s10 + $0x4] sm:$0xf] }
  0x19   : > { %v4371_v39 = vor.u32 %v4129_v36, %v3597_v37  ;;  %v3639_v41 = vld [vmem:[%s4316_s10 + $0x10] sm:$0xf0]  ;;  %v4143_v42 = vld [vmem:[%s4316_s10 + $0x2c] sm:$0xf]  ;;  %v3661_v43 = vld [vmem:[%s4316_s10 + $0x28] sm:$0xf] }
  0x1a   : > { %380 = vmatpush.bf16.msra.mxu0 %v3508_v22  ;;  %v3663_v44 = vld [vmem:[%s4316_s10 + $0x38] sm:$0xf0]  ;;  %v4380_v45 = vor.u32 %v4138_v40, %v3639_v41  ;;  %v3557_v46 = vld [vmem:[%s4293_s29 + $0x20] sm:$0xf]  ;;  %v4116_v47 = vld [vmem:[%s4293_s29 + $0x2c] sm:$0xf0] }
  0x1b   : > { %590 = vrot.lane.b32.xlu1 %v4321_v14, %s4230_s30  ;;  %v3558_v48 = vor.u32 %v4116_v47, %v3557_v46  ;;  %v4123_v49 = vld [vmem:[%s4316_s10 + $0x24] sm:$0xf]  ;;  %v3521_v50 = vld [vmem:[%s4316_s10 + $0x30] sm:$0xf0]  ;;  %v3545_v51 = vld [vmem:[%s4293_s29] sm:$0xf]  ;;  %v4396_v57 = vor.u32 %v4143_v42, %v3663_v44 }
  0x1c   : > { %600 = vrot.lane.b32.xlu0 %v4326_v16, %s4230_s30  ;;  %v4145_v52 = vld [vmem:[%s4316_s10 + $0x34] sm:$0xf0]  ;;  %v3524_v54 = vor.u32 %v4123_v49, %v3521_v50  ;;  %v4113_v55 = vld [vmem:[%s4293_s29 + $0xc] sm:$0xf0]  ;;  %v3645_v59 = vld [vmem:[%s4316_s10 + $0x8] sm:$0xf] }
  0x1d   : > { %594 = vrot.lane.b32.xlu2 %v4334_v23, %s4230_s30  ;;  %3529 = vmatmul.msk.bf16.vlgmr.msra.gmra.mxu0 %vm366_vm0, %v4345_v28  ;;  %v3546_v56 = vor.u32 %v4113_v55, %v3545_v51  ;;  %v4400_v58 = vor.u32 %v4145_v52, %v3661_v43  ;;  %v4141_v60 = vld [vmem:[%s4316_s10 + $0x14] sm:$0xf0]  ;;  %v4115_v61 = vld [vmem:[%s4293_s29 + $0x24] sm:$0xf]  ;;  %v3559_v62 = vld [vmem:[%s4293_s29 + $0x30] sm:$0xf0] }
  0x1e   : > { %484 = vmatpush.bf16.msra.mxu3 %v3558_v48  ;;  %398 = vmatpush.bf16.msra.mxu1 %v3524_v54  ;;  %v3562_v63 = vor.u32 %v4115_v61, %v3559_v62  ;;  %v4410_v0 = vor.u32 %v4141_v60, %v3645_v59  ;;  %v4110_v1 = vld [vmem:[%s5647_s2] sm:$0xff]  ;;  %v3509_v4 = vld [vmem:[%s4316_s10 + $0x10] sm:$0xf0]  ;;  %v4139_v9 = vld [vmem:[%s4316_s10 + $0xc] sm:$0xf]  ;;  %s4236_s12 = smov 95  }
  0x1f   : > { %v4120_v2 = vld [vmem:[%s4316_s10 + $0x4] sm:$0xf]  ;;  %v3547_v8 = vld [vmem:[%s4293_s29 + $0x10] sm:$0xf0]  ;;  %v3647_v10 = vld [vmem:[%s4316_s10 + $0x18] sm:$0xf0] }
  0x20   : > { %503 = vmatpush.bf16.msrb.mxu0 %v3562_v63  ;;  %v3512_v6 = vor.u32 %v4120_v2, %v3509_v4  ;;  %v4112_v7 = vld [vmem:[%s4293_s29 + $0x4] sm:$0xf]  ;;  %v4426_v13 = vor.u32 %v4139_v9, %v3647_v10  ;;  %v4111_v15 = vld [vmem:[%s5647_s2 + $0x8] sm:$0xff]  ;;  %v4125_v18 = vld [vmem:[%s4316_s10 + $0x34] sm:$0xf0]  ;;  %s4237_s22 = smov 94  }
  0x21   : > { %v3550_v11 = vor.u32 %v4112_v7, %v3547_v8  ;;  %v3527_v17 = vld [vmem:[%s4316_s10 + $0x28] sm:$0xf]  ;;  %v4122_v21 = vld [vmem:[%s4316_s10 + $0x14] sm:$0xf0]  ;;  %v4126_v48 = vld [vmem:[%s5647_s2 + $0x10] sm:$0xff] }
  0x22   : > { %485 = vmatpush.bf16.msra.mxu3 %v3546_v56  ;;  %399 = vmatpush.bf16.msra.mxu1 %v3512_v6  ;;  %v3528_v19 = vor.u32 %v4125_v18, %v3527_v17  ;;  %v3515_v20 = vld [vmem:[%s4316_s10 + $0x8] sm:$0xf]  ;;  %v4117_v25 = vld [vmem:[%s4293_s29 + $0x34] sm:$0xf0]  ;;  %v4136_v60 = vld [vmem:[%s5648_s3 + $0x10] sm:$0xff]  ;;  %s4234_s10 = smov 110  }
  0x23   : > { %757 = vrot.lane.b32.xlu1 %v4347_v29, %s4230_s30  ;;  %v3565_v22 = vld [vmem:[%s4293_s29 + $0x28] sm:$0xf]  ;;  %v3516_v24 = vor.u32 %v4122_v21, %v3515_v20  ;;  %v4114_v31 = vld [vmem:[%s4293_s29 + $0x14] sm:$0xf0] }
  0x24   : > { %604 = vrot.lane.b32.xlu0 %v4351_v30, %s4230_s30  ;;  %504 = vmatpush.bf16.msrb.mxu0 %v3550_v11  ;;  %v3566_v26 = vor.u32 %v4117_v25, %v3565_v22  ;;  %v3553_v27 = vld [vmem:[%s4293_s29 + $0x8] sm:$0xf]  ;;  %v4137_v17 = vld [vmem:[%s5648_s3 + $0x18] sm:$0xff] }
  0x25   : > { %759 = vrot.lane.b32.xlu2 %v4359_v33, %s4230_s30  ;;  %3567 = vmatmul.msk.bf16.vlgmr.msra.gmra.mxu3 %vm366_vm0, %v4110_v1  ;;  %v3554_v32 = vor.u32 %v4114_v31, %v3553_v27 }
  0x26   : > { %3531 = vmatmul.msk.bf16.vlgmr.msra.gmra.mxu1 %vm366_vm0, %v4345_v28  ;;  %417 = vmatpush.bf16.msra.mxu2 %v3528_v19 }
  0x27   : > { %522 = vmatpush.bf16.msrb.mxu1 %v3566_v26 }
  0x2a   : > { %418 = vmatpush.bf16.msra.mxu2 %v3516_v24 }
  0x2b   : > { %749 = vrot.lane.b32.xlu1 %v4367_v38, %s4230_s30  ;;  %523 = vmatpush.bf16.msrb.mxu1 %v3554_v32 }
  0x2c   : > { %596 = vrot.lane.b32.xlu0 %v4371_v39, %s4230_s30 }
  0x2d   : > { %751 = vrot.lane.b32.xlu2 %v4380_v45, %s4230_s30  ;;  %3530 = vmatmul.msk.bf16.gmra.mxu0 %vm366_vm0, %v4393_v53 }
  0x2e   : > { %3533 = vmatmul.msk.bf16.vlgmr.msra.gmra.mxu2 %vm366_vm0, %v4345_v28 }
  0x33   : > { %763 = vrot.lane.b32.xlu1 %v4396_v57, %s4230_s30 }
  0x34   : > { %761 = vrot.lane.b32.xlu0 %v4400_v58, %s4230_s30 }
  0x35   : > { %753 = vrot.lane.b32.xlu2 %v4410_v0, %s4230_s30  ;;  %3568 = vmatmul.msk.bf16.gmra.mxu3 %vm366_vm0, %v4111_v15 }
  0x36   : > { %3532 = vmatmul.msk.bf16.gmra.mxu1 %vm366_vm0, %v4393_v53 }
  0x3b   : > { %875 = vrot.lane.b32.xlu1 %v4301_v5, %s4231_s17 }
  0x3c   : > { %755 = vrot.lane.b32.xlu0 %v4426_v13, %s4230_s30 }
  0x3d   : > { %877 = vrot.lane.b32.xlu2 %v4326_v16, %s4231_s17  ;;  %3569 = vmatmul.msk.bf16.vlgmr.msrb.gmra.mxu0 %vm366_vm0, %v4110_v1 }
  0x3e   : > { %3534 = vmatmul.msk.bf16.gmra.mxu2 %vm366_vm0, %v4393_v53 }
  0x43   : > { %867 = vrot.lane.b32.xlu1 %v4321_v14, %s4231_s17 }
  0x44   : > { %879 = vrot.lane.b32.xlu0 %v4298_v3, %s4231_s17 }
  0x45   : > { %869 = vrot.lane.b32.xlu2 %v4318_v12, %s4231_s17 }
  0x46   : > { %3571 = vmatmul.msk.bf16.vlgmr.msrb.gmra.mxu1 %vm366_vm0, %v4110_v1  ;;  %v4127_v1 = vld [vmem:[%s5647_s2 + $0x18] sm:$0xff] }
  0x4b   : > { %881 = vrot.lane.b32.xlu1 %v4351_v30, %s4231_s17 }
  0x4c   : > { %871 = vrot.lane.b32.xlu0 %v4334_v23, %s4231_s17 }
  0x4d   : > { %994 = vrot.lane.b32.xlu2 %v4347_v29, %s4231_s17  ;;  %3570 = vmatmul.msk.bf16.gmra.mxu0 %vm366_vm0, %v4111_v15 }
  0x53   : > { %873 = vrot.lane.b32.xlu1 %v4371_v39, %s4231_s17 }
  0x54   : > { %996 = vrot.lane.b32.xlu0 %v4359_v33, %s4231_s17 }
  0x55   : > { %986 = vrot.lane.b32.xlu2 %v4367_v38, %s4231_s17 }
  0x56   : > { %3572 = vmatmul.msk.bf16.gmra.mxu1 %vm366_vm0, %v4111_v15 }
  0x5b   : > { %998 = vrot.lane.b32.xlu1 %v4400_v58, %s4231_s17 }
  0x5c   : > { %988 = vrot.lane.b32.xlu0 %v4380_v45, %s4231_s17 }
  0x5d   : > { %1000 = vrot.lane.b32.xlu2 %v4396_v57, %s4231_s17 }
  0x63   : > { %992 = vrot.lane.b32.xlu1 %v4426_v13, %s4231_s17 }
  0x64   : > { %990 = vrot.lane.b32.xlu0 %v4410_v0, %s4231_s17 }
  0x65   : > { %1112 = vrot.lane.b32.xlu2 %v4301_v5, %s4232_s20 }
  0x6b   : > { %1116 = vrot.lane.b32.xlu1 %v4298_v3, %s4232_s20 }
  0x6c   : > { %1114 = vrot.lane.b32.xlu0 %v4326_v16, %s4232_s20 }
  0x6d   : > { %1104 = vrot.lane.b32.xlu2 %v4321_v14, %s4232_s20 }
  0x6f   : > { %v593_v28 = vpop.permute.xlu2 %592 }
  0x73   : > { %1108 = vrot.lane.b32.xlu1 %v4334_v23, %s4232_s20 }
  0x74   : > { %1106 = vrot.lane.b32.xlu0 %v4318_v12, %s4232_s20 }
  0x75   : > { %1118 = vrot.lane.b32.xlu2 %v4351_v30, %s4232_s20 }
  0x77   : > { %v595_v34 = vpop.permute.xlu2 %594 }
  0x78   : > { %v608_v49 = vsel %vm606_vm1, %v593_v28, %v595_v34 }
  0x7b   : > { %1233 = vrot.lane.b32.xlu1 %v4359_v33, %s4232_s20 }
  0x7c   : > { %1231 = vrot.lane.b32.xlu0 %v4347_v29, %s4232_s20 }
  0x7d   : > { %1110 = vrot.lane.b32.xlu2 %v4371_v39, %s4232_s20 }
  0x7f   : > { %v760_v35 = vpop.permute.xlu2 %759 }
  0x83   : > { %1225 = vrot.lane.b32.xlu1 %v4380_v45, %s4232_s20 }
  0x84   : > { %1223 = vrot.lane.b32.xlu0 %v4367_v38, %s4232_s20 }
  0x85   : > { %v603_v36 = vpop.permute.xlu1 %602  ;;  %1235 = vrot.lane.b32.xlu2 %v4400_v58, %s4232_s20 }
  0x86   : > { %v599_v37 = vpop.permute.xlu0 %598 }
  0x87   : > { %v752_v40 = vpop.permute.xlu2 %751 }
  0x8b   : > { %1227 = vrot.lane.b32.xlu1 %v4410_v0, %s4232_s20 }
  0x8c   : > { %1237 = vrot.lane.b32.xlu0 %v4396_v57, %s4232_s20 }
  0x8d   : > { %v591_v41 = vpop.permute.xlu1 %590  ;;  %1229 = vrot.lane.b32.xlu2 %v4426_v13, %s4232_s20 }
  0x8e   : > { %v601_v42 = vpop.permute.xlu0 %600  ;;  %v607_v47 = vsel %vm606_vm1, %v591_v41, %v593_v28 }
  0x8f   : > { %v610_v43 = vsel %vm606_vm1, %v599_v37, %v601_v42  ;;  %v611_v44 = vsel %vm606_vm1, %v601_v42, %v603_v36  ;;  %v754_v46 = vpop.permute.xlu2 %753  ;;  %v4146_v42 = vld [vmem:[%s5647_s2 + $0x20] sm:$0xff] }
  0x90   : > { %631 = vmatpush.bf16.msrb.mxu2 %v610_v43  ;;  %650 = vmatpush.bf16.msrb.mxu3 %v611_v44  ;;  %v766_v10 = vsel %vm606_vm1, %v752_v40, %v754_v46 }
  0x93   : > { %1351 = vrot.lane.b32.xlu1 %v4326_v16, %s4233_s23 }
  0x94   : > { %1349 = vrot.lane.b32.xlu0 %v4301_v5, %s4233_s23  ;;  %632 = vmatpush.bf16.msrb.mxu2 %v607_v47 }
  0x95   : > { %651 = vmatpush.bf16.msrb.mxu3 %v608_v49  ;;  %v758_v50 = vpop.permute.xlu1 %757  ;;  %1353 = vrot.lane.b32.xlu2 %v4298_v3, %s4233_s23 }
  0x96   : > { %v605_v51 = vpop.permute.xlu0 %604  ;;  %v768_v52 = vsel %vm606_vm1, %v758_v50, %v760_v35 }
  0x97   : > { %v612_v53 = vsel %vm606_vm1, %v603_v36, %v605_v51  ;;  %3617 = vmatmul.msk.bf16.vlgmr.msrb.gmra.mxu2 %vm366_vm0, %v4126_v48  ;;  %789 = vmatpush.bf16.msra.mxu1 %v768_v52  ;;  %v878_v54 = vpop.permute.xlu2 %877 }
  0x98   : > { %3619 = vmatmul.msk.bf16.vlgmr.msrb.gmra.mxu3 %vm366_vm0, %v4126_v48  ;;  %669 = vmatpush.bf16.msra.mxu0 %v612_v53 }
  0x9a   : > { %v382_v61 = vpop.f32.mrf.mxu0 }
  0x9b   : > { %1343 = vrot.lane.b32.xlu1 %v4318_v12, %s4233_s23 }
  0x9c   : > { %1341 = vrot.lane.b32.xlu0 %v4321_v14, %s4233_s23 }
  0x9d   : > { %v750_v55 = vpop.permute.xlu1 %749  ;;  %1345 = vrot.lane.b32.xlu2 %v4334_v23, %s4233_s23 }
  0x9e   : > { %v597_v56 = vpop.permute.xlu0 %596  ;;  %v765_v59 = vsel %vm606_vm1, %v750_v55, %v752_v40 }
  0x9f   : > { %v609_v62 = vsel %vm606_vm1, %v595_v34, %v597_v56  ;;  %790 = vmatpush.bf16.msra.mxu1 %v765_v59  ;;  %v870_v63 = vpop.permute.xlu2 %869 }
  0xa0   : > { %670 = vmatpush.bf16.msra.mxu0 %v609_v62 }
  0xa2   : > { %3667 = vmatmul.msk.bf16.vlgmr.msra.gmra.mxu1 %vm366_vm0, %v4136_v60  ;;  %v4555_v6 = vpop.f32.mrf.mxu0 }
  0xa3   : > { %3621 = vmatmul.msk.bf16.vlgmr.msra.gmra.mxu0 %vm366_vm0, %v4126_v48  ;;  %1468 = vrot.lane.b32.xlu1 %v4347_v29, %s4233_s23  ;;  %v401_v31 = vpop.f32.mrf.mxu1 }
  0xa4   : > { %1355 = vrot.lane.b32.xlu0 %v4351_v30, %s4233_s23 }
  0xa5   : > { %v764_v2 = vpop.permute.xlu1 %763  ;;  %1470 = vrot.lane.b32.xlu2 %v4359_v33, %s4233_s23 }
  0xa6   : > { %v762_v4 = vpop.permute.xlu0 %761 }
  0xa7   : > { %v770_v7 = vsel %vm606_vm1, %v762_v4, %v764_v2  ;;  %3618 = vmatmul.msk.bf16.gmra.mxu2 %vm366_vm0, %v4127_v1  ;;  %v769_v8 = vsel %vm606_vm1, %v760_v35, %v762_v4  ;;  %v995_v9 = vpop.permute.xlu2 %994  ;;  %v4147_v2 = vld [vmem:[%s5647_s2 + $0x28] sm:$0xff] }
  0xa8   : > { %3620 = vmatmul.msk.bf16.gmra.mxu3 %vm366_vm0, %v4127_v1  ;;  %808 = vmatpush.bf16.msra.mxu2 %v769_v8  ;;  %v487_v32 = vpop.f32.mrf.mxu3 }
  0xa9   : > { %827 = vmatpush.bf16.msra.mxu3 %v770_v7  ;;  %v4587_v34 = vadd.f32 %v487_v32, %v382_v61 }
  0xaa   : > { %v387_v19 = vpop.f32.mrf.mxu0 }
  0xab   : > { %1460 = vrot.lane.b32.xlu1 %v4367_v38, %s4233_s23  ;;  %v4602_v44 = vpop.f32.mrf.mxu1 }
  0xac   : > { %1347 = vrot.lane.b32.xlu0 %v4371_v39, %s4233_s23  ;;  %809 = vmatpush.bf16.msra.mxu2 %v766_v10 }
  0xad   : > { %v876_v11 = vpop.permute.xlu1 %875  ;;  %1462 = vrot.lane.b32.xlu2 %v4380_v45, %s4233_s23 }
  0xae   : > { %v756_v15 = vpop.permute.xlu0 %755  ;;  %v887_v18 = vsel %vm883_vm2, %v876_v11, %v878_v54 }
  0xaf   : > { %v767_v20 = vsel %vm606_vm1, %v754_v46, %v756_v15  ;;  %908 = vmatpush.bf16.msrb.mxu0 %v887_v18  ;;  %v987_v21 = vpop.permute.xlu2 %986 }
  0xb0   : > { %828 = vmatpush.bf16.msra.mxu3 %v767_v20  ;;  %v4604_v46 = vpop.f32.mrf.mxu3 }
  0xb1   : > { %v420_v11 = vpop.f32.mrf.mxu2 }
  0xb2   : > { %3668 = vmatmul.msk.bf16.gmra.mxu1 %vm366_vm0, %v4137_v17  ;;  %v4582_v26 = vpop.f32.mrf.mxu0 }
  0xb3   : > { %3622 = vmatmul.msk.bf16.gmra.mxu0 %vm366_vm0, %v4127_v1  ;;  %1474 = vrot.lane.b32.xlu1 %v4396_v57, %s4233_s23  ;;  %v406_v53 = vpop.f32.mrf.mxu1 }
  0xb4   : > { %1472 = vrot.lane.b32.xlu0 %v4400_v58, %s4233_s23 }
  0xb5   : > { %v868_v22 = vpop.permute.xlu1 %867  ;;  %1464 = vrot.lane.b32.xlu2 %v4410_v0, %s4233_s23 }
  0xb6   : > { %v880_v24 = vpop.permute.xlu0 %879  ;;  %v884_v25 = vsel %vm883_vm2, %v868_v22, %v870_v63 }
  0xb7   : > { %3669 = vmatmul.msk.bf16.vlgmr.msra.gmra.mxu2 %vm366_vm0, %v4136_v60  ;;  %v888_v27 = vsel %vm883_vm2, %v878_v54, %v880_v24  ;;  %909 = vmatpush.bf16.msrb.mxu0 %v884_v25  ;;  %v1001_v28 = vpop.permute.xlu2 %1000 }
  0xb8   : > { %3671 = vmatmul.msk.bf16.vlgmr.msra.gmra.mxu3 %vm366_vm0, %v4136_v60  ;;  %927 = vmatpush.bf16.msrb.mxu1 %v888_v27  ;;  %v492_v54 = vpop.f32.mrf.mxu3 }
  0xb9   : > { %v4620_v56 = vadd.f32 %v492_v54, %v387_v19 }
  0xba   : > { %v506_v40 = vpop.f32.mrf.mxu0 }
  0xbb   : > { %1586 = vrot.lane.b32.xlu1 %v4301_v5, %s4234_s10  ;;  %v4600_v43 = vadd.f32 %v506_v40, %v401_v31  ;;  %v4636_v7 = vpop.f32.mrf.mxu1 }
  0xbc   : > { %1466 = vrot.lane.b32.xlu0 %v4426_v13, %s4233_s23 }
  0xbd   : > { %v882_v35 = vpop.permute.xlu1 %881  ;;  %1588 = vrot.lane.b32.xlu2 %v4326_v16, %s4234_s10 }
  0xbe   : > { %v872_v36 = vpop.permute.xlu0 %871  ;;  %v889_v37 = vsel %vm883_vm2, %v880_v24, %v882_v35  ;;  %v4661_v24 = vpop.f32.mrf.mxu2  ;;  %v4149_v35 = vld [vmem:[%s5648_s3 + $0x28] sm:$0xff] }
  0xbf   : > { %v885_v41 = vsel %vm883_vm2, %v870_v63, %v872_v36  ;;  %946 = vmatpush.bf16.msrb.mxu2 %v889_v37  ;;  %v1113_v47 = vpop.permute.xlu2 %1112 }
  0xc0   : > { %928 = vmatpush.bf16.msrb.mxu1 %v885_v41 }
  0xc2   : > { %v4615_v51 = vpop.f32.mrf.mxu0 }
  0xc3   : > { %3685 = vmatmul.msk.bf16.vlgmr.msrb.gmra.mxu0 %vm366_vm0, %v4146_v42  ;;  %3687 = vmatmul.msk.bf16.vlgmr.msrb.gmra.mxu1 %vm366_vm0, %v4146_v42  ;;  %v525_v19 = vpop.f32.mrf.mxu1 }
  0xc4   : > { %1578 = vrot.lane.b32.xlu1 %v4321_v14, %s4234_s10  ;;  %1590 = vrot.lane.b32.xlu0 %v4298_v3, %s4234_s10  ;;  %v4653_v20 = vadd.f32 %v525_v19, %v420_v11 }
  0xc5   : > { %v874_v48 = vpop.permute.xlu1 %873  ;;  %1580 = vrot.lane.b32.xlu2 %v4318_v12, %s4234_s10 }
  0xc6   : > { %v997_v49 = vpop.permute.xlu0 %996  ;;  %v886_v50 = vsel %vm883_vm2, %v872_v36, %v874_v48  ;;  %v425_v48 = vpop.f32.mrf.mxu2 }
  0xc7   : > { %3670 = vmatmul.msk.bf16.gmra.mxu2 %vm366_vm0, %v4137_v17  ;;  %v1005_v52 = vsel %vm883_vm2, %v995_v9, %v997_v49  ;;  %v1105_v55 = vpop.permute.xlu2 %1104  ;;  %v4148_v9 = vld [vmem:[%s5648_s3 + $0x20] sm:$0xff] }
  0xc8   : > { %3672 = vmatmul.msk.bf16.gmra.mxu3 %vm366_vm0, %v4137_v17  ;;  %947 = vmatpush.bf16.msrb.mxu2 %v886_v50 }
  0xc9   : > { %1026 = vmatpush.bf16.msrb.mxu3 %v1005_v52 }
  0xca   : > { %v511_v63 = vpop.f32.mrf.mxu0 }
  0xcb   : > { %v4634_v4 = vadd.f32 %v511_v63, %v406_v53 }
  0xcc   : > { %1592 = vrot.lane.b32.xlu1 %v4351_v30, %s4234_s10  ;;  %1582 = vrot.lane.b32.xlu0 %v4334_v23, %s4234_s10 }
  0xcd   : > { %v999_v59 = vpop.permute.xlu1 %998  ;;  %1705 = vrot.lane.b32.xlu2 %v4347_v29, %s4234_s10 }
  0xce   : > { %v989_v60 = vpop.permute.xlu0 %988  ;;  %v1007_v61 = vsel %vm883_vm2, %v999_v59, %v1001_v28  ;;  %v1006_v62 = vsel %vm883_vm2, %v997_v49, %v999_v59  ;;  %v4666_v28 = vpop.f32.mrf.mxu1 }
  0xcf   : > { %v1002_v1 = vsel %vm883_vm2, %v987_v21, %v989_v60  ;;  %1045 = vmatpush.bf16.msra.mxu0 %v1006_v62  ;;  %1064 = vmatpush.bf16.msra.mxu1 %v1007_v61  ;;  %v1119_v8 = vpop.permute.xlu2 %1118 }
  0xd0   : > { %1027 = vmatpush.bf16.msrb.mxu3 %v1002_v1 }
  0xd3   : > { %3686 = vmatmul.msk.bf16.gmra.mxu0 %vm366_vm0, %v4147_v2  ;;  %3688 = vmatmul.msk.bf16.gmra.mxu1 %vm366_vm0, %v4147_v2 }
  0xd4   : > { %1584 = vrot.lane.b32.xlu1 %v4371_v39, %s4234_s10  ;;  %1707 = vrot.lane.b32.xlu0 %v4359_v33, %s4234_s10 }
  0xd5   : > { %v993_v10 = vpop.permute.xlu1 %992  ;;  %1697 = vrot.lane.b32.xlu2 %v4367_v38, %s4234_s10 }
  0xd6   : > { %v991_v15 = vpop.permute.xlu0 %990  ;;  %v530_v49 = vpop.f32.mrf.mxu1 }
  0xd7   : > { %3689 = vmatmul.msk.bf16.vlgmr.msrb.gmra.mxu2 %vm366_vm0, %v4146_v42  ;;  %v1003_v17 = vsel %vm883_vm2, %v989_v60, %v991_v15  ;;  %v1004_v18 = vsel %vm883_vm2, %v991_v15, %v993_v10  ;;  %v1111_v21 = vpop.permute.xlu2 %1110  ;;  %v4684_v50 = vadd.f32 %v530_v49, %v425_v48  ;;  %v4150_v60 = vld [vmem:[%s5647_s2 + $0x30] sm:$0xff] }
  0xd8   : > { %3703 = vmatmul.msk.bf16.vlgmr.msrb.gmra.mxu3 %vm366_vm0, %v4148_v9  ;;  %1046 = vmatpush.bf16.msra.mxu0 %v1003_v17  ;;  %v4152_v15 = vld [vmem:[%s5648_s3 + $0x30] sm:$0xff] }
  0xd9   : > { %1065 = vmatpush.bf16.msra.mxu1 %v1004_v18  ;;  %v4151_v18 = vld [vmem:[%s5647_s2 + $0x38] sm:$0xff] }
  0xdc   : > { %1709 = vrot.lane.b32.xlu1 %v4400_v58, %s4234_s10  ;;  %1699 = vrot.lane.b32.xlu0 %v4380_v45, %s4234_s10 }
  0xdd   : > { %v1117_v22 = vpop.permute.xlu1 %1116  ;;  %1711 = vrot.lane.b32.xlu2 %v4396_v57, %s4234_s10 }
  0xde   : > { %v1115_v25 = vpop.permute.xlu0 %1114  ;;  %v1126_v27 = vsel %vm1120_vm3, %v1117_v22, %v1119_v8 }
  0xdf   : > { %v1124_v31 = vsel %vm1120_vm3, %v1113_v47, %v1115_v25  ;;  %v1125_v32 = vsel %vm1120_vm3, %v1115_v25, %v1117_v22  ;;  %1183 = vmatpush.bf16.msrb.mxu0 %v1126_v27  ;;  %v1236_v41 = vpop.permute.xlu2 %1235 }
  0xe0   : > { %1145 = vmatpush.bf16.msra.mxu2 %v1124_v31  ;;  %1164 = vmatpush.bf16.msra.mxu3 %v1125_v32 }
  0xe3   : > { %3705 = vmatmul.msk.bf16.vlgmr.msra.gmra.mxu0 %vm366_vm0, %v4148_v9  ;;  %3707 = vmatmul.msk.bf16.vlgmr.msra.gmra.mxu1 %vm366_vm0, %v4148_v9 }
  0xe4   : > { %1701 = vrot.lane.b32.xlu0 %v4410_v0, %s4234_s10  ;;  %1703 = vrot.lane.b32.xlu1 %v4426_v13, %s4234_s10 }
  0xe5   : > { %v1109_v36 = vpop.permute.xlu1 %1108  ;;  %1823 = vrot.lane.b32.xlu2 %v4301_v5, %s4235_s21 }
  0xe6   : > { %v1107_v37 = vpop.permute.xlu0 %1106  ;;  %v1123_v40 = vsel %vm1120_vm3, %v1109_v36, %v1111_v21 }
  0xe7   : > { %3690 = vmatmul.msk.bf16.gmra.mxu2 %vm366_vm0, %v4147_v2  ;;  %v1121_v42 = vsel %vm1120_vm3, %v1105_v55, %v1107_v37  ;;  %v1122_v47 = vsel %vm1120_vm3, %v1107_v37, %v1109_v36  ;;  %1184 = vmatpush.bf16.msrb.mxu0 %v1123_v40  ;;  %v1230_v55 = vpop.permute.xlu2 %1229  ;;  %v4153_v37 = vld [vmem:[%s5648_s3 + $0x38] sm:$0xff] }
  0xe8   : > { %3704 = vmatmul.msk.bf16.gmra.mxu3 %vm366_vm0, %v4149_v35  ;;  %1146 = vmatpush.bf16.msra.mxu2 %v1121_v42  ;;  %v4757_v42 = vpop.f32.mrf.mxu3 }
  0xe9   : > { %1165 = vmatpush.bf16.msra.mxu3 %v1122_v47 }
  0xec   : > { %1825 = vrot.lane.b32.xlu0 %v4326_v16, %s4235_s21  ;;  %1827 = vrot.lane.b32.xlu1 %v4298_v3, %s4235_s21 }
  0xed   : > { %v1234_v52 = vpop.permute.xlu1 %1233  ;;  %1815 = vrot.lane.b32.xlu2 %v4321_v14, %s4235_s21 }
  0xee   : > { %v1232_v53 = vpop.permute.xlu0 %1231  ;;  %v1243_v54 = vsel %vm1120_vm3, %v1234_v52, %v1236_v41 }
  0xef   : > { %v1242_v59 = vsel %vm1120_vm3, %v1232_v53, %v1234_v52  ;;  %1282 = vmatpush.bf16.msrb.mxu2 %v1243_v54  ;;  %v1354_v63 = vpop.permute.xlu2 %1353  ;;  %v4769_v53 = vpop.f32.mrf.mxu1 }
  0xf0   : > { %1263 = vmatpush.bf16.msrb.mxu1 %v1242_v59 }
  0xf3   : > { %3706 = vmatmul.msk.bf16.gmra.mxu0 %vm366_vm0, %v4149_v35  ;;  %3708 = vmatmul.msk.bf16.gmra.mxu1 %vm366_vm0, %v4149_v35 }
  0xf4   : > { %1817 = vrot.lane.b32.xlu0 %v4318_v12, %s4235_s21  ;;  %1819 = vrot.lane.b32.xlu1 %v4334_v23, %s4235_s21 }
  0xf5   : > { %v1226_v61 = vpop.permute.xlu1 %1225  ;;  %1829 = vrot.lane.b32.xlu2 %v4351_v30, %s4235_s21 }
  0xf6   : > { %v1224_v62 = vpop.permute.xlu0 %1223 }
  0xf7   : > { %3721 = vmatmul.msk.bf16.vlgmr.msra.gmra.mxu2 %vm366_vm0, %v4150_v60  ;;  %v1239_v1 = vsel %vm1120_vm3, %v1224_v62, %v1226_v61  ;;  %v4715_v10 = vpop.permute.xlu2 %1345 }
  0xf8   : > { %3723 = vmatmul.msk.bf16.vlgmr.msra.gmra.mxu3 %vm366_vm0, %v4150_v60  ;;  %1264 = vmatpush.bf16.msrb.mxu1 %v1239_v1 }
  0xfc   : > { %1942 = vrot.lane.b32.xlu0 %v4347_v29, %s4235_s21  ;;  %1944 = vrot.lane.b32.xlu1 %v4359_v33, %s4235_s21 }
  0xfd   : > { %v1228_v2 = vpop.permute.xlu1 %1227  ;;  %1821 = vrot.lane.b32.xlu2 %v4371_v39, %s4235_s21 }
  0xfe   : > { %v1238_v8 = vpop.permute.xlu0 %1237  ;;  %v1240_v9 = vsel %vm1120_vm3, %v1226_v61, %v1228_v2  ;;  %v1241_v17 = vsel %vm1120_vm3, %v1228_v2, %v1230_v55  ;;  %v4773_v55 = vpop.f32.mrf.mxu0 }
  0xff   : > { %v1244_v11 = vsel %vm1120_vm3, %v1236_v41, %v1238_v8  ;;  %1283 = vmatpush.bf16.msrb.mxu2 %v1240_v9  ;;  %v4734_v25 = vpop.permute.xlu2 %1470  ;;  %v4755_v41 = vpop.f32.mrf.mxu2 }
 0x100   : > { %1301 = vmatpush.bf16.msrb.mxu3 %v1244_v11 }
 0x103   : > { %3725 = vmatmul.msk.bf16.vlgmr.msrb.gmra.mxu0 %vm366_vm0, %v4150_v60  ;;  %3739 = vmatmul.msk.bf16.vlgmr.msrb.gmra.mxu1 %vm366_vm0, %v4152_v15 }
 0x104   : > { %1302 = vmatpush.bf16.msrb.mxu3 %v1241_v17  ;;  %1934 = vrot.lane.b32.xlu0 %v4367_v38, %s4235_s21 }
 0x105   : > { %v1352_v19 = vpop.permute.xlu1 %1351  ;;  %1936 = vrot.lane.b32.xlu1 %v4380_v45, %s4235_s21  ;;  %1946 = vrot.lane.b32.xlu2 %v4400_v58, %s4235_s21 }
 0x106   : > { %v1350_v21 = vpop.permute.xlu0 %1349  ;;  %v1362_v22 = vsel %vm1357_vm4, %v1352_v19, %v1354_v63 }
 0x107   : > { %3722 = vmatmul.msk.bf16.gmra.mxu2 %vm366_vm0, %v4151_v18  ;;  %v1361_v27 = vsel %vm1357_vm4, %v1350_v21, %v1352_v19  ;;  %1401 = vmatpush.bf16.msra.mxu1 %v1362_v22  ;;  %v4747_v36 = vpop.permute.xlu2 %1462 }
 0x108   : > { %3724 = vmatmul.msk.bf16.gmra.mxu3 %vm366_vm0, %v4151_v18  ;;  %1382 = vmatpush.bf16.msra.mxu0 %v1361_v27 }
 0x10c   : > { %1948 = vrot.lane.b32.xlu0 %v4396_v57, %s4235_s21 }
 0x10d   : > { %v1344_v31 = vpop.permute.xlu1 %1343  ;;  %1938 = vrot.lane.b32.xlu1 %v4410_v0, %s4235_s21  ;;  %1940 = vrot.lane.b32.xlu2 %v4426_v13, %s4235_s21 }
 0x10e   : > { %v1342_v32 = vpop.permute.xlu0 %1341  ;;  %v1359_v35 = vsel %vm1357_vm4, %v1344_v31, %v4715_v10 }
 0x10f   : > { %v1358_v40 = vsel %vm1357_vm4, %v1342_v32, %v1344_v31  ;;  %1402 = vmatpush.bf16.msra.mxu1 %v1359_v35  ;;  %v4767_v52 = vpop.permute.xlu2 %1464 }
 0x110   : > { %1383 = vmatpush.bf16.msra.mxu0 %v1358_v40  ;;  %v1477_v40 = vsel %vm1357_vm4, %v4747_v36, %v4767_v52 }
 0x113   : > { %3726 = vmatmul.msk.bf16.gmra.mxu0 %vm366_vm0, %v4151_v18  ;;  %3740 = vmatmul.msk.bf16.gmra.mxu1 %vm366_vm0, %v4153_v37 }
 0x114   : > { %2060 = vrot.lane.b32.xlu0 %v4301_v5, %s4236_s12 }
 0x115   : > { %v1469_v47 = vpop.permute.xlu1 %1468  ;;  %2062 = vrot.lane.b32.xlu1 %v4326_v16, %s4236_s12  ;;  %2064 = vrot.lane.b32.xlu2 %v4298_v3, %s4236_s12 }
 0x116   : > { %v1356_v48 = vpop.permute.xlu0 %1355  ;;  %v1479_v49 = vsel %vm1357_vm4, %v1469_v47, %v4734_v25 }
 0x117   : > { %v1363_v54 = vsel %vm1357_vm4, %v1354_v63, %v1356_v48  ;;  %3741 = vmatmul.msk.bf16.vlgmr.msrb.gmra.mxu2 %vm366_vm0, %v4152_v15  ;;  %1500 = vmatpush.bf16.msra.mxu3 %v1479_v49  ;;  %v4788_v8 = vpop.permute.xlu2 %1588 }
 0x118   : > { %3743 = vmatmul.msk.bf16.vlgmr.msrb.gmra.mxu3 %vm366_vm0, %v4152_v15  ;;  %1420 = vmatpush.bf16.msra.mxu2 %v1363_v54 }
 0x11a   : > { %v634_v59 = vpop.f32.mrf.mxu2 }
 0x11b   : > { %v682_v60 = vadd.f32 %v634_v59, %v4587_v34  ;;  %v653_v61 = vpop.f32.mrf.mxu3 }
 0x11c   : > { %v4780_v62 = vadd.f32 %v653_v61, %v4600_v43  ;;  %2052 = vrot.lane.b32.xlu0 %v4321_v14, %s4236_s12  ;;  %v4154_v43 = vld [vmem:[%s5647_s2 + $0x40] sm:$0xff] }
 0x11d   : > { %v1461_v63 = vpop.permute.xlu1 %1460  ;;  %2054 = vrot.lane.b32.xlu1 %v4318_v12, %s4236_s12  ;;  %2056 = vrot.lane.b32.xlu2 %v4334_v23, %s4236_s12 }
 0x11e   : > { %v1348_v1 = vpop.permute.xlu0 %1347  ;;  %v1476_v2 = vsel %vm1357_vm4, %v1461_v63, %v4747_v36 }
 0x11f   : > { %v792_v9 = vpop.f32.mrf.mxu1  ;;  %v1360_v34 = vsel %vm1357_vm4, %v4715_v10, %v1348_v1  ;;  %1501 = vmatpush.bf16.msra.mxu3 %v1476_v2  ;;  %v490_v10 = vadd.f32 %v4604_v46, %v4555_v6  ;;  %v4812_v27 = vpop.permute.xlu2 %1580 }
 0x120   : > { %v672_v11 = vpop.f32.mrf.mxu0  ;;  %v4795_v15 = vadd.f32 %v792_v9, %v682_v60  ;;  %1421 = vmatpush.bf16.msra.mxu2 %v1360_v34 }
 0x121   : > { %v4798_v17 = vadd.f32 %v672_v11, %v4653_v20 }
 0x122   : > { %v636_v18 = vpop.f32.mrf.mxu2 }
 0x123   : > { %v4802_v19 = vpop.f32.mrf.mxu3  ;;  %3757 = vmatmul.msk.bf16.vlgmr.msra.gmra.mxu0 %vm366_vm0, %v4154_v43  ;;  %3759 = vmatmul.msk.bf16.vlgmr.msra.gmra.mxu1 %vm366_vm0, %v4154_v43  ;;  %v685_v20 = vadd.f32 %v636_v18, %v490_v10 }
 0x124   : > { %2066 = vrot.lane.b32.xlu0 %v4351_v30, %s4236_s12 }
 0x125   : > { %v1475_v21 = vpop.permute.xlu1 %1474  ;;  %2179 = vrot.lane.b32.xlu1 %v4347_v29, %s4236_s12  ;;  %2181 = vrot.lane.b32.xlu2 %v4359_v33, %s4236_s12 }
 0x126   : > { %v1473_v22 = vpop.permute.xlu0 %1472 }
 0x127   : > { %3742 = vmatmul.msk.bf16.gmra.mxu2 %vm366_vm0, %v4153_v37  ;;  %v794_v31 = vpop.f32.mrf.mxu1  ;;  %v1480_v32 = vsel %vm1357_vm4, %v4734_v25, %v1473_v22  ;;  %v1481_v35 = vsel %vm1357_vm4, %v1473_v22, %v1475_v21  ;;  %v4838_v59 = vpop.permute.xlu2 %1705 }
 0x128   : > { %3744 = vmatmul.msk.bf16.gmra.mxu3 %vm366_vm0, %v4153_v37  ;;  %v4819_v6 = vpop.f32.mrf.mxu0  ;;  %v4821_v46 = vadd.f32 %v794_v31, %v685_v20  ;;  %1519 = vmatpush.bf16.msrb.mxu0 %v1480_v32 }
 0x129   : > { %1538 = vmatpush.bf16.msrb.mxu1 %v1481_v35 }
 0x12a   : > { %v639_v47 = vpop.f32.mrf.mxu2 }
 0x12b   : > { %v688_v25 = vadd.f32 %v639_v47, %v4620_v56  ;;  %v658_v48 = vpop.f32.mrf.mxu3  ;;  %v509_v47 = vadd.f32 %v4615_v51, %v4602_v44 }
 0x12c   : > { %v4830_v37 = vadd.f32 %v658_v48, %v4634_v4  ;;  %1520 = vmatpush.bf16.msrb.mxu0 %v1477_v40  ;;  %2058 = vrot.lane.b32.xlu0 %v4371_v39, %s4236_s12  ;;  %v4843_v4 = vld [vmem:[%s5647_s2 + $0x48] sm:$0xff] }
 0x12d   : > { %v1587_v49 = vpop.permute.xlu1 %1586  ;;  %2171 = vrot.lane.b32.xlu1 %v4367_v38, %s4236_s12  ;;  %2173 = vrot.lane.b32.xlu2 %v4380_v45, %s4236_s12 }
 0x12e   : > { %v1467_v36 = vpop.permute.xlu0 %1466  ;;  %v1598_v54 = vsel %vm1594_vm5, %v1587_v49, %v4788_v8 }
 0x12f   : > { %v797_v56 = vpop.f32.mrf.mxu1  ;;  %v1478_v60 = vsel %vm1357_vm4, %v4767_v52, %v1467_v36  ;;  %1619 = vmatpush.bf16.msrb.mxu2 %v1598_v54  ;;  %v495_v52 = vadd.f32 %v4757_v42, %v4582_v26  ;;  %v4874_v42 = vpop.permute.xlu2 %1697 }
 0x130   : > { %v677_v61 = vpop.f32.mrf.mxu0  ;;  %v4847_v63 = vadd.f32 %v797_v56, %v688_v25  ;;  %1539 = vmatpush.bf16.msrb.mxu1 %v1478_v60 }
 0x131   : > { %v4850_v1 = vadd.f32 %v677_v61, %v4684_v50  ;;  %v4156_v50 = vld [vmem:[%s5648_s3 + $0x40] sm:$0xff] }
 0x132   : > { %v641_v2 = vpop.f32.mrf.mxu2 }
 0x133   : > { %v4854_v9 = vpop.f32.mrf.mxu3  ;;  %3758 = vmatmul.msk.bf16.gmra.mxu0 %vm366_vm0, %v4843_v4  ;;  %3760 = vmatmul.msk.bf16.gmra.mxu1 %vm366_vm0, %v4843_v4  ;;  %v691_v34 = vadd.f32 %v641_v2, %v495_v52 }
 0x134   : > { %2183 = vrot.lane.b32.xlu0 %v4400_v58, %s4236_s12 }
 0x135   : > { %2185 = vrot.lane.b32.xlu1 %v4396_v57, %s4236_s12  ;;  %2175 = vrot.lane.b32.xlu2 %v4410_v0, %s4236_s12 }
 0x136   : > { %v1579_v11 = vpop.permute.xlu1 %1578  ;;  %v1591_v18 = vpop.permute.xlu0 %1590 }
 0x137   : > { %3761 = vmatmul.msk.bf16.vlgmr.msra.gmra.mxu2 %vm366_vm0, %v4154_v43  ;;  %v799_v10 = vpop.f32.mrf.mxu1  ;;  %v1599_v21 = vsel %vm1594_vm5, %v4788_v8, %v1591_v18  ;;  %v1595_v26 = vsel %vm1594_vm5, %v1579_v11, %v4812_v27  ;;  %v1712_v48 = vpop.permute.xlu2 %1711 }
 0x138   : > { %3775 = vmatmul.msk.bf16.vlgmr.msra.gmra.mxu3 %vm366_vm0, %v4156_v50  ;;  %v4877_v20 = vpop.f32.mrf.mxu0  ;;  %v4879_v22 = vadd.f32 %v799_v10, %v691_v34  ;;  %1620 = vmatpush.bf16.msrb.mxu2 %v1595_v26 }
 0x139   : > { %1638 = vmatpush.bf16.msrb.mxu3 %v1599_v21 }
 0x13a   : > { %v811_v43 = vpop.f32.mrf.mxu2 }
 0x13b   : > { %v841_v31 = vadd.f32 %v811_v43, %v4780_v62  ;;  %v830_v8 = vpop.f32.mrf.mxu3 }
 0x13c   : > { %v4885_v32 = vadd.f32 %v830_v8, %v4798_v17  ;;  %2177 = vrot.lane.b32.xlu0 %v4426_v13, %s4236_s12  ;;  %v528_v17 = vadd.f32 %v4666_v28, %v4661_v24  ;;  %v4157_v28 = vld [vmem:[%s5648_s3 + $0x48] sm:$0xff] }
 0x13d   : > { %2297 = vrot.lane.b32.xlu1 %v4301_v5, %s4237_s22  ;;  %v686_v5 = vadd.f32 %v4802_v19, %v509_v47  ;;  %2299 = vrot.lane.b32.xlu2 %v4326_v16, %s4237_s22 }
 0x13e   : > { %v1593_v35 = vpop.permute.xlu1 %1592  ;;  %v1583_v40 = vpop.permute.xlu0 %1582  ;;  %v687_v44 = vadd.f32 %v4819_v6, %v528_v17 }
 0x13f   : > { %v1600_v25 = vsel %vm1594_vm5, %v1591_v18, %v1593_v35  ;;  %v1596_v62 = vsel %vm1594_vm5, %v4812_v27, %v1583_v40  ;;  %v4923_v61 = vpop.permute.xlu2 %1823  ;;  %v514_v18 = vadd.f32 %v4773_v55, %v4636_v7 }
 0x140   : > { %v911_v49 = vpop.f32.mrf.mxu0  ;;  %v930_v36 = vpop.f32.mrf.mxu1  ;;  %1657 = vmatpush.bf16.msra.mxu0 %v1600_v25  ;;  %1639 = vmatpush.bf16.msrb.mxu3 %v1596_v62 }
 0x141   : > { %v4900_v54 = vadd.f32 %v911_v49, %v4795_v15  ;;  %v4902_v56 = vadd.f32 %v930_v36, %v841_v31 }
 0x142   : > { %v813_v51 = vpop.f32.mrf.mxu2 }
 0x143   : > { %v844_v27 = vadd.f32 %v813_v51, %v686_v5  ;;  %v832_v60 = vpop.f32.mrf.mxu3  ;;  %3777 = vmatmul.msk.bf16.vlgmr.msrb.gmra.mxu0 %vm366_vm0, %v4156_v50  ;;  %3779 = vmatmul.msk.bf16.vlgmr.msrb.gmra.mxu1 %vm366_vm0, %v4156_v50 }
 0x144   : > { %v4909_v24 = vadd.f32 %v832_v60, %v687_v44  ;;  %2301 = vrot.lane.b32.xlu0 %v4298_v3, %s4237_s22 }
 0x145   : > { %2289 = vrot.lane.b32.xlu1 %v4321_v14, %s4237_s22  ;;  %2291 = vrot.lane.b32.xlu2 %v4318_v12, %s4237_s22 }
 0x146   : > { %v1585_v16 = vpop.permute.xlu1 %1584  ;;  %v1708_v15 = vpop.permute.xlu0 %1707 }
 0x147   : > { %3762 = vmatmul.msk.bf16.gmra.mxu2 %vm366_vm0, %v4843_v4  ;;  %v1716_v19 = vsel %vm1594_vm5, %v4838_v59, %v1708_v15  ;;  %v1597_v6 = vsel %vm1594_vm5, %v1583_v40, %v1585_v16 }
 0x148   : > { %3776 = vmatmul.msk.bf16.gmra.mxu3 %vm366_vm0, %v4157_v28  ;;  %v913_v2 = vpop.f32.mrf.mxu0  ;;  %v932_v52 = vpop.f32.mrf.mxu1  ;;  %1658 = vmatpush.bf16.msra.mxu0 %v1597_v6 }
 0x149   : > { %v4927_v3 = vadd.f32 %v913_v2, %v4821_v46  ;;  %v4929_v14 = vadd.f32 %v932_v52, %v844_v27  ;;  %1737 = vmatpush.bf16.msra.mxu1 %v1716_v19 }
 0x14a   : > { %v816_v4 = vpop.f32.mrf.mxu2 }
 0x14b   : > { %v847_v59 = vadd.f32 %v816_v4, %v4830_v37  ;;  %v835_v50 = vpop.f32.mrf.mxu3 }
 0x14c   : > { %v4935_v34 = vadd.f32 %v835_v50, %v4850_v1  ;;  %2293 = vrot.lane.b32.xlu0 %v4334_v23, %s4237_s22  ;;  %v4947_v1 = vpop.permute.xlu2 %1815  ;;  %v533_v23 = vadd.f32 %v4769_v53, %v4755_v41  ;;  %v4158_v53 = vld [vmem:[%s5647_s2 + $0x50] sm:$0xff] }
 0x14d   : > { %2303 = vrot.lane.b32.xlu1 %v4351_v30, %s4237_s22  ;;  %v692_v30 = vadd.f32 %v4854_v9, %v514_v18  ;;  %2416 = vrot.lane.b32.xlu2 %v4347_v29, %s4237_s22  ;;  %v4161_v18 = vld [vmem:[%s5648_s3 + $0x58] sm:$0xff] }
 0x14e   : > { %v1710_v46 = vpop.permute.xlu1 %1709  ;;  %v1700_v11 = vpop.permute.xlu0 %1699 }
 0x14f   : > { %v1717_v12 = vsel %vm1594_vm5, %v1708_v15, %v1710_v46  ;;  %v1718_v10 = vsel %vm1594_vm5, %v1710_v46, %v1712_v48  ;;  %v1713_v37 = vsel %vm1594_vm5, %v4874_v42, %v1700_v11  ;;  %v693_v42 = vadd.f32 %v4877_v20, %v533_v23 }
 0x150   : > { %v916_v21 = vpop.f32.mrf.mxu0  ;;  %v935_v26 = vpop.f32.mrf.mxu1  ;;  %1756 = vmatpush.bf16.msra.mxu2 %v1717_v12  ;;  %1738 = vmatpush.bf16.msra.mxu1 %v1713_v37 }
 0x151   : > { %v4953_v7 = vadd.f32 %v916_v21, %v4847_v63  ;;  %v4955_v55 = vadd.f32 %v935_v26, %v847_v59  ;;  %1775 = vmatpush.bf16.msra.mxu3 %v1718_v10 }
 0x152   : > { %v818_v43 = vpop.f32.mrf.mxu2 }
 0x153   : > { %v850_v31 = vadd.f32 %v818_v43, %v692_v30  ;;  %v837_v41 = vpop.f32.mrf.mxu3  ;;  %3778 = vmatmul.msk.bf16.gmra.mxu0 %vm366_vm0, %v4157_v28  ;;  %3780 = vmatmul.msk.bf16.gmra.mxu1 %vm366_vm0, %v4157_v28  ;;  %v4159_v28 = vld [vmem:[%s5647_s2 + $0x58] sm:$0xff] }
 0x154   : > { %v4965_v63 = vadd.f32 %v837_v41, %v693_v42  ;;  %2418 = vrot.lane.b32.xlu0 %v4359_v33, %s4237_s22  ;;  %v1830_v25 = vpop.permute.xlu2 %1829 }
 0x155   : > { %2295 = vrot.lane.b32.xlu1 %v4371_v39, %s4237_s22  ;;  %2408 = vrot.lane.b32.xlu2 %v4367_v38, %s4237_s22  ;;  %v4160_v38 = vld [vmem:[%s5648_s3 + $0x50] sm:$0xff] }
 0x156   : > { %v1702_v29 = vpop.permute.xlu0 %1701  ;;  %v1704_v9 = vpop.permute.xlu1 %1703 }
 0x157   : > { %3793 = vmatmul.msk.bf16.vlgmr.msrb.gmra.mxu2 %vm366_vm0, %v4158_v53  ;;  %v1714_v20 = vsel %vm1594_vm5, %v1700_v11, %v1702_v29  ;;  %v1715_v8 = vsel %vm1594_vm5, %v1702_v29, %v1704_v9 }
 0x158   : > { %3795 = vmatmul.msk.bf16.vlgmr.msrb.gmra.mxu3 %vm366_vm0, %v4158_v53  ;;  %v918_v35 = vpop.f32.mrf.mxu0  ;;  %v937_v40 = vpop.f32.mrf.mxu1  ;;  %1757 = vmatpush.bf16.msra.mxu2 %v1714_v20 }
 0x159   : > { %v4976_v47 = vadd.f32 %v918_v35, %v4879_v22  ;;  %v4978_v33 = vadd.f32 %v937_v40, %v850_v31  ;;  %1776 = vmatpush.bf16.msra.mxu3 %v1715_v8 }
 0x15a   : > { %v949_v39 = vpop.f32.mrf.mxu2 }
 0x15b   : > { %v961_v62 = vadd.f32 %v949_v39, %v4885_v32  ;;  %v1029_v48 = vpop.f32.mrf.mxu3 }
 0x15c   : > { %v4984_v17 = vadd.f32 %v1029_v48, %v4900_v54  ;;  %2410 = vrot.lane.b32.xlu0 %v4380_v45, %s4237_s22  ;;  %v1822_v16 = vpop.permute.xlu2 %1821 }
 0x15d   : > { %2420 = vrot.lane.b32.xlu1 %v4400_v58, %s4237_s22  ;;  %2422 = vrot.lane.b32.xlu2 %v4396_v57, %s4237_s22 }
 0x15e   : > { %v1826_v22 = vpop.permute.xlu0 %1825  ;;  %v1828_v49 = vpop.permute.xlu1 %1827 }
 0x15f   : > { %v1835_v32 = vsel %vm1831_vm6, %v4923_v61, %v1826_v22  ;;  %v1836_v36 = vsel %vm1831_vm6, %v1826_v22, %v1828_v49  ;;  %v1837_v5 = vsel %vm1831_vm6, %v1828_v49, %v1830_v25 }
 0x160   : > { %v1048_v54 = vpop.f32.mrf.mxu0  ;;  %v1067_v44 = vpop.f32.mrf.mxu1  ;;  %1856 = vmatpush.bf16.msrb.mxu0 %v1835_v32  ;;  %1875 = vmatpush.bf16.msrb.mxu1 %v1836_v36 }
 0x161   : > { %v4998_v45 = vadd.f32 %v1048_v54, %v4902_v56  ;;  %v5000_v58 = vadd.f32 %v1067_v44, %v961_v62  ;;  %1894 = vmatpush.bf16.msrb.mxu2 %v1837_v5 }
 0x162   : > { %v951_v51 = vpop.f32.mrf.mxu2 }
 0x163   : > { %v964_v27 = vadd.f32 %v951_v51, %v4909_v24  ;;  %v1031_v60 = vpop.f32.mrf.mxu3  ;;  %3797 = vmatmul.msk.bf16.vlgmr.msra.gmra.mxu0 %vm366_vm0, %v4158_v53  ;;  %3811 = vmatmul.msk.bf16.vlgmr.msra.gmra.mxu1 %vm366_vm0, %v4160_v38 }
 0x164   : > { %v5011_v56 = vadd.f32 %v1031_v60, %v4927_v3  ;;  %2412 = vrot.lane.b32.xlu0 %v4410_v0, %s4237_s22  ;;  %v1947_v50 = vpop.permute.xlu2 %1946 }
 0x165   : > { %2414 = vrot.lane.b32.xlu1 %v4426_v13, %s4237_s22 }
 0x166   : > { %v1818_v57 = vpop.permute.xlu0 %1817  ;;  %v1820_v24 = vpop.permute.xlu1 %1819 }
 0x167   : > { %3794 = vmatmul.msk.bf16.gmra.mxu2 %vm366_vm0, %v4159_v28  ;;  %v1832_v15 = vsel %vm1831_vm6, %v4947_v1, %v1818_v57  ;;  %v1833_v19 = vsel %vm1831_vm6, %v1818_v57, %v1820_v24  ;;  %v1834_v6 = vsel %vm1831_vm6, %v1820_v24, %v1822_v16 }
 0x168   : > { %3796 = vmatmul.msk.bf16.gmra.mxu3 %vm366_vm0, %v4159_v28  ;;  %v1050_v61 = vpop.f32.mrf.mxu0  ;;  %v1069_v2 = vpop.f32.mrf.mxu1  ;;  %1857 = vmatpush.bf16.msrb.mxu0 %v1832_v15 }
 0x169   : > { %v1081_v0 = vadd.f32 %v1050_v61, %v4929_v14  ;;  %v5024_v52 = vadd.f32 %v1069_v2, %v964_v27  ;;  %1876 = vmatpush.bf16.msrb.mxu1 %v1833_v19  ;;  %1895 = vmatpush.bf16.msrb.mxu2 %v1834_v6  ;;  %v4163_v6 = vld [vmem:[%s5647_s2 + $0x68] sm:$0xff] }
 0x16a   : > { %v954_v13 = vpop.f32.mrf.mxu2 }
 0x16b   : > { %v967_v3 = vadd.f32 %v954_v13, %v4935_v34  ;;  %v1034_v4 = vpop.f32.mrf.mxu3 }
 0x16c   : > { %v5028_v59 = vadd.f32 %v1034_v4, %v4953_v7  ;;  %v1941_v7 = vpop.permute.xlu2 %1940 }
 0x16e   : > { %v1943_v46 = vpop.permute.xlu0 %1942  ;;  %v1945_v11 = vpop.permute.xlu1 %1944 }
 0x16f   : > { %v1953_v14 = vsel %vm1831_vm6, %v1943_v46, %v1945_v11  ;;  %v1954_v12 = vsel %vm1831_vm6, %v1945_v11, %v1947_v50 }
 0x170   : > { %v1053_v10 = vpop.f32.mrf.mxu0  ;;  %v1072_v37 = vpop.f32.mrf.mxu1  ;;  %1974 = vmatpush.bf16.msrb.mxu3 %v1953_v14  ;;  %1993 = vmatpush.bf16.msra.mxu0 %v1954_v12  ;;  %v4164_v14 = vld [vmem:[%s5648_s3 + $0x60] sm:$0xff] }
 0x171   : > { %v1084_v34 = vadd.f32 %v1053_v10, %v4955_v55  ;;  %v5036_v1 = vadd.f32 %v1072_v37, %v967_v3 }
 0x172   : > { %v956_v23 = vpop.f32.mrf.mxu2 }
 0x173   : > { %v970_v21 = vadd.f32 %v956_v23, %v4965_v63  ;;  %v1036_v26 = vpop.f32.mrf.mxu3  ;;  %3798 = vmatmul.msk.bf16.gmra.mxu0 %vm366_vm0, %v4159_v28  ;;  %3812 = vmatmul.msk.bf16.gmra.mxu1 %vm366_vm0, %v4161_v18 }
 0x174   : > { %v5042_v30 = vadd.f32 %v1036_v26, %v4976_v47  ;;  %v2065_v35 = vpop.permute.xlu2 %2064  ;;  %v4162_v47 = vld [vmem:[%s5647_s2 + $0x60] sm:$0xff] }
 0x176   : > { %v1935_v42 = vpop.permute.xlu0 %1934 }
 0x177   : > { %3813 = vmatmul.msk.bf16.vlgmr.msra.gmra.mxu2 %vm366_vm0, %v4160_v38  ;;  %v1937_v43 = vpop.permute.xlu1 %1936 }
 0x178   : > { %3815 = vmatmul.msk.bf16.vlgmr.msra.gmra.mxu3 %vm366_vm0, %v4160_v38  ;;  %v1055_v55 = vpop.f32.mrf.mxu0  ;;  %v1074_v31 = vpop.f32.mrf.mxu1  ;;  %v1950_v41 = vsel %vm1831_vm6, %v1935_v42, %v1937_v43 }
 0x179   : > { %v1087_v53 = vadd.f32 %v1055_v55, %v4978_v33  ;;  %v5048_v63 = vadd.f32 %v1074_v31, %v970_v21  ;;  %1975 = vmatpush.bf16.msrb.mxu3 %v1950_v41 }
 0x17a   : > { %v1148_v29 = vpop.f32.mrf.mxu2 }
 0x17b   : > { %v1196_v9 = vadd.f32 %v1148_v29, %v4984_v17  ;;  %v1167_v20 = vpop.f32.mrf.mxu3 }
 0x17c   : > { %v5052_v8 = vadd.f32 %v1167_v20, %v4998_v45  ;;  %v2057_v45 = vpop.permute.xlu2 %2056 }
 0x17e   : > { %v1949_v40 = vpop.permute.xlu0 %1948 }
 0x17f   : > { %v1955_v39 = vsel %vm1831_vm6, %v1947_v50, %v1949_v40  ;;  %v1939_v25 = vpop.permute.xlu1 %1938 }
 0x180   : > { %v1186_v33 = vpop.f32.mrf.mxu0  ;;  %v1266_v62 = vpop.f32.mrf.mxu1  ;;  %v1951_v48 = vsel %vm1831_vm6, %v1937_v43, %v1939_v25  ;;  %2012 = vmatpush.bf16.msra.mxu1 %v1955_v39  ;;  %v1952_v49 = vsel %vm1831_vm6, %v1939_v25, %v1941_v7  ;;  %v4165_v25 = vld [vmem:[%s5648_s3 + $0x68] sm:$0xff] }
 0x181   : > { %v5060_v17 = vadd.f32 %v1186_v33, %v5000_v58  ;;  %v5062_v22 = vadd.f32 %v1266_v62, %v1196_v9  ;;  %1994 = vmatpush.bf16.msra.mxu0 %v1951_v48 }
 0x182   : > { %v1150_v38 = vpop.f32.mrf.mxu2 }
 0x183   : > { %v1199_v32 = vadd.f32 %v1150_v38, %v5011_v56  ;;  %v1169_v36 = vpop.f32.mrf.mxu3  ;;  %3829 = vmatmul.msk.bf16.vlgmr.msrb.gmra.mxu0 %vm366_vm0, %v4162_v47  ;;  %3831 = vmatmul.msk.bf16.vlgmr.msrb.gmra.mxu1 %vm366_vm0, %v4162_v47 }
 0x184   : > { %v5068_v5 = vadd.f32 %v1169_v36, %v1081_v0  ;;  %2013 = vmatpush.bf16.msra.mxu1 %v1952_v49  ;;  %v2182_v50 = vpop.permute.xlu2 %2181 }
 0x186   : > { %v2061_v54 = vpop.permute.xlu0 %2060 }
 0x187   : > { %3814 = vmatmul.msk.bf16.gmra.mxu2 %vm366_vm0, %v4161_v18  ;;  %v2063_v44 = vpop.permute.xlu1 %2062 }
 0x188   : > { %3816 = vmatmul.msk.bf16.gmra.mxu3 %vm366_vm0, %v4161_v18  ;;  %v1188_v58 = vpop.f32.mrf.mxu0  ;;  %v1268_v51 = vpop.f32.mrf.mxu1  ;;  %v2072_v27 = vsel %vm2068_vm7, %v2061_v54, %v2063_v44  ;;  %v2073_v60 = vsel %vm2068_vm7, %v2063_v44, %v2065_v35 }
 0x189   : > { %v1201_v28 = vadd.f32 %v1188_v58, %v5024_v52  ;;  %v5075_v56 = vadd.f32 %v1268_v51, %v1199_v32  ;;  %2093 = vmatpush.bf16.msra.mxu2 %v2072_v27  ;;  %2112 = vmatpush.bf16.msra.mxu3 %v2073_v60 }
 0x18a   : > { %v1153_v16 = vpop.f32.mrf.mxu2 }
 0x18b   : > { %v1202_v57 = vadd.f32 %v1153_v16, %v5028_v59  ;;  %v1172_v24 = vpop.f32.mrf.mxu3 }
 0x18c   : > { %v5078_v15 = vadd.f32 %v1172_v24, %v1084_v34  ;;  %v2174_v55 = vpop.permute.xlu2 %2173 }
 0x18e   : > { %v2053_v19 = vpop.permute.xlu0 %2052 }
 0x18f   : > { %v2055_v61 = vpop.permute.xlu1 %2054 }
 0x190   : > { %v1191_v2 = vpop.f32.mrf.mxu0  ;;  %v1271_v0 = vpop.f32.mrf.mxu1  ;;  %v2069_v52 = vsel %vm2068_vm7, %v2053_v19, %v2055_v61  ;;  %v2070_v13 = vsel %vm2068_vm7, %v2055_v61, %v2057_v45 }
 0x191   : > { %v5086_v3 = vadd.f32 %v1191_v2, %v5036_v1  ;;  %v5088_v4 = vadd.f32 %v1271_v0, %v1202_v57  ;;  %2094 = vmatpush.bf16.msra.mxu2 %v2069_v52  ;;  %2113 = vmatpush.bf16.msra.mxu3 %v2070_v13 }
 0x192   : > { %v1155_v59 = vpop.f32.mrf.mxu2 }
 0x193   : > { %v1205_v46 = vadd.f32 %v1155_v59, %v5042_v30  ;;  %v1174_v11 = vpop.f32.mrf.mxu3  ;;  %3830 = vmatmul.msk.bf16.gmra.mxu0 %vm366_vm0, %v4163_v6  ;;  %3832 = vmatmul.msk.bf16.gmra.mxu1 %vm366_vm0, %v4163_v6 }
 0x194   : > { %v5093_v18 = vadd.f32 %v1174_v11, %v1087_v53  ;;  %v2176_v62 = vpop.permute.xlu2 %2175 }
 0x196   : > { %v2067_v12 = vpop.permute.xlu0 %2066 }
 0x197   : > { %3833 = vmatmul.msk.bf16.vlgmr.msrb.gmra.mxu2 %vm366_vm0, %v4162_v47  ;;  %v2074_v10 = vsel %vm2068_vm7, %v2065_v35, %v2067_v12  ;;  %v2180_v37 = vpop.permute.xlu1 %2179 }
 0x198   : > { %3847 = vmatmul.msk.bf16.vlgmr.msrb.gmra.mxu3 %vm366_vm0, %v4164_v14  ;;  %v1193_v34 = vpop.f32.mrf.mxu0  ;;  %v1273_v1 = vpop.f32.mrf.mxu1  ;;  %2131 = vmatpush.bf16.msrb.mxu0 %v2074_v10  ;;  %v2190_v23 = vsel %vm2068_vm7, %v2180_v37, %v2182_v50 }
 0x199   : > { %v1207_v21 = vadd.f32 %v1193_v34, %v5048_v63  ;;  %v5103_v26 = vadd.f32 %v1273_v1, %v1205_v46  ;;  %2211 = vmatpush.bf16.msrb.mxu1 %v2190_v23  ;;  %v4168_v34 = vld [vmem:[%s5648_s3 + $0x70] sm:$0xff] }
 0x19a   : > { %v1285_v30 = vpop.f32.mrf.mxu2 }
 0x19b   : > { %v1315_v7 = vadd.f32 %v1285_v30, %v5052_v8  ;;  %v1304_v42 = vpop.f32.mrf.mxu3 }
 0x19c   : > { %v5107_v43 = vadd.f32 %v1304_v42, %v5060_v17  ;;  %v2300_v2 = vpop.permute.xlu2 %2299 }
 0x19e   : > { %v2059_v31 = vpop.permute.xlu0 %2058 }
 0x19f   : > { %v2071_v41 = vsel %vm2068_vm7, %v2057_v45, %v2059_v31  ;;  %v2172_v53 = vpop.permute.xlu1 %2171 }
 0x1a0   : > { %v1385_v29 = vpop.f32.mrf.mxu0  ;;  %v1404_v9 = vpop.f32.mrf.mxu1  ;;  %2132 = vmatpush.bf16.msrb.mxu0 %v2071_v41  ;;  %v2187_v63 = vsel %vm2068_vm7, %v2172_v53, %v2174_v55  ;;  %v4167_v53 = vld [vmem:[%s5647_s2 + $0x78] sm:$0xff] }
 0x1a1   : > { %v1433_v20 = vadd.f32 %v1385_v29, %v5062_v22  ;;  %v5112_v35 = vadd.f32 %v1404_v9, %v1315_v7  ;;  %2212 = vmatpush.bf16.msrb.mxu1 %v2187_v63 }
 0x1a2   : > { %v1287_v8 = vpop.f32.mrf.mxu2 }
 0x1a3   : > { %v1318_v40 = vadd.f32 %v1287_v8, %v5068_v5  ;;  %v1306_v47 = vpop.f32.mrf.mxu3  ;;  %3849 = vmatmul.msk.bf16.vlgmr.msra.gmra.mxu0 %vm366_vm0, %v4164_v14  ;;  %3851 = vmatmul.msk.bf16.vlgmr.msra.gmra.mxu1 %vm366_vm0, %v4164_v14  ;;  %v2188_v5 = vsel %vm2068_vm7, %v2174_v55, %v2176_v62 }
 0x1a4   : > { %v5117_v39 = vadd.f32 %v1306_v47, %v1201_v28  ;;  %v2292_v10 = vpop.permute.xlu2 %2291 }
 0x1a6   : > { %v2184_v33 = vpop.permute.xlu0 %2183 }
 0x1a7   : > { %3834 = vmatmul.msk.bf16.gmra.mxu2 %vm366_vm0, %v4163_v6  ;;  %v2191_v48 = vsel %vm2068_vm7, %v2182_v50, %v2184_v33  ;;  %v2186_v17 = vpop.permute.xlu1 %2185  ;;  %v4166_v6 = vld [vmem:[%s5647_s2 + $0x70] sm:$0xff] }
 0x1a8   : > { %3848 = vmatmul.msk.bf16.gmra.mxu3 %vm366_vm0, %v4165_v25  ;;  %v1387_v22 = vpop.f32.mrf.mxu0  ;;  %v1406_v49 = vpop.f32.mrf.mxu1  ;;  %2230 = vmatpush.bf16.msrb.mxu2 %v2191_v48  ;;  %v2192_v38 = vsel %vm2068_vm7, %v2184_v33, %v2186_v17 }
 0x1a9   : > { %v1436_v32 = vadd.f32 %v1387_v22, %v5075_v56  ;;  %v5127_v36 = vadd.f32 %v1406_v49, %v1318_v40  ;;  %2249 = vmatpush.bf16.msrb.mxu3 %v2192_v38  ;;  %v4169_v38 = vld [vmem:[%s5648_s3 + $0x78] sm:$0xff] }
 0x1aa   : > { %v1290_v54 = vpop.f32.mrf.mxu2 }
 0x1ab   : > { %v1321_v44 = vadd.f32 %v1290_v54, %v5078_v15  ;;  %v1309_v45 = vpop.f32.mrf.mxu3 }
 0x1ac   : > { %v5132_v58 = vadd.f32 %v1309_v45, %v5086_v3  ;;  %2231 = vmatpush.bf16.msrb.mxu2 %v2188_v5  ;;  %v2417_v9 = vpop.permute.xlu2 %2416 }
 0x1ae   : > { %v2178_v51 = vpop.permute.xlu0 %2177 }
 0x1af   : > { %v2298_v27 = vpop.permute.xlu1 %2297  ;;  %v2189_v16 = vsel %vm2068_vm7, %v2176_v62, %v2178_v51 }
 0x1b0   : > { %v1390_v60 = vpop.f32.mrf.mxu0  ;;  %v1409_v28 = vpop.f32.mrf.mxu1  ;;  %2250 = vmatpush.bf16.msrb.mxu3 %v2189_v16  ;;  %v2309_v0 = vsel %vm2305_vm8, %v2298_v27, %v2300_v2 }
 0x1b1   : > { %v5136_v56 = vadd.f32 %v1390_v60, %v5088_v4  ;;  %v5138_v57 = vadd.f32 %v1409_v28, %v1321_v44  ;;  %2330 = vmatpush.bf16.msra.mxu0 %v2309_v0 }
 0x1b2   : > { %v1292_v24 = vpop.f32.mrf.mxu2 }
 0x1b3   : > { %v1324_v15 = vadd.f32 %v1292_v24, %v5093_v18  ;;  %v1311_v19 = vpop.f32.mrf.mxu3  ;;  %3850 = vmatmul.msk.bf16.gmra.mxu0 %vm366_vm0, %v4165_v25  ;;  %3852 = vmatmul.msk.bf16.gmra.mxu1 %vm366_vm0, %v4165_v25 }
 0x1b4   : > { %v5146_v61 = vadd.f32 %v1311_v19, %v1207_v21  ;;  %v2409_v22 = vpop.permute.xlu2 %2408 }
 0x1b6   : > { %v2302_v52 = vpop.permute.xlu0 %2301 }
 0x1b7   : > { %3865 = vmatmul.msk.bf16.vlgmr.msra.gmra.mxu2 %vm366_vm0, %v4166_v6  ;;  %v2290_v13 = vpop.permute.xlu1 %2289  ;;  %v2310_v3 = vsel %vm2305_vm8, %v2300_v2, %v2302_v52 }
 0x1b8   : > { %3867 = vmatmul.msk.bf16.vlgmr.msra.gmra.mxu3 %vm366_vm0, %v4166_v6  ;;  %v1392_v4 = vpop.f32.mrf.mxu0  ;;  %v1411_v59 = vpop.f32.mrf.mxu1  ;;  %2349 = vmatpush.bf16.msra.mxu1 %v2310_v3 }
 0x1b9   : > { %v1442_v50 = vadd.f32 %v1392_v4, %v5103_v26  ;;  %v5153_v46 = vadd.f32 %v1411_v59, %v1324_v15  ;;  %v2306_v26 = vsel %vm2305_vm8, %v2290_v13, %v2292_v10  ;;  %v4170_v4 = vld [vmem:[%s5647_s2 + $0x80] sm:$0xff] }
 0x1ba   : > { %v1423_v11 = vpop.f32.mrf.mxu2  ;;  %2331 = vmatpush.bf16.msra.mxu0 %v2306_v26 }
 0x1bb   : > { %v1435_v18 = vadd.f32 %v1423_v11, %v5107_v43  ;;  %v1503_v14 = vpop.f32.mrf.mxu3 }
 0x1bc   : > { %v5156_v12 = vadd.f32 %v1503_v14, %v1433_v20  ;;  %v2423_v16 = vpop.permute.xlu2 %2422 }
 0x1be   : > { %v2294_v37 = vpop.permute.xlu0 %2293 }
 0x1bf   : > { %v2304_v1 = vpop.permute.xlu1 %2303  ;;  %v2307_v7 = vsel %vm2305_vm8, %v2292_v10, %v2294_v37 }
 0x1c0   : > { %v1522_v23 = vpop.f32.mrf.mxu0  ;;  %v1541_v21 = vpop.f32.mrf.mxu1  ;;  %v2311_v30 = vsel %vm2305_vm8, %v2302_v52, %v2304_v1  ;;  %2350 = vmatpush.bf16.msra.mxu1 %v2307_v7  ;;  %v4171_v7 = vld [vmem:[%s5647_s2 + $0x88] sm:$0xff] }
 0x1c1   : > { %v1552_v42 = vadd.f32 %v1522_v23, %v5112_v35  ;;  %v5165_v43 = vadd.f32 %v1541_v21, %v1435_v18  ;;  %2368 = vmatpush.bf16.msra.mxu2 %v2311_v30  ;;  %v4238_v23 = vmov 0  }
 0x1c2   : > { %v1425_v55 = vpop.f32.mrf.mxu2  ;;  %4221 = vset.pattern.permute.xlu1 %v4238_v23  ;;  %4220 = vset.pattern.permute.xlu0 %v4238_v23 }
 0x1c3   : > { %v1438_v31 = vadd.f32 %v1425_v55, %v5117_v39  ;;  %v1505_v41 = vpop.f32.mrf.mxu3  ;;  %3869 = vmatmul.msk.bf16.vlgmr.msrb.gmra.mxu0 %vm366_vm0, %v4166_v6  ;;  %3883 = vmatmul.msk.bf16.vlgmr.msrb.gmra.mxu1 %vm366_vm0, %v4168_v34 }
 0x1c4   : > { %v5173_v29 = vadd.f32 %v1505_v41, %v1436_v32  ;;  %4219 = vset.pattern.permute.xlu2 %v4238_v23 }
 0x1c6   : > { %v2419_v63 = vpop.permute.xlu0 %2418 }
 0x1c7   : > { %3866 = vmatmul.msk.bf16.gmra.mxu2 %vm366_vm0, %v4167_v53  ;;  %v2296_v20 = vpop.permute.xlu1 %2295  ;;  %v2427_v35 = vsel %vm2305_vm8, %v2417_v9, %v2419_v63  ;;  %v4172_v9 = vld [vmem:[%s5648_s3 + $0x80] sm:$0xff] }
 0x1c8   : > { %3868 = vmatmul.msk.bf16.gmra.mxu3 %vm366_vm0, %v4167_v53  ;;  %v1524_v8 = vpop.f32.mrf.mxu0  ;;  %v1543_v40 = vpop.f32.mrf.mxu1  ;;  %v2308_v47 = vsel %vm2305_vm8, %v2294_v37, %v2296_v20 }
 0x1c9   : > { %v5180_v39 = vadd.f32 %v1524_v8, %v5127_v36  ;;  %v5182_v25 = vadd.f32 %v1543_v40, %v1438_v31  ;;  %2369 = vmatpush.bf16.msra.mxu2 %v2308_v47  ;;  %2448 = vmatpush.bf16.msra.mxu3 %v2427_v35 }
 0x1ca   : > { %v1428_v33 = vpop.f32.mrf.mxu2 }
 0x1cb   : > { %v1441_v62 = vadd.f32 %v1428_v33, %v5132_v58  ;;  %v1508_v48 = vpop.f32.mrf.mxu3 }
 0x1cc   : > { %v1557_v17 = vadd.f32 %v1508_v48, %v5136_v56 }
 0x1ce   : > { %v2411_v49 = vpop.permute.xlu0 %2410 }
 0x1cf   : > { %v2421_v32 = vpop.permute.xlu1 %2420  ;;  %v2424_v51 = vsel %vm2305_vm8, %v2409_v22, %v2411_v49  ;;  %v2514_v22 = vld [vmem:[%s5649_s4 + $0x18] sm:$0xff] }
 0x1d0   : > { %v1527_v5 = vpop.f32.mrf.mxu0  ;;  %v1546_v36 = vpop.f32.mrf.mxu1  ;;  %v2428_v54 = vsel %vm2305_vm8, %v2419_v63, %v2421_v32  ;;  %2449 = vmatpush.bf16.msra.mxu3 %v2424_v51  ;;  %v2429_v56 = vsel %vm2305_vm8, %v2421_v32, %v2423_v16  ;;  %2532 = vperm.xlu0 %4220, %v2514_v22  }
 0x1d1   : > { %v1558_v44 = vadd.f32 %v1527_v5, %v5138_v57  ;;  %v1559_v45 = vadd.f32 %v1546_v36, %v1441_v62  ;;  %2467 = vmatpush.bf16.msrb.mxu0 %v2428_v54  ;;  %2486 = vmatpush.bf16.msrb.mxu1 %v2429_v56  ;;  %v4173_v5 = vld [vmem:[%s5648_s3 + $0x88] sm:$0xff] }
 0x1d2   : > { %v1430_v58 = vpop.f32.mrf.mxu2 }
 0x1d3   : > { %v1444_v27 = vadd.f32 %v1430_v58, %v5146_v61  ;;  %v1510_v60 = vpop.f32.mrf.mxu3  ;;  %3870 = vmatmul.msk.bf16.gmra.mxu0 %vm366_vm0, %v4167_v53  ;;  %3884 = vmatmul.msk.bf16.gmra.mxu1 %vm366_vm0, %v4169_v38 }
 0x1d4   : > { %v5195_v28 = vadd.f32 %v1510_v60, %v1442_v50 }
 0x1d6   : > { %v2413_v24 = vpop.permute.xlu0 %2412 }
 0x1d7   : > { %3885 = vmatmul.msk.bf16.vlgmr.msrb.gmra.mxu2 %vm366_vm0, %v4168_v34  ;;  %v2425_v19 = vsel %vm2305_vm8, %v2411_v49, %v2413_v24  ;;  %v2415_v3 = vpop.permute.xlu1 %2414  ;;  %v2513_v49 = vld [vmem:[%s5649_s4 + $0x10] sm:$0xff] }
 0x1d8   : > { %3887 = vmatmul.msk.bf16.vlgmr.msrb.gmra.mxu3 %vm366_vm0, %v4168_v34  ;;  %v1529_v57 = vpop.f32.mrf.mxu0  ;;  %v1548_v15 = vpop.f32.mrf.mxu1  ;;  %2468 = vmatpush.bf16.msrb.mxu0 %v2425_v19  ;;  %v2426_v11 = vsel %vm2305_vm8, %v2413_v24, %v2415_v3  ;;  %v2511_v34 = vld [vmem:[%s5649_s4] sm:$0xff] }
 0x1d9   : > { %v5202_v6 = vadd.f32 %v1529_v57, %v5153_v46  ;;  %v5204_v61 = vadd.f32 %v1548_v15, %v1444_v27  ;;  %2487 = vmatpush.bf16.msrb.mxu1 %v2426_v11  ;;  %2517 = vperm.xlu1 %4221, %v2511_v34  }
 0x1da   : > { %v1622_v2 = vpop.f32.mrf.mxu2  ;;  %2527 = vperm.xlu2 %4219, %v2513_v49  }
 0x1db   : > { %v1670_v0 = vadd.f32 %v1622_v2, %v5156_v12  ;;  %v1641_v52 = vpop.f32.mrf.mxu3 }
 0x1dc   : > { %v1671_v13 = vadd.f32 %v1641_v52, %v1552_v42 }
 0x1e0   : > { %v1660_v59 = vpop.f32.mrf.mxu0  ;;  %v1740_v50 = vpop.f32.mrf.mxu1 }
 0x1e1   : > { %v1672_v46 = vadd.f32 %v1660_v59, %v5165_v43  ;;  %v1788_v18 = vadd.f32 %v1740_v50, %v1670_v0 }
 0x1e2   : > { %v5212_v14 = vpop.f32.mrf.mxu2 }
 0x1e3   : > { %v5214_v10 = vpop.f32.mrf.mxu3  ;;  %3901 = vmatmul.msk.bf16.vlgmr.msra.gmra.mxu0 %vm366_vm0, %v4170_v4  ;;  %3903 = vmatmul.msk.bf16.vlgmr.msra.gmra.mxu1 %vm366_vm0, %v4170_v4 }
 0x1e7   : > { %3886 = vmatmul.msk.bf16.gmra.mxu2 %vm366_vm0, %v4169_v38 }
 0x1e8   : > { %3888 = vmatmul.msk.bf16.gmra.mxu3 %vm366_vm0, %v4169_v38  ;;  %v5220_v12 = vpop.f32.mrf.mxu0  ;;  %v5222_v37 = vpop.f32.mrf.mxu1 }
 0x1ea   : > { %v1627_v1 = vpop.f32.mrf.mxu2 }
 0x1eb   : > { %v1676_v21 = vadd.f32 %v1627_v1, %v1557_v17  ;;  %v1646_v30 = vpop.f32.mrf.mxu3 }
 0x1ec   : > { %v1677_v26 = vadd.f32 %v1646_v30, %v1558_v44  ;;  %v2512_v44 = vld [vmem:[%s5649_s4 + $0x8] sm:$0xff] }
 0x1ed   : > { %2522 = vperm.xlu2 %4219, %v2512_v44  }
 0x1f0   : > { %v1665_v42 = vpop.f32.mrf.mxu0  ;;  %v1745_v43 = vpop.f32.mrf.mxu1 }
 0x1f1   : > { %v1678_v55 = vadd.f32 %v1665_v42, %v1559_v45  ;;  %v1794_v31 = vadd.f32 %v1745_v43, %v1676_v21 }
 0x1f2   : > { %v5230_v41 = vpop.f32.mrf.mxu2 }
 0x1f3   : > { %v5232_v53 = vpop.f32.mrf.mxu3  ;;  %3902 = vmatmul.msk.bf16.gmra.mxu0 %vm366_vm0, %v4171_v7  ;;  %3904 = vmatmul.msk.bf16.gmra.mxu1 %vm366_vm0, %v4171_v7 }
 0x1f7   : > { %3905 = vmatmul.msk.bf16.vlgmr.msra.gmra.mxu2 %vm366_vm0, %v4170_v4 }
 0x1f8   : > { %3919 = vmatmul.msk.bf16.vlgmr.msra.gmra.mxu3 %vm366_vm0, %v4172_v9  ;;  %v5241_v63 = vpop.f32.mrf.mxu0  ;;  %v5243_v20 = vpop.f32.mrf.mxu1 }
 0x1fa   : > { %v1759_v35 = vpop.f32.mrf.mxu2 }
 0x1fb   : > { %v1789_v8 = vadd.f32 %v1759_v35, %v1671_v13  ;;  %v1778_v40 = vpop.f32.mrf.mxu3 }
 0x1fc   : > { %v1790_v47 = vadd.f32 %v1778_v40, %v1672_v46 }
 0x200   : > { %v1859_v33 = vpop.f32.mrf.mxu0  ;;  %v1878_v62 = vpop.f32.mrf.mxu1 }
 0x201   : > { %v1907_v48 = vadd.f32 %v1859_v33, %v1788_v18  ;;  %v1908_v17 = vadd.f32 %v1878_v62, %v1789_v8 }
 0x202   : > { %v5251_v38 = vpop.f32.mrf.mxu2 }
 0x203   : > { %v5253_v32 = vpop.f32.mrf.mxu3  ;;  %3921 = vmatmul.msk.bf16.vlgmr.msrb.gmra.mxu0 %vm366_vm0, %v4172_v9  ;;  %3923 = vmatmul.msk.bf16.vlgmr.msrb.gmra.mxu1 %vm366_vm0, %v4172_v9 }
 0x207   : > { %3906 = vmatmul.msk.bf16.gmra.mxu2 %vm366_vm0, %v4171_v7 }
 0x208   : > { %3920 = vmatmul.msk.bf16.gmra.mxu3 %vm366_vm0, %v4173_v5  ;;  %v5262_v36 = vpop.f32.mrf.mxu0  ;;  %v5264_v54 = vpop.f32.mrf.mxu1 }
 0x20a   : > { %v1764_v45 = vpop.f32.mrf.mxu2 }
 0x20b   : > { %v1795_v51 = vadd.f32 %v1764_v45, %v1677_v26  ;;  %v1783_v58 = vpop.f32.mrf.mxu3 }
 0x20c   : > { %v1796_v27 = vadd.f32 %v1783_v58, %v1678_v55 }
 0x210   : > { %v1864_v60 = vpop.f32.mrf.mxu0  ;;  %v1883_v16 = vpop.f32.mrf.mxu1 }
 0x211   : > { %v1913_v56 = vadd.f32 %v1864_v60, %v1794_v31  ;;  %v1914_v24 = vadd.f32 %v1883_v16, %v1795_v51 }
 0x212   : > { %v5269_v57 = vpop.f32.mrf.mxu2 }
 0x213   : > { %v5271_v15 = vpop.f32.mrf.mxu3  ;;  %3922 = vmatmul.msk.bf16.gmra.mxu0 %vm366_vm0, %v4173_v5  ;;  %3924 = vmatmul.msk.bf16.gmra.mxu1 %vm366_vm0, %v4173_v5 }
 0x218   : > { %v5275_v19 = vpop.f32.mrf.mxu0  ;;  %v5277_v2 = vpop.f32.mrf.mxu1 }
 0x219   : > { %5653 = vst [vmem:[#allocation3_spill] sm:$0xff] %v5277_v2 }
 0x21a   : > { %v1897_v0 = vpop.f32.mrf.mxu2 }
 0x21b   : > { %v1909_v52 = vadd.f32 %v1897_v0, %v1790_v47  ;;  %v1977_v13 = vpop.f32.mrf.mxu3 }
 0x21c   : > { %v2025_v3 = vadd.f32 %v1977_v13, %v1907_v48 }
 0x220   : > { %v1996_v4 = vpop.f32.mrf.mxu0  ;;  %v2015_v59 = vpop.f32.mrf.mxu1 }
 0x221   : > { %v2026_v50 = vadd.f32 %v1996_v4, %v1908_v17  ;;  %v2027_v11 = vadd.f32 %v2015_v59, %v1909_v52 }
 0x222   : > { %v5279_v46 = vpop.f32.mrf.mxu2 }
 0x223   : > { %v1979_v18 = vpop.f32.mrf.mxu3 }
 0x228   : > { %v5281_v34 = vpop.f32.mrf.mxu0  ;;  %v5283_v1 = vpop.f32.mrf.mxu1 }
 0x22a   : > { %v1902_v23 = vpop.f32.mrf.mxu2 }
 0x22b   : > { %v1915_v21 = vadd.f32 %v1902_v23, %v1796_v27  ;;  %v1982_v30 = vpop.f32.mrf.mxu3 }
 0x22c   : > { %v5285_v26 = vadd.f32 %v1982_v30, %v1913_v56 }
 0x230   : > { %v2001_v7 = vpop.f32.mrf.mxu0  ;;  %v2020_v42 = vpop.f32.mrf.mxu1 }
 0x231   : > { %v5287_v43 = vadd.f32 %v2001_v7, %v1914_v24  ;;  %v5289_v55 = vadd.f32 %v2020_v42, %v1915_v21 }
 0x232   : > { %v5291_v31 = vpop.f32.mrf.mxu2 }
 0x233   : > { %5654 = vst [vmem:[#allocation4_spill] sm:$0xff] %v5291_v31  ;;  %v5293_v9 = vpop.f32.mrf.mxu3 }
 0x234   : > { %5655 = vst [vmem:[#allocation5_spill] sm:$0xff] %v5293_v9 }
 0x238   : > { %v5295_v35 = vpop.f32.mrf.mxu0  ;;  %v5297_v8 = vpop.f32.mrf.mxu1 }
 0x239   : > { %5656 = vst [vmem:[#allocation6_spill] sm:$0xff] %v5295_v35 }
 0x23a   : > { %5657 = vst [vmem:[#allocation7_spill] sm:$0xff] %v5297_v8  ;;  %v2096_v40 = vpop.f32.mrf.mxu2 }
 0x23b   : > { %v2115_v47 = vpop.f32.mrf.mxu3  ;;  %v2144_v8 = vadd.f32 %v2096_v40, %v2025_v3 }
 0x240   : > { %v2134_v33 = vpop.f32.mrf.mxu0  ;;  %v2214_v62 = vpop.f32.mrf.mxu1 }
 0x241   : > { %v2262_v2 = vadd.f32 %v2214_v62, %v2144_v8  ;;  %v2146_v9 = vadd.f32 %v2134_v33, %v2027_v11 }
 0x242   : > { %v2098_v48 = vpop.f32.mrf.mxu2 }
 0x243   : > { %v2117_v17 = vpop.f32.mrf.mxu3 }
 0x248   : > { %v2136_v22 = vpop.f32.mrf.mxu0  ;;  %v2216_v49 = vpop.f32.mrf.mxu1 }
 0x24a   : > { %v5299_v5 = vpop.f32.mrf.mxu2 }
 0x24b   : > { %v5301_v44 = vpop.f32.mrf.mxu3 }
 0x250   : > { %v5303_v45 = vpop.f32.mrf.mxu0  ;;  %v5305_v51 = vpop.f32.mrf.mxu1 }
 0x252   : > { %v5307_v58 = vpop.f32.mrf.mxu2 }
 0x253   : > { %5658 = vst [vmem:[#allocation8_spill] sm:$0xff] %v5307_v58  ;;  %v5309_v27 = vpop.f32.mrf.mxu3 }
 0x254   : > { %5659 = vst [vmem:[#allocation9_spill] sm:$0xff] %v5309_v27 }
 0x258   : > { %v5311_v60 = vpop.f32.mrf.mxu0  ;;  %v5313_v16 = vpop.f32.mrf.mxu1 }
 0x259   : > { %5660 = vst [vmem:[#allocation10_spill] sm:$0xff] %v5311_v60 }
 0x25a   : > { %5661 = vst [vmem:[#allocation11_spill] sm:$0xff] %v5313_v16  ;;  %v2233_v56 = vpop.f32.mrf.mxu2  ;;  %v1673_v16 = vadd.f32 %v5212_v14, %v5173_v29 }
 0x25b   : > { %v2252_v24 = vpop.f32.mrf.mxu3 }
 0x25c   : > { %v1791_v31 = vadd.f32 %v5222_v37, %v1673_v16  ;;  %v2264_v62 = vadd.f32 %v2252_v24, %v2146_v9 }
 0x260   : > { %v2333_v0 = vpop.f32.mrf.mxu0  ;;  %v2352_v52 = vpop.f32.mrf.mxu1 }
 0x261   : > { %v2381_v29 = vadd.f32 %v2333_v0, %v2262_v2 }
 0x262   : > { %v2235_v13 = vpop.f32.mrf.mxu2 }
 0x263   : > { %v2254_v4 = vpop.f32.mrf.mxu3 }
 0x268   : > { %v2335_v59 = vpop.f32.mrf.mxu0  ;;  %v2354_v23 = vpop.f32.mrf.mxu1 }
 0x26a   : > { %v5315_v21 = vpop.f32.mrf.mxu2 }
 0x26b   : > { %5662 = vst [vmem:[#allocation12_spill] sm:$0xff] %v5315_v21  ;;  %v5317_v30 = vpop.f32.mrf.mxu3  ;;  %v2145_v21 = vadd.f32 %v2115_v47, %v2026_v50 }
 0x26c   : > { %5663 = vst [vmem:[#allocation13_spill] sm:$0xff] %v5317_v30  ;;  %v1674_v30 = vadd.f32 %v5214_v10, %v5180_v39 }
 0x26d   : > { %v2263_v8 = vadd.f32 %v2233_v56, %v2145_v21 }
 0x26e   : > { %v1792_v3 = vadd.f32 %v5251_v38, %v1674_v30 }
 0x26f   : > { %v2382_v50 = vadd.f32 %v2352_v52, %v2263_v8 }
 0x270   : > { %v5319_v7 = vpop.f32.mrf.mxu0  ;;  %v5321_v42 = vpop.f32.mrf.mxu1  ;;  %v1911_v10 = vadd.f32 %v5264_v54, %v1792_v3 }
 0x271   : > { %5664 = vst [vmem:[#allocation14_spill] sm:$0xff] %v5321_v42  ;;  %v1675_v42 = vadd.f32 %v5220_v12, %v5182_v25  ;;  %v2518_v12 = vpop.permute.xlu1 %2517 }
 0x272   : > { %v5323_v27 = vpop.f32.mrf.mxu2  ;;  %v2029_v2 = vadd.f32 %v5281_v34, %v1911_v10 }
 0x273   : > { %5665 = vst [vmem:[#allocation15_spill] sm:$0xff] %v5323_v27  ;;  %v5325_v60 = vpop.f32.mrf.mxu3  ;;  %v1793_v40 = vadd.f32 %v5253_v32, %v1675_v42 }
 0x274   : > { %5666 = vst [vmem:[#allocation16_spill] sm:$0xff] %v5325_v60  ;;  %v1910_v60 = vadd.f32 %v5262_v36, %v1791_v31  ;;  %v2148_v9 = vadd.f32 %v2117_v17, %v2029_v2 }
 0x275   : > { %v1912_v25 = vadd.f32 %v5279_v46, %v1793_v40 }
 0x276   : > { %v2028_v37 = vadd.f32 %v1979_v18, %v1910_v60 }
 0x277   : > { %v2030_v38 = vadd.f32 %v5283_v1, %v1912_v25  ;;  %v1679_v1 = vadd.f32 %v5230_v41, %v5195_v28 }
 0x278   : > { %v5329_v35 = vpop.f32.mrf.mxu0  ;;  %v5331_v58 = vpop.f32.mrf.mxu1  ;;  %v2147_v36 = vadd.f32 %v2098_v48, %v2028_v37  ;;  %v2266_v48 = vadd.f32 %v2235_v13, %v2148_v9  ;;  %v5676_v9 = vld [vmem:[#allocation7_spill] sm:$0xff] }
 0x279   : > { %5667 = vst [vmem:[#allocation17_spill] sm:$0xff] %v5331_v58  ;;  %v5341_v58 = vpop.permute.xlu2 %2527  ;;  %v2149_v16 = vadd.f32 %v2136_v22, %v2030_v38  ;;  %v1797_v13 = vadd.f32 %v5243_v20, %v1679_v1 }
 0x27a   : > { %v2371_v27 = vpop.f32.mrf.mxu2  ;;  %v2265_v47 = vadd.f32 %v2216_v49, %v2147_v36  ;;  %v2150_v49 = vadd.f32 %v5299_v5, %v5285_v26  ;;  %v2385_v17 = vadd.f32 %v2354_v23, %v2266_v48  ;;  %v1681_v26 = vadd.f32 %v5241_v63, %v5204_v61  ;;  %v5668_v61 = vld [vmem:[#allocation5_spill] sm:$0xff] }
 0x27b   : > { %v2451_v14 = vpop.f32.mrf.mxu3  ;;  %v2383_v11 = vadd.f32 %v2371_v27, %v2264_v62  ;;  %v2267_v52 = vadd.f32 %v2254_v4, %v2149_v16  ;;  %v1916_v5 = vadd.f32 %v5275_v19, %v1797_v13  ;;  %v2151_v23 = vadd.f32 %v5301_v44, %v5287_v43  ;;  %v5669_v19 = vld [vmem:[#allocation12_spill] sm:$0xff] }
 0x27c   : > { %v2499_v39 = vadd.f32 %v2451_v14, %v2381_v29  ;;  %v2384_v54 = vadd.f32 %v2335_v59, %v2265_v47  ;;  %v1680_v14 = vadd.f32 %v5232_v53, %v5202_v6  ;;  %v2268_v40 = vadd.f32 %v5305_v51, %v2150_v49 }
 0x27d   : > { %v2152_v6 = vadd.f32 %v5303_v45, %v5289_v55  ;;  %v1799_v10 = vadd.f32 %v5271_v15, %v1681_v26  ;;  %v2034_v63 = vadd.f32 %v5668_v61, %v1916_v5  ;;  %v2269_v25 = vadd.f32 %v5669_v19, %v2151_v23 }
 0x27e   : > { %v2535_v33 = vadd.f32 %v2518_v12, %v2499_v39  ;;  %v1798_v20 = vadd.f32 %v5269_v57, %v1680_v14  ;;  %v2387_v51 = vadd.f32 %v5319_v7, %v2268_v40  ;;  %v5672_v57 = vld [vmem:[#allocation4_spill] sm:$0xff] }
 0x27f   : > { %v1918_v2 = vadd.f32 %v5672_v57, %v1799_v10  ;;  %v5673_v7 = vld [vmem:[#allocation8_spill] sm:$0xff] }
 0x280   : > { %v2470_v31 = vpop.f32.mrf.mxu0  ;;  %v2489_v32 = vpop.f32.mrf.mxu1  ;;  %v2547_v27 = vmax.f32 %v2535_v33, 0.0  ;;  %v2153_v38 = vadd.f32 %v5673_v7, %v2034_v63 }
 0x281   : > { %v2500_v18 = vadd.f32 %v2470_v31, %v2382_v50  ;;  %v2501_v60 = vadd.f32 %v2489_v32, %v2383_v11  ;;  %v2523_v42 = vpop.permute.xlu2 %2522  ;;  %v5671_v50 = vld [vmem:[#allocation3_spill] sm:$0xff]  ;;  %v5674_v31 = vld [vmem:[#allocation14_spill] sm:$0xff]  ;;  %v2036_v16 = vadd.f32 %v5676_v9, %v1918_v2 }
 0x282   : > { %v2373_v56 = vpop.f32.mrf.mxu2  ;;  %v1917_v11 = vadd.f32 %v5671_v50, %v1798_v20  ;;  %v2388_v32 = vadd.f32 %v5674_v31, %v2269_v25 }
 0x283   : > { %v2536_v24 = vadd.f32 %v2518_v12, %v2500_v18  ;;  %v2537_v46 = vadd.f32 %v2518_v12, %v2501_v60  ;;  %v2453_v0 = vpop.f32.mrf.mxu3  ;;  %v2386_v59 = vadd.f32 %v2373_v56, %v2267_v52  ;;  %v5670_v12 = vld [vmem:[#allocation13_spill] sm:$0xff]  ;;  %v5675_v18 = vld [vmem:[#allocation6_spill] sm:$0xff] }
 0x284   : > { %v2502_v30 = vadd.f32 %v2453_v0, %v2384_v54  ;;  %v2270_v43 = vadd.f32 %v5670_v12, %v2152_v6  ;;  %v2035_v60 = vadd.f32 %v5675_v18, %v1917_v11 }
 0x285   : > { %v2548_v21 = vmax.f32 %v2536_v24, 0.0  ;;  %v2549_v34 = vmax.f32 %v2537_v46, 0.0  ;;  %v5677_v24 = vld [vmem:[#allocation11_spill] sm:$0xff] }
 0x286   : > { %v2538_v37 = vadd.f32 %v2523_v42, %v2502_v30  ;;  %v2271_v46 = vadd.f32 %v5677_v24, %v2153_v38 }
 0x287   : > { %v2559_v22 = vpack.c.bf16 %v2548_v21, %v2547_v27  ;;  %v2560_v29 = vpack.c.bf16 %v2549_v34, %v2549_v34  ;;  %v5678_v27 = vld [vmem:[#allocation9_spill] sm:$0xff]  ;;  %v5679_v34 = vld [vmem:[#allocation10_spill] sm:$0xff] }
 0x288   : > { %v2472_v4 = vpop.f32.mrf.mxu0  ;;  %v2491_v3 = vpop.f32.mrf.mxu1  ;;  %v2550_v44 = vmax.f32 %v2538_v37, 0.0  ;;  %v2154_v21 = vadd.f32 %v5678_v27, %v2035_v60  ;;  %v2155_v30 = vadd.f32 %v5679_v34, %v2036_v16  ;;  %v2390_v1 = vadd.f32 %v5329_v35, %v2271_v46 }
 0x289   : > { %2567 = vst [vmem:[#allocation2] sm:$0xff] %v2559_v22  ;;  %v2503_v28 = vadd.f32 %v2472_v4, %v2385_v17  ;;  %v2504_v41 = vadd.f32 %v2491_v3, %v2386_v59  ;;  %v5680_v22 = vld [vmem:[#allocation15_spill] sm:$0xff]  ;;  %v5681_v59 = vld [vmem:[#allocation16_spill] sm:$0xff] }
 0x28a   : > { %2568 = vst [vmem:[#allocation2 + $0x8] sm:$0xf] %v2560_v29  ;;  %v2376_v53 = vpop.f32.mrf.mxu2  ;;  %v2272_v29 = vadd.f32 %v5680_v22, %v2154_v21  ;;  %v2273_v14 = vadd.f32 %v5681_v59, %v2155_v30  ;;  %v4174_v30 = vld [vmem:[%s5650_s5] sm:$0xff]  ;;  %v4175_v59 = vld [vmem:[%s5650_s5 + $0x8] sm:$0xff] }
 0x28b   : > { %v2539_v8 = vadd.f32 %v2523_v42, %v2503_v28  ;;  %v2540_v62 = vadd.f32 %v2523_v42, %v2504_v41  ;;  %v2456_v39 = vpop.f32.mrf.mxu3  ;;  %v2389_v33 = vadd.f32 %v2376_v53, %v2270_v43  ;;  %v2533_v28 = vpop.permute.xlu0 %2532  ;;  %v5682_v41 = vld [vmem:[#allocation17_spill] sm:$0xff] }
 0x28c   : > { %v2505_v45 = vadd.f32 %v2456_v39, %v2387_v51  ;;  %v2391_v26 = vadd.f32 %v5682_v41, %v2272_v29  ;;  %v3381_v41 = vld [vmem:[%s5651_s6 + $0x10] sm:$0xff] }
 0x28d   : > { %v2551_v36 = vmax.f32 %v2539_v8, 0.0  ;;  %v2552_v55 = vmax.f32 %v2540_v62, 0.0 }
 0x28e   : > { %v2541_v0 = vadd.f32 %v5341_v58, %v2505_v45 }
 0x28f   : > { %v2561_v47 = vpack.c.bf16 %v2551_v36, %v2550_v44  ;;  %v2562_v15 = vpack.c.bf16 %v2552_v55, %v2552_v55 }
 0x290   : > { %v2475_v56 = vpop.f32.mrf.mxu0  ;;  %v2494_v54 = vpop.f32.mrf.mxu1  ;;  %v2553_v4 = vmax.f32 %v2541_v0, 0.0  ;;  %v4176_v60 = vld [vmem:[#allocation2 + $0x4] sm:$0xf]  ;;  %v3939_v24 = vld [vmem:[#allocation2] sm:$0xf] }
 0x291   : > { %2569 = vst [vmem:[#allocation2 + $0xc] sm:$0xff] %v2561_v47  ;;  %v2506_v48 = vadd.f32 %v2475_v56, %v2388_v32  ;;  %v2507_v52 = vadd.f32 %v2494_v54, %v2389_v33  ;;  %v3975_v33 = vld [vmem:[#allocation2] sm:$0xf]  ;;  %v4182_v46 = vld [vmem:[#allocation2 + $0x4] sm:$0xf] }
 0x292   : > { %2570 = vst [vmem:[#allocation2 + $0x14] sm:$0xf] %v2562_v15  ;;  %v2378_v13 = vpop.f32.mrf.mxu2  ;;  %v3947_v0 = vld [vmem:[#allocation2 + $0x8] sm:$0xf] }
 0x293   : > { %v2542_v49 = vadd.f32 %v5341_v58, %v2506_v48  ;;  %v2543_v42 = vadd.f32 %v5341_v58, %v2507_v52  ;;  %v2458_v17 = vpop.f32.mrf.mxu3  ;;  %v2392_v35 = vadd.f32 %v2378_v13, %v2273_v14 }
 0x294   : > { %v2508_v37 = vadd.f32 %v2458_v17, %v2390_v1 }
 0x295   : > { %v2554_v3 = vmax.f32 %v2542_v49, 0.0  ;;  %v2555_v40 = vmax.f32 %v2543_v42, 0.0 }
 0x296   : > { %v2544_v58 = vadd.f32 %v2533_v28, %v2508_v37 }
 0x297   : > { %v2563_v5 = vpack.c.bf16 %v2554_v3, %v2553_v4  ;;  %v2564_v23 = vpack.c.bf16 %v2555_v40, %v2555_v40  ;;  %v4180_v40 = vld [vmem:[%s5650_s5 + $0x10] sm:$0xff] }
 0x298   : > { %v2477_v6 = vpop.f32.mrf.mxu0  ;;  %v2496_v53 = vpop.f32.mrf.mxu1  ;;  %v2556_v39 = vmax.f32 %v2544_v58, 0.0  ;;  %v4177_v47 = vld [vmem:[#allocation2 + $0x8] sm:$0xf0]  ;;  %v3977_v15 = vld [vmem:[#allocation2 + $0xc] sm:$0xf0]  ;;  %v3382_v58 = vld [vmem:[%s5651_s6 + $0x18] sm:$0xff] }
 0x299   : > { %2571 = vst [vmem:[#allocation2 + $0x18] sm:$0xff] %v2563_v5  ;;  %v2509_v20 = vadd.f32 %v2477_v6, %v2391_v26  ;;  %v2510_v51 = vadd.f32 %v2496_v53, %v2392_v35  ;;  %v3976_v18 = vor.u32 %v4177_v47, %v3975_v33  ;;  %v4183_v9 = vld [vmem:[#allocation2 + $0x8] sm:$0xf0]  ;;  %v3941_v16 = vld [vmem:[#allocation2 + $0xc] sm:$0xf0]  ;;  %v3980_v56 = vor.u32 %v4176_v60, %v3977_v15 }
 0x29a   : > { %2572 = vst [vmem:[#allocation2 + $0x20] sm:$0xf] %v2564_v23  ;;  %v4184_v54 = vld [vmem:[#allocation2 + $0x10] sm:$0xf0]  ;;  %v3940_v48 = vor.u32 %v4183_v9, %v3939_v24  ;;  %v3944_v52 = vor.u32 %v4182_v46, %v3941_v16  ;;  %v3380_v26 = vld [vmem:[%s5651_s6 + $0x8] sm:$0xff] }
 0x29b   : > { %v2545_v8 = vadd.f32 %v2533_v28, %v2509_v20  ;;  %v2546_v62 = vadd.f32 %v2533_v28, %v2510_v51  ;;  %v3948_v27 = vor.u32 %v4184_v54, %v3947_v0  ;;  %v3379_v28 = vld [vmem:[%s5651_s6] sm:$0xff]  ;;  %v4189_v47 = vld [vmem:[%s5650_s5 + $0x28] sm:$0xff]  ;;  %v4190_v15 = vld [vmem:[%s5650_s5 + $0x30] sm:$0xff] }
 0x29c   : > { %v4191_v0 = vld [vmem:[%s5650_s5 + $0x38] sm:$0xff] }
 0x29d   : > { %v2557_v10 = vmax.f32 %v2545_v8, 0.0  ;;  %v2558_v61 = vmax.f32 %v2546_v62, 0.0  ;;  %v4181_v62 = vld [vmem:[%s5650_s5 + $0x18] sm:$0xff] }
 0x29f   : > { %v2565_v63 = vpack.c.bf16 %v2557_v10, %v2556_v39  ;;  %v2566_v19 = vpack.c.bf16 %v2558_v61, %v2558_v61 }
 0x2a0   : > { %v3951_v25 = vld [vmem:[#allocation2 + $0x18] sm:$0xf]  ;;  %v4185_v43 = vld [vmem:[#allocation2 + $0x1c] sm:$0xf] }
 0x2a1   : > { %2573 = vst [vmem:[#allocation2 + $0x24] sm:$0xff] %v2565_v63  ;;  %v3959_v12 = vld [vmem:[#allocation2 + $0x20] sm:$0xf]  ;;  %v3983_v44 = vld [vmem:[#allocation2 + $0x18] sm:$0xf] }
 0x2a2   : > { %2574 = vst [vmem:[#allocation2 + $0x2c] sm:$0xf] %v2566_v19  ;;  %v4178_v7 = vld [vmem:[#allocation2 + $0x1c] sm:$0xf] }
 0x2a8   : > { %v4186_v36 = vld [vmem:[#allocation2 + $0x20] sm:$0xf0]  ;;  %v3953_v55 = vld [vmem:[#allocation2 + $0x24] sm:$0xf0] }
 0x2a9   : > { %v4179_v45 = vld [vmem:[#allocation2 + $0x20] sm:$0xf0]  ;;  %v4187_v50 = vld [vmem:[#allocation2 + $0x28] sm:$0xf0]  ;;  %v5384_v11 = vor.u32 %v4186_v36, %v3951_v25  ;;  %v5386_v57 = vor.u32 %v4185_v43, %v3953_v55  ;;  %v3985_v38 = vld [vmem:[#allocation2 + $0x24] sm:$0xf0] }
 0x2aa   : > { %v3984_v2 = vor.u32 %v4179_v45, %v3983_v44  ;;  %v5388_v31 = vor.u32 %v4187_v50, %v3959_v12  ;;  %v3988_v32 = vor.u32 %v4178_v7, %v3985_v38  ;;  %v4188_v36 = vld [vmem:[%s5650_s5 + $0x20] sm:$0xff] }
 0x2ab   : > { %2638 = vrot.lane.b32.xlu1 %v5384_v11, %s4230_s30  ;;  %2640 = vrot.lane.b32.xlu2 %v5386_v57, %s4230_s30 }
 0x2ac   : > { %2642 = vrot.lane.b32.xlu0 %v5388_v31, %s4230_s30  ;;  %2738 = vmatpush.bf16.msra.mxu0 %v3984_v2 }
 0x2ad   : > { %2757 = vmatpush.bf16.msra.mxu1 %v3988_v32 }
 0x2b0   : > { %2739 = vmatpush.bf16.msra.mxu0 %v3976_v18 }
 0x2b1   : > { %2758 = vmatpush.bf16.msra.mxu1 %v3980_v56 }
 0x2b3   : > { %2632 = vrot.lane.b32.xlu1 %v3940_v48, %s4230_s30  ;;  %2634 = vrot.lane.b32.xlu2 %v3944_v52, %s4230_s30 }
 0x2b4   : > { %2636 = vrot.lane.b32.xlu0 %v3948_v27, %s4230_s30  ;;  %3989 = vmatmul.msk.bf16.vlgmr.msra.gmra.mxu0 %vm366_vm0, %v4174_v30 }
 0x2b5   : > { %3991 = vmatmul.msk.bf16.vlgmr.msra.gmra.mxu1 %vm366_vm0, %v4174_v30 }
 0x2bb   : > { %2791 = vrot.lane.b32.xlu1 %v5384_v11, %s4231_s17  ;;  %2793 = vrot.lane.b32.xlu2 %v5386_v57, %s4231_s17 }
 0x2bc   : > { %2795 = vrot.lane.b32.xlu0 %v5388_v31, %s4231_s17 }
 0x2c3   : > { %2785 = vrot.lane.b32.xlu1 %v3940_v48, %s4231_s17  ;;  %2787 = vrot.lane.b32.xlu2 %v3944_v52, %s4231_s17 }
 0x2c4   : > { %2789 = vrot.lane.b32.xlu0 %v3948_v27, %s4231_s17  ;;  %3990 = vmatmul.msk.bf16.gmra.mxu0 %vm366_vm0, %v4175_v59 }
 0x2c5   : > { %3992 = vmatmul.msk.bf16.gmra.mxu1 %vm366_vm0, %v4175_v59  ;;  %v4193_v59 = vld [vmem:[%s5650_s5 + $0x48] sm:$0xff] }
 0x2cb   : > { %2965 = vrot.lane.b32.xlu1 %v5384_v11, %s4233_s23  ;;  %2967 = vrot.lane.b32.xlu2 %v5386_v57, %s4233_s23 }
 0x2cc   : > { %2963 = vrot.lane.b32.xlu0 %v3948_v27, %s4233_s23 }
 0x2d3   : > { %2878 = vrot.lane.b32.xlu1 %v5384_v11, %s4232_s20  ;;  %2880 = vrot.lane.b32.xlu2 %v5386_v57, %s4232_s20 }
 0x2d4   : > { %2969 = vrot.lane.b32.xlu0 %v5388_v31, %s4233_s23 }
 0x2db   : > { %2959 = vrot.lane.b32.xlu1 %v3940_v48, %s4233_s23  ;;  %2961 = vrot.lane.b32.xlu2 %v3944_v52, %s4233_s23 }
 0x2dc   : > { %2882 = vrot.lane.b32.xlu0 %v5388_v31, %s4232_s20 }
 0x2e3   : > { %2872 = vrot.lane.b32.xlu1 %v3940_v48, %s4232_s20  ;;  %2874 = vrot.lane.b32.xlu2 %v3944_v52, %s4232_s20 }
 0x2e4   : > { %2876 = vrot.lane.b32.xlu0 %v3948_v27, %s4232_s20  ;;  %s4109_s20 = sshll.u32 %s5684_s25, 5 }
 0x2eb   : > { %3139 = vrot.lane.b32.xlu1 %v5384_v11, %s4235_s21  ;;  %3141 = vrot.lane.b32.xlu2 %v5386_v57, %s4235_s21 }
 0x2ec   : > { %3137 = vrot.lane.b32.xlu0 %v3948_v27, %s4235_s21 }
 0x2f3   : > { %3052 = vrot.lane.b32.xlu1 %v5384_v11, %s4234_s10  ;;  %3054 = vrot.lane.b32.xlu2 %v5386_v57, %s4234_s10 }
 0x2f4   : > { %3143 = vrot.lane.b32.xlu0 %v5388_v31, %s4235_s21 }
 0x2fb   : > { %3133 = vrot.lane.b32.xlu1 %v3940_v48, %s4235_s21  ;;  %3135 = vrot.lane.b32.xlu2 %v3944_v52, %s4235_s21  ;;  %s5624_s21 = scalar_lea.vmem %s5652_s7, %s4109_s20 }
 0x2fc   : > { %3056 = vrot.lane.b32.xlu0 %v5388_v31, %s4234_s10 }
 0x303   : > { %3046 = vrot.lane.b32.xlu1 %v3940_v48, %s4234_s10  ;;  %3048 = vrot.lane.b32.xlu2 %v3944_v52, %s4234_s10 }
 0x304   : > { %3050 = vrot.lane.b32.xlu0 %v3948_v27, %s4234_s10 }
 0x305   : > { %v2641_v21 = vpop.permute.xlu2 %2640 }
 0x30b   : > { %3313 = vrot.lane.b32.xlu1 %v5384_v11, %s4237_s22  ;;  %3315 = vrot.lane.b32.xlu2 %v5386_v57, %s4237_s22 }
 0x30c   : > { %3311 = vrot.lane.b32.xlu0 %v3948_v27, %s4237_s22 }
 0x30d   : > { %v2635_v34 = vpop.permute.xlu2 %2634 }
 0x313   : > { %3226 = vrot.lane.b32.xlu1 %v5384_v11, %s4236_s12  ;;  %3228 = vrot.lane.b32.xlu2 %v5386_v57, %s4236_s12 }
 0x314   : > { %3317 = vrot.lane.b32.xlu0 %v5388_v31, %s4237_s22 }
 0x315   : > { %v2794_v1 = vpop.permute.xlu2 %2793 }
 0x31b   : > { %3307 = vrot.lane.b32.xlu1 %v3940_v48, %s4237_s22  ;;  %3309 = vrot.lane.b32.xlu2 %v3944_v52, %s4237_s22 }
 0x31c   : > { %3230 = vrot.lane.b32.xlu0 %v5388_v31, %s4236_s12 }
 0x31d   : > { %v2639_v49 = vpop.permute.xlu1 %2638  ;;  %v2788_v42 = vpop.permute.xlu2 %2787 }
 0x31e   : > { %v2643_v17 = vpop.permute.xlu0 %2642  ;;  %v2646_v22 = vsel %vm606_vm1, %v2639_v49, %v2641_v21 }
 0x31f   : > { %v2647_v29 = vsel %vm606_vm1, %v2641_v21, %v2643_v17  ;;  %2664 = vmatpush.bf16.msrb.mxu2 %v2646_v22 }
 0x320   : > { %2683 = vmatpush.bf16.msrb.mxu3 %v2647_v29 }
 0x323   : > { %3220 = vrot.lane.b32.xlu1 %v3940_v48, %s4236_s12  ;;  %3222 = vrot.lane.b32.xlu2 %v3944_v52, %s4236_s12  ;;  %v4192_v48 = vld [vmem:[%s5650_s5 + $0x40] sm:$0xff] }
 0x324   : > { %3224 = vrot.lane.b32.xlu0 %v3948_v27, %s4236_s12 }
 0x325   : > { %v2633_v14 = vpop.permute.xlu1 %2632  ;;  %v2968_v4 = vpop.permute.xlu2 %2967 }
 0x326   : > { %v2637_v13 = vpop.permute.xlu0 %2636  ;;  %v2644_v3 = vsel %vm606_vm1, %v2633_v14, %v2635_v34  ;;  %v4194_v14 = vld [vmem:[%s5650_s5 + $0x50] sm:$0xff] }
 0x327   : > { %2665 = vmatpush.bf16.msrb.mxu2 %v2644_v3  ;;  %v2645_v37 = vsel %vm606_vm1, %v2635_v34, %v2637_v13 }
 0x328   : > { %2684 = vmatpush.bf16.msrb.mxu3 %v2645_v37 }
 0x32a   : > { %3961 = vmatmul.msk.bf16.vlgmr.msrb.gmra.mxu2 %vm366_vm0, %v4180_v40 }
 0x32b   : > { %3963 = vmatmul.msk.bf16.vlgmr.msrb.gmra.mxu3 %vm366_vm0, %v4180_v40  ;;  %3385 = vperm.xlu1 %4221, %v3379_v28  }
 0x32c   : > { %3395 = vperm.xlu0 %4220, %v3381_v41   ;;  %3390 = vperm.xlu2 %4219, %v3380_v26  }
 0x32d   : > { %v2792_v5 = vpop.permute.xlu1 %2791  ;;  %v2881_v53 = vpop.permute.xlu2 %2880 }
 0x32e   : > { %v2796_v23 = vpop.permute.xlu0 %2795  ;;  %v2799_v35 = vsel %vm883_vm2, %v2792_v5, %v2794_v1  ;;  %v4195_v5 = vld [vmem:[%s5650_s5 + $0x58] sm:$0xff] }
 0x32f   : > { %v2800_v6 = vsel %vm883_vm2, %v2794_v1, %v2796_v23  ;;  %2817 = vmatpush.bf16.msra.mxu2 %v2799_v35  ;;  %v4196_v23 = vld [vmem:[%s5650_s5 + $0x60] sm:$0xff] }
 0x330   : > { %2836 = vmatpush.bf16.msra.mxu3 %v2800_v6 }
 0x333   : > { %3400 = vperm.xlu1 %4221, %v3382_v58  }
 0x335   : > { %v2786_v20 = vpop.permute.xlu1 %2785  ;;  %v2962_v10 = vpop.permute.xlu2 %2961 }
 0x336   : > { %v2790_v51 = vpop.permute.xlu0 %2789  ;;  %v2797_v8 = vsel %vm883_vm2, %v2786_v20, %v2788_v42 }
 0x337   : > { %2818 = vmatpush.bf16.msra.mxu2 %v2797_v8  ;;  %v2798_v39 = vsel %vm883_vm2, %v2788_v42, %v2790_v51 }
 0x338   : > { %2837 = vmatpush.bf16.msra.mxu3 %v2798_v39 }
 0x33a   : > { %3962 = vmatmul.msk.bf16.gmra.mxu2 %vm366_vm0, %v4181_v62 }
 0x33b   : > { %3964 = vmatmul.msk.bf16.gmra.mxu3 %vm366_vm0, %v4181_v62 }
 0x33d   : > { %v2966_v61 = vpop.permute.xlu1 %2965  ;;  %v2875_v25 = vpop.permute.xlu2 %2874 }
 0x33e   : > { %v2964_v63 = vpop.permute.xlu0 %2963  ;;  %v2973_v19 = vsel %vm1357_vm4, %v2966_v61, %v2968_v4 }
 0x33f   : > { %2991 = vmatpush.bf16.msrb.mxu2 %v2973_v19  ;;  %v2972_v45 = vsel %vm1357_vm4, %v2962_v10, %v2964_v63  ;;  %v4197_v63 = vld [vmem:[%s5650_s5 + $0x68] sm:$0xff]  ;;  %v4198_v19 = vld [vmem:[%s5650_s5 + $0x70] sm:$0xff] }
 0x345   : > { %v2879_v12 = vpop.permute.xlu1 %2878  ;;  %v3142_v11 = vpop.permute.xlu2 %3141 }
 0x346   : > { %v2970_v43 = vpop.permute.xlu0 %2969  ;;  %v2886_v44 = vsel %vm1120_vm3, %v2879_v12, %v2881_v53  ;;  %v2741_v12 = vpop.f32.mrf.mxu0 }
 0x347   : > { %v2974_v55 = vsel %vm1357_vm4, %v2968_v4, %v2970_v43  ;;  %2904 = vmatpush.bf16.msrb.mxu0 %v2886_v44  ;;  %v4199_v43 = vld [vmem:[%s5650_s5 + $0x78] sm:$0xff]  ;;  %v4200_v44 = vld [vmem:[%s5650_s5 + $0x80] sm:$0xff] }
 0x348   : > { %3010 = vmatpush.bf16.msrb.mxu3 %v2974_v55 }
 0x34a   : > { %4005 = vmatmul.msk.bf16.vlgmr.msra.gmra.mxu2 %vm366_vm0, %v4188_v36 }
 0x34b   : > { %4007 = vmatmul.msk.bf16.vlgmr.msra.gmra.mxu3 %vm366_vm0, %v4188_v36  ;;  %v2760_v36 = vpop.f32.mrf.mxu1 }
 0x34c   : > { %3011 = vmatpush.bf16.msrb.mxu3 %v2972_v45 }
 0x34d   : > { %v2960_v50 = vpop.permute.xlu1 %2959  ;;  %v3055_v18 = vpop.permute.xlu2 %3054 }
 0x34e   : > { %v2883_v57 = vpop.permute.xlu0 %2882  ;;  %v2971_v2 = vsel %vm1357_vm4, %v2960_v50, %v2962_v10 }
 0x34f   : > { %v2887_v7 = vsel %vm1120_vm3, %v2881_v53, %v2883_v57  ;;  %2992 = vmatpush.bf16.msrb.mxu2 %v2971_v2  ;;  %v2743_v57 = vpop.f32.mrf.mxu0 }
 0x350   : > { %2923 = vmatpush.bf16.msrb.mxu1 %v2887_v7 }
 0x353   : > { %v2762_v2 = vpop.f32.mrf.mxu1 }
 0x355   : > { %v2873_v38 = vpop.permute.xlu1 %2872  ;;  %v3136_v56 = vpop.permute.xlu2 %3135 }
 0x356   : > { %v2877_v31 = vpop.permute.xlu0 %2876  ;;  %v2884_v32 = vsel %vm1120_vm3, %v2873_v38, %v2875_v25 }
 0x357   : > { %2905 = vmatpush.bf16.msrb.mxu0 %v2884_v32  ;;  %v2885_v33 = vsel %vm1120_vm3, %v2875_v25, %v2877_v31  ;;  %v4201_v31 = vld [vmem:[%s5650_s5 + $0x88] sm:$0xff] }
 0x358   : > { %2924 = vmatpush.bf16.msrb.mxu1 %v2885_v33 }
 0x35a   : > { %4006 = vmatmul.msk.bf16.gmra.mxu2 %vm366_vm0, %v4189_v47  ;;  %4021 = vmatmul.msk.bf16.vlgmr.msrb.gmra.mxu0 %vm366_vm0, %v4190_v15 }
 0x35b   : > { %4008 = vmatmul.msk.bf16.gmra.mxu3 %vm366_vm0, %v4189_v47  ;;  %4023 = vmatmul.msk.bf16.vlgmr.msrb.gmra.mxu1 %vm366_vm0, %v4190_v15  ;;  %v2746_v15 = vpop.f32.mrf.mxu0  ;;  %v2765_v33 = vpop.f32.mrf.mxu1 }
 0x35d   : > { %v3140_v60 = vpop.permute.xlu1 %3139  ;;  %v3049_v21 = vpop.permute.xlu2 %3048 }
 0x35e   : > { %v3138_v9 = vpop.permute.xlu0 %3137  ;;  %v3147_v16 = vsel %vm1831_vm6, %v3140_v60, %v3142_v11 }
 0x35f   : > { %3165 = vmatpush.bf16.msra.mxu2 %v3147_v16  ;;  %v3146_v27 = vsel %vm1831_vm6, %v3136_v56, %v3138_v9 }
 0x365   : > { %v3053_v54 = vpop.permute.xlu1 %3052  ;;  %v3316_v17 = vpop.permute.xlu2 %3315 }
 0x366   : > { %v3144_v24 = vpop.permute.xlu0 %3143  ;;  %v3060_v46 = vsel %vm1594_vm5, %v3053_v54, %v3055_v18  ;;  %v2767_v54 = vpop.f32.mrf.mxu1 }
 0x367   : > { %v3148_v52 = vsel %vm1831_vm6, %v3142_v11, %v3144_v24  ;;  %3078 = vmatpush.bf16.msra.mxu0 %v3060_v46 }
 0x368   : > { %3184 = vmatpush.bf16.msra.mxu3 %v3148_v52 }
 0x36a   : > { %4022 = vmatmul.msk.bf16.gmra.mxu0 %vm366_vm0, %v4191_v0  ;;  %4037 = vmatmul.msk.bf16.vlgmr.msrb.gmra.mxu2 %vm366_vm0, %v4192_v48 }
 0x36b   : > { %4024 = vmatmul.msk.bf16.gmra.mxu1 %vm366_vm0, %v4191_v0  ;;  %4039 = vmatmul.msk.bf16.vlgmr.msrb.gmra.mxu3 %vm366_vm0, %v4192_v48 }
 0x36c   : > { %3185 = vmatpush.bf16.msra.mxu3 %v3146_v27 }
 0x36d   : > { %v3134_v34 = vpop.permute.xlu1 %3133  ;;  %v3229_v37 = vpop.permute.xlu2 %3228 }
 0x36e   : > { %v3057_v30 = vpop.permute.xlu0 %3056  ;;  %v3145_v1 = vsel %vm1831_vm6, %v3134_v34, %v3136_v56  ;;  %v2748_v56 = vpop.f32.mrf.mxu0 }
 0x36f   : > { %v3061_v49 = vsel %vm1594_vm5, %v3055_v18, %v3057_v30  ;;  %3166 = vmatpush.bf16.msra.mxu2 %v3145_v1 }
 0x370   : > { %3097 = vmatpush.bf16.msra.mxu1 %v3061_v49 }
 0x375   : > { %v3047_v42 = vpop.permute.xlu1 %3046  ;;  %v3310_v6 = vpop.permute.xlu2 %3309 }
 0x376   : > { %v3051_v22 = vpop.permute.xlu0 %3050  ;;  %v3058_v29 = vsel %vm1594_vm5, %v3047_v42, %v3049_v21 }
 0x377   : > { %3079 = vmatpush.bf16.msra.mxu0 %v3058_v29  ;;  %v3059_v13 = vsel %vm1594_vm5, %v3049_v21, %v3051_v22 }
 0x378   : > { %3098 = vmatpush.bf16.msra.mxu1 %v3059_v13 }
 0x37a   : > { %4038 = vmatmul.msk.bf16.gmra.mxu2 %vm366_vm0, %v4193_v59  ;;  %4053 = vmatmul.msk.bf16.vlgmr.msra.gmra.mxu0 %vm366_vm0, %v4194_v14 }
 0x37b   : > { %4040 = vmatmul.msk.bf16.gmra.mxu3 %vm366_vm0, %v4193_v59  ;;  %4055 = vmatmul.msk.bf16.vlgmr.msra.gmra.mxu1 %vm366_vm0, %v4194_v14 }
 0x37d   : > { %v3314_v4 = vpop.permute.xlu1 %3313  ;;  %v3223_v62 = vpop.permute.xlu2 %3222 }
 0x37e   : > { %v3312_v3 = vpop.permute.xlu0 %3311  ;;  %v3321_v40 = vsel %vm2305_vm8, %v3314_v4, %v3316_v17 }
 0x37f   : > { %3339 = vmatpush.bf16.msrb.mxu2 %v3321_v40  ;;  %v3320_v53 = vsel %vm2305_vm8, %v3310_v6, %v3312_v3 }
 0x385   : > { %v3227_v28 = vpop.permute.xlu1 %3226 }
 0x386   : > { %v3318_v41 = vpop.permute.xlu0 %3317  ;;  %v3234_v26 = vsel %vm2068_vm7, %v3227_v28, %v3229_v37 }
 0x387   : > { %v3322_v35 = vsel %vm2305_vm8, %v3316_v17, %v3318_v41  ;;  %3252 = vmatpush.bf16.msrb.mxu0 %v3234_v26 }
 0x388   : > { %3358 = vmatpush.bf16.msrb.mxu3 %v3322_v35 }
 0x38a   : > { %4054 = vmatmul.msk.bf16.gmra.mxu0 %vm366_vm0, %v4195_v5  ;;  %4069 = vmatmul.msk.bf16.vlgmr.msra.gmra.mxu2 %vm366_vm0, %v4196_v23 }
 0x38b   : > { %4056 = vmatmul.msk.bf16.gmra.mxu1 %vm366_vm0, %v4195_v5  ;;  %4071 = vmatmul.msk.bf16.vlgmr.msra.gmra.mxu3 %vm366_vm0, %v4196_v23 }
 0x38c   : > { %3359 = vmatpush.bf16.msrb.mxu3 %v3320_v53 }
 0x38d   : > { %v3308_v58 = vpop.permute.xlu1 %3307 }
 0x38e   : > { %v3231_v20 = vpop.permute.xlu0 %3230  ;;  %v3319_v51 = vsel %vm2305_vm8, %v3308_v58, %v3310_v6 }
 0x38f   : > { %v3235_v8 = vsel %vm2068_vm7, %v3229_v37, %v3231_v20  ;;  %3340 = vmatpush.bf16.msrb.mxu2 %v3319_v51 }
 0x390   : > { %3271 = vmatpush.bf16.msrb.mxu1 %v3235_v8 }
 0x395   : > { %v3221_v39 = vpop.permute.xlu1 %3220 }
 0x396   : > { %v3225_v10 = vpop.permute.xlu0 %3224  ;;  %v3232_v61 = vsel %vm2068_vm7, %v3221_v39, %v3223_v62 }
 0x397   : > { %3253 = vmatpush.bf16.msrb.mxu0 %v3232_v61  ;;  %v3233_v25 = vsel %vm2068_vm7, %v3223_v62, %v3225_v10 }
 0x398   : > { %3272 = vmatpush.bf16.msrb.mxu1 %v3233_v25 }
 0x39a   : > { %4070 = vmatmul.msk.bf16.gmra.mxu2 %vm366_vm0, %v4197_v63  ;;  %4085 = vmatmul.msk.bf16.vlgmr.msrb.gmra.mxu0 %vm366_vm0, %v4198_v19 }
 0x39b   : > { %4072 = vmatmul.msk.bf16.gmra.mxu3 %vm366_vm0, %v4197_v63  ;;  %4087 = vmatmul.msk.bf16.vlgmr.msrb.gmra.mxu1 %vm366_vm0, %v4198_v19 }
 0x3aa   : > { %4086 = vmatmul.msk.bf16.gmra.mxu0 %vm366_vm0, %v4199_v43  ;;  %4101 = vmatmul.msk.bf16.vlgmr.msrb.gmra.mxu2 %vm366_vm0, %v4200_v44 }
 0x3ab   : > { %4088 = vmatmul.msk.bf16.gmra.mxu1 %vm366_vm0, %v4199_v43  ;;  %4103 = vmatmul.msk.bf16.vlgmr.msrb.gmra.mxu3 %vm366_vm0, %v4200_v44 }
 0x3ad   : > { %v2667_v55 = vpop.f32.mrf.mxu2 }
 0x3ae   : > { %v2686_v45 = vpop.f32.mrf.mxu3  ;;  %v2742_v50 = vadd.f32 %v2741_v12, %v2667_v55 }
 0x3af   : > { %v2761_v11 = vadd.f32 %v2760_v36, %v2686_v45 }
 0x3b5   : > { %v2669_v7 = vpop.f32.mrf.mxu2 }
 0x3b6   : > { %v2688_v38 = vpop.f32.mrf.mxu3  ;;  %v2744_v32 = vadd.f32 %v2743_v57, %v2669_v7 }
 0x3b7   : > { %v2763_v47 = vadd.f32 %v2762_v2, %v2688_v38 }
 0x3ba   : > { %4102 = vmatmul.msk.bf16.gmra.mxu2 %vm366_vm0, %v4201_v31 }
 0x3bb   : > { %4104 = vmatmul.msk.bf16.gmra.mxu3 %vm366_vm0, %v4201_v31 }
 0x3bd   : > { %v2672_v18 = vpop.f32.mrf.mxu2 }
 0x3be   : > { %v2691_v60 = vpop.f32.mrf.mxu3  ;;  %v2747_v9 = vadd.f32 %v2746_v15, %v2672_v18 }
 0x3bf   : > { %v2766_v16 = vadd.f32 %v2765_v33, %v2691_v60 }
 0x3c5   : > { %v2674_v24 = vpop.f32.mrf.mxu2 }
 0x3c6   : > { %v2693_v46 = vpop.f32.mrf.mxu3  ;;  %v2749_v0 = vadd.f32 %v2748_v56, %v2674_v24 }
 0x3c7   : > { %v2768_v48 = vadd.f32 %v2767_v54, %v2693_v46 }
 0x3cd   : > { %v2820_v52 = vpop.f32.mrf.mxu2 }
 0x3ce   : > { %v2849_v27 = vadd.f32 %v2820_v52, %v2742_v50  ;;  %v2839_v21 = vpop.f32.mrf.mxu3 }
 0x3cf   : > { %v2850_v34 = vadd.f32 %v2839_v21, %v2761_v11 }
 0x3d5   : > { %v2822_v30 = vpop.f32.mrf.mxu2 }
 0x3d6   : > { %v2851_v1 = vadd.f32 %v2822_v30, %v2744_v32  ;;  %v2841_v49 = vpop.f32.mrf.mxu3  ;;  %v3386_v30 = vpop.permute.xlu1 %3385 }
 0x3d7   : > { %v2852_v42 = vadd.f32 %v2841_v49, %v2763_v47  ;;  %v2907_v17 = vpop.f32.mrf.mxu0 }
 0x3d8   : > { %v2926_v22 = vpop.f32.mrf.mxu1  ;;  %v2936_v7 = vadd.f32 %v2907_v17, %v2849_v27 }
 0x3d9   : > { %v2937_v31 = vadd.f32 %v2926_v22, %v2850_v34 }
 0x3dd   : > { %v2825_v29 = vpop.f32.mrf.mxu2 }
 0x3de   : > { %v5596_v59 = vadd.f32 %v2825_v29, %v2747_v9  ;;  %v2844_v14 = vpop.f32.mrf.mxu3 }
 0x3df   : > { %v5598_v13 = vadd.f32 %v2844_v14, %v2766_v16  ;;  %v2909_v4 = vpop.f32.mrf.mxu0 }
 0x3e0   : > { %v2928_v3 = vpop.f32.mrf.mxu1  ;;  %v2938_v56 = vadd.f32 %v2909_v4, %v2851_v1 }
 0x3e1   : > { %v2939_v24 = vadd.f32 %v2928_v3, %v2852_v42 }
 0x3e5   : > { %v2827_v40 = vpop.f32.mrf.mxu2 }
 0x3e6   : > { %v5600_v37 = vadd.f32 %v2827_v40, %v2749_v0  ;;  %v2846_v28 = vpop.f32.mrf.mxu3 }
 0x3e7   : > { %v5602_v41 = vadd.f32 %v2846_v28, %v2768_v48  ;;  %v2912_v26 = vpop.f32.mrf.mxu0 }
 0x3e8   : > { %v2931_v5 = vpop.f32.mrf.mxu1  ;;  %v2940_v4 = vadd.f32 %v2912_v26, %v5596_v59 }
 0x3ed   : > { %v2994_v23 = vpop.f32.mrf.mxu2 }
 0x3ee   : > { %v3013_v35 = vpop.f32.mrf.mxu3  ;;  %v3023_v47 = vadd.f32 %v2994_v23, %v2936_v7  ;;  %v2941_v23 = vadd.f32 %v2931_v5, %v5598_v13 }
 0x3ef   : > { %v5604_v6 = vpop.f32.mrf.mxu0  ;;  %v3024_v33 = vadd.f32 %v3013_v35, %v2937_v31 }
 0x3f0   : > { %v5606_v53 = vpop.f32.mrf.mxu1  ;;  %v2942_v13 = vadd.f32 %v5604_v6, %v5600_v37 }
 0x3f5   : > { %v2996_v58 = vpop.f32.mrf.mxu2 }
 0x3f6   : > { %v3015_v20 = vpop.f32.mrf.mxu3  ;;  %v3025_v52 = vadd.f32 %v2996_v58, %v2938_v56 }
 0x3f7   : > { %v3081_v51 = vpop.f32.mrf.mxu0  ;;  %v3026_v49 = vadd.f32 %v3015_v20, %v2939_v24 }
 0x3f8   : > { %v3100_v8 = vpop.f32.mrf.mxu1  ;;  %v3110_v18 = vadd.f32 %v3081_v51, %v3023_v47 }
 0x3f9   : > { %v3111_v60 = vadd.f32 %v3100_v8, %v3024_v33 }
 0x3fd   : > { %v2999_v62 = vpop.f32.mrf.mxu2 }
 0x3fe   : > { %v3018_v39 = vpop.f32.mrf.mxu3  ;;  %v3027_v20 = vadd.f32 %v2999_v62, %v2940_v4  ;;  %v2943_v62 = vadd.f32 %v5606_v53, %v5602_v41 }
 0x3ff   : > { %v3083_v10 = vpop.f32.mrf.mxu0 }
 0x400   : > { %v3102_v63 = vpop.f32.mrf.mxu1  ;;  %v3112_v22 = vadd.f32 %v3083_v10, %v3025_v52  ;;  %v3391_v10 = vpop.permute.xlu2 %3390 }
 0x401   : > { %v3113_v14 = vadd.f32 %v3102_v63, %v3026_v49  ;;  %v3028_v63 = vadd.f32 %v3018_v39, %v2941_v23 }
 0x405   : > { %v5608_v61 = vpop.f32.mrf.mxu2 }
 0x406   : > { %v5610_v19 = vpop.f32.mrf.mxu3  ;;  %v3029_v33 = vadd.f32 %v5608_v61, %v2942_v13 }
 0x407   : > { %v3086_v43 = vpop.f32.mrf.mxu0 }
 0x408   : > { %v3105_v44 = vpop.f32.mrf.mxu1 }
 0x409   : > { %v3115_v7 = vadd.f32 %v3105_v44, %v3028_v63  ;;  %v3396_v44 = vpop.permute.xlu0 %3395 }
 0x40d   : > { %v3168_v25 = vpop.f32.mrf.mxu2 }
 0x40e   : > { %v3187_v12 = vpop.f32.mrf.mxu3  ;;  %v3197_v9 = vadd.f32 %v3168_v25, %v3110_v18 }
 0x40f   : > { %v5612_v45 = vpop.f32.mrf.mxu0  ;;  %v3198_v16 = vadd.f32 %v3187_v12, %v3111_v60 }
 0x410   : > { %v5614_v50 = vpop.f32.mrf.mxu1  ;;  %v3116_v60 = vadd.f32 %v5612_v45, %v3029_v33 }
 0x415   : > { %v3170_v36 = vpop.f32.mrf.mxu2 }
 0x416   : > { %v3189_v55 = vpop.f32.mrf.mxu3  ;;  %v3199_v28 = vadd.f32 %v3170_v36, %v3112_v22  ;;  %v3114_v36 = vadd.f32 %v3086_v43, %v3027_v20 }
 0x417   : > { %v3255_v2 = vpop.f32.mrf.mxu0  ;;  %v3200_v1 = vadd.f32 %v3189_v55, %v3113_v14 }
 0x418   : > { %v3274_v38 = vpop.f32.mrf.mxu1  ;;  %v3284_v54 = vadd.f32 %v3255_v2, %v3197_v9 }
 0x419   : > { %v3285_v46 = vadd.f32 %v3274_v38, %v3198_v16 }
 0x41d   : > { %v3173_v11 = vpop.f32.mrf.mxu2 }
 0x41e   : > { %v3192_v57 = vpop.f32.mrf.mxu3  ;;  %v3201_v59 = vadd.f32 %v3173_v11, %v3114_v36  ;;  %v3030_v11 = vadd.f32 %v5610_v19, %v2943_v62 }
 0x41f   : > { %v3257_v0 = vpop.f32.mrf.mxu0  ;;  %v3202_v26 = vadd.f32 %v3192_v57, %v3115_v7 }
 0x420   : > { %v3276_v27 = vpop.f32.mrf.mxu1  ;;  %v3286_v3 = vadd.f32 %v3257_v0, %v3199_v28  ;;  %v3117_v37 = vadd.f32 %v5614_v50, %v3030_v11 }
 0x421   : > { %v3287_v35 = vadd.f32 %v3276_v27, %v3200_v1 }
 0x425   : > { %v5616_v32 = vpop.f32.mrf.mxu2 }
 0x426   : > { %v5618_v15 = vpop.f32.mrf.mxu3  ;;  %v3203_v41 = vadd.f32 %v5616_v32, %v3116_v60 }
 0x427   : > { %v3260_v25 = vpop.f32.mrf.mxu0  ;;  %v3204_v61 = vadd.f32 %v5618_v15, %v3117_v37 }
 0x428   : > { %v3279_v2 = vpop.f32.mrf.mxu1  ;;  %v3288_v5 = vadd.f32 %v3260_v25, %v3201_v59 }
 0x429   : > { %v3289_v47 = vadd.f32 %v3279_v2, %v3202_v26 }
 0x42d   : > { %v3342_v48 = vpop.f32.mrf.mxu2 }
 0x42e   : > { %v3371_v21 = vadd.f32 %v3342_v48, %v3284_v54  ;;  %v3361_v34 = vpop.f32.mrf.mxu3  ;;  %v3401_v48 = vpop.permute.xlu1 %3400 }
 0x42f   : > { %v3372_v17 = vadd.f32 %v3361_v34, %v3285_v46  ;;  %v3262_v6 = vpop.f32.mrf.mxu0 }
 0x430   : > { %v3403_v29 = vadd.f32 %v3386_v30, %v3371_v21  ;;  %v3281_v53 = vpop.f32.mrf.mxu1  ;;  %v3290_v54 = vadd.f32 %v3262_v6, %v3203_v41 }
 0x431   : > { %v3404_v40 = vadd.f32 %v3386_v30, %v3372_v17  ;;  %v3291_v24 = vadd.f32 %v3281_v53, %v3204_v61 }
 0x433   : > { %v3411_v42 = vpack.c.bf16 %v3404_v40, %v3403_v29 }
 0x435   : > { %3415 = vst [vmem:[%s5624_s21] sm:$0xff] %v3411_v42  ;;  %v3344_v58 = vpop.f32.mrf.mxu2 }
 0x436   : > { %v3373_v51 = vadd.f32 %v3344_v58, %v3286_v3  ;;  %v3363_v8 = vpop.f32.mrf.mxu3 }
 0x437   : > { %v3374_v12 = vadd.f32 %v3363_v8, %v3287_v35 }
 0x438   : > { %v3405_v55 = vadd.f32 %v3391_v10, %v3373_v51 }
 0x439   : > { %v3406_v38 = vadd.f32 %v3391_v10, %v3374_v12 }
 0x43b   : > { %v3412_v31 = vpack.c.bf16 %v3406_v38, %v3405_v55 }
 0x43d   : > { %3416 = vst [vmem:[%s5624_s21 + $0x8] sm:$0xff] %v3412_v31  ;;  %v3347_v39 = vpop.f32.mrf.mxu2 }
 0x43e   : > { %v3375_v43 = vadd.f32 %v3347_v39, %v3288_v5  ;;  %v3366_v18 = vpop.f32.mrf.mxu3 }
 0x43f   : > { %v3376_v57 = vadd.f32 %v3366_v18, %v3289_v47 }
 0x440   : > { %v3407_v9 = vadd.f32 %v3396_v44, %v3375_v43 }
 0x441   : > { %v3408_v16 = vadd.f32 %v3396_v44, %v3376_v57 }
 0x443   : > { %v3413_v56 = vpack.c.bf16 %v3408_v16, %v3407_v9 }
 0x445   : > { %3417 = vst [vmem:[%s5624_s21 + $0x10] sm:$0xff] %v3413_v56  ;;  %v3349_v46 = vpop.f32.mrf.mxu2 }
 0x446   : > { %v3377_v19 = vadd.f32 %v3349_v46, %v3290_v54  ;;  %v3368_v0 = vpop.f32.mrf.mxu3 }
 0x447   : > { %v3378_v45 = vadd.f32 %v3368_v0, %v3291_v24 }
 0x448   : > { %v3409_v52 = vadd.f32 %v3401_v48, %v3377_v19 }
 0x449   : > { %v3410_v27 = vadd.f32 %v3401_v48, %v3378_v45 }
 0x44b   : > { %v3414_v50 = vpack.c.bf16 %v3410_v27, %v3409_v52 }
 0x44d   : > { %3418 = vst [vmem:[%s5624_s21 + $0x18] sm:$0xff] %v3414_v50 }
 0x44e PF: > { %s17_s24 = sadd.s32 1, %s4228_s24  }
 0x44f   : > { %p14_p4 = scmp.ge.s32.totalorder %s17_s24, 4  }
 0x451   :  { %16 = sbr.rel (!%p14_p4) target bundleno = 1 (0x1), region = 105 }

// kernel: decoder_forward.7
= control target key start
LH: loop header
LB: loop body
LE: loop exit
PB: predicated region body
PF: predicated region fallthrough
CT: control target
= control target key end

     0   :  { %s4564_s24 = smov 0   ;;  %s5707_s0 = inlined_call_operand.vmem [shape: bf16[2,16,896], index: 0, kind: input, shape index: {}]   ;;  %s5708_s1 = inlined_call_operand.vmem [shape: bf16[2,16,896], index: 1, kind: input, shape index: {}]   ;;  %s5709_s2 = inlined_call_operand.vmem [shape: bf16[9,16,16], index: 2, kind: input, shape index: {}]   ;;  %s5710_s3 = inlined_call_operand.vmem [shape: bf16[9,16,16], index: 3, kind: input, shape index: {}]   ;;  %s5711_s4 = inlined_call_operand.vmem [shape: f32[16,1], index: 4, kind: input, shape index: {}]   ;;  %s5712_s5 = inlined_call_operand.vmem [shape: bf16[9,16,16], index: 5, kind: input, shape index: {}]   ;;  %s5713_s6 = inlined_call_operand.vmem [shape: f32[16,1], index: 6, kind: input, shape index: {}]   ;;  %s5714_s7 = inlined_call_operand.vmem [shape: f32[2,16,640], index: 7, kind: output, shape index: {}]  }
   0x1 LB: > { %s3954_s25 = sadd.s32 4294967295, %s4513_s24   ;;  %p3958_p0 = scmp.ge.s32.totalorder %s4513_s24, 1  ;;  %s4513_s24 = sphi %s4564_s24, %s17_s24  }
   0x2   : > { %p247_p1 = scmp.lt.s32.totalorder %s4513_s24, 3 }
   0x4   : > { %p248_p2 = pnand %p3958_p0, %p247_p1 }
   0x6   : > { %251 = sbr.rel (%p248_p2) target bundleno = 1099 (0x44b), region = 48 }
   0xb   : > { %p284_p3 = scmp.lt.s32.totalorder %s3954_s25, 1  ;;  %s4515_s30 = smov 127   ;;  %v4428_v28 = vld [vmem:[%s5710_s3] sm:$0xff]  ;;  %vm351_vm0 = vcmask 130048   ;;  %vm620_vm1 = vcmask 1039360   ;;  %vm924_vm2 = vcmask 1031168  }
   0xc   : > { %s4516_s15 = smov 126   ;;  %s4517_s16 = smov 104   ;;  %vm1191_vm3 = vcmask 850944   ;;  %vm1458_vm4 = vcmask 842752   ;;  %vm1725_vm5 = vcmask 834560   ;;  %vm1992_vm6 = vcmask 654336  }
   0xd   : > { %s5742_s25 = smov (!%p284_p3, %s3954_s25), 1  ;;  %s4518_s17 = smov 103   ;;  %vm2259_vm7 = vcmask 646144   ;;  %vm2526_vm8 = vcmask 637952  }
   0xe   : > { %s4485_s26 = smul.u32 56, %s5742_s25  ;;  %s4519_s22 = smov 102  }
   0xf   : > { %s4520_s27 = smov 80   ;;  %s4522_s13 = smov 78  }
  0x10   : > { %s4578_s29 = scalar_lea.vmem %s5707_s0, %s4485_s26  ;;  %s4605_s10 = scalar_lea.vmem %s5708_s1, %s4485_s26 }
  0x11   : > { %v4054_v0 = vld [vmem:[%s4578_s29 + $0x10] sm:$0xf]  ;;  %v4441_v1 = vld [vmem:[%s4578_s29 + $0x28] sm:$0xf0]  ;;  %v4046_v2 = vld [vmem:[%s4578_s29 + $0x8] sm:$0xf] }
  0x12   : > { %v4583_v3 = vor.u32 %v4441_v1, %v4054_v0  ;;  %v4440_v4 = vld [vmem:[%s4578_s29 + $0x20] sm:$0xf0]  ;;  %v4040_v7 = vld [vmem:[%s4578_s29 + $0x1c] sm:$0xf0]  ;;  %v4439_v9 = vld [vmem:[%s4578_s29 + $0x18] sm:$0xf0] }
  0x13   : > { %v4586_v5 = vor.u32 %v4440_v4, %v4046_v2  ;;  %v4436_v6 = vld [vmem:[%s4578_s29 + $0x4] sm:$0xf]  ;;  %v4038_v8 = vld [vmem:[%s4578_s29] sm:$0xf]  ;;  %v4437_v11 = vld [vmem:[%s4578_s29 + $0xc] sm:$0xf] }
  0x14   : > { %614 = vrot.lane.b32.xlu1 %v4583_v3, %s4515_s30  ;;  %v4596_v10 = vor.u32 %v4436_v6, %v4040_v7  ;;  %v4048_v12 = vld [vmem:[%s4578_s29 + $0x24] sm:$0xf0]  ;;  %v4607_v13 = vor.u32 %v4439_v9, %v4038_v8  ;;  %v4078_v14 = vld [vmem:[%s4605_s10] sm:$0xf]  ;;  %v4447_v15 = vld [vmem:[%s4605_s10 + $0x18] sm:$0xf0] }
  0x15   : > { %610 = vrot.lane.b32.xlu0 %v4586_v5, %s4515_s30  ;;  %v4611_v16 = vor.u32 %v4437_v11, %v4048_v12  ;;  %v4613_v17 = vor.u32 %v4447_v15, %v4078_v14  ;;  %v3968_v18 = vld [vmem:[%s4605_s10] sm:$0xf]  ;;  %v4432_v19 = vld [vmem:[%s4605_s10 + $0x18] sm:$0xf0]  ;;  %v4429_v20 = vld [vmem:[%s4605_s10 + $0x4] sm:$0xf] }
  0x16   : > { %608 = vrot.lane.b32.xlu2 %v4596_v10, %s4515_s30  ;;  %v4086_v21 = vld [vmem:[%s4605_s10 + $0x8] sm:$0xf]  ;;  %v4448_v22 = vld [vmem:[%s4605_s10 + $0x20] sm:$0xf0]  ;;  %v3969_v23 = vor.u32 %v4432_v19, %v3968_v18  ;;  %v3970_v24 = vld [vmem:[%s4605_s10 + $0x1c] sm:$0xf0] }
  0x17   : > { %v4444_v25 = vld [vmem:[%s4605_s10 + $0x4] sm:$0xf]  ;;  %v4080_v26 = vld [vmem:[%s4605_s10 + $0x1c] sm:$0xf0]  ;;  %v3973_v27 = vor.u32 %v4429_v20, %v3970_v24  ;;  %v4632_v29 = vor.u32 %v4448_v22, %v4086_v21  ;;  %v4438_v30 = vld [vmem:[%s4578_s29 + $0x14] sm:$0xf] }
  0x18   : > { %362 = vmatpush.bf16.msra.mxu0 %v3969_v23  ;;  %v4056_v31 = vld [vmem:[%s4578_s29 + $0x2c] sm:$0xf0]  ;;  %v4636_v32 = vor.u32 %v4444_v25, %v4080_v26  ;;  %v4449_v35 = vld [vmem:[%s4605_s10 + $0x28] sm:$0xf0]  ;;  %v3976_v36 = vld [vmem:[%s4605_s10 + $0x8] sm:$0xf] }
  0x19   : > { %376 = vmatpush.bf16.msra.mxu1 %v3973_v27  ;;  %v4639_v33 = vor.u32 %v4438_v30, %v4056_v31  ;;  %v4094_v34 = vld [vmem:[%s4605_s10 + $0x10] sm:$0xf]  ;;  %v4433_v37 = vld [vmem:[%s4605_s10 + $0x20] sm:$0xf0]  ;;  %v4430_v38 = vld [vmem:[%s4605_s10 + $0xc] sm:$0xf] }
  0x1a   : > { %v4062_v39 = vld [vmem:[%s4578_s29 + $0x18] sm:$0xf]  ;;  %v4442_v40 = vld [vmem:[%s4578_s29 + $0x30] sm:$0xf0]  ;;  %v3977_v41 = vor.u32 %v4433_v37, %v3976_v36  ;;  %v3978_v42 = vld [vmem:[%s4605_s10 + $0x24] sm:$0xf0]  ;;  %v4656_v44 = vor.u32 %v4449_v35, %v4094_v34 }
  0x1b   : > { %3990 = vmatmul.msk.bf16.vlgmr.msra.gmra.mxu0 %vm351_vm0, %v4428_v28  ;;  %v3981_v43 = vor.u32 %v4430_v38, %v3978_v42  ;;  %v4658_v45 = vor.u32 %v4442_v40, %v4062_v39  ;;  %v4445_v46 = vld [vmem:[%s4605_s10 + $0xc] sm:$0xf]  ;;  %v4088_v47 = vld [vmem:[%s4605_s10 + $0x24] sm:$0xf0]  ;;  %v3984_v48 = vld [vmem:[%s4605_s10 + $0x10] sm:$0xf] }
  0x1c   : > { %606 = vrot.lane.b32.xlu1 %v4607_v13, %s4515_s30  ;;  %3991 = vmatmul.msk.bf16.vlgmr.msra.gmra.mxu1 %vm351_vm0, %v4428_v28  ;;  %v4434_v49 = vld [vmem:[%s4605_s10 + $0x28] sm:$0xf0]  ;;  %v4431_v50 = vld [vmem:[%s4605_s10 + $0x14] sm:$0xf]  ;;  %v3986_v52 = vld [vmem:[%s4605_s10 + $0x2c] sm:$0xf0]  ;;  %v4678_v59 = vor.u32 %v4445_v46, %v4088_v47 }
  0x1d   : > { %612 = vrot.lane.b32.xlu0 %v4611_v16, %s4515_s30  ;;  %390 = vmatpush.bf16.msra.mxu2 %v3977_v41  ;;  %v3985_v51 = vor.u32 %v4434_v49, %v3984_v48  ;;  %v4446_v53 = vld [vmem:[%s4605_s10 + $0x14] sm:$0xf]  ;;  %v4096_v54 = vld [vmem:[%s4605_s10 + $0x2c] sm:$0xf0]  ;;  %v4102_v55 = vld [vmem:[%s4605_s10 + $0x18] sm:$0xf]  ;;  %v3989_v57 = vor.u32 %v4431_v50, %v3986_v52 }
  0x1e   : > { %777 = vrot.lane.b32.xlu2 %v4613_v17, %s4515_s30  ;;  %404 = vmatpush.bf16.msra.mxu3 %v3981_v43  ;;  %v4450_v56 = vld [vmem:[%s4605_s10 + $0x30] sm:$0xf0]  ;;  %v4676_v58 = vor.u32 %v4446_v53, %v4096_v54  ;;  %v4002_v61 = vld [vmem:[%s4578_s29] sm:$0xf]  ;;  %v4425_v62 = vld [vmem:[%s4578_s29 + $0x18] sm:$0xf0] }
  0x1f   : > { %418 = vmatpush.bf16.msrb.mxu0 %v3985_v51  ;;  %432 = vmatpush.bf16.msrb.mxu1 %v3989_v57  ;;  %v4682_v60 = vor.u32 %v4450_v56, %v4102_v55  ;;  %v4422_v63 = vld [vmem:[%s4578_s29 + $0x4] sm:$0xf]  ;;  %v4003_v0 = vor.u32 %v4425_v62, %v4002_v61  ;;  %v4004_v1 = vld [vmem:[%s4578_s29 + $0x1c] sm:$0xf0]  ;;  %v4010_v6 = vld [vmem:[%s4578_s29 + $0x8] sm:$0xf] }
  0x20   : > { %3992 = vmatmul.msk.bf16.vlgmr.msra.gmra.mxu2 %vm351_vm0, %v4428_v28  ;;  %v4007_v2 = vor.u32 %v4422_v63, %v4004_v1  ;;  %v4421_v4 = vld [vmem:[%s5709_s2] sm:$0xff]  ;;  %v4423_v8 = vld [vmem:[%s4578_s29 + $0xc] sm:$0xf]  ;;  %v4012_v11 = vld [vmem:[%s4578_s29 + $0x24] sm:$0xf0]  ;;  %s4521_s10 = smov 79  }
  0x21   : > { %3993 = vmatmul.msk.bf16.vlgmr.msra.gmra.mxu3 %vm351_vm0, %v4428_v28  ;;  %484 = vmatpush.bf16.msrb.mxu2 %v4003_v0  ;;  %v4426_v7 = vld [vmem:[%s4578_s29 + $0x20] sm:$0xf0]  ;;  %v4018_v12 = vld [vmem:[%s4578_s29 + $0x10] sm:$0xf]  ;;  %v4427_v14 = vld [vmem:[%s4578_s29 + $0x28] sm:$0xf0]  ;;  %v4015_v15 = vor.u32 %v4423_v8, %v4012_v11 }
  0x22   : > { %498 = vmatpush.bf16.msrb.mxu3 %v4007_v2  ;;  %v4011_v9 = vor.u32 %v4426_v7, %v4010_v6  ;;  %v4019_v18 = vor.u32 %v4427_v14, %v4018_v12  ;;  %v4424_v19 = vld [vmem:[%s4578_s29 + $0x14] sm:$0xf]  ;;  %v4020_v20 = vld [vmem:[%s4578_s29 + $0x2c] sm:$0xf0]  ;;  %v4443_v52 = vld [vmem:[%s5710_s3 + $0x8] sm:$0xff] }
  0x23   : > { %v4023_v21 = vor.u32 %v4424_v19, %v4020_v20  ;;  %526 = vmatpush.bf16.msra.mxu1 %v4015_v15 }
  0x24   : > { %781 = vrot.lane.b32.xlu1 %v4632_v29, %s4515_s30  ;;  %512 = vmatpush.bf16.msra.mxu0 %v4011_v9 }
  0x25   : > { %779 = vrot.lane.b32.xlu0 %v4636_v32, %s4515_s30  ;;  %540 = vmatpush.bf16.msra.mxu2 %v4019_v18 }
  0x26   : > { %616 = vrot.lane.b32.xlu2 %v4639_v33, %s4515_s30  ;;  %554 = vmatpush.bf16.msra.mxu3 %v4023_v21 }
  0x2b   : > { %3994 = vmatmul.msk.bf16.vlgmr.msrb.gmra.mxu0 %vm351_vm0, %v4428_v28 }
  0x2c   : > { %785 = vrot.lane.b32.xlu1 %v4656_v44, %s4515_s30  ;;  %3995 = vmatmul.msk.bf16.vlgmr.msrb.gmra.mxu1 %vm351_vm0, %v4428_v28  ;;  %v4435_v28 = vld [vmem:[%s5709_s2 + $0x8] sm:$0xff] }
  0x2d   : > { %618 = vrot.lane.b32.xlu0 %v4658_v45, %s4515_s30 }
  0x2e   : > { %787 = vrot.lane.b32.xlu2 %v4676_v58, %s4515_s30 }
  0x30   : > { %4024 = vmatmul.msk.bf16.vlgmr.msrb.gmra.mxu2 %vm351_vm0, %v4421_v4 }
  0x31   : > { %4025 = vmatmul.msk.bf16.vlgmr.msrb.gmra.mxu3 %vm351_vm0, %v4421_v4 }
  0x34   : > { %783 = vrot.lane.b32.xlu1 %v4678_v59, %s4515_s30 }
  0x35   : > { %789 = vrot.lane.b32.xlu0 %v4682_v60, %s4515_s30 }
  0x36   : > { %914 = vrot.lane.b32.xlu2 %v4586_v5, %s4516_s15 }
  0x3b   : > { %4026 = vmatmul.msk.bf16.vlgmr.msra.gmra.mxu0 %vm351_vm0, %v4421_v4 }
  0x3c   : > { %918 = vrot.lane.b32.xlu1 %v4583_v3, %s4516_s15  ;;  %4027 = vmatmul.msk.bf16.vlgmr.msra.gmra.mxu1 %vm351_vm0, %v4421_v4 }
  0x3d   : > { %916 = vrot.lane.b32.xlu0 %v4611_v16, %s4516_s15 }
  0x3e   : > { %910 = vrot.lane.b32.xlu2 %v4607_v13, %s4516_s15 }
  0x40   : > { %4028 = vmatmul.msk.bf16.vlgmr.msra.gmra.mxu2 %vm351_vm0, %v4421_v4 }
  0x41   : > { %4029 = vmatmul.msk.bf16.vlgmr.msra.gmra.mxu3 %vm351_vm0, %v4421_v4 }
  0x44   : > { %1044 = vrot.lane.b32.xlu1 %v4613_v17, %s4516_s15 }
  0x45   : > { %912 = vrot.lane.b32.xlu0 %v4596_v10, %s4516_s15 }
  0x46   : > { %1046 = vrot.lane.b32.xlu2 %v4636_v32, %s4516_s15 }
  0x4c   : > { %920 = vrot.lane.b32.xlu1 %v4639_v33, %s4516_s15 }
  0x4d   : > { %1048 = vrot.lane.b32.xlu0 %v4632_v29, %s4516_s15 }
  0x4e   : > { %922 = vrot.lane.b32.xlu2 %v4658_v45, %s4516_s15 }
  0x54   : > { %1054 = vrot.lane.b32.xlu1 %v4676_v58, %s4516_s15 }
  0x55   : > { %1052 = vrot.lane.b32.xlu0 %v4656_v44, %s4516_s15 }
  0x56   : > { %1056 = vrot.lane.b32.xlu2 %v4682_v60, %s4516_s15 }
  0x5c   : > { %1181 = vrot.lane.b32.xlu1 %v4586_v5, %s4517_s16 }
  0x5d   : > { %1050 = vrot.lane.b32.xlu0 %v4678_v59, %s4516_s15 }
  0x5e   : > { %1183 = vrot.lane.b32.xlu2 %v4611_v16, %s4517_s16 }
  0x64   : > { %1177 = vrot.lane.b32.xlu1 %v4607_v13, %s4517_s16 }
  0x65   : > { %1185 = vrot.lane.b32.xlu0 %v4583_v3, %s4517_s16 }
  0x66   : > { %1179 = vrot.lane.b32.xlu2 %v4596_v10, %s4517_s16 }
  0x6c   : > { %1313 = vrot.lane.b32.xlu1 %v4636_v32, %s4517_s16 }
  0x6d   : > { %1311 = vrot.lane.b32.xlu0 %v4613_v17, %s4517_s16 }
  0x6e   : > { %1315 = vrot.lane.b32.xlu2 %v4632_v29, %s4517_s16 }
  0x70   : > { %v609_v22 = vpop.permute.xlu2 %608 }
  0x74   : > { %1189 = vrot.lane.b32.xlu1 %v4658_v45, %s4517_s16 }
  0x75   : > { %1187 = vrot.lane.b32.xlu0 %v4639_v33, %s4517_s16 }
  0x76   : > { %1319 = vrot.lane.b32.xlu2 %v4656_v44, %s4517_s16 }
  0x78   : > { %v778_v23 = vpop.permute.xlu2 %777 }
  0x7c   : > { %1323 = vrot.lane.b32.xlu1 %v4682_v60, %s4517_s16 }
  0x7d   : > { %1321 = vrot.lane.b32.xlu0 %v4676_v58, %s4517_s16 }
  0x7e   : > { %1317 = vrot.lane.b32.xlu2 %v4678_v59, %s4517_s16 }
  0x80   : > { %v617_v24 = vpop.permute.xlu2 %616 }
  0x84   : > { %1450 = vrot.lane.b32.xlu1 %v4611_v16, %s4518_s17 }
  0x85   : > { %1448 = vrot.lane.b32.xlu0 %v4586_v5, %s4518_s17 }
  0x86   : > { %v615_v25 = vpop.permute.xlu1 %614  ;;  %1452 = vrot.lane.b32.xlu2 %v4583_v3, %s4518_s17 }
  0x87   : > { %v611_v26 = vpop.permute.xlu0 %610  ;;  %v625_v38 = vsel %vm620_vm1, %v615_v25, %v617_v24 }
  0x88   : > { %v622_v27 = vsel %vm620_vm1, %v609_v22, %v611_v26  ;;  %v788_v30 = vpop.permute.xlu2 %787 }
  0x89   : > { %657 = vmatpush.bf16.msrb.mxu1 %v622_v27 }
  0x8c   : > { %4065 = vmatmul.msk.bf16.vlgmr.msrb.gmra.mxu1 %vm351_vm0, %v4435_v28  ;;  %1446 = vrot.lane.b32.xlu1 %v4596_v10, %s4518_s17 }
  0x8d   : > { %1444 = vrot.lane.b32.xlu0 %v4607_v13, %s4518_s17 }
  0x8e   : > { %v607_v31 = vpop.permute.xlu1 %606  ;;  %1578 = vrot.lane.b32.xlu2 %v4613_v17, %s4518_s17 }
  0x8f   : > { %v613_v34 = vpop.permute.xlu0 %612  ;;  %v621_v35 = vsel %vm620_vm1, %v607_v31, %v609_v22  ;;  %v4451_v31 = vld [vmem:[%s5709_s2 + $0x10] sm:$0xff] }
  0x90   : > { %643 = vmatpush.bf16.msrb.mxu0 %v621_v35  ;;  %v623_v36 = vsel %vm620_vm1, %v611_v26, %v613_v34  ;;  %v624_v37 = vsel %vm620_vm1, %v613_v34, %v615_v25  ;;  %v4795_v39 = vpop.permute.xlu2 %914 }
  0x91   : > { %671 = vmatpush.bf16.msrb.mxu2 %v623_v36  ;;  %685 = vmatpush.bf16.msrb.mxu3 %v624_v37 }
  0x93   : > { %4064 = vmatmul.msk.bf16.vlgmr.msrb.gmra.mxu0 %vm351_vm0, %v4435_v28 }
  0x94   : > { %699 = vmatpush.bf16.msra.mxu0 %v625_v38  ;;  %4066 = vmatmul.msk.bf16.vlgmr.msrb.gmra.mxu2 %vm351_vm0, %v4435_v28 }
  0x95   : > { %4067 = vmatmul.msk.bf16.vlgmr.msrb.gmra.mxu3 %vm351_vm0, %v4435_v28  ;;  %1582 = vrot.lane.b32.xlu1 %v4632_v29, %s4518_s17 }
  0x96   : > { %1580 = vrot.lane.b32.xlu0 %v4636_v32, %s4518_s17  ;;  %v782_v40 = vpop.permute.xlu1 %781  ;;  %1454 = vrot.lane.b32.xlu2 %v4639_v33, %s4518_s17 }
  0x97   : > { %v780_v41 = vpop.permute.xlu0 %779 }
  0x98   : > { %v791_v42 = vsel %vm620_vm1, %v778_v23, %v780_v41  ;;  %v792_v43 = vsel %vm620_vm1, %v780_v41, %v782_v40  ;;  %v911_v47 = vpop.permute.xlu2 %910  ;;  %v4806_v50 = vpop.f32.mrf.mxu0 }
  0x99   : > { %813 = vmatpush.bf16.msra.mxu2 %v791_v42  ;;  %827 = vmatpush.bf16.msra.mxu3 %v792_v43  ;;  %v4812_v53 = vpop.f32.mrf.mxu1 }
  0x9d   : > { %1586 = vrot.lane.b32.xlu1 %v4656_v44, %s4518_s17 }
  0x9e   : > { %1456 = vrot.lane.b32.xlu0 %v4658_v45, %s4518_s17  ;;  %v786_v46 = vpop.permute.xlu1 %785  ;;  %1588 = vrot.lane.b32.xlu2 %v4676_v58, %s4518_s17 }
  0x9f   : > { %v619_v48 = vpop.permute.xlu0 %618  ;;  %v795_v49 = vsel %vm620_vm1, %v786_v46, %v788_v30 }
  0xa0   : > { %v626_v51 = vsel %vm620_vm1, %v617_v24, %v619_v48  ;;  %869 = vmatpush.bf16.msrb.mxu2 %v795_v49  ;;  %v4826_v61 = vpop.f32.mrf.mxu0  ;;  %v1047_v0 = vpop.permute.xlu2 %1046 }
  0xa1   : > { %713 = vmatpush.bf16.msra.mxu1 %v626_v51  ;;  %v4829_v63 = vpop.f32.mrf.mxu1 }
  0xa3   : > { %4068 = vmatmul.msk.bf16.vlgmr.msra.gmra.mxu0 %vm351_vm0, %v4435_v28  ;;  %v392_v2 = vpop.f32.mrf.mxu2 }
  0xa4   : > { %4069 = vmatmul.msk.bf16.vlgmr.msra.gmra.mxu1 %vm351_vm0, %v4435_v28  ;;  %4104 = vmatmul.msk.bf16.vlgmr.msra.gmra.mxu2 %vm351_vm0, %v4443_v52  ;;  %v406_v6 = vpop.f32.mrf.mxu3 }
  0xa5   : > { %4105 = vmatmul.msk.bf16.vlgmr.msra.gmra.mxu3 %vm351_vm0, %v4443_v52  ;;  %1584 = vrot.lane.b32.xlu1 %v4678_v59, %s4518_s17 }
  0xa6   : > { %v784_v54 = vpop.permute.xlu1 %783  ;;  %1590 = vrot.lane.b32.xlu0 %v4682_v60, %s4518_s17  ;;  %1715 = vrot.lane.b32.xlu2 %v4586_v5, %s4519_s22 }
  0xa7   : > { %v790_v55 = vpop.permute.xlu0 %789  ;;  %v793_v56 = vsel %vm620_vm1, %v782_v40, %v784_v54  ;;  %v794_v57 = vsel %vm620_vm1, %v784_v54, %v786_v46 }
  0xa8   : > { %841 = vmatpush.bf16.msrb.mxu0 %v793_v56  ;;  %855 = vmatpush.bf16.msrb.mxu1 %v794_v57  ;;  %v796_v62 = vsel %vm620_vm1, %v788_v30, %v790_v55  ;;  %v4840_v9 = vpop.f32.mrf.mxu0  ;;  %v923_v12 = vpop.permute.xlu2 %922 }
  0xa9   : > { %883 = vmatpush.bf16.msrb.mxu3 %v796_v62  ;;  %v4842_v11 = vpop.f32.mrf.mxu1 }
  0xab   : > { %v4854_v15 = vpop.f32.mrf.mxu2 }
  0xac   : > { %v4857_v20 = vpop.f32.mrf.mxu3 }
  0xad   : > { %1719 = vrot.lane.b32.xlu1 %v4583_v3, %s4519_s22 }
  0xae   : > { %v919_v1 = vpop.permute.xlu1 %918  ;;  %1717 = vrot.lane.b32.xlu0 %v4611_v16, %s4519_s22  ;;  %1711 = vrot.lane.b32.xlu2 %v4607_v13, %s4519_s22 }
  0xaf   : > { %v917_v4 = vpop.permute.xlu0 %916 }
  0xb0   : > { %v927_v7 = vsel %vm924_vm2, %v4795_v39, %v917_v4  ;;  %v928_v8 = vsel %vm924_vm2, %v917_v4, %v919_v1  ;;  %v4862_v23 = vpop.f32.mrf.mxu0  ;;  %v1057_v25 = vpop.permute.xlu2 %1056 }
  0xb1   : > { %975 = vmatpush.bf16.msra.mxu2 %v927_v7  ;;  %989 = vmatpush.bf16.msra.mxu3 %v928_v8  ;;  %v4864_v24 = vpop.f32.mrf.mxu1 }
  0xb3   : > { %4106 = vmatmul.msk.bf16.vlgmr.msrb.gmra.mxu0 %vm351_vm0, %v4443_v52  ;;  %v486_v27 = vpop.f32.mrf.mxu2 }
  0xb4   : > { %4107 = vmatmul.msk.bf16.vlgmr.msrb.gmra.mxu1 %vm351_vm0, %v4443_v52  ;;  %4108 = vmatmul.msk.bf16.vlgmr.msrb.gmra.mxu2 %vm351_vm0, %v4443_v52  ;;  %v4878_v35 = vadd.f32 %v486_v27, %v4806_v50  ;;  %v500_v36 = vpop.f32.mrf.mxu3 }
  0xb5   : > { %4109 = vmatmul.msk.bf16.vlgmr.msrb.gmra.mxu3 %vm351_vm0, %v4443_v52  ;;  %1845 = vrot.lane.b32.xlu1 %v4613_v17, %s4519_s22  ;;  %v4882_v38 = vadd.f32 %v500_v36, %v4812_v53 }
  0xb6   : > { %v1045_v14 = vpop.permute.xlu1 %1044  ;;  %1713 = vrot.lane.b32.xlu0 %v4596_v10, %s4519_s22  ;;  %1847 = vrot.lane.b32.xlu2 %v4636_v32, %s4519_s22 }
  0xb7   : > { %v913_v18 = vpop.permute.xlu0 %912  ;;  %v1058_v19 = vsel %vm924_vm2, %v1045_v14, %v1047_v0 }
  0xb8   : > { %v926_v21 = vsel %vm924_vm2, %v913_v18, %v4795_v39  ;;  %v925_v22 = vsel %vm924_vm2, %v911_v47, %v913_v18  ;;  %1080 = vmatpush.bf16.msrb.mxu2 %v1058_v19  ;;  %v514_v39 = vpop.f32.mrf.mxu0  ;;  %v1184_v43 = vpop.permute.xlu2 %1183 }
  0xb9   : > { %961 = vmatpush.bf16.msra.mxu1 %v926_v21  ;;  %947 = vmatpush.bf16.msra.mxu0 %v925_v22  ;;  %v528_v40 = vpop.f32.mrf.mxu1  ;;  %v4884_v41 = vadd.f32 %v514_v39, %v392_v2 }
  0xba   : > { %v4886_v42 = vadd.f32 %v528_v40, %v406_v6 }
  0xbb   : > { %v4898_v47 = vpop.f32.mrf.mxu2 }
  0xbc   : > { %v4901_v50 = vpop.f32.mrf.mxu3 }
  0xbd   : > { %1721 = vrot.lane.b32.xlu1 %v4639_v33, %s4519_s22 }
  0xbe   : > { %v921_v26 = vpop.permute.xlu1 %920  ;;  %1849 = vrot.lane.b32.xlu0 %v4632_v29, %s4519_s22  ;;  %1723 = vrot.lane.b32.xlu2 %v4658_v45, %s4519_s22 }
  0xbf   : > { %v929_v28 = vsel %vm924_vm2, %v919_v1, %v921_v26  ;;  %v1049_v30 = vpop.permute.xlu0 %1048  ;;  %v930_v34 = vsel %vm924_vm2, %v921_v26, %v923_v12 }
  0xc0   : > { %1003 = vmatpush.bf16.msrb.mxu0 %v929_v28  ;;  %v1059_v37 = vsel %vm924_vm2, %v1047_v0, %v1049_v30  ;;  %1017 = vmatpush.bf16.msrb.mxu1 %v930_v34  ;;  %v4452_v0 = vld [vmem:[%s5710_s3 + $0x10] sm:$0xff]  ;;  %v1180_v2 = vpop.permute.xlu2 %1179 }
  0xc1   : > { %1094 = vmatpush.bf16.msrb.mxu3 %v1059_v37 }
  0xc3   : > { %4116 = vmatmul.msk.bf16.vlgmr.msra.gmra.mxu0 %vm351_vm0, %v4451_v31  ;;  %v542_v53 = vpop.f32.mrf.mxu2 }
  0xc4   : > { %4117 = vmatmul.msk.bf16.vlgmr.msra.gmra.mxu1 %vm351_vm0, %v4451_v31  ;;  %4118 = vmatmul.msk.bf16.vlgmr.msra.gmra.mxu2 %vm351_vm0, %v4451_v31  ;;  %v4911_v55 = vadd.f32 %v542_v53, %v4840_v9  ;;  %v556_v56 = vpop.f32.mrf.mxu3 }
  0xc5   : > { %4119 = vmatmul.msk.bf16.vlgmr.msra.gmra.mxu3 %vm351_vm0, %v4451_v31  ;;  %1855 = vrot.lane.b32.xlu1 %v4676_v58, %s4519_s22  ;;  %v4919_v1 = vadd.f32 %v556_v56, %v4842_v11 }
  0xc6   : > { %v1055_v46 = vpop.permute.xlu1 %1054  ;;  %1853 = vrot.lane.b32.xlu0 %v4656_v44, %s4519_s22  ;;  %1857 = vrot.lane.b32.xlu2 %v4682_v60, %s4519_s22 }
  0xc7   : > { %v1053_v48 = vpop.permute.xlu0 %1052  ;;  %v1063_v49 = vsel %vm924_vm2, %v1055_v46, %v1057_v25 }
  0xc8   : > { %v1062_v51 = vsel %vm924_vm2, %v1053_v48, %v1055_v46  ;;  %1150 = vmatpush.bf16.msra.mxu3 %v1063_v49  ;;  %v1316_v12 = vpop.permute.xlu2 %1315 }
  0xc9   : > { %1136 = vmatpush.bf16.msra.mxu2 %v1062_v51 }
  0xcd   : > { %1982 = vrot.lane.b32.xlu1 %v4586_v5, %s4520_s27 }
  0xce   : > { %v1182_v52 = vpop.permute.xlu1 %1181  ;;  %1851 = vrot.lane.b32.xlu0 %v4678_v59, %s4519_s22  ;;  %1984 = vrot.lane.b32.xlu2 %v4611_v16, %s4520_s27 }
  0xcf   : > { %v1051_v54 = vpop.permute.xlu0 %1050  ;;  %v1193_v4 = vsel %vm1191_vm3, %v1180_v2, %v1182_v52  ;;  %v1194_v6 = vsel %vm1191_vm3, %v1182_v52, %v1184_v43  ;;  %v4454_v52 = vld [vmem:[%s5710_s3 + $0x18] sm:$0xff] }
  0xd0   : > { %v1060_v57 = vsel %vm924_vm2, %v1049_v30, %v1051_v54  ;;  %v1061_v62 = vsel %vm924_vm2, %v1051_v54, %v1053_v48  ;;  %v1320_v22 = vpop.permute.xlu2 %1319  ;;  %v4987_v54 = vpop.f32.mrf.mxu1 }
  0xd1   : > { %1108 = vmatpush.bf16.msra.mxu0 %v1060_v57  ;;  %1122 = vmatpush.bf16.msra.mxu1 %v1061_v62 }
  0xd3   : > { %4120 = vmatmul.msk.bf16.vlgmr.msrb.gmra.mxu0 %vm351_vm0, %v4451_v31 }
  0xd4   : > { %4121 = vmatmul.msk.bf16.vlgmr.msrb.gmra.mxu1 %vm351_vm0, %v4451_v31  ;;  %4128 = vmatmul.msk.bf16.vlgmr.msrb.gmra.mxu2 %vm351_vm0, %v4452_v0  ;;  %v4453_v31 = vld [vmem:[%s5709_s2 + $0x18] sm:$0xff] }
  0xd5   : > { %4129 = vmatmul.msk.bf16.vlgmr.msrb.gmra.mxu3 %vm351_vm0, %v4452_v0  ;;  %1228 = vmatpush.bf16.msrb.mxu1 %v1193_v4 }
  0xd6   : > { %v1178_v7 = vpop.permute.xlu1 %1177  ;;  %1242 = vmatpush.bf16.msrb.mxu2 %v1194_v6  ;;  %1986 = vrot.lane.b32.xlu0 %v4583_v3, %s4520_s27  ;;  %v5001_v6 = vpop.f32.mrf.mxu0 }
  0xd7   : > { %v1186_v8 = vpop.permute.xlu0 %1185  ;;  %v1192_v9 = vsel %vm1191_vm3, %v1178_v7, %v1180_v2  ;;  %1978 = vrot.lane.b32.xlu1 %v4607_v13, %s4520_s27  ;;  %1980 = vrot.lane.b32.xlu2 %v4596_v10, %s4520_s27 }
  0xd8   : > { %v1195_v11 = vsel %vm1191_vm3, %v1184_v43, %v1186_v8  ;;  %1214 = vmatpush.bf16.msrb.mxu0 %v1192_v9  ;;  %v1318_v34 = vpop.permute.xlu2 %1317 }
  0xd9   : > { %1256 = vmatpush.bf16.msrb.mxu3 %v1195_v11  ;;  %v1327_v37 = vsel %vm1191_vm3, %v1316_v12, %v1318_v34  ;;  %v1328_v39 = vsel %vm1191_vm3, %v1318_v34, %v1320_v22  ;;  %v5010_v11 = vpop.f32.mrf.mxu2 }
  0xde   : > { %v1314_v14 = vpop.permute.xlu1 %1313  ;;  %2112 = vrot.lane.b32.xlu0 %v4613_v17, %s4520_s27 }
  0xdf   : > { %v1312_v18 = vpop.permute.xlu0 %1311  ;;  %2114 = vrot.lane.b32.xlu1 %v4636_v32, %s4520_s27  ;;  %2116 = vrot.lane.b32.xlu2 %v4632_v29, %s4520_s27  ;;  %v1326_v21 = vsel %vm1191_vm3, %v1314_v14, %v1316_v12  ;;  %v5012_v12 = vpop.f32.mrf.mxu3 }
  0xe0   : > { %v1325_v19 = vsel %vm1191_vm3, %v1312_v18, %v1314_v14  ;;  %v1453_v49 = vpop.permute.xlu2 %1452 }
  0xe3   : > { %4130 = vmatmul.msk.bf16.vlgmr.msra.gmra.mxu0 %vm351_vm0, %v4452_v0 }
  0xe4   : > { %4131 = vmatmul.msk.bf16.vlgmr.msra.gmra.mxu1 %vm351_vm0, %v4452_v0  ;;  %4132 = vmatmul.msk.bf16.vlgmr.msra.gmra.mxu2 %vm351_vm0, %v4452_v0 }
  0xe5   : > { %4133 = vmatmul.msk.bf16.vlgmr.msra.gmra.mxu3 %vm351_vm0, %v4452_v0  ;;  %1347 = vmatpush.bf16.msra.mxu2 %v1325_v19 }
  0xe6   : > { %v1190_v25 = vpop.permute.xlu1 %1189  ;;  %1361 = vmatpush.bf16.msra.mxu3 %v1326_v21  ;;  %1988 = vrot.lane.b32.xlu0 %v4639_v33, %s4520_s27 }
  0xe7   : > { %v1188_v26 = vpop.permute.xlu0 %1187  ;;  %1990 = vrot.lane.b32.xlu1 %v4658_v45, %s4520_s27  ;;  %2120 = vrot.lane.b32.xlu2 %v4656_v44, %s4520_s27 }
  0xe8   : > { %v1196_v27 = vsel %vm1191_vm3, %v1186_v8, %v1188_v26  ;;  %v1197_v28 = vsel %vm1191_vm3, %v1188_v26, %v1190_v25  ;;  %v1579_v2 = vpop.permute.xlu2 %1578 }
  0xe9   : > { %1270 = vmatpush.bf16.msra.mxu0 %v1196_v27  ;;  %1284 = vmatpush.bf16.msra.mxu1 %v1197_v28 }
  0xee   : > { %v1324_v30 = vpop.permute.xlu1 %1323  ;;  %2122 = vrot.lane.b32.xlu0 %v4676_v58, %s4520_s27 }
  0xef   : > { %v1322_v36 = vpop.permute.xlu0 %1321  ;;  %2124 = vrot.lane.b32.xlu1 %v4682_v60, %s4520_s27  ;;  %2118 = vrot.lane.b32.xlu2 %v4678_v59, %s4520_s27 }
  0xf0   : > { %v1329_v40 = vsel %vm1191_vm3, %v1320_v22, %v1322_v36  ;;  %v1330_v43 = vsel %vm1191_vm3, %v1322_v36, %v1324_v30  ;;  %v1455_v14 = vpop.permute.xlu2 %1454 }
  0xf1   : > { %v1463_v21 = vsel %vm1458_vm4, %v1453_v49, %v1455_v14 }
  0xf3   : > { %4140 = vmatmul.msk.bf16.vlgmr.msrb.gmra.mxu0 %vm351_vm0, %v4453_v31 }
  0xf4   : > { %4141 = vmatmul.msk.bf16.vlgmr.msrb.gmra.mxu1 %vm351_vm0, %v4453_v31  ;;  %4142 = vmatmul.msk.bf16.vlgmr.msrb.gmra.mxu2 %vm351_vm0, %v4453_v31 }
  0xf5   : > { %4143 = vmatmul.msk.bf16.vlgmr.msrb.gmra.mxu3 %vm351_vm0, %v4453_v31  ;;  %1375 = vmatpush.bf16.msrb.mxu0 %v1327_v37 }
  0xf6   : > { %v1451_v46 = vpop.permute.xlu1 %1450  ;;  %1389 = vmatpush.bf16.msrb.mxu1 %v1328_v39  ;;  %1403 = vmatpush.bf16.msrb.mxu2 %v1329_v40 }
  0xf7   : > { %1417 = vmatpush.bf16.msrb.mxu3 %v1330_v43  ;;  %v1449_v48 = vpop.permute.xlu0 %1448  ;;  %2251 = vrot.lane.b32.xlu1 %v4611_v16, %s4521_s10  ;;  %v1462_v57 = vsel %vm1458_vm4, %v1451_v46, %v1453_v49 }
  0xf8   : > { %2249 = vrot.lane.b32.xlu0 %v4586_v5, %s4521_s10  ;;  %2253 = vrot.lane.b32.xlu2 %v4583_v3, %s4521_s10  ;;  %v1461_v62 = vsel %vm1458_vm4, %v1449_v48, %v1451_v46  ;;  %v1589_v37 = vpop.permute.xlu2 %1588 }
  0xfe   : > { %v1447_v53 = vpop.permute.xlu1 %1446 }
  0xff   : > { %v1445_v51 = vpop.permute.xlu0 %1444  ;;  %2247 = vrot.lane.b32.xlu1 %v4596_v10, %s4521_s10  ;;  %v1460_v56 = vsel %vm1458_vm4, %v1447_v53, %v1449_v48 }
 0x100   : > { %2245 = vrot.lane.b32.xlu0 %v4607_v13, %s4521_s10  ;;  %2379 = vrot.lane.b32.xlu2 %v4613_v17, %s4521_s10  ;;  %v1459_v0 = vsel %vm1458_vm4, %v1445_v51, %v1447_v53 }
 0x103   : > { %4144 = vmatmul.msk.bf16.vlgmr.msra.gmra.mxu0 %vm351_vm0, %v4453_v31 }
 0x104   : > { %4145 = vmatmul.msk.bf16.vlgmr.msra.gmra.mxu1 %vm351_vm0, %v4453_v31  ;;  %4152 = vmatmul.msk.bf16.vlgmr.msra.gmra.mxu2 %vm351_vm0, %v4454_v52 }
 0x105   : > { %4153 = vmatmul.msk.bf16.vlgmr.msra.gmra.mxu3 %vm351_vm0, %v4454_v52  ;;  %1495 = vmatpush.bf16.msra.mxu1 %v1460_v56 }
 0x106   : > { %1509 = vmatpush.bf16.msra.mxu2 %v1461_v62  ;;  %1523 = vmatpush.bf16.msra.mxu3 %v1462_v57 }
 0x107   : > { %1481 = vmatpush.bf16.msra.mxu0 %v1459_v0  ;;  %2383 = vrot.lane.b32.xlu1 %v4632_v29, %s4521_s10  ;;  %v1583_v9 = vpop.permute.xlu1 %1582 }
 0x108   : > { %v1581_v4 = vpop.permute.xlu0 %1580  ;;  %2381 = vrot.lane.b32.xlu0 %v4636_v32, %s4521_s10  ;;  %2255 = vrot.lane.b32.xlu2 %v4639_v33, %s4521_s10 }
 0x109   : > { %v659_v7 = vpop.f32.mrf.mxu1  ;;  %v1592_v22 = vsel %vm1458_vm4, %v1579_v2, %v1581_v4  ;;  %v1593_v25 = vsel %vm1458_vm4, %v1581_v4, %v1583_v9  ;;  %v489_v4 = vadd.f32 %v4898_v47, %v4826_v61 }
 0x10a   : > { %v5006_v8 = vadd.f32 %v659_v7, %v4882_v38 }
 0x10f   : > { %2387 = vrot.lane.b32.xlu1 %v4656_v44, %s4521_s10  ;;  %v1587_v26 = vpop.permute.xlu1 %1586 }
 0x110   : > { %v645_v18 = vpop.f32.mrf.mxu0  ;;  %2257 = vrot.lane.b32.xlu0 %v4658_v45, %s4521_s10  ;;  %v1457_v38 = vpop.permute.xlu0 %1456  ;;  %2389 = vrot.lane.b32.xlu2 %v4676_v58, %s4521_s10 }
 0x111   : > { %v720_v19 = vadd.f32 %v645_v18, %v4878_v35  ;;  %v1464_v27 = vsel %vm1458_vm4, %v1455_v14, %v1457_v38  ;;  %v5035_v36 = vpop.f32.mrf.mxu1 }
 0x113   : > { %4154 = vmatmul.msk.bf16.vlgmr.msrb.gmra.mxu0 %vm351_vm0, %v4454_v52 }
 0x114   : > { %4155 = vmatmul.msk.bf16.vlgmr.msrb.gmra.mxu1 %vm351_vm0, %v4454_v52  ;;  %4156 = vmatmul.msk.bf16.vlgmr.msrb.gmra.mxu2 %vm351_vm0, %v4454_v52 }
 0x115   : > { %4157 = vmatmul.msk.bf16.vlgmr.msrb.gmra.mxu3 %vm351_vm0, %v4454_v52  ;;  %1537 = vmatpush.bf16.msrb.mxu0 %v1463_v21  ;;  %v1596_v52 = vsel %vm1458_vm4, %v1587_v26, %v1589_v37 }
 0x116   : > { %1614 = vmatpush.bf16.msrb.mxu2 %v1592_v22  ;;  %1628 = vmatpush.bf16.msrb.mxu3 %v1593_v25  ;;  %v517_v22 = vadd.f32 %v5001_v6, %v4854_v15 }
 0x117   : > { %v673_v35 = vpop.f32.mrf.mxu2  ;;  %1551 = vmatpush.bf16.msrb.mxu1 %v1464_v27  ;;  %2385 = vrot.lane.b32.xlu1 %v4678_v59, %s4521_s10  ;;  %v1585_v40 = vpop.permute.xlu1 %1584 }
 0x118   : > { %v687_v28 = vpop.f32.mrf.mxu3  ;;  %v722_v30 = vadd.f32 %v673_v35, %v4884_v41  ;;  %v647_v34 = vpop.f32.mrf.mxu0  ;;  %2391 = vrot.lane.b32.xlu0 %v4682_v60, %s4521_s10  ;;  %2516 = vrot.lane.b32.xlu2 %v4586_v5, %s4522_s13  ;;  %v4455_v41 = vld [vmem:[%s5709_s2 + $0x20] sm:$0xff]  ;;  %v1594_v51 = vsel %vm1458_vm4, %v1583_v9, %v1585_v40 }
 0x119   : > { %v723_v31 = vadd.f32 %v687_v28, %v4886_v42  ;;  %v1591_v39 = vpop.permute.xlu0 %1590  ;;  %v726_v7 = vadd.f32 %v647_v34, %v489_v4 }
 0x11f   : > { %v5039_v43 = vpop.f32.mrf.mxu2  ;;  %2520 = vrot.lane.b32.xlu1 %v4583_v3, %s4522_s13  ;;  %v1595_v3 = vsel %vm1458_vm4, %v1585_v40, %v1587_v26  ;;  %v5077_v2 = vpop.permute.xlu1 %1719 }
 0x120   : > { %v5041_v46 = vpop.f32.mrf.mxu3  ;;  %v701_v42 = vpop.f32.mrf.mxu0  ;;  %2518 = vrot.lane.b32.xlu0 %v4611_v16, %s4522_s13  ;;  %2512 = vrot.lane.b32.xlu2 %v4607_v13, %s4522_s13  ;;  %v1597_v16 = vsel %vm1458_vm4, %v1589_v37, %v1591_v39  ;;  %v728_v26 = vadd.f32 %v5039_v43, %v517_v22  ;;  %v559_v39 = vadd.f32 %v5012_v12, %v4864_v24 }
 0x121   : > { %v5051_v5 = vadd.f32 %v701_v42, %v4911_v55  ;;  %v715_v48 = vpop.f32.mrf.mxu1  ;;  %v1716_v55 = vpop.permute.xlu2 %1715 }
 0x122   : > { %v5054_v49 = vadd.f32 %v715_v48, %v4919_v1  ;;  %v1718_v13 = vpop.permute.xlu0 %1717 }
 0x123   : > { %4164 = vmatmul.msk.bf16.vlgmr.msra.gmra.mxu0 %vm351_vm0, %v4455_v41  ;;  %v1729_v38 = vsel %vm1725_vm5, %v1718_v13, %v5077_v2  ;;  %v1728_v21 = vsel %vm1725_vm5, %v1716_v55, %v1718_v13 }
 0x124   : > { %4165 = vmatmul.msk.bf16.vlgmr.msra.gmra.mxu1 %vm351_vm0, %v4455_v41  ;;  %4166 = vmatmul.msk.bf16.vlgmr.msra.gmra.mxu2 %vm351_vm0, %v4455_v41 }
 0x125   : > { %4167 = vmatmul.msk.bf16.vlgmr.msra.gmra.mxu3 %vm351_vm0, %v4455_v41  ;;  %1642 = vmatpush.bf16.msra.mxu0 %v1594_v51 }
 0x126   : > { %1656 = vmatpush.bf16.msra.mxu1 %v1595_v3  ;;  %1670 = vmatpush.bf16.msra.mxu2 %v1596_v52  ;;  %v503_v3 = vadd.f32 %v4901_v50, %v4829_v63 }
 0x127   : > { %v815_v1 = vpop.f32.mrf.mxu2  ;;  %1684 = vmatpush.bf16.msra.mxu3 %v1597_v16  ;;  %2646 = vrot.lane.b32.xlu1 %v4613_v17, %s4522_s13  ;;  %v1846_v25 = vpop.permute.xlu1 %1845 }
 0x128   : > { %v5068_v53 = vadd.f32 %v815_v1, %v720_v19  ;;  %v829_v56 = vpop.f32.mrf.mxu3  ;;  %v703_v57 = vpop.f32.mrf.mxu0  ;;  %2514 = vrot.lane.b32.xlu0 %v4596_v10, %s4522_s13  ;;  %2648 = vrot.lane.b32.xlu2 %v4636_v32, %s4522_s13  ;;  %v4456_v32 = vld [vmem:[%s5710_s3 + $0x20] sm:$0xff]  ;;  %v727_v16 = vadd.f32 %v5035_v36, %v503_v3  ;;  %v4457_v36 = vld [vmem:[%s5709_s2 + $0x28] sm:$0xff] }
 0x129   : > { %v5073_v62 = vadd.f32 %v829_v56, %v5006_v8  ;;  %v717_v0 = vpop.f32.mrf.mxu1  ;;  %v1712_v17 = vpop.permute.xlu2 %1711 }
 0x12a   : > { %v1714_v18 = vpop.permute.xlu0 %1713  ;;  %v731_v43 = vadd.f32 %v717_v0, %v559_v39 }
 0x12f   : > { %v817_v9 = vpop.f32.mrf.mxu2  ;;  %2522 = vrot.lane.b32.xlu1 %v4639_v33, %s4522_s13  ;;  %v1727_v33 = vsel %vm1725_vm5, %v1714_v18, %v1716_v55 }
 0x130   : > { %v5083_v10 = vadd.f32 %v817_v9, %v726_v7  ;;  %v5085_v8 = vpop.f32.mrf.mxu3  ;;  %v843_v14 = vpop.f32.mrf.mxu0  ;;  %2650 = vrot.lane.b32.xlu0 %v4632_v29, %s4522_s13  ;;  %2524 = vrot.lane.b32.xlu2 %v4658_v45, %s4522_s13  ;;  %v1726_v29 = vsel %vm1725_vm5, %v1712_v17, %v1714_v18  ;;  %v531_v45 = vadd.f32 %v4987_v54, %v4857_v20 }
 0x131   : > { %v5092_v61 = vadd.f32 %v843_v14, %v722_v30  ;;  %v857_v47 = vpop.f32.mrf.mxu1  ;;  %v1848_v35 = vpop.permute.xlu2 %1847  ;;  %v897_v1 = vadd.f32 %v5085_v8, %v727_v16 }
 0x132   : > { %v5094_v19 = vadd.f32 %v857_v47, %v723_v31  ;;  %v729_v28 = vadd.f32 %v5041_v46, %v531_v45  ;;  %v1850_v37 = vpop.permute.xlu0 %1849 }
 0x133   : > { %4168 = vmatmul.msk.bf16.vlgmr.msrb.gmra.mxu0 %vm351_vm0, %v4455_v41  ;;  %v1860_v12 = vsel %vm1725_vm5, %v1848_v35, %v1850_v37 }
 0x134   : > { %4169 = vmatmul.msk.bf16.vlgmr.msrb.gmra.mxu1 %vm351_vm0, %v4455_v41  ;;  %4176 = vmatmul.msk.bf16.vlgmr.msrb.gmra.mxu2 %vm351_vm0, %v4456_v32  ;;  %v1722_v41 = vpop.permute.xlu1 %1721 }
 0x135   : > { %4177 = vmatmul.msk.bf16.vlgmr.msrb.gmra.mxu3 %vm351_vm0, %v4456_v32  ;;  %1762 = vmatpush.bf16.msrb.mxu1 %v1727_v33  ;;  %v1730_v24 = vsel %vm1725_vm5, %v5077_v2, %v1722_v41 }
 0x136   : > { %1776 = vmatpush.bf16.msrb.mxu2 %v1728_v21  ;;  %1790 = vmatpush.bf16.msrb.mxu3 %v1729_v38 }
 0x137   : > { %v871_v27 = vpop.f32.mrf.mxu2  ;;  %1748 = vmatpush.bf16.msrb.mxu0 %v1726_v29  ;;  %2656 = vrot.lane.b32.xlu1 %v4676_v58, %s4522_s13  ;;  %v545_v58 = vadd.f32 %v5010_v11, %v4862_v23  ;;  %v1859_v11 = vsel %vm1725_vm5, %v1846_v25, %v1848_v35 }
 0x138   : > { %v894_v15 = vadd.f32 %v871_v27, %v5051_v5  ;;  %v885_v6 = vpop.f32.mrf.mxu3  ;;  %v845_v30 = vpop.f32.mrf.mxu0  ;;  %2654 = vrot.lane.b32.xlu0 %v4656_v44, %s4522_s13  ;;  %2658 = vrot.lane.b32.xlu2 %v4682_v60, %s4522_s13 }
 0x139   : > { %v895_v20 = vadd.f32 %v885_v6, %v5054_v49  ;;  %v898_v54 = vadd.f32 %v845_v30, %v728_v26  ;;  %v859_v31 = vpop.f32.mrf.mxu1  ;;  %v730_v40 = vadd.f32 %v703_v57, %v545_v58  ;;  %v1724_v51 = vpop.permute.xlu2 %1723 }
 0x13a   : > { %v899_v34 = vadd.f32 %v859_v31, %v729_v28  ;;  %v1854_v52 = vpop.permute.xlu0 %1853 }
 0x13c   : > { %v1856_v0 = vpop.permute.xlu1 %1855 }
 0x13f   : > { %v873_v46 = vpop.f32.mrf.mxu2 }
 0x140   : > { %v5125_v44 = vadd.f32 %v873_v46, %v730_v40  ;;  %v887_v42 = vpop.f32.mrf.mxu3  ;;  %v949_v5 = vpop.f32.mrf.mxu0  ;;  %2652 = vrot.lane.b32.xlu0 %v4678_v59, %s4522_s13  ;;  %v1731_v59 = vsel %vm1725_vm5, %v1722_v41, %v1724_v51 }
 0x141   : > { %v901_v48 = vadd.f32 %v887_v42, %v731_v43  ;;  %v1024_v60 = vadd.f32 %v949_v5, %v5068_v53  ;;  %v963_v49 = vpop.f32.mrf.mxu1  ;;  %v1858_v2 = vpop.permute.xlu2 %1857 }
 0x142   : > { %v1025_v23 = vadd.f32 %v963_v49, %v5073_v62  ;;  %v1852_v17 = vpop.permute.xlu0 %1851  ;;  %v1864_v33 = vsel %vm1725_vm5, %v1856_v0, %v1858_v2 }
 0x143   : > { %4178 = vmatmul.msk.bf16.vlgmr.msra.gmra.mxu0 %vm351_vm0, %v4456_v32  ;;  %v1861_v18 = vsel %vm1725_vm5, %v1850_v37, %v1852_v17 }
 0x144   : > { %4179 = vmatmul.msk.bf16.vlgmr.msra.gmra.mxu1 %vm351_vm0, %v4456_v32  ;;  %4180 = vmatmul.msk.bf16.vlgmr.msra.gmra.mxu2 %vm351_vm0, %v4456_v32  ;;  %v1983_v38 = vpop.permute.xlu1 %1982 }
 0x145   : > { %4181 = vmatmul.msk.bf16.vlgmr.msra.gmra.mxu3 %vm351_vm0, %v4456_v32  ;;  %1804 = vmatpush.bf16.msra.mxu0 %v1730_v24 }
 0x146   : > { %1881 = vmatpush.bf16.msra.mxu2 %v1859_v11  ;;  %1895 = vmatpush.bf16.msra.mxu3 %v1860_v12 }
 0x147   : > { %v977_v55 = vpop.f32.mrf.mxu2  ;;  %1818 = vmatpush.bf16.msra.mxu1 %v1731_v59 }
 0x148   : > { %v1026_v63 = vadd.f32 %v977_v55, %v5092_v61  ;;  %v991_v50 = vpop.f32.mrf.mxu3  ;;  %v951_v13 = vpop.f32.mrf.mxu0 }
 0x149   : > { %v1027_v53 = vadd.f32 %v991_v50, %v5094_v19  ;;  %v1030_v56 = vadd.f32 %v951_v13, %v5083_v10  ;;  %v965_v57 = vpop.f32.mrf.mxu1  ;;  %v1862_v10 = vsel %vm1725_vm5, %v1852_v17, %v1854_v52  ;;  %v1863_v19 = vsel %vm1725_vm5, %v1854_v52, %v1856_v0  ;;  %v1985_v29 = vpop.permute.xlu2 %1984 }
 0x14a   : > { %v1031_v62 = vadd.f32 %v965_v57, %v897_v1 }
 0x14c   : > { %v1979_v6 = vpop.permute.xlu1 %1978 }
 0x14f   : > { %v979_v4 = vpop.f32.mrf.mxu2 }
 0x150   : > { %v1032_v7 = vadd.f32 %v979_v4, %v898_v54  ;;  %v993_v9 = vpop.f32.mrf.mxu3  ;;  %v1005_v8 = vpop.f32.mrf.mxu0 }
 0x151   : > { %v1033_v14 = vadd.f32 %v993_v9, %v899_v34  ;;  %v1028_v32 = vadd.f32 %v1005_v8, %v894_v15  ;;  %v1019_v61 = vpop.f32.mrf.mxu1  ;;  %v1987_v15 = vpop.permute.xlu0 %1986  ;;  %v4458_v34 = vld [vmem:[%s5710_s3 + $0x28] sm:$0xff] }
 0x152   : > { %v1029_v47 = vadd.f32 %v1019_v61, %v895_v20  ;;  %v1981_v40 = vpop.permute.xlu2 %1980  ;;  %v1996_v41 = vsel %vm1992_vm6, %v1985_v29, %v1987_v15 }
 0x153   : > { %4188 = vmatmul.msk.bf16.vlgmr.msrb.gmra.mxu0 %vm351_vm0, %v4457_v36  ;;  %v1994_v46 = vsel %vm1992_vm6, %v1981_v40, %v1983_v38  ;;  %v1993_v42 = vsel %vm1992_vm6, %v1979_v6, %v1981_v40 }
 0x154   : > { %4189 = vmatmul.msk.bf16.vlgmr.msrb.gmra.mxu1 %vm351_vm0, %v4457_v36  ;;  %4190 = vmatmul.msk.bf16.vlgmr.msrb.gmra.mxu2 %vm351_vm0, %v4457_v36 }
 0x155   : > { %4191 = vmatmul.msk.bf16.vlgmr.msrb.gmra.mxu3 %vm351_vm0, %v4457_v36  ;;  %1909 = vmatpush.bf16.msrb.mxu0 %v1861_v18 }
 0x156   : > { %1923 = vmatpush.bf16.msrb.mxu1 %v1862_v10  ;;  %1937 = vmatpush.bf16.msrb.mxu2 %v1863_v19 }
 0x157   : > { %v1082_v21 = vpop.f32.mrf.mxu2  ;;  %1951 = vmatpush.bf16.msrb.mxu3 %v1864_v33  ;;  %v4459_v33 = vld [vmem:[%s5709_s2 + $0x30] sm:$0xff] }
 0x158   : > { %v1157_v22 = vadd.f32 %v1082_v21, %v1024_v60  ;;  %v1096_v25 = vpop.f32.mrf.mxu3  ;;  %v1007_v45 = vpop.f32.mrf.mxu0 }
 0x159   : > { %v1158_v26 = vadd.f32 %v1096_v25, %v1025_v23  ;;  %v1034_v27 = vadd.f32 %v1007_v45, %v5125_v44  ;;  %v1021_v35 = vpop.f32.mrf.mxu1  ;;  %v1995_v44 = vsel %vm1992_vm6, %v1983_v38, %v1985_v29  ;;  %v2113_v5 = vpop.permute.xlu0 %2112 }
 0x15a   : > { %v1035_v28 = vadd.f32 %v1021_v35, %v901_v48  ;;  %v2115_v60 = vpop.permute.xlu1 %2114  ;;  %v2117_v59 = vpop.permute.xlu2 %2116 }
 0x15b   : > { %v2126_v0 = vsel %vm1992_vm6, %v2113_v5, %v2115_v60  ;;  %v2127_v2 = vsel %vm1992_vm6, %v2115_v60, %v2117_v59  ;;  %v4460_v60 = vld [vmem:[%s5710_s3 + $0x30] sm:$0xff] }
 0x15f   : > { %v1084_v30 = vpop.f32.mrf.mxu2 }
 0x160   : > { %v1163_v20 = vadd.f32 %v1084_v30, %v1030_v56  ;;  %v1098_v54 = vpop.f32.mrf.mxu3  ;;  %v1110_v31 = vpop.f32.mrf.mxu0 }
 0x161   : > { %v1164_v37 = vadd.f32 %v1098_v54, %v1031_v62  ;;  %v1159_v58 = vadd.f32 %v1110_v31, %v1026_v63  ;;  %v1124_v39 = vpop.f32.mrf.mxu1  ;;  %v1989_v16 = vpop.permute.xlu0 %1988 }
 0x162   : > { %v1160_v43 = vadd.f32 %v1124_v39, %v1027_v53  ;;  %v1991_v56 = vpop.permute.xlu1 %1990  ;;  %v1997_v62 = vsel %vm1992_vm6, %v1987_v15, %v1989_v16 }
 0x163   : > { %4192 = vmatmul.msk.bf16.vlgmr.msra.gmra.mxu0 %vm351_vm0, %v4457_v36  ;;  %v1998_v4 = vsel %vm1992_vm6, %v1989_v16, %v1991_v56 }
 0x164   : > { %4193 = vmatmul.msk.bf16.vlgmr.msra.gmra.mxu1 %vm351_vm0, %v4457_v36  ;;  %4200 = vmatmul.msk.bf16.vlgmr.msra.gmra.mxu2 %vm351_vm0, %v4458_v34  ;;  %v2121_v36 = vpop.permute.xlu2 %2120 }
 0x165   : > { %4201 = vmatmul.msk.bf16.vlgmr.msra.gmra.mxu3 %vm351_vm0, %v4458_v34  ;;  %2029 = vmatpush.bf16.msra.mxu1 %v1994_v46 }
 0x166   : > { %2043 = vmatpush.bf16.msra.mxu2 %v1995_v44  ;;  %2057 = vmatpush.bf16.msra.mxu3 %v1996_v41 }
 0x167   : > { %v1138_v48 = vpop.f32.mrf.mxu2  ;;  %2015 = vmatpush.bf16.msra.mxu0 %v1993_v42 }
 0x168   : > { %v1161_v49 = vadd.f32 %v1138_v48, %v1028_v32  ;;  %v1152_v51 = vpop.f32.mrf.mxu3  ;;  %v1112_v23 = vpop.f32.mrf.mxu0 }
 0x169   : > { %v1162_v24 = vadd.f32 %v1152_v51, %v1029_v47  ;;  %v1165_v11 = vadd.f32 %v1112_v23, %v1032_v7  ;;  %v1126_v12 = vpop.f32.mrf.mxu1  ;;  %v2123_v18 = vpop.permute.xlu0 %2122 }
 0x16a   : > { %v1166_v3 = vadd.f32 %v1126_v12, %v1033_v14  ;;  %v2125_v10 = vpop.permute.xlu1 %2124  ;;  %v2130_v15 = vsel %vm1992_vm6, %v2121_v36, %v2123_v18 }
 0x16b   : > { %v2131_v6 = vsel %vm1992_vm6, %v2123_v18, %v2125_v10 }
 0x16c   : > { %v2119_v38 = vpop.permute.xlu2 %2118 }
 0x16d   : > { %v2128_v35 = vsel %vm1992_vm6, %v2117_v59, %v2119_v38 }
 0x16f   : > { %v1140_v52 = vpop.f32.mrf.mxu2 }
 0x170   : > { %v1167_v55 = vadd.f32 %v1140_v52, %v1034_v27  ;;  %v1154_v1 = vpop.f32.mrf.mxu3  ;;  %v1216_v63 = vpop.f32.mrf.mxu0 }
 0x171   : > { %v1168_v50 = vadd.f32 %v1154_v1, %v1035_v28  ;;  %v1291_v13 = vadd.f32 %v1216_v63, %v1157_v22  ;;  %v1230_v53 = vpop.f32.mrf.mxu1  ;;  %v2129_v28 = vsel %vm1992_vm6, %v2119_v38, %v2121_v36  ;;  %v2250_v30 = vpop.permute.xlu0 %2249 }
 0x172   : > { %v1292_v57 = vadd.f32 %v1230_v53, %v1158_v26  ;;  %v2252_v54 = vpop.permute.xlu1 %2251 }
 0x173   : > { %4202 = vmatmul.msk.bf16.vlgmr.msrb.gmra.mxu0 %vm351_vm0, %v4458_v34  ;;  %v2262_v59 = vsel %vm2259_vm7, %v2250_v30, %v2252_v54 }
 0x174   : > { %4203 = vmatmul.msk.bf16.vlgmr.msrb.gmra.mxu1 %vm351_vm0, %v4458_v34  ;;  %4204 = vmatmul.msk.bf16.vlgmr.msrb.gmra.mxu2 %vm351_vm0, %v4458_v34  ;;  %v2254_v46 = vpop.permute.xlu2 %2253 }
 0x175   : > { %4205 = vmatmul.msk.bf16.vlgmr.msrb.gmra.mxu3 %vm351_vm0, %v4458_v34  ;;  %2071 = vmatpush.bf16.msrb.mxu0 %v1997_v62 }
 0x176   : > { %2148 = vmatpush.bf16.msrb.mxu2 %v2126_v0  ;;  %2162 = vmatpush.bf16.msrb.mxu3 %v2127_v2 }
 0x177   : > { %v1244_v17 = vpop.f32.mrf.mxu2  ;;  %2085 = vmatpush.bf16.msrb.mxu1 %v1998_v4 }
 0x178   : > { %v1293_v7 = vadd.f32 %v1244_v17, %v1159_v58  ;;  %v1258_v9 = vpop.f32.mrf.mxu3  ;;  %v1218_v8 = vpop.f32.mrf.mxu0 }
 0x179   : > { %v1294_v14 = vadd.f32 %v1258_v9, %v1160_v43  ;;  %v1297_v32 = vadd.f32 %v1218_v8, %v1163_v20  ;;  %v1232_v61 = vpop.f32.mrf.mxu1  ;;  %v2246_v41 = vpop.permute.xlu0 %2245 }
 0x17a   : > { %v1298_v47 = vadd.f32 %v1232_v61, %v1164_v37 }
 0x17c   : > { %v2380_v16 = vpop.permute.xlu2 %2379 }
 0x17f   : > { %v1246_v19 = vpop.f32.mrf.mxu2 }
 0x180   : > { %v1299_v21 = vadd.f32 %v1246_v19, %v1165_v11  ;;  %v1260_v29 = vpop.f32.mrf.mxu3  ;;  %v1272_v22 = vpop.f32.mrf.mxu0 }
 0x181   : > { %v1300_v25 = vadd.f32 %v1260_v29, %v1166_v3  ;;  %v1295_v45 = vadd.f32 %v1272_v22, %v1161_v49  ;;  %v1286_v26 = vpop.f32.mrf.mxu1  ;;  %v2263_v3 = vsel %vm2259_vm7, %v2252_v54, %v2254_v46  ;;  %v2382_v1 = vpop.permute.xlu0 %2381 }
 0x182   : > { %v1296_v27 = vadd.f32 %v1286_v26, %v1162_v24  ;;  %v2248_v24 = vpop.permute.xlu1 %2247  ;;  %v2393_v18 = vsel %vm2259_vm7, %v2380_v16, %v2382_v1 }
 0x183   : > { %4212 = vmatmul.msk.bf16.vlgmr.msra.gmra.mxu0 %vm351_vm0, %v4459_v33  ;;  %v2261_v12 = vsel %vm2259_vm7, %v2248_v24, %v2250_v30  ;;  %v2260_v52 = vsel %vm2259_vm7, %v2246_v41, %v2248_v24 }
 0x184   : > { %4213 = vmatmul.msk.bf16.vlgmr.msra.gmra.mxu1 %vm351_vm0, %v4459_v33  ;;  %4214 = vmatmul.msk.bf16.vlgmr.msra.gmra.mxu2 %vm351_vm0, %v4459_v33  ;;  %v2256_v4 = vpop.permute.xlu2 %2255 }
 0x185   : > { %4215 = vmatmul.msk.bf16.vlgmr.msra.gmra.mxu3 %vm351_vm0, %v4459_v33  ;;  %2176 = vmatpush.bf16.msra.mxu0 %v2128_v35 }
 0x186   : > { %2190 = vmatpush.bf16.msra.mxu1 %v2129_v28  ;;  %2204 = vmatpush.bf16.msra.mxu2 %v2130_v15 }
 0x187   : > { %v1349_v20 = vpop.f32.mrf.mxu2  ;;  %2218 = vmatpush.bf16.msra.mxu3 %v2131_v6  ;;  %v4461_v6 = vld [vmem:[%s5709_s2 + $0x38] sm:$0xff] }
 0x188   : > { %v1424_v31 = vadd.f32 %v1349_v20, %v1291_v13  ;;  %v1363_v34 = vpop.f32.mrf.mxu3  ;;  %v1274_v37 = vpop.f32.mrf.mxu0 }
 0x189   : > { %v1425_v58 = vadd.f32 %v1363_v34, %v1292_v57  ;;  %v1301_v39 = vadd.f32 %v1274_v37, %v1167_v55  ;;  %v1288_v40 = vpop.f32.mrf.mxu1 }
 0x18a   : > { %v1302_v43 = vadd.f32 %v1288_v40, %v1168_v50  ;;  %v2384_v0 = vpop.permute.xlu1 %2383 }
 0x18b   : > { %v2394_v10 = vsel %vm2259_vm7, %v2382_v1, %v2384_v0 }
 0x18c   : > { %v2390_v28 = vpop.permute.xlu2 %2389 }
 0x18f   : > { %v1351_v44 = vpop.f32.mrf.mxu2 }
 0x190   : > { %v1430_v42 = vadd.f32 %v1351_v44, %v1297_v32  ;;  %v1365_v5 = vpop.f32.mrf.mxu3  ;;  %v1377_v48 = vpop.f32.mrf.mxu0 }
 0x191   : > { %v1431_v49 = vadd.f32 %v1365_v5, %v1298_v47  ;;  %v1426_v51 = vadd.f32 %v1377_v48, %v1293_v7  ;;  %v1391_v23 = vpop.f32.mrf.mxu1  ;;  %v2258_v32 = vpop.permute.xlu0 %2257  ;;  %v2264_v47 = vsel %vm2259_vm7, %v2254_v46, %v2256_v4 }
 0x192   : > { %v1427_v11 = vadd.f32 %v1391_v23, %v1294_v14  ;;  %v2265_v19 = vsel %vm2259_vm7, %v2256_v4, %v2258_v32 }
 0x193   : > { %4216 = vmatmul.msk.bf16.vlgmr.msrb.gmra.mxu0 %vm351_vm0, %v4459_v33 }
 0x194   : > { %4217 = vmatmul.msk.bf16.vlgmr.msrb.gmra.mxu1 %vm351_vm0, %v4459_v33  ;;  %4224 = vmatmul.msk.bf16.vlgmr.msrb.gmra.mxu2 %vm351_vm0, %v4460_v60  ;;  %v2388_v33 = vpop.permute.xlu1 %2387 }
 0x195   : > { %4225 = vmatmul.msk.bf16.vlgmr.msrb.gmra.mxu3 %vm351_vm0, %v4460_v60  ;;  %2296 = vmatpush.bf16.msrb.mxu1 %v2261_v12  ;;  %v2397_v46 = vsel %vm2259_vm7, %v2388_v33, %v2390_v28 }
 0x196   : > { %2310 = vmatpush.bf16.msrb.mxu2 %v2262_v59  ;;  %2324 = vmatpush.bf16.msrb.mxu3 %v2263_v3 }
 0x197   : > { %v1405_v55 = vpop.f32.mrf.mxu2  ;;  %2282 = vmatpush.bf16.msrb.mxu0 %v2260_v52 }
 0x198   : > { %v1428_v63 = vadd.f32 %v1405_v55, %v1295_v45  ;;  %v1419_v50 = vpop.f32.mrf.mxu3  ;;  %v1379_v13 = vpop.f32.mrf.mxu0 }
 0x199   : > { %v1429_v53 = vadd.f32 %v1419_v50, %v1296_v27  ;;  %v1432_v56 = vadd.f32 %v1379_v13, %v1299_v21  ;;  %v1393_v57 = vpop.f32.mrf.mxu1  ;;  %v2392_v35 = vpop.permute.xlu0 %2391 }
 0x19a   : > { %v1433_v62 = vadd.f32 %v1393_v57, %v1300_v25  ;;  %v2398_v41 = vsel %vm2259_vm7, %v2390_v28, %v2392_v35 }
 0x19c   : > { %v2386_v30 = vpop.permute.xlu1 %2385 }
 0x19d   : > { %v2395_v40 = vsel %vm2259_vm7, %v2384_v0, %v2386_v30 }
 0x19f   : > { %v1407_v2 = vpop.f32.mrf.mxu2 }
 0x1a0   : > { %v1434_v36 = vadd.f32 %v1407_v2, %v1301_v39  ;;  %v1421_v17 = vpop.f32.mrf.mxu3  ;;  %v1483_v7 = vpop.f32.mrf.mxu0 }
 0x1a1   : > { %v1435_v9 = vadd.f32 %v1421_v17, %v1302_v43  ;;  %v1558_v8 = vadd.f32 %v1483_v7, %v1424_v31  ;;  %v1497_v14 = vpop.f32.mrf.mxu1  ;;  %v2396_v43 = vsel %vm2259_vm7, %v2386_v30, %v2388_v33  ;;  %v2519_v44 = vpop.permute.xlu0 %2518 }
 0x1a2   : > { %v1559_v61 = vadd.f32 %v1497_v14, %v1425_v58 }
 0x1a3   : > { %4226 = vmatmul.msk.bf16.vlgmr.msra.gmra.mxu0 %vm351_vm0, %v4460_v60 }
 0x1a4   : > { %4227 = vmatmul.msk.bf16.vlgmr.msra.gmra.mxu1 %vm351_vm0, %v4460_v60  ;;  %4228 = vmatmul.msk.bf16.vlgmr.msra.gmra.mxu2 %vm351_vm0, %v4460_v60  ;;  %v2521_v12 = vpop.permute.xlu1 %2520 }
 0x1a5   : > { %4229 = vmatmul.msk.bf16.vlgmr.msra.gmra.mxu3 %vm351_vm0, %v4460_v60  ;;  %2338 = vmatpush.bf16.msra.mxu0 %v2264_v47 }
 0x1a6   : > { %2415 = vmatpush.bf16.msra.mxu2 %v2393_v18  ;;  %2429 = vmatpush.bf16.msra.mxu3 %v2394_v10 }
 0x1a7   : > { %v1511_v38 = vpop.f32.mrf.mxu2  ;;  %2352 = vmatpush.bf16.msra.mxu1 %v2265_v19 }
 0x1a8   : > { %v1560_v21 = vadd.f32 %v1511_v38, %v1426_v51  ;;  %v1525_v29 = vpop.f32.mrf.mxu3  ;;  %v1485_v22 = vpop.f32.mrf.mxu0 }
 0x1a9   : > { %v1561_v25 = vadd.f32 %v1525_v29, %v1427_v11  ;;  %v1564_v45 = vadd.f32 %v1485_v22, %v1430_v42  ;;  %v1499_v26 = vpop.f32.mrf.mxu1  ;;  %v2517_v42 = vpop.permute.xlu2 %2516 }
 0x1aa   : > { %v1565_v27 = vadd.f32 %v1499_v26, %v1431_v49  ;;  %v2515_v52 = vpop.permute.xlu0 %2514  ;;  %v2529_v0 = vsel %vm2526_vm8, %v2517_v42, %v2519_v44 }
 0x1ab   : > { %v2528_v57 = vsel %vm2526_vm8, %v2515_v52, %v2517_v42 }
 0x1ac   : > { %v2647_v4 = vpop.permute.xlu1 %2646 }
 0x1af   : > { %v1513_v15 = vpop.f32.mrf.mxu2 }
 0x1b0   : > { %v1566_v20 = vadd.f32 %v1513_v15, %v1432_v56  ;;  %v1527_v54 = vpop.f32.mrf.mxu3  ;;  %v1539_v31 = vpop.f32.mrf.mxu0 }
 0x1b1   : > { %v1567_v34 = vadd.f32 %v1527_v54, %v1433_v62  ;;  %v1562_v37 = vadd.f32 %v1539_v31, %v1428_v63  ;;  %v1553_v58 = vpop.f32.mrf.mxu1  ;;  %v2513_v3 = vpop.permute.xlu2 %2512  ;;  %v4462_v63 = vld [vmem:[%s5710_s3 + $0x38] sm:$0xff]  ;;  %v2530_v62 = vsel %vm2526_vm8, %v2519_v44, %v2521_v12 }
 0x1b2   : > { %v1563_v39 = vadd.f32 %v1553_v58, %v1429_v53  ;;  %v2527_v2 = vsel %vm2526_vm8, %v2513_v3, %v2515_v52  ;;  %v2651_v18 = vpop.permute.xlu0 %2650 }
 0x1b3   : > { %4236 = vmatmul.msk.bf16.vlgmr.msrb.gmra.mxu0 %vm351_vm0, %v4461_v6 }
 0x1b4   : > { %4237 = vmatmul.msk.bf16.vlgmr.msrb.gmra.mxu1 %vm351_vm0, %v4461_v6  ;;  %4238 = vmatmul.msk.bf16.vlgmr.msrb.gmra.mxu2 %vm351_vm0, %v4461_v6  ;;  %v2523_v19 = vpop.permute.xlu1 %2522 }
 0x1b5   : > { %4239 = vmatmul.msk.bf16.vlgmr.msrb.gmra.mxu3 %vm351_vm0, %v4461_v6  ;;  %2443 = vmatpush.bf16.msrb.mxu0 %v2395_v40  ;;  %v4463_v40 = vld [vmem:[%s5709_s2 + $0x40] sm:$0xff] }
 0x1b6   : > { %2457 = vmatpush.bf16.msrb.mxu1 %v2396_v43  ;;  %2471 = vmatpush.bf16.msrb.mxu2 %v2397_v46 }
 0x1b7   : > { %v1616_v5 = vpop.f32.mrf.mxu2  ;;  %2485 = vmatpush.bf16.msrb.mxu3 %v2398_v41 }
 0x1b8   : > { %v1691_v48 = vadd.f32 %v1616_v5, %v1558_v8  ;;  %v1630_v60 = vpop.f32.mrf.mxu3  ;;  %v1541_v49 = vpop.f32.mrf.mxu0 }
 0x1b9   : > { %v1692_v51 = vadd.f32 %v1630_v60, %v1559_v61  ;;  %v1568_v23 = vadd.f32 %v1541_v49, %v1434_v36  ;;  %v1555_v24 = vpop.f32.mrf.mxu1  ;;  %v2649_v17 = vpop.permute.xlu2 %2648 }
 0x1ba   : > { %v1569_v11 = vadd.f32 %v1555_v24, %v1435_v9  ;;  %v2660_v35 = vsel %vm2526_vm8, %v2647_v4, %v2649_v17  ;;  %v2661_v28 = vsel %vm2526_vm8, %v2649_v17, %v2651_v18  ;;  %v2655_v15 = vpop.permute.xlu0 %2654  ;;  %v2771_v24 = vld [vmem:[%s5711_s4] sm:$0xff] }
 0x1bc   : > { %v2657_v43 = vpop.permute.xlu1 %2656 }
 0x1bf   : > { %v1618_v59 = vpop.f32.mrf.mxu2 }
 0x1c0   : > { %v5219_v16 = vadd.f32 %v1618_v59, %v1564_v45  ;;  %v1632_v55 = vpop.f32.mrf.mxu3  ;;  %v1644_v1 = vpop.f32.mrf.mxu0 }
 0x1c1   : > { %v5224_v50 = vadd.f32 %v1632_v55, %v1565_v27  ;;  %v1693_v13 = vadd.f32 %v1644_v1, %v1560_v21  ;;  %v1658_v53 = vpop.f32.mrf.mxu1  ;;  %v2525_v45 = vpop.permute.xlu2 %2524  ;;  %v2531_v27 = vsel %vm2526_vm8, %v2521_v12, %v2523_v19  ;;  %v4523_v12 = vmov 0  }
 0x1c2   : > { %v1694_v56 = vadd.f32 %v1658_v53, %v1561_v25  ;;  %v2653_v58 = vpop.permute.xlu0 %2652  ;;  %4504 = vset.pattern.permute.xlu1 %v4523_v12  ;;  %4505 = vset.pattern.permute.xlu2 %v4523_v12 }
 0x1c3   : > { %4240 = vmatmul.msk.bf16.vlgmr.msra.gmra.mxu0 %vm351_vm0, %v4461_v6  ;;  %v2662_v60 = vsel %vm2526_vm8, %v2651_v18, %v2653_v58  ;;  %v2663_v49 = vsel %vm2526_vm8, %v2653_v58, %v2655_v15  ;;  %2775 = vperm.xlu1 %4504, %v2771_v24  }
 0x1c4   : > { %4241 = vmatmul.msk.bf16.vlgmr.msra.gmra.mxu1 %vm351_vm0, %v4461_v6  ;;  %4248 = vmatmul.msk.bf16.vlgmr.msra.gmra.mxu2 %vm351_vm0, %v4462_v63  ;;  %v2532_v6 = vsel %vm2526_vm8, %v2523_v19, %v2525_v45 }
 0x1c5   : > { %4249 = vmatmul.msk.bf16.vlgmr.msra.gmra.mxu3 %vm351_vm0, %v4462_v63  ;;  %2563 = vmatpush.bf16.msra.mxu1 %v2528_v57 }
 0x1c6   : > { %2577 = vmatpush.bf16.msra.mxu2 %v2529_v0  ;;  %2591 = vmatpush.bf16.msra.mxu3 %v2530_v62 }
 0x1c7   : > { %v1672_v36 = vpop.f32.mrf.mxu2  ;;  %2549 = vmatpush.bf16.msra.mxu0 %v2527_v2  ;;  %4506 = vset.pattern.permute.xlu0 %v4523_v12 }
 0x1c8   : > { %v1695_v7 = vadd.f32 %v1672_v36, %v1562_v37  ;;  %v1686_v9 = vpop.f32.mrf.mxu3  ;;  %v1646_v8 = vpop.f32.mrf.mxu0 }
 0x1c9   : > { %v1696_v14 = vadd.f32 %v1686_v9, %v1563_v39  ;;  %v5234_v32 = vadd.f32 %v1646_v8, %v1566_v20  ;;  %v1660_v61 = vpop.f32.mrf.mxu1  ;;  %v2659_v5 = vpop.permute.xlu2 %2658 }
 0x1ca   : > { %v5236_v47 = vadd.f32 %v1660_v61, %v1567_v34 }
 0x1cf   : > { %v1674_v10 = vpop.f32.mrf.mxu2 }
 0x1d0   : > { %v5238_v33 = vadd.f32 %v1674_v10, %v1568_v23  ;;  %v1688_v38 = vpop.f32.mrf.mxu3  ;;  %v1750_v21 = vpop.f32.mrf.mxu0  ;;  %v2665_v23 = vsel %vm2526_vm8, %v2657_v43, %v2659_v5 }
 0x1d1   : > { %v5240_v29 = vadd.f32 %v1688_v38, %v1569_v11  ;;  %v1825_v22 = vadd.f32 %v1750_v21, %v1691_v48  ;;  %v1764_v25 = vpop.f32.mrf.mxu1  ;;  %v2772_v38 = vld [vmem:[%s5711_s4 + $0x8] sm:$0xff] }
 0x1d2   : > { %v1826_v26 = vadd.f32 %v1764_v25, %v1692_v51  ;;  %v2664_v51 = vsel %vm2526_vm8, %v2655_v15, %v2657_v43  ;;  %2780 = vperm.xlu2 %4505, %v2772_v38  }
 0x1d3   : > { %4250 = vmatmul.msk.bf16.vlgmr.msrb.gmra.mxu0 %vm351_vm0, %v4462_v63 }
 0x1d4   : > { %4251 = vmatmul.msk.bf16.vlgmr.msrb.gmra.mxu1 %vm351_vm0, %v4462_v63  ;;  %4252 = vmatmul.msk.bf16.vlgmr.msrb.gmra.mxu2 %vm351_vm0, %v4462_v63 }
 0x1d5   : > { %4253 = vmatmul.msk.bf16.vlgmr.msrb.gmra.mxu3 %vm351_vm0, %v4462_v63  ;;  %2605 = vmatpush.bf16.msrb.mxu0 %v2531_v27 }
 0x1d6   : > { %2682 = vmatpush.bf16.msrb.mxu2 %v2660_v35  ;;  %2696 = vmatpush.bf16.msrb.mxu3 %v2661_v28 }
 0x1d7   : > { %v1778_v30 = vpop.f32.mrf.mxu2  ;;  %2619 = vmatpush.bf16.msrb.mxu1 %v2532_v6 }
 0x1d8   : > { %v1827_v20 = vadd.f32 %v1778_v30, %v1693_v13  ;;  %v1792_v54 = vpop.f32.mrf.mxu3  ;;  %v5250_v31 = vpop.f32.mrf.mxu0 }
 0x1d9   : > { %v1828_v34 = vadd.f32 %v1792_v54, %v1694_v56  ;;  %v5252_v37 = vpop.f32.mrf.mxu1  ;;  %v4464_v56 = vld [vmem:[%s5710_s3 + $0x40] sm:$0xff] }
 0x1df   : > { %v5254_v39 = vpop.f32.mrf.mxu2 }
 0x1e0   : > { %v5259_v46 = vpop.f32.mrf.mxu3  ;;  %v1806_v41 = vpop.f32.mrf.mxu0 }
 0x1e1   : > { %v1829_v44 = vadd.f32 %v1806_v41, %v1695_v7  ;;  %v1820_v42 = vpop.f32.mrf.mxu1 }
 0x1e2   : > { %v1830_v48 = vadd.f32 %v1820_v42, %v1696_v14 }
 0x1e3   : > { %4260 = vmatmul.msk.bf16.vlgmr.msra.gmra.mxu0 %vm351_vm0, %v4463_v40 }
 0x1e4   : > { %4261 = vmatmul.msk.bf16.vlgmr.msra.gmra.mxu1 %vm351_vm0, %v4463_v40  ;;  %4262 = vmatmul.msk.bf16.vlgmr.msra.gmra.mxu2 %vm351_vm0, %v4463_v40 }
 0x1e5   : > { %4263 = vmatmul.msk.bf16.vlgmr.msra.gmra.mxu3 %vm351_vm0, %v4463_v40  ;;  %2710 = vmatpush.bf16.msra.mxu0 %v2662_v60 }
 0x1e6   : > { %2724 = vmatpush.bf16.msra.mxu1 %v2663_v49  ;;  %2738 = vmatpush.bf16.msra.mxu2 %v2664_v51 }
 0x1e7   : > { %v1883_v11 = vpop.f32.mrf.mxu2  ;;  %2752 = vmatpush.bf16.msra.mxu3 %v2665_v23 }
 0x1e8   : > { %v1958_v3 = vadd.f32 %v1883_v11, %v1825_v22  ;;  %v1897_v59 = vpop.f32.mrf.mxu3  ;;  %v5272_v52 = vpop.f32.mrf.mxu0 }
 0x1e9   : > { %v1959_v55 = vadd.f32 %v1897_v59, %v1826_v26  ;;  %v5274_v1 = vpop.f32.mrf.mxu1 }
 0x1ef   : > { %v5276_v63 = vpop.f32.mrf.mxu2 }
 0x1f0   : > { %v5278_v13 = vpop.f32.mrf.mxu3  ;;  %v1911_v53 = vpop.f32.mrf.mxu0 }
 0x1f1   : > { %v1960_v57 = vadd.f32 %v1911_v53, %v1827_v20  ;;  %v1925_v62 = vpop.f32.mrf.mxu1 }
 0x1f2   : > { %v1961_v0 = vadd.f32 %v1925_v62, %v1828_v34 }
 0x1f3   : > { %4264 = vmatmul.msk.bf16.vlgmr.msrb.gmra.mxu0 %vm351_vm0, %v4463_v40 }
 0x1f4   : > { %4265 = vmatmul.msk.bf16.vlgmr.msrb.gmra.mxu1 %vm351_vm0, %v4463_v40  ;;  %4272 = vmatmul.msk.bf16.vlgmr.msrb.gmra.mxu2 %vm351_vm0, %v4464_v56 }
 0x1f5   : > { %4273 = vmatmul.msk.bf16.vlgmr.msrb.gmra.mxu3 %vm351_vm0, %v4464_v56 }
 0x1f7   : > { %v1939_v2 = vpop.f32.mrf.mxu2 }
 0x1f8   : > { %v1962_v4 = vadd.f32 %v1939_v2, %v1829_v44  ;;  %v1953_v36 = vpop.f32.mrf.mxu3  ;;  %v5287_v17 = vpop.f32.mrf.mxu0 }
 0x1f9   : > { %v1963_v7 = vadd.f32 %v1953_v36, %v1830_v48  ;;  %v5289_v9 = vpop.f32.mrf.mxu1 }
 0x1ff   : > { %v5291_v8 = vpop.f32.mrf.mxu2 }
 0x200   : > { %v5293_v14 = vpop.f32.mrf.mxu3  ;;  %v2017_v61 = vpop.f32.mrf.mxu0 }
 0x201   : > { %v2092_v18 = vadd.f32 %v2017_v61, %v1958_v3  ;;  %v2031_v10 = vpop.f32.mrf.mxu1 }
 0x202   : > { %v2093_v19 = vadd.f32 %v2031_v10, %v1959_v55 }
 0x203   : > { %4274 = vmatmul.msk.bf16.vlgmr.msra.gmra.mxu0 %vm351_vm0, %v4464_v56 }
 0x204   : > { %4275 = vmatmul.msk.bf16.vlgmr.msra.gmra.mxu1 %vm351_vm0, %v4464_v56  ;;  %4276 = vmatmul.msk.bf16.vlgmr.msra.gmra.mxu2 %vm351_vm0, %v4464_v56 }
 0x205   : > { %4277 = vmatmul.msk.bf16.vlgmr.msra.gmra.mxu3 %vm351_vm0, %v4464_v56 }
 0x207   : > { %v2045_v21 = vpop.f32.mrf.mxu2 }
 0x208   : > { %v2094_v22 = vadd.f32 %v2045_v21, %v1960_v57  ;;  %v2059_v25 = vpop.f32.mrf.mxu3  ;;  %v5302_v45 = vpop.f32.mrf.mxu0 }
 0x209   : > { %v2095_v26 = vadd.f32 %v2059_v25, %v1961_v0  ;;  %v5304_v27 = vpop.f32.mrf.mxu1 }
 0x20f   : > { %v5306_v35 = vpop.f32.mrf.mxu2 }
 0x210   : > { %v5308_v28 = vpop.f32.mrf.mxu3  ;;  %v2073_v15 = vpop.f32.mrf.mxu0 }
 0x211   : > { %v2096_v6 = vadd.f32 %v2073_v15, %v1962_v4  ;;  %v2087_v30 = vpop.f32.mrf.mxu1 }
 0x212   : > { %v2097_v20 = vadd.f32 %v2087_v30, %v1963_v7 }
 0x217   : > { %v2150_v54 = vpop.f32.mrf.mxu2 }
 0x218   : > { %v2225_v34 = vadd.f32 %v2150_v54, %v2092_v18  ;;  %v2164_v58 = vpop.f32.mrf.mxu3  ;;  %v5310_v40 = vpop.f32.mrf.mxu0 }
 0x219   : > { %5715 = vst [vmem:[#allocation3_spill] sm:$0xff] %v5310_v40  ;;  %v2226_v43 = vadd.f32 %v2164_v58, %v2093_v19  ;;  %v5312_v41 = vpop.f32.mrf.mxu1 }
 0x21a   : > { %5716 = vst [vmem:[#allocation4_spill] sm:$0xff] %v5312_v41 }
 0x21f   : > { %v5314_v44 = vpop.f32.mrf.mxu2 }
 0x220   : > { %v5316_v42 = vpop.f32.mrf.mxu3  ;;  %v2178_v5 = vpop.f32.mrf.mxu0 }
 0x221   : > { %v2227_v48 = vadd.f32 %v2178_v5, %v2094_v22  ;;  %v2192_v60 = vpop.f32.mrf.mxu1 }
 0x222   : > { %v2228_v49 = vadd.f32 %v2192_v60, %v2095_v26 }
 0x227   : > { %v2206_v51 = vpop.f32.mrf.mxu2 }
 0x228   : > { %v2229_v23 = vadd.f32 %v2206_v51, %v2096_v6  ;;  %v2220_v24 = vpop.f32.mrf.mxu3  ;;  %v5318_v11 = vpop.f32.mrf.mxu0 }
 0x229   : > { %v2230_v12 = vadd.f32 %v2220_v24, %v2097_v20  ;;  %v5320_v3 = vpop.f32.mrf.mxu1 }
 0x22f   : > { %v5322_v59 = vpop.f32.mrf.mxu2 }
 0x230   : > { %5717 = vst [vmem:[#allocation5_spill] sm:$0xff] %v5322_v59  ;;  %v5324_v55 = vpop.f32.mrf.mxu3  ;;  %v2284_v53 = vpop.f32.mrf.mxu0 }
 0x231   : > { %5718 = vst [vmem:[#allocation6_spill] sm:$0xff] %v5324_v55  ;;  %v2359_v56 = vadd.f32 %v2284_v53, %v2225_v34  ;;  %v2298_v57 = vpop.f32.mrf.mxu1 }
 0x232   : > { %v2360_v62 = vadd.f32 %v2298_v57, %v2226_v43 }
 0x237   : > { %v2312_v0 = vpop.f32.mrf.mxu2 }
 0x238   : > { %v5326_v2 = vadd.f32 %v2312_v0, %v2227_v48  ;;  %v2326_v4 = vpop.f32.mrf.mxu3  ;;  %v2286_v36 = vpop.f32.mrf.mxu0 }
 0x239   : > { %v5328_v7 = vadd.f32 %v2326_v4, %v2228_v49  ;;  %v2300_v61 = vpop.f32.mrf.mxu1 }
 0x23f   : > { %v5330_v18 = vpop.f32.mrf.mxu2 }
 0x240   : > { %v5332_v10 = vpop.f32.mrf.mxu3  ;;  %v2340_v19 = vpop.f32.mrf.mxu0 }
 0x241   : > { %v5334_v38 = vadd.f32 %v2340_v19, %v2229_v23  ;;  %v2354_v21 = vpop.f32.mrf.mxu1 }
 0x242   : > { %v5336_v22 = vadd.f32 %v2354_v21, %v2230_v12 }
 0x247   : > { %v2417_v25 = vpop.f32.mrf.mxu2 }
 0x248   : > { %v2431_v26 = vpop.f32.mrf.mxu3  ;;  %v5338_v15 = vpop.f32.mrf.mxu0 }
 0x249   : > { %5719 = vst [vmem:[#allocation7_spill] sm:$0xff] %v5338_v15  ;;  %v5340_v6 = vpop.f32.mrf.mxu1  ;;  %v2492_v15 = vadd.f32 %v2417_v25, %v2359_v56  ;;  %v2493_v59 = vadd.f32 %v2431_v26, %v2360_v62 }
 0x24a   : > { %5720 = vst [vmem:[#allocation8_spill] sm:$0xff] %v5340_v6  ;;  %v1831_v6 = vadd.f32 %v5250_v31, %v5219_v16 }
 0x24f   : > { %v2419_v30 = vpop.f32.mrf.mxu2 }
 0x250   : > { %v2433_v20 = vpop.f32.mrf.mxu3  ;;  %v2445_v54 = vpop.f32.mrf.mxu0 }
 0x251   : > { %v2459_v34 = vpop.f32.mrf.mxu1 }
 0x257   : > { %v5342_v58 = vpop.f32.mrf.mxu2 }
 0x258   : > { %v5344_v43 = vpop.f32.mrf.mxu3  ;;  %v5346_v5 = vpop.f32.mrf.mxu0 }
 0x259   : > { %v5348_v48 = vpop.f32.mrf.mxu1 }
 0x25a   : > { %5721 = vst [vmem:[#allocation9_spill] sm:$0xff] %v5348_v48 }
 0x25f   : > { %v5350_v60 = vpop.f32.mrf.mxu2 }
 0x260   : > { %5722 = vst [vmem:[#allocation10_spill] sm:$0xff] %v5350_v60  ;;  %v5352_v49 = vpop.f32.mrf.mxu3  ;;  %v2551_v51 = vpop.f32.mrf.mxu0  ;;  %v1964_v60 = vadd.f32 %v5276_v63, %v1831_v6 }
 0x261   : > { %5723 = vst [vmem:[#allocation11_spill] sm:$0xff] %v5352_v49  ;;  %v2565_v23 = vpop.f32.mrf.mxu1  ;;  %v1832_v49 = vadd.f32 %v5252_v37, %v5224_v50  ;;  %v2626_v41 = vadd.f32 %v2551_v51, %v2492_v15  ;;  %v2495_v15 = vadd.f32 %v2459_v34, %v5328_v7  ;;  %v1836_v7 = vadd.f32 %v5274_v1, %v5240_v29 }
 0x263   : > { %v1965_v55 = vadd.f32 %v5278_v13, %v1832_v49 }
 0x267   : > { %v2579_v24 = vpop.f32.mrf.mxu2 }
 0x268   : > { %v2593_v12 = vpop.f32.mrf.mxu3  ;;  %v2553_v53 = vpop.f32.mrf.mxu0 }
 0x269   : > { %v2567_v57 = vpop.f32.mrf.mxu1 }
 0x26f   : > { %v5354_v0 = vpop.f32.mrf.mxu2 }
 0x270   : > { %5724 = vst [vmem:[#allocation12_spill] sm:$0xff] %v5354_v0  ;;  %v5356_v4 = vpop.f32.mrf.mxu3  ;;  %v5358_v19 = vpop.f32.mrf.mxu0  ;;  %v2098_v0 = vadd.f32 %v5302_v45, %v1964_v60 }
 0x271   : > { %5725 = vst [vmem:[#allocation13_spill] sm:$0xff] %v5356_v4  ;;  %v5360_v21 = vpop.f32.mrf.mxu1  ;;  %v2099_v4 = vadd.f32 %v5304_v27, %v1965_v55  ;;  %v1833_v27 = vadd.f32 %v5254_v39, %v5234_v32 }
 0x272   : > { %5726 = vst [vmem:[#allocation14_spill] sm:$0xff] %v5358_v19  ;;  %v2627_v19 = vadd.f32 %v2565_v23, %v2493_v59  ;;  %v2231_v16 = vadd.f32 %v5314_v44, %v2098_v0 }
 0x273   : > { %5727 = vst [vmem:[#allocation15_spill] sm:$0xff] %v5360_v21  ;;  %v5370_v21 = vpop.permute.xlu1 %2775  ;;  %v2232_v37 = vadd.f32 %v5316_v42, %v2099_v4  ;;  %v1966_v25 = vadd.f32 %v5287_v17, %v1833_v27 }
 0x274   : > { %v2365_v56 = vadd.f32 %v2286_v36, %v2231_v16 }
 0x275   : > { %v2366_v59 = vadd.f32 %v2300_v61, %v2232_v37  ;;  %v2100_v32 = vadd.f32 %v5306_v35, %v1966_v25 }
 0x276   : > { %v2498_v44 = vadd.f32 %v2419_v30, %v2365_v56 }
 0x277   : > { %v2684_v48 = vpop.f32.mrf.mxu2  ;;  %v2499_v42 = vadd.f32 %v2433_v20, %v2366_v59  ;;  %v2233_v35 = vadd.f32 %v5318_v11, %v2100_v32  ;;  %v2496_v11 = vadd.f32 %v5342_v58, %v5334_v38  ;;  %v5732_v38 = vld [vmem:[#allocation12_spill] sm:$0xff]  ;;  %v5737_v32 = vld [vmem:[#allocation7_spill] sm:$0xff] }
 0x278   : > { %v2759_v31 = vadd.f32 %v2684_v48, %v2626_v41  ;;  %v2698_v40 = vpop.f32.mrf.mxu3  ;;  %v5373_v50 = vpop.f32.mrf.mxu0  ;;  %v1834_v41 = vadd.f32 %v5259_v46, %v5236_v47  ;;  %v2632_v6 = vadd.f32 %v2553_v53, %v2498_v44  ;;  %v1835_v46 = vadd.f32 %v5272_v52, %v5238_v33 }
 0x279   : > { %v2760_v63 = vadd.f32 %v2698_v40, %v2627_v19  ;;  %v5376_v13 = vpop.f32.mrf.mxu1  ;;  %v2494_v40 = vadd.f32 %v2445_v54, %v5326_v2  ;;  %v2633_v61 = vadd.f32 %v2567_v57, %v2499_v42  ;;  %v5389_v47 = vpop.permute.xlu2 %2780  ;;  %v2629_v2 = vadd.f32 %v2593_v12, %v2495_v15  ;;  %v5729_v19 = vld [vmem:[#allocation9_spill] sm:$0xff] }
 0x27a   : > { %v2783_v45 = vadd.f32 %v5370_v21, %v2759_v31  ;;  %v1967_v36 = vadd.f32 %v5289_v9, %v1834_v41  ;;  %v1968_v51 = vadd.f32 %v5291_v8, %v1835_v46  ;;  %v5730_v31 = vld [vmem:[#allocation14_spill] sm:$0xff] }
 0x27b   : > { %v2784_v55 = vadd.f32 %v5370_v21, %v2760_v63  ;;  %v2628_v39 = vadd.f32 %v2579_v24, %v2494_v40  ;;  %v2367_v24 = vadd.f32 %v5330_v18, %v2233_v35  ;;  %v5728_v18 = vld [vmem:[#allocation3_spill] sm:$0xff]  ;;  %v2630_v37 = vadd.f32 %v5730_v31, %v2496_v11  ;;  %v5731_v63 = vld [vmem:[#allocation4_spill] sm:$0xff]  ;;  %v5736_v40 = vld [vmem:[#allocation6_spill] sm:$0xff] }
 0x27c   : > { %v2795_v62 = vmax.f32 %v2783_v45, 0.0  ;;  %v2101_v17 = vadd.f32 %v5308_v28, %v1967_v36  ;;  %v1969_v28 = vadd.f32 %v5293_v14, %v1836_v7  ;;  %v2102_v4 = vadd.f32 %v5728_v18, %v1968_v51  ;;  %v5733_v45 = vld [vmem:[#allocation15_spill] sm:$0xff] }
 0x27d   : > { %v2796_v26 = vmax.f32 %v2784_v55, 0.0  ;;  %v2500_v57 = vadd.f32 %v5346_v5, %v2367_v24  ;;  %v5735_v5 = vld [vmem:[#allocation13_spill] sm:$0xff]  ;;  %v5740_v35 = vld [vmem:[#allocation11_spill] sm:$0xff] }
 0x27e   : > { %v2234_v23 = vadd.f32 %v5320_v3, %v2101_v17  ;;  %v2497_v3 = vadd.f32 %v5344_v43, %v5336_v22  ;;  %v2103_v56 = vadd.f32 %v5731_v63, %v1969_v28  ;;  %v5734_v22 = vld [vmem:[#allocation5_spill] sm:$0xff] }
 0x27f   : > { %v2807_v48 = vpack.c.bf16 %v2796_v26, %v2795_v62  ;;  %v2686_v60 = vpop.f32.mrf.mxu2  ;;  %v2634_v58 = vadd.f32 %v5732_v38, %v2500_v57  ;;  %v2235_v43 = vadd.f32 %v5734_v22, %v2102_v4 }
 0x280   : > { %v2765_v30 = vadd.f32 %v2686_v60, %v2632_v6  ;;  %v2700_v20 = vpop.f32.mrf.mxu3  ;;  %v2712_v9 = vpop.f32.mrf.mxu0  ;;  %v2368_v1 = vadd.f32 %v5332_v10, %v2234_v23  ;;  %v2631_v27 = vadd.f32 %v5733_v45, %v2497_v3  ;;  %v2236_v26 = vadd.f32 %v5736_v40, %v2103_v56  ;;  %v5738_v60 = vld [vmem:[#allocation8_spill] sm:$0xff] }
 0x281   : > { %2813 = vst [vmem:[#allocation2] sm:$0xff] %v2807_v48  ;;  %v2766_v54 = vadd.f32 %v2700_v20, %v2633_v61  ;;  %v2761_v34 = vadd.f32 %v2712_v9, %v2628_v39  ;;  %v2726_v49 = vpop.f32.mrf.mxu1  ;;  %v2369_v39 = vadd.f32 %v5737_v32, %v2235_v43 }
 0x282   : > { %v2789_v33 = vadd.f32 %v5389_v47, %v2765_v30  ;;  %v2762_v52 = vadd.f32 %v2726_v49, %v2629_v2  ;;  %v2501_v16 = vadd.f32 %v5729_v19, %v2368_v1  ;;  %v2370_v46 = vadd.f32 %v5738_v60, %v2236_v26  ;;  %v5739_v30 = vld [vmem:[#allocation10_spill] sm:$0xff] }
 0x283   : > { %v2790_v12 = vadd.f32 %v5389_v47, %v2766_v54  ;;  %v2785_v29 = vadd.f32 %v5370_v21, %v2761_v34  ;;  %v2502_v20 = vadd.f32 %v5739_v30, %v2369_v39 }
 0x284   : > { %v2801_v53 = vmax.f32 %v2789_v33, 0.0  ;;  %v2786_v8 = vadd.f32 %v5370_v21, %v2762_v52  ;;  %v2635_v41 = vadd.f32 %v5735_v5, %v2501_v16  ;;  %v2503_v54 = vadd.f32 %v5740_v35, %v2370_v46 }
 0x285   : > { %v2802_v14 = vmax.f32 %v2790_v12, 0.0  ;;  %v2797_v0 = vmax.f32 %v2785_v29, 0.0  ;;  %v2636_v51 = vadd.f32 %v5373_v50, %v2502_v20 }
 0x286   : > { %v2798_v10 = vmax.f32 %v2786_v8, 0.0  ;;  %v2637_v33 = vadd.f32 %v5376_v13, %v2503_v54 }
 0x287   : > { %v2810_v59 = vpack.c.bf16 %v2802_v14, %v2801_v53  ;;  %v2740_v55 = vpop.f32.mrf.mxu2 }
 0x288   : > { %v2808_v44 = vpack.c.bf16 %v2798_v10, %v2797_v0  ;;  %v2763_v62 = vadd.f32 %v2740_v55, %v2630_v37  ;;  %v2754_v25 = vpop.f32.mrf.mxu3  ;;  %v2714_v42 = vpop.f32.mrf.mxu0  ;;  %v4286_v24 = vld [vmem:[#allocation2] sm:$0xf]  ;;  %v4472_v11 = vld [vmem:[#allocation2 + $0x4] sm:$0xf] }
 0x289   : > { %2816 = vst [vmem:[#allocation2 + $0x18] sm:$0xff] %v2810_v59  ;;  %v2764_v36 = vadd.f32 %v2754_v25, %v2631_v27  ;;  %v2767_v15 = vadd.f32 %v2714_v42, %v2634_v58  ;;  %v2728_v6 = vpop.f32.mrf.mxu1  ;;  %v4319_v5 = vld [vmem:[#allocation2] sm:$0xf]  ;;  %v4471_v25 = vld [vmem:[%s5712_s5 + $0x8] sm:$0xff]  ;;  %v4466_v32 = vld [vmem:[#allocation2 + $0x4] sm:$0xf] }
 0x28a   : > { %2814 = vst [vmem:[#allocation2 + $0x8] sm:$0xff] %v2808_v44  ;;  %v2787_v61 = vadd.f32 %v5370_v21, %v2763_v62  ;;  %v2768_v48 = vadd.f32 %v2728_v6, %v2635_v41 }
 0x28b   : > { %v2788_v17 = vadd.f32 %v5370_v21, %v2764_v36  ;;  %v2791_v2 = vadd.f32 %v5389_v47, %v2767_v15 }
 0x28c   : > { %v2799_v9 = vmax.f32 %v2787_v61, 0.0  ;;  %v2792_v7 = vadd.f32 %v5389_v47, %v2768_v48 }
 0x28d   : > { %v2800_v34 = vmax.f32 %v2788_v17, 0.0  ;;  %v2803_v49 = vmax.f32 %v2791_v2, 0.0 }
 0x28e   : > { %v2804_v23 = vmax.f32 %v2792_v7, 0.0 }
 0x28f   : > { %v2809_v52 = vpack.c.bf16 %v2800_v34, %v2799_v9  ;;  %v2742_v28 = vpop.f32.mrf.mxu2  ;;  %v4465_v34 = vld [vmem:[%s5712_s5] sm:$0xff] }
 0x290   : > { %v2811_v21 = vpack.c.bf16 %v2804_v23, %v2803_v49  ;;  %v2769_v12 = vadd.f32 %v2742_v28, %v2636_v51  ;;  %v2756_v29 = vpop.f32.mrf.mxu3  ;;  %v4475_v1 = vld [vmem:[#allocation2 + $0x14] sm:$0xf0]  ;;  %v4288_v53 = vld [vmem:[#allocation2 + $0x18] sm:$0xf0]  ;;  %v3856_v49 = vld [vmem:[%s5713_s6 + $0x8] sm:$0xff] }
 0x291   : > { %2815 = vst [vmem:[#allocation2 + $0x10] sm:$0xff] %v2809_v52  ;;  %v2770_v8 = vadd.f32 %v2756_v29, %v2637_v33  ;;  %v5430_v3 = vor.u32 %v4475_v1, %v4286_v24  ;;  %v5432_v57 = vor.u32 %v4472_v11, %v4288_v53  ;;  %v4294_v4 = vld [vmem:[#allocation2 + $0x8] sm:$0xf]  ;;  %v4473_v19 = vld [vmem:[#allocation2 + $0xc] sm:$0xf] }
 0x292   : > { %2817 = vst [vmem:[#allocation2 + $0x20] sm:$0xff] %v2811_v21  ;;  %v2793_v50 = vadd.f32 %v5389_v47, %v2769_v12  ;;  %v4468_v55 = vld [vmem:[#allocation2 + $0x14] sm:$0xf0]  ;;  %v4321_v15 = vld [vmem:[#allocation2 + $0x18] sm:$0xf0] }
 0x293   : > { %v2794_v13 = vadd.f32 %v5389_v47, %v2770_v8  ;;  %2865 = vrot.lane.b32.xlu0 %v5430_v3, %s4515_s30  ;;  %2867 = vrot.lane.b32.xlu1 %v5432_v57, %s4515_s30  ;;  %v4320_v62 = vor.u32 %v4468_v55, %v4319_v5  ;;  %v4324_v61 = vor.u32 %v4466_v32, %v4321_v15  ;;  %v4327_v2 = vld [vmem:[#allocation2 + $0x8] sm:$0xf]  ;;  %v4467_v30 = vld [vmem:[#allocation2 + $0xc] sm:$0xf] }
 0x294   : > { %v2805_v14 = vmax.f32 %v2793_v50, 0.0 }
 0x295   : > { %v2806_v0 = vmax.f32 %v2794_v13, 0.0  ;;  %v4478_v13 = vld [vmem:[%s5712_s5 + $0x10] sm:$0xff] }
 0x297   : > { %v2812_v18 = vpack.c.bf16 %v2806_v0, %v2805_v14 }
 0x298   : > { %v4302_v47 = vld [vmem:[#allocation2 + $0x10] sm:$0xf]  ;;  %v4474_v58 = vld [vmem:[#allocation2 + $0x14] sm:$0xf] }
 0x299   : > { %2818 = vst [vmem:[#allocation2 + $0x28] sm:$0xff] %v2812_v18  ;;  %v4476_v16 = vld [vmem:[#allocation2 + $0x1c] sm:$0xf0]  ;;  %v4296_v31 = vld [vmem:[#allocation2 + $0x20] sm:$0xf0] }
 0x29a   : > { %v5440_v37 = vor.u32 %v4476_v16, %v4294_v4  ;;  %v5442_v10 = vor.u32 %v4473_v19, %v4296_v31  ;;  %v4335_v40 = vld [vmem:[#allocation2 + $0x10] sm:$0xf]  ;;  %v4469_v48 = vld [vmem:[#allocation2 + $0x1c] sm:$0xf0]  ;;  %v4329_v60 = vld [vmem:[#allocation2 + $0x20] sm:$0xf0] }
 0x29b   : > { %v4328_v35 = vor.u32 %v4469_v48, %v4327_v2  ;;  %v4332_v54 = vor.u32 %v4467_v30, %v4329_v60 }
 0x29c   : > { %2869 = vrot.lane.b32.xlu2 %v5440_v37, %s4515_s30  ;;  %2871 = vrot.lane.b32.xlu0 %v5442_v10, %s4515_s30 }
 0x2a0   : > { %v4477_v63 = vld [vmem:[#allocation2 + $0x24] sm:$0xf0]  ;;  %v4304_v56 = vld [vmem:[#allocation2 + $0x28] sm:$0xf0] }
 0x2a1   : > { %v5448_v38 = vor.u32 %v4477_v63, %v4302_v47  ;;  %v5450_v45 = vor.u32 %v4474_v58, %v4304_v56  ;;  %v4470_v42 = vld [vmem:[#allocation2 + $0x24] sm:$0xf0] }
 0x2a2   : > { %v4336_v26 = vor.u32 %v4470_v42, %v4335_v40 }
 0x2a3   : > { %2873 = vrot.lane.b32.xlu1 %v5448_v38, %s4515_s30 }
 0x2a4   : > { %2875 = vrot.lane.b32.xlu2 %v5450_v45, %s4515_s30  ;;  %3072 = vrot.lane.b32.xlu0 %v5430_v3, %s4516_s15 }
 0x2ab   : > { %3074 = vrot.lane.b32.xlu1 %v5432_v57, %s4516_s15 }
 0x2ac   : > { %3076 = vrot.lane.b32.xlu2 %v5440_v37, %s4516_s15  ;;  %3078 = vrot.lane.b32.xlu0 %v5442_v10, %s4516_s15 }
 0x2b3   : > { %3080 = vrot.lane.b32.xlu1 %v5448_v38, %s4516_s15 }
 0x2b4   : > { %3082 = vrot.lane.b32.xlu2 %v5450_v45, %s4516_s15  ;;  %3185 = vrot.lane.b32.xlu0 %v5430_v3, %s4517_s16  ;;  %s4486_s15 = smul.u32 80, %s5742_s25 }
 0x2bb   : > { %3187 = vrot.lane.b32.xlu1 %v5432_v57, %s4517_s16 }
 0x2bc   : > { %3189 = vrot.lane.b32.xlu2 %v5440_v37, %s4517_s16  ;;  %3191 = vrot.lane.b32.xlu0 %v5442_v10, %s4517_s16 }
 0x2c3   : > { %3193 = vrot.lane.b32.xlu1 %v5448_v38, %s4517_s16 }
 0x2c4   : > { %3195 = vrot.lane.b32.xlu2 %v5450_v45, %s4517_s16  ;;  %3298 = vrot.lane.b32.xlu0 %v5430_v3, %s4518_s17 }
 0x2cb   : > { %3300 = vrot.lane.b32.xlu1 %v5432_v57, %s4518_s17 }
 0x2cc   : > { %3302 = vrot.lane.b32.xlu2 %v5440_v37, %s4518_s17  ;;  %3304 = vrot.lane.b32.xlu0 %v5442_v10, %s4518_s17 }
 0x2d3   : > { %3306 = vrot.lane.b32.xlu1 %v5448_v38, %s4518_s17 }
 0x2d4   : > { %3308 = vrot.lane.b32.xlu2 %v5450_v45, %s4518_s17  ;;  %3413 = vrot.lane.b32.xlu0 %v5432_v57, %s4519_s22 }
 0x2db   : > { %3415 = vrot.lane.b32.xlu1 %v5440_v37, %s4519_s22 }
 0x2dc   : > { %3417 = vrot.lane.b32.xlu2 %v5442_v10, %s4519_s22  ;;  %3411 = vrot.lane.b32.xlu0 %v5430_v3, %s4519_s22 }
 0x2e3   : > { %3419 = vrot.lane.b32.xlu1 %v5448_v38, %s4519_s22 }
 0x2e4   : > { %3524 = vrot.lane.b32.xlu2 %v5430_v3, %s4520_s27  ;;  %3526 = vrot.lane.b32.xlu0 %v5432_v57, %s4520_s27 }
 0x2eb   : > { %3528 = vrot.lane.b32.xlu1 %v5440_v37, %s4520_s27 }
 0x2ec   : > { %3421 = vrot.lane.b32.xlu2 %v5450_v45, %s4519_s22  ;;  %3530 = vrot.lane.b32.xlu0 %v5442_v10, %s4520_s27  ;;  %s5682_s22 = scalar_lea.vmem %s5714_s7, %s4486_s15 }
 0x2f3   : > { %3532 = vrot.lane.b32.xlu1 %v5448_v38, %s4520_s27 }
 0x2f4   : > { %3534 = vrot.lane.b32.xlu2 %v5450_v45, %s4520_s27  ;;  %3637 = vrot.lane.b32.xlu0 %v5430_v3, %s4521_s10 }
 0x2f6   : > { %v2870_v27 = vpop.permute.xlu2 %2869 }
 0x2fb   : > { %3639 = vrot.lane.b32.xlu1 %v5432_v57, %s4521_s10 }
 0x2fc   : > { %3641 = vrot.lane.b32.xlu2 %v5440_v37, %s4521_s10  ;;  %3643 = vrot.lane.b32.xlu0 %v5442_v10, %s4521_s10 }
 0x2fe   : > { %v2876_v59 = vpop.permute.xlu2 %2875 }
 0x303   : > { %3645 = vrot.lane.b32.xlu1 %v5448_v38, %s4521_s10 }
 0x304   : > { %3647 = vrot.lane.b32.xlu2 %v5450_v45, %s4521_s10  ;;  %3750 = vrot.lane.b32.xlu0 %v5430_v3, %s4522_s13 }
 0x305   : > { %v2866_v22 = vpop.permute.xlu0 %2865  ;;  %v2868_v43 = vpop.permute.xlu1 %2867 }
 0x306   : > { %v2877_v41 = vsel %vm620_vm1, %v2866_v22, %v2868_v43  ;;  %v2878_v44 = vsel %vm620_vm1, %v2868_v43, %v2870_v27  ;;  %v3077_v36 = vpop.permute.xlu2 %3076 }
 0x307   : > { %2897 = vmatpush.bf16.msrb.mxu0 %v2877_v41  ;;  %2911 = vmatpush.bf16.msrb.mxu1 %v2878_v44 }
 0x30a   : > { %4308 = vmatmul.msk.bf16.vlgmr.msrb.gmra.mxu0 %vm351_vm0, %v4471_v25  ;;  %4309 = vmatmul.msk.bf16.vlgmr.msrb.gmra.mxu1 %vm351_vm0, %v4471_v25 }
 0x30b   : > { %3001 = vmatpush.bf16.msra.mxu1 %v4320_v62  ;;  %3752 = vrot.lane.b32.xlu1 %v5432_v57, %s4522_s13  ;;  %v4480_v62 = vld [vmem:[%s5712_s5 + $0x20] sm:$0xff] }
 0x30c   : > { %3754 = vrot.lane.b32.xlu2 %v5440_v37, %s4522_s13  ;;  %3756 = vrot.lane.b32.xlu0 %v5442_v10, %s4522_s13 }
 0x30e   : > { %v2872_v6 = vpop.permute.xlu0 %2871  ;;  %v3083_v46 = vpop.permute.xlu2 %3082 }
 0x30f   : > { %3057 = vmatpush.bf16.msrb.mxu1 %v4336_v26  ;;  %v2879_v39 = vsel %vm620_vm1, %v2870_v27, %v2872_v6 }
 0x310   : > { %2925 = vmatpush.bf16.msrb.mxu2 %v2879_v39  ;;  %v4481_v39 = vld [vmem:[%s5712_s5 + $0x28] sm:$0xff] }
 0x313   : > { %3758 = vrot.lane.b32.xlu1 %v5448_v38, %s4522_s13  ;;  %4310 = vmatmul.msk.bf16.vlgmr.msrb.gmra.mxu2 %vm351_vm0, %v4471_v25 }
 0x314   : > { %3015 = vmatpush.bf16.msra.mxu2 %v4324_v61  ;;  %3760 = vrot.lane.b32.xlu2 %v5450_v45, %s4522_s13  ;;  %v4479_v45 = vld [vmem:[%s5712_s5 + $0x18] sm:$0xff] }
 0x315   : > { %v2874_v17 = vpop.permute.xlu1 %2873 }
 0x316   : > { %v2880_v20 = vsel %vm620_vm1, %v2872_v6, %v2874_v17  ;;  %v2881_v9 = vsel %vm620_vm1, %v2874_v17, %v2876_v59  ;;  %v3073_v7 = vpop.permute.xlu0 %3072  ;;  %v3190_v23 = vpop.permute.xlu2 %3189 }
 0x317   : > { %2939 = vmatpush.bf16.msrb.mxu3 %v2880_v20  ;;  %2953 = vmatpush.bf16.msra.mxu0 %v2881_v9 }
 0x31a   : > { %4311 = vmatmul.msk.bf16.vlgmr.msrb.gmra.mxu3 %vm351_vm0, %v4471_v25  ;;  %4312 = vmatmul.msk.bf16.vlgmr.msra.gmra.mxu0 %vm351_vm0, %v4471_v25 }
 0x31b   : > { %3029 = vmatpush.bf16.msra.mxu3 %v4328_v35  ;;  %3043 = vmatpush.bf16.msrb.mxu0 %v4332_v54 }
 0x31c   : > { %4337 = vmatmul.msk.bf16.vlgmr.msra.gmra.mxu1 %vm351_vm0, %v4465_v34  ;;  %3864 = vperm.xlu1 %4504, %v3856_v49  }
 0x31d   : > { %v3075_v51 = vpop.permute.xlu1 %3074 }
 0x31e   : > { %v3084_v33 = vsel %vm924_vm2, %v3073_v7, %v3075_v51  ;;  %v3085_v52 = vsel %vm924_vm2, %v3075_v51, %v3077_v36  ;;  %v3079_v28 = vpop.permute.xlu0 %3078  ;;  %v3196_v11 = vpop.permute.xlu2 %3195  ;;  %v4482_v51 = vld [vmem:[%s5712_s5 + $0x30] sm:$0xff] }
 0x31f   : > { %v3086_v24 = vsel %vm924_vm2, %v3077_v36, %v3079_v28  ;;  %3104 = vmatpush.bf16.msrb.mxu2 %v3084_v33  ;;  %3118 = vmatpush.bf16.msrb.mxu3 %v3085_v52 }
 0x320   : > { %3132 = vmatpush.bf16.msra.mxu0 %v3086_v24 }
 0x323   : > { %4338 = vmatmul.msk.bf16.vlgmr.msra.gmra.mxu2 %vm351_vm0, %v4465_v34 }
 0x325   : > { %v3081_v21 = vpop.permute.xlu1 %3080 }
 0x326   : > { %v3087_v12 = vsel %vm924_vm2, %v3079_v28, %v3081_v21  ;;  %v3088_v29 = vsel %vm924_vm2, %v3081_v21, %v3083_v46  ;;  %v3186_v1 = vpop.permute.xlu0 %3185  ;;  %v3303_v14 = vpop.permute.xlu2 %3302 }
 0x327   : > { %3146 = vmatpush.bf16.msra.mxu1 %v3087_v12  ;;  %3160 = vmatpush.bf16.msra.mxu2 %v3088_v29 }
 0x32a   : > { %4339 = vmatmul.msk.bf16.vlgmr.msra.gmra.mxu3 %vm351_vm0, %v4465_v34  ;;  %4340 = vmatmul.msk.bf16.vlgmr.msrb.gmra.mxu0 %vm351_vm0, %v4465_v34 }
 0x32c   : > { %4341 = vmatmul.msk.bf16.vlgmr.msrb.gmra.mxu1 %vm351_vm0, %v4465_v34 }
 0x32d   : > { %v3188_v53 = vpop.permute.xlu1 %3187 }
 0x32e   : > { %v3197_v8 = vsel %vm1191_vm3, %v3186_v1, %v3188_v53  ;;  %v3198_v3 = vsel %vm1191_vm3, %v3188_v53, %v3190_v23  ;;  %v3192_v57 = vpop.permute.xlu0 %3191  ;;  %v3309_v16 = vpop.permute.xlu2 %3308 }
 0x32f   : > { %v3199_v50 = vsel %vm1191_vm3, %v3190_v23, %v3192_v57  ;;  %3217 = vmatpush.bf16.msra.mxu3 %v3197_v8  ;;  %3231 = vmatpush.bf16.msrb.mxu0 %v3198_v3 }
 0x330   : > { %3245 = vmatpush.bf16.msrb.mxu1 %v3199_v50 }
 0x333   : > { %4348 = vmatmul.msk.bf16.vlgmr.msrb.gmra.mxu2 %vm351_vm0, %v4478_v13 }
 0x335   : > { %v3194_v0 = vpop.permute.xlu1 %3193 }
 0x336   : > { %v3200_v18 = vsel %vm1191_vm3, %v3192_v57, %v3194_v0  ;;  %v3299_v4 = vpop.permute.xlu0 %3298  ;;  %v3201_v19 = vsel %vm1191_vm3, %v3194_v0, %v3196_v11  ;;  %v3418_v38 = vpop.permute.xlu2 %3417 }
 0x337   : > { %3259 = vmatpush.bf16.msrb.mxu2 %v3200_v18 }
 0x33a   : > { %4349 = vmatmul.msk.bf16.vlgmr.msrb.gmra.mxu3 %vm351_vm0, %v4478_v13  ;;  %4350 = vmatmul.msk.bf16.vlgmr.msra.gmra.mxu0 %vm351_vm0, %v4478_v13 }
 0x33b   : > { %3273 = vmatpush.bf16.msrb.mxu3 %v3201_v19 }
 0x33c   : > { %4351 = vmatmul.msk.bf16.vlgmr.msra.gmra.mxu1 %vm351_vm0, %v4478_v13 }
 0x33d   : > { %v3301_v31 = vpop.permute.xlu1 %3300 }
 0x33e   : > { %v3310_v37 = vsel %vm1458_vm4, %v3299_v4, %v3301_v31  ;;  %v3311_v10 = vsel %vm1458_vm4, %v3301_v31, %v3303_v14  ;;  %v3305_v47 = vpop.permute.xlu0 %3304  ;;  %v3525_v5 = vpop.permute.xlu2 %3524 }
 0x33f   : > { %3330 = vmatpush.bf16.msra.mxu0 %v3310_v37  ;;  %3344 = vmatpush.bf16.msra.mxu1 %v3311_v10  ;;  %v3312_v63 = vsel %vm1458_vm4, %v3303_v14, %v3305_v47  ;;  %v3855_v14 = vld [vmem:[%s5713_s6] sm:$0xff] }
 0x340   : > { %3859 = vperm.xlu0 %4506, %v3855_v14  }
 0x343   : > { %4352 = vmatmul.msk.bf16.vlgmr.msra.gmra.mxu2 %vm351_vm0, %v4478_v13  ;;  %v4483_v13 = vld [vmem:[%s5712_s5 + $0x38] sm:$0xff] }
 0x344   : > { %3358 = vmatpush.bf16.msra.mxu2 %v3312_v63 }
 0x345   : > { %v3307_v56 = vpop.permute.xlu1 %3306 }
 0x346   : > { %v3414_v58 = vpop.permute.xlu0 %3413  ;;  %v3313_v27 = vsel %vm1458_vm4, %v3305_v47, %v3307_v56  ;;  %v3314_v59 = vsel %vm1458_vm4, %v3307_v56, %v3309_v16  ;;  %v3422_v25 = vpop.permute.xlu2 %3421 }
 0x34a   : > { %4359 = vmatmul.msk.bf16.vlgmr.msra.gmra.mxu3 %vm351_vm0, %v4479_v45  ;;  %4360 = vmatmul.msk.bf16.vlgmr.msrb.gmra.mxu0 %vm351_vm0, %v4479_v45 }
 0x34b   : > { %3372 = vmatpush.bf16.msra.mxu3 %v3313_v27  ;;  %3386 = vmatpush.bf16.msrb.mxu0 %v3314_v59  ;;  %v4484_v27 = vld [vmem:[%s5712_s5 + $0x40] sm:$0xff] }
 0x34c   : > { %4361 = vmatmul.msk.bf16.vlgmr.msrb.gmra.mxu1 %vm351_vm0, %v4479_v45 }
 0x34d   : > { %v3416_v55 = vpop.permute.xlu1 %3415 }
 0x34e   : > { %v3412_v22 = vpop.permute.xlu0 %3411  ;;  %v3424_v41 = vsel %vm1725_vm5, %v3414_v58, %v3416_v55  ;;  %v3425_v42 = vsel %vm1725_vm5, %v3416_v55, %v3418_v38  ;;  %v3535_v17 = vpop.permute.xlu2 %3534 }
 0x34f   : > { %v3423_v43 = vsel %vm1725_vm5, %v3412_v22, %v3414_v58 }
 0x350   : > { %3443 = vmatpush.bf16.msrb.mxu1 %v3423_v43 }
 0x353   : > { %4362 = vmatmul.msk.bf16.vlgmr.msrb.gmra.mxu2 %vm351_vm0, %v4479_v45 }
 0x354   : > { %3457 = vmatpush.bf16.msrb.mxu2 %v3424_v41 }
 0x355   : > { %v3420_v44 = vpop.permute.xlu1 %3419 }
 0x356   : > { %v3527_v40 = vpop.permute.xlu0 %3526  ;;  %v3426_v26 = vsel %vm1725_vm5, %v3418_v38, %v3420_v44  ;;  %v3427_v36 = vsel %vm1725_vm5, %v3420_v44, %v3422_v25  ;;  %v3642_v9 = vpop.permute.xlu2 %3641 }
 0x357   : > { %v3536_v6 = vsel %vm1992_vm6, %v3525_v5, %v3527_v40 }
 0x35a   : > { %4363 = vmatmul.msk.bf16.vlgmr.msrb.gmra.mxu3 %vm351_vm0, %v4479_v45  ;;  %4370 = vmatmul.msk.bf16.vlgmr.msra.gmra.mxu0 %vm351_vm0, %v4480_v62 }
 0x35b   : > { %3471 = vmatpush.bf16.msrb.mxu3 %v3425_v42  ;;  %3485 = vmatpush.bf16.msra.mxu0 %v3426_v26 }
 0x35c   : > { %4371 = vmatmul.msk.bf16.vlgmr.msra.gmra.mxu1 %vm351_vm0, %v4480_v62 }
 0x35d   : > { %3499 = vmatpush.bf16.msra.mxu1 %v3427_v36  ;;  %v3529_v15 = vpop.permute.xlu1 %3528 }
 0x35e   : > { %v3531_v32 = vpop.permute.xlu0 %3530  ;;  %v3537_v48 = vsel %vm1992_vm6, %v3527_v40, %v3529_v15  ;;  %v3648_v23 = vpop.permute.xlu2 %3647 }
 0x35f   : > { %v3538_v60 = vsel %vm1992_vm6, %v3529_v15, %v3531_v32 }
 0x363   : > { %4372 = vmatmul.msk.bf16.vlgmr.msra.gmra.mxu2 %vm351_vm0, %v4480_v62 }
 0x364   : > { %3556 = vmatpush.bf16.msra.mxu2 %v3536_v6 }
 0x365   : > { %v3533_v61 = vpop.permute.xlu1 %3532 }
 0x366   : > { %v3539_v46 = vsel %vm1992_vm6, %v3531_v32, %v3533_v61  ;;  %v3638_v2 = vpop.permute.xlu0 %3637  ;;  %v3540_v30 = vsel %vm1992_vm6, %v3533_v61, %v3535_v17  ;;  %v3755_v12 = vpop.permute.xlu2 %3754 }
 0x36a   : > { %4373 = vmatmul.msk.bf16.vlgmr.msra.gmra.mxu3 %vm351_vm0, %v4480_v62  ;;  %4374 = vmatmul.msk.bf16.vlgmr.msrb.gmra.mxu0 %vm351_vm0, %v4480_v62 }
 0x36b   : > { %3570 = vmatpush.bf16.msra.mxu3 %v3537_v48  ;;  %3584 = vmatpush.bf16.msrb.mxu0 %v3538_v60 }
 0x36c   : > { %4381 = vmatmul.msk.bf16.vlgmr.msrb.gmra.mxu1 %vm351_vm0, %v4481_v39 }
 0x36d   : > { %3598 = vmatpush.bf16.msrb.mxu1 %v3539_v46  ;;  %v3640_v20 = vpop.permute.xlu1 %3639 }
 0x36e   : > { %v3644_v7 = vpop.permute.xlu0 %3643  ;;  %v3649_v35 = vsel %vm2259_vm7, %v3638_v2, %v3640_v20  ;;  %v3650_v54 = vsel %vm2259_vm7, %v3640_v20, %v3642_v9  ;;  %v3761_v16 = vpop.permute.xlu2 %3760 }
 0x36f   : > { %v3651_v34 = vsel %vm2259_vm7, %v3642_v9, %v3644_v7 }
 0x373   : > { %4382 = vmatmul.msk.bf16.vlgmr.msrb.gmra.mxu2 %vm351_vm0, %v4481_v39 }
 0x374   : > { %3612 = vmatpush.bf16.msrb.mxu2 %v3540_v30 }
 0x375   : > { %v3646_v49 = vpop.permute.xlu1 %3645 }
 0x376   : > { %v3652_v33 = vsel %vm2259_vm7, %v3644_v7, %v3646_v49  ;;  %v3751_v52 = vpop.permute.xlu0 %3750  ;;  %v3653_v29 = vsel %vm2259_vm7, %v3646_v49, %v3648_v23 }
 0x37a   : > { %4383 = vmatmul.msk.bf16.vlgmr.msrb.gmra.mxu3 %vm351_vm0, %v4481_v39  ;;  %4384 = vmatmul.msk.bf16.vlgmr.msra.gmra.mxu0 %vm351_vm0, %v4481_v39 }
 0x37b   : > { %3669 = vmatpush.bf16.msrb.mxu3 %v3649_v35  ;;  %3683 = vmatpush.bf16.msra.mxu0 %v3650_v54 }
 0x37c   : > { %4385 = vmatmul.msk.bf16.vlgmr.msra.gmra.mxu1 %vm351_vm0, %v4481_v39 }
 0x37d   : > { %3697 = vmatpush.bf16.msra.mxu1 %v3651_v34  ;;  %v3753_v21 = vpop.permute.xlu1 %3752 }
 0x37e   : > { %v3762_v1 = vsel %vm2526_vm8, %v3751_v52, %v3753_v21  ;;  %v3763_v11 = vsel %vm2526_vm8, %v3753_v21, %v3755_v12  ;;  %v3757_v3 = vpop.permute.xlu0 %3756 }
 0x37f   : > { %v3764_v57 = vsel %vm2526_vm8, %v3755_v12, %v3757_v3 }
 0x383   : > { %4392 = vmatmul.msk.bf16.vlgmr.msra.gmra.mxu2 %vm351_vm0, %v4482_v51 }
 0x384   : > { %3711 = vmatpush.bf16.msra.mxu2 %v3652_v33 }
 0x385   : > { %v3759_v0 = vpop.permute.xlu1 %3758 }
 0x386   : > { %v3765_v31 = vsel %vm2526_vm8, %v3757_v3, %v3759_v0  ;;  %v3766_v37 = vsel %vm2526_vm8, %v3759_v0, %v3761_v16 }
 0x387   : > { %v2899_v28 = vpop.f32.mrf.mxu0  ;;  %v2913_v24 = vpop.f32.mrf.mxu1 }
 0x38a   : > { %4393 = vmatmul.msk.bf16.vlgmr.msra.gmra.mxu3 %vm351_vm0, %v4482_v51  ;;  %4394 = vmatmul.msk.bf16.vlgmr.msrb.gmra.mxu0 %vm351_vm0, %v4482_v51 }
 0x38b   : > { %3725 = vmatpush.bf16.msra.mxu3 %v3653_v29  ;;  %3782 = vmatpush.bf16.msrb.mxu0 %v3762_v1 }
 0x38c   : > { %4395 = vmatmul.msk.bf16.vlgmr.msrb.gmra.mxu1 %vm351_vm0, %v4482_v51 }
 0x38d   : > { %3796 = vmatpush.bf16.msrb.mxu1 %v3763_v11 }
 0x38f   : > { %v2901_v53 = vpop.f32.mrf.mxu0  ;;  %v2915_v8 = vpop.f32.mrf.mxu1 }
 0x393   : > { %4396 = vmatmul.msk.bf16.vlgmr.msrb.gmra.mxu2 %vm351_vm0, %v4482_v51 }
 0x394   : > { %3810 = vmatpush.bf16.msrb.mxu2 %v3764_v57 }
 0x396   : > { %v2927_v50 = vpop.f32.mrf.mxu2 }
 0x397   : > { %v2955_v18 = vpop.f32.mrf.mxu0 }
 0x399   : > { %v3003_v4 = vpop.f32.mrf.mxu1 }
 0x39a   : > { %v3004_v19 = vadd.f32 %v3003_v4, %v2899_v28  ;;  %4403 = vmatmul.msk.bf16.vlgmr.msrb.gmra.mxu3 %vm351_vm0, %v4483_v13  ;;  %4404 = vmatmul.msk.bf16.vlgmr.msra.gmra.mxu0 %vm351_vm0, %v4483_v13 }
 0x39b   : > { %3824 = vmatpush.bf16.msrb.mxu3 %v3765_v31  ;;  %3838 = vmatpush.bf16.msra.mxu0 %v3766_v37 }
 0x39c   : > { %4405 = vmatmul.msk.bf16.vlgmr.msra.gmra.mxu1 %vm351_vm0, %v4483_v13 }
 0x39d   : > { %v2941_v10 = vpop.f32.mrf.mxu3 }
 0x39e   : > { %v2929_v47 = vpop.f32.mrf.mxu2 }
 0x39f   : > { %v2957_v63 = vpop.f32.mrf.mxu0 }
 0x3a1   : > { %v3005_v56 = vpop.f32.mrf.mxu1 }
 0x3a2   : > { %v3006_v38 = vadd.f32 %v3005_v56, %v2901_v53 }
 0x3a3   : > { %4406 = vmatmul.msk.bf16.vlgmr.msra.gmra.mxu2 %vm351_vm0, %v4483_v13 }
 0x3a5   : > { %v2943_v58 = vpop.f32.mrf.mxu3 }
 0x3a6   : > { %v3017_v45 = vpop.f32.mrf.mxu2 }
 0x3a7   : > { %v3018_v59 = vadd.f32 %v3017_v45, %v2913_v24  ;;  %v3045_v55 = vpop.f32.mrf.mxu0 }
 0x3a8   : > { %v3046_v22 = vadd.f32 %v3045_v55, %v2941_v10 }
 0x3a9   : > { %v3059_v43 = vpop.f32.mrf.mxu1 }
 0x3aa   : > { %v3060_v5 = vadd.f32 %v3059_v43, %v2955_v18  ;;  %4407 = vmatmul.msk.bf16.vlgmr.msra.gmra.mxu3 %vm351_vm0, %v4483_v13  ;;  %4414 = vmatmul.msk.bf16.vlgmr.msrb.gmra.mxu0 %vm351_vm0, %v4484_v27 }
 0x3ac   : > { %4415 = vmatmul.msk.bf16.vlgmr.msrb.gmra.mxu1 %vm351_vm0, %v4484_v27 }
 0x3ad   : > { %v3031_v41 = vpop.f32.mrf.mxu3 }
 0x3ae   : > { %v3032_v44 = vadd.f32 %v3031_v41, %v2927_v50  ;;  %v3019_v62 = vpop.f32.mrf.mxu2 }
 0x3af   : > { %v3020_v25 = vadd.f32 %v3019_v62, %v2915_v8  ;;  %v3047_v42 = vpop.f32.mrf.mxu0 }
 0x3b0   : > { %v3048_v40 = vadd.f32 %v3047_v42, %v2943_v58 }
 0x3b1   : > { %v3061_v26 = vpop.f32.mrf.mxu1 }
 0x3b2   : > { %v3062_v36 = vadd.f32 %v3061_v26, %v2957_v63 }
 0x3b3   : > { %4416 = vmatmul.msk.bf16.vlgmr.msrb.gmra.mxu2 %vm351_vm0, %v4484_v27 }
 0x3b5   : > { %v3033_v15 = vpop.f32.mrf.mxu3 }
 0x3b6   : > { %v3034_v6 = vadd.f32 %v3033_v15, %v2929_v47  ;;  %v3106_v32 = vpop.f32.mrf.mxu2 }
 0x3b7   : > { %v3167_v39 = vadd.f32 %v3106_v32, %v3004_v19  ;;  %v3134_v61 = vpop.f32.mrf.mxu0 }
 0x3b8   : > { %v3169_v48 = vadd.f32 %v3134_v61, %v3032_v44 }
 0x3b9   : > { %v3148_v60 = vpop.f32.mrf.mxu1 }
 0x3ba   : > { %v3170_v46 = vadd.f32 %v3148_v60, %v3046_v22  ;;  %4417 = vmatmul.msk.bf16.vlgmr.msrb.gmra.mxu3 %vm351_vm0, %v4484_v27  ;;  %4418 = vmatmul.msk.bf16.vlgmr.msra.gmra.mxu0 %vm351_vm0, %v4484_v27 }
 0x3bd   : > { %v3120_v17 = vpop.f32.mrf.mxu3 }
 0x3be   : > { %v3168_v2 = vadd.f32 %v3120_v17, %v3018_v59  ;;  %v3108_v30 = vpop.f32.mrf.mxu2 }
 0x3bf   : > { %v3172_v20 = vadd.f32 %v3108_v30, %v3006_v38  ;;  %v3136_v9 = vpop.f32.mrf.mxu0 }
 0x3c0   : > { %v3174_v7 = vadd.f32 %v3136_v9, %v3034_v6 }
 0x3c1   : > { %v3150_v35 = vpop.f32.mrf.mxu1 }
 0x3c2   : > { %v3175_v54 = vadd.f32 %v3150_v35, %v3048_v40 }
 0x3c5   : > { %v3122_v34 = vpop.f32.mrf.mxu3 }
 0x3c6   : > { %v3173_v49 = vadd.f32 %v3122_v34, %v3020_v25  ;;  %v3162_v51 = vpop.f32.mrf.mxu2 }
 0x3c7   : > { %v3171_v23 = vadd.f32 %v3162_v51, %v3060_v5  ;;  %v3233_v33 = vpop.f32.mrf.mxu0 }
 0x3c8   : > { %v3281_v52 = vadd.f32 %v3233_v33, %v3168_v2 }
 0x3c9   : > { %v3247_v28 = vpop.f32.mrf.mxu1 }
 0x3ca   : > { %v3282_v24 = vadd.f32 %v3247_v28, %v3169_v48 }
 0x3cd   : > { %v3219_v21 = vpop.f32.mrf.mxu3 }
 0x3ce   : > { %v3280_v12 = vadd.f32 %v3219_v21, %v3167_v39  ;;  %v3164_v29 = vpop.f32.mrf.mxu2 }
 0x3cf   : > { %v3176_v1 = vadd.f32 %v3164_v29, %v3062_v36  ;;  %v3235_v11 = vpop.f32.mrf.mxu0 }
 0x3d0   : > { %v3286_v53 = vadd.f32 %v3235_v11, %v3173_v49 }
 0x3d1   : > { %v3249_v8 = vpop.f32.mrf.mxu1 }
 0x3d2   : > { %v3287_v3 = vadd.f32 %v3249_v8, %v3174_v7 }
 0x3d5   : > { %v3221_v57 = vpop.f32.mrf.mxu3 }
 0x3d6   : > { %v3285_v50 = vadd.f32 %v3221_v57, %v3172_v20  ;;  %v3261_v13 = vpop.f32.mrf.mxu2 }
 0x3d7   : > { %v3283_v14 = vadd.f32 %v3261_v13, %v3170_v46  ;;  %v3332_v0 = vpop.f32.mrf.mxu0  ;;  %v3860_v13 = vpop.permute.xlu0 %3859 }
 0x3d8   : > { %v3393_v18 = vadd.f32 %v3332_v0, %v3280_v12 }
 0x3d9   : > { %v3346_v4 = vpop.f32.mrf.mxu1 }
 0x3da   : > { %v3394_v19 = vadd.f32 %v3346_v4, %v3281_v52 }
 0x3dd   : > { %v3275_v16 = vpop.f32.mrf.mxu3 }
 0x3de   : > { %v3284_v31 = vadd.f32 %v3275_v16, %v3171_v23  ;;  %v3263_v37 = vpop.f32.mrf.mxu2 }
 0x3df   : > { %v3288_v10 = vadd.f32 %v3263_v37, %v3175_v54  ;;  %v3334_v47 = vpop.f32.mrf.mxu0 }
 0x3e0   : > { %v3398_v63 = vadd.f32 %v3334_v47, %v3285_v50 }
 0x3e1   : > { %v3348_v56 = vpop.f32.mrf.mxu1 }
 0x3e2   : > { %v3399_v38 = vadd.f32 %v3348_v56, %v3286_v53 }
 0x3e5   : > { %v3277_v58 = vpop.f32.mrf.mxu3 }
 0x3e6   : > { %v3289_v45 = vadd.f32 %v3277_v58, %v3176_v1  ;;  %v3360_v27 = vpop.f32.mrf.mxu2 }
 0x3e7   : > { %v5658_v59 = vadd.f32 %v3360_v27, %v3282_v24  ;;  %v3388_v55 = vpop.f32.mrf.mxu0 }
 0x3e8   : > { %v5660_v22 = vadd.f32 %v3388_v55, %v3284_v31 }
 0x3e9   : > { %v3445_v43 = vpop.f32.mrf.mxu1 }
 0x3ea   : > { %v3506_v12 = vadd.f32 %v3445_v43, %v3393_v18 }
 0x3ed   : > { %v3374_v5 = vpop.f32.mrf.mxu3 }
 0x3ee   : > { %v3396_v41 = vadd.f32 %v3374_v5, %v3283_v14  ;;  %v3362_v44 = vpop.f32.mrf.mxu2  ;;  %v3865_v5 = vpop.permute.xlu1 %3864 }
 0x3ef   : > { %v5662_v62 = vadd.f32 %v3362_v44, %v3287_v3  ;;  %v3390_v25 = vpop.f32.mrf.mxu0 }
 0x3f0   : > { %v5664_v42 = vadd.f32 %v3390_v25, %v3289_v45 }
 0x3f1   : > { %v3447_v40 = vpop.f32.mrf.mxu1 }
 0x3f2   : > { %v3511_v18 = vadd.f32 %v3447_v40, %v3398_v63 }
 0x3f5   : > { %v3376_v26 = vpop.f32.mrf.mxu3 }
 0x3f6   : > { %v3401_v36 = vadd.f32 %v3376_v26, %v3288_v10  ;;  %v3459_v15 = vpop.f32.mrf.mxu2 }
 0x3f7   : > { %v3487_v6 = vpop.f32.mrf.mxu0  ;;  %v3507_v29 = vadd.f32 %v3459_v15, %v3394_v19 }
 0x3f8   : > { %v5666_v32 = vadd.f32 %v3487_v6, %v3396_v41 }
 0x3f9   : > { %v3501_v39 = vpop.f32.mrf.mxu1 }
 0x3fd   : > { %v3473_v61 = vpop.f32.mrf.mxu3 }
 0x3fe   : > { %v3461_v48 = vpop.f32.mrf.mxu2  ;;  %v3508_v41 = vadd.f32 %v3473_v61, %v5658_v59 }
 0x3ff   : > { %v3489_v60 = vpop.f32.mrf.mxu0  ;;  %v3512_v16 = vadd.f32 %v3461_v48, %v3399_v38  ;;  %v3510_v38 = vadd.f32 %v3501_v39, %v5660_v22 }
 0x400   : > { %v5668_v46 = vadd.f32 %v3489_v60, %v3401_v36 }
 0x401   : > { %v5670_v17 = vpop.f32.mrf.mxu1 }
 0x402   : > { %v3515_v22 = vadd.f32 %v5670_v17, %v5664_v42 }
 0x405   : > { %v5672_v2 = vpop.f32.mrf.mxu3 }
 0x406   : > { %v3558_v30 = vpop.f32.mrf.mxu2  ;;  %v3513_v59 = vadd.f32 %v5672_v2, %v5662_v62 }
 0x407   : > { %v3586_v20 = vpop.f32.mrf.mxu0  ;;  %v3619_v1 = vadd.f32 %v3558_v30, %v3506_v12 }
 0x408   : > { %v3621_v25 = vadd.f32 %v3586_v20, %v3508_v41 }
 0x409   : > { %v5674_v9 = vpop.f32.mrf.mxu1 }
 0x40a   : > { %v3622_v39 = vadd.f32 %v5674_v9, %v5666_v32 }
 0x40d   : > { %v3572_v7 = vpop.f32.mrf.mxu3 }
 0x40e   : > { %v3560_v35 = vpop.f32.mrf.mxu2  ;;  %v3620_v11 = vadd.f32 %v3572_v7, %v3507_v29 }
 0x40f   : > { %v3588_v54 = vpop.f32.mrf.mxu0  ;;  %v3624_v37 = vadd.f32 %v3560_v35, %v3511_v18 }
 0x410   : > { %v3626_v35 = vadd.f32 %v3588_v54, %v3513_v59 }
 0x411   : > { %v5676_v34 = vpop.f32.mrf.mxu1 }
 0x412   : > { %v3627_v9 = vadd.f32 %v5676_v34, %v5668_v46 }
 0x415   : > { %v3574_v49 = vpop.f32.mrf.mxu3 }
 0x416   : > { %v3614_v51 = vpop.f32.mrf.mxu2  ;;  %v3625_v10 = vadd.f32 %v3574_v49, %v3512_v16 }
 0x417   : > { %v3685_v23 = vpop.f32.mrf.mxu0  ;;  %v3623_v26 = vadd.f32 %v3614_v51, %v3510_v38 }
 0x418   : > { %v3733_v57 = vadd.f32 %v3685_v23, %v3620_v11 }
 0x419   : > { %v3699_v33 = vpop.f32.mrf.mxu1 }
 0x41a   : > { %v3734_v36 = vadd.f32 %v3699_v33, %v3621_v25 }
 0x41d   : > { %v3671_v52 = vpop.f32.mrf.mxu3 }
 0x41e   : > { %v3616_v28 = vpop.f32.mrf.mxu2  ;;  %v3732_v8 = vadd.f32 %v3671_v52, %v3619_v1 }
 0x41f   : > { %v3687_v24 = vpop.f32.mrf.mxu0  ;;  %v3628_v49 = vadd.f32 %v3616_v28, %v3515_v22 }
 0x420   : > { %v3738_v45 = vadd.f32 %v3687_v24, %v3625_v10 }
 0x421   : > { %v3701_v21 = vpop.f32.mrf.mxu1 }
 0x422   : > { %v3739_v23 = vadd.f32 %v3701_v21, %v3626_v35 }
 0x425   : > { %v3673_v53 = vpop.f32.mrf.mxu3 }
 0x426   : > { %v3713_v3 = vpop.f32.mrf.mxu2  ;;  %v3737_v56 = vadd.f32 %v3673_v53, %v3624_v37 }
 0x427   : > { %v3784_v50 = vpop.f32.mrf.mxu0  ;;  %v3735_v51 = vadd.f32 %v3713_v3, %v3622_v39 }
 0x428   : > { %v3845_v14 = vadd.f32 %v3784_v50, %v3732_v8 }
 0x429   : > { %v3798_v0 = vpop.f32.mrf.mxu1 }
 0x42a   : > { %v3846_v4 = vadd.f32 %v3798_v0, %v3733_v57  ;;  %v3867_v19 = vadd.f32 %v3860_v13, %v3845_v14 }
 0x42c   : > { %v3868_v31 = vadd.f32 %v3860_v13, %v3846_v4  ;;  %3877 = vst [vmem:[%s5682_s22] sm:$0xff] %v3867_v19 }
 0x42d   : > { %v3727_v47 = vpop.f32.mrf.mxu3 }
 0x42e   : > { %3878 = vst [vmem:[%s5682_s22 + $0x8] sm:$0xff] %v3868_v31  ;;  %v3715_v58 = vpop.f32.mrf.mxu2  ;;  %v3736_v6 = vadd.f32 %v3727_v47, %v3623_v26 }
 0x42f   : > { %v3786_v27 = vpop.f32.mrf.mxu0  ;;  %v3740_v28 = vadd.f32 %v3715_v58, %v3627_v9 }
 0x430   : > { %v3850_v55 = vadd.f32 %v3786_v27, %v3737_v56 }
 0x431   : > { %v3800_v43 = vpop.f32.mrf.mxu1 }
 0x432   : > { %v3851_v63 = vadd.f32 %v3800_v43, %v3738_v45  ;;  %v3872_v44 = vadd.f32 %v3865_v5, %v3850_v55 }
 0x434   : > { %v3873_v40 = vadd.f32 %v3865_v5, %v3851_v63  ;;  %3882 = vst [vmem:[%s5682_s22 + $0x28] sm:$0xff] %v3872_v44 }
 0x435   : > { %v3729_v15 = vpop.f32.mrf.mxu3 }
 0x436   : > { %3883 = vst [vmem:[%s5682_s22 + $0x30] sm:$0xff] %v3873_v40  ;;  %v3812_v48 = vpop.f32.mrf.mxu2  ;;  %v3741_v52 = vadd.f32 %v3729_v15, %v3628_v49 }
 0x437   : > { %v3847_v60 = vadd.f32 %v3812_v48, %v3734_v36  ;;  %v3840_v30 = vpop.f32.mrf.mxu0 }
 0x438   : > { %v3849_v7 = vadd.f32 %v3840_v30, %v3736_v6 }
 0x439   : > { %v3869_v61 = vadd.f32 %v3860_v13, %v3847_v60 }
 0x43a   : > { %v3871_v20 = vadd.f32 %v3860_v13, %v3849_v7 }
 0x43b   : > { %3879 = vst [vmem:[%s5682_s22 + $0x10] sm:$0xff] %v3869_v61 }
 0x43c   : > { %3881 = vst [vmem:[%s5682_s22 + $0x20] sm:$0xff] %v3871_v20 }
 0x43d   : > { %v3826_v33 = vpop.f32.mrf.mxu3 }
 0x43e   : > { %v3848_v62 = vadd.f32 %v3826_v33, %v3735_v51  ;;  %v3814_v2 = vpop.f32.mrf.mxu2 }
 0x43f   : > { %v3852_v24 = vadd.f32 %v3814_v2, %v3739_v23  ;;  %v3842_v42 = vpop.f32.mrf.mxu0 }
 0x440   : > { %v3870_v17 = vadd.f32 %v3860_v13, %v3848_v62  ;;  %v3854_v12 = vadd.f32 %v3842_v42, %v3741_v52 }
 0x441   : > { %v3874_v32 = vadd.f32 %v3865_v5, %v3852_v24 }
 0x442   : > { %3880 = vst [vmem:[%s5682_s22 + $0x18] sm:$0xff] %v3870_v17  ;;  %v3876_v54 = vadd.f32 %v3865_v5, %v3854_v12 }
 0x443   : > { %3884 = vst [vmem:[%s5682_s22 + $0x38] sm:$0xff] %v3874_v32 }
 0x444   : > { %3886 = vst [vmem:[%s5682_s22 + $0x48] sm:$0xff] %v3876_v54 }
 0x445   : > { %v3828_v29 = vpop.f32.mrf.mxu3 }
 0x446   : > { %v3853_v21 = vadd.f32 %v3828_v29, %v3740_v28 }
 0x448   : > { %v3875_v1 = vadd.f32 %v3865_v5, %v3853_v21 }
 0x44a   : > { %3885 = vst [vmem:[%s5682_s22 + $0x40] sm:$0xff] %v3875_v1 }
 0x44b PF: > { %s17_s24 = sadd.s32 1, %s4513_s24  }
 0x44c   : > { %p14_p4 = scmp.ge.s32.totalorder %s17_s24, 4  }
 0x44e   :  { %16 = sbr.rel (!%p14_p4) target bundleno = 1 (0x1), region = 105 }

</bundles_post_ra>
